<compile_context>
chip_gen: v5e
topology: v5e:2x2
jax: 0.10.0
libtpu: 0.0.40
codegen_flags: <defaults>
</compile_context>

<pallas_src>
import jax
import jax.numpy as jnp
from jax.experimental import pallas as pl
from jax.experimental.pallas import tpu as pltpu

AUDIO_DIM = 1024
TEXT_DIM = 768
COMMON_DIM = 512
NUM_HEADS = 8  # does not affect the math when seq_len == 1


def _round_up(x, m):
    return ((x + m - 1) // m) * m


def _choose_block_b(B):
    Bp = _round_up(max(B, 8), 8)
    if Bp <= 128:
        return Bp                          # one small block; nothing to shard
    # >= 2 blocks keeps both v7x TensorCores busy ("parallel" grid axis); cap
    # at 512 rows so double-buffered f32 input tiles stay ~12 MiB of VMEM while
    # M >= 256 amortizes the weight push on v6e/v7x's 256-wide MXU.
    return max(128, min(512, _round_up(Bp // 2, 8)))


def _weight_spec(shape):
    # Grid-invariant weights: single-buffer them (halves their VMEM footprint).
    idx = lambda i: (0,) * len(shape)
    try:
        return pl.BlockSpec(shape, idx, pipeline_mode=pl.Buffered(1))
    except TypeError:  # older jax without pipeline_mode: default double-buffering
        return pl.BlockSpec(shape, idx)


def fusion_kernel(a_ref, t_ref, wa_ref, wt_ref, bf_ref, w2_ref, b2_ref, o_ref):
    f32 = jnp.float32
    bf16 = jnp.bfloat16
    # Cast the f32 input tiles to bf16 in VMEM (free VPU work, hidden under DMA)
    # so the matmuls stay bf16 MXU ops with f32 accumulation.
    a = a_ref[...].astype(bf16)
    t = t_ref[...].astype(bf16)
    h = (jnp.dot(a, wa_ref[...], preferred_element_type=f32)
         + jnp.dot(t, wt_ref[...], preferred_element_type=f32)
         + bf_ref[...])
    h = jnp.maximum(h, 0.0)                 # ReLU (Dropout p=0.1 is identity at inference)
    out = jnp.dot(h.astype(bf16), w2_ref[...], preferred_element_type=f32) + b2_ref[...]
    o_ref[...] = out.astype(o_ref.dtype)


def prepare_fused_params(params):
    """One-time offline fold of the linear chain. Call once and reuse the result
    across every cross_modal_fusion call (hoisted out of the per-call path)."""
    with jax.default_matmul_precision("highest"):   # scoped; no global side effect
        wa_fold = params["wa"] @ params["w1a"]                                 # (1024,512)
        wt_fold = params["wt"] @ params["wv"] @ params["wo"] @ params["w1b"]   # (768, 512)
        b_fold = (params["ba"] @ params["w1a"]
                  + ((params["bt"] @ params["wv"] + params["bv"]) @ params["wo"]
                     + params["bo"]) @ params["w1b"]
                  + params["b1"])                                              # (1, 512)
    return {
        "wa_fold": wa_fold.astype(jnp.bfloat16),
        "wt_fold": wt_fold.astype(jnp.bfloat16),
        "b_fold": b_fold.astype(jnp.float32),
        "w2": params["w2"].astype(jnp.bfloat16),
        "b2": params["b2"].astype(jnp.float32),
    }


def cross_modal_fusion(audio, text, fused, block_b=None, out_dtype=jnp.float32):
    """audio: (B, 1024) f32, text: (B, 768) f32, fused: prepare_fused_params output."""
    assert audio.ndim == 2 and text.ndim == 2 and audio.shape[0] == text.shape[0]
    B = audio.shape[0]
    block_b = _choose_block_b(B) if block_b is None else _round_up(max(block_b, 8), 8)
    grid = -(-B // block_b)
    Bp = grid * block_b

    a, t = audio, text
    if Bp != B:
        # Ragged tail only (< block_b rows); skipped entirely when block_b | B.
        # Padded rows produce garbage outputs that are dropped by out[:B].
        a = jnp.pad(a, ((0, Bp - B), (0, 0)))
        t = jnp.pad(t, ((0, Bp - B), (0, 0)))

    wa, wt, bf, w2, b2 = (fused["wa_fold"], fused["wt_fold"], fused["b_fold"],
                          fused["w2"], fused["b2"])

    def row_spec(d):
        return pl.BlockSpec((block_b, d), lambda i: (i, 0))

    grid_spec = pltpu.PrefetchScalarGridSpec(
        num_scalar_prefetch=0,
        grid=(grid,),
        in_specs=[row_spec(AUDIO_DIM), row_spec(TEXT_DIM),
                  _weight_spec(wa.shape), _weight_spec(wt.shape),
                  _weight_spec(bf.shape), _weight_spec(w2.shape),
                  _weight_spec(b2.shape)],
        out_specs=row_spec(COMMON_DIM),
    )

    flops = 2 * Bp * COMMON_DIM * (AUDIO_DIM + TEXT_DIM + COMMON_DIM)
    bytes_accessed = (
        Bp * (AUDIO_DIM + TEXT_DIM) * 4                       # f32 input rows
        + (wa.size + wt.size + w2.size) * 2                   # bf16 weights
        + (bf.size + b2.size) * 4                             # f32 biases
        + Bp * COMMON_DIM * jnp.dtype(out_dtype).itemsize)    # output writeback

    out = pl.pallas_call(
        fusion_kernel,
        out_shape=jax.ShapeDtypeStruct((Bp, COMMON_DIM), out_dtype),
        grid_spec=grid_spec,
        compiler_params=pltpu.CompilerParams(
            # Batch blocks are independent -> megacore-shardable on v7x.
            dimension_semantics=("parallel",),
            # Resident need is ~12-15 MiB at block_b=512; fits v5e's 16 MiB
            # default only barely, so raise explicitly (well under 64 MiB v7x).
            vmem_limit_bytes=32 << 20,
        ),
        cost_estimate=pl.CostEstimate(flops=flops, transcendentals=0,
                                      bytes_accessed=bytes_accessed),
    )(a, t, wa, wt, bf, w2, b2)
    return out[:B] if Bp != B else out


def init_params(key):
    """Raw (unfused) torch-equivalent parameters, Linear weights pre-transposed."""
    ks = jax.random.split(key, 9)
    s = 0.02

    def w(k, shape):
        return jax.random.normal(k, shape, jnp.float32) * s

    params = {}
    params["wa"] = w(ks[0], (AUDIO_DIM, COMMON_DIM))
    params["ba"] = w(ks[1], (1, COMMON_DIM))
    params["wt"] = w(ks[2], (TEXT_DIM, COMMON_DIM))
    params["bt"] = w(ks[3], (1, COMMON_DIM))

    # MultiheadAttention in_proj is (3E, E); only the V third influences the
    # output when seq_len == 1 (softmax over a single key is exactly 1).
    in_proj_w = w(ks[4], (3 * COMMON_DIM, COMMON_DIM))
    in_proj_b = w(ks[5], (1, 3 * COMMON_DIM))
    params["wv"] = in_proj_w[2 * COMMON_DIM:, :].T          # (E, E)
    params["bv"] = in_proj_b[:, 2 * COMMON_DIM:]            # (1, E)
    params["wo"] = w(ks[6], (COMMON_DIM, COMMON_DIM))
    params["bo"] = w(ks[7], (1, COMMON_DIM))

    ks2 = jax.random.split(ks[8], 4)
    w1 = jax.random.normal(ks2[0], (2 * COMMON_DIM, COMMON_DIM), jnp.float32) * s
    params["w1a"] = w1[:COMMON_DIM, :]
    params["w1b"] = w1[COMMON_DIM:, :]
    params["b1"] = jax.random.normal(ks2[1], (1, COMMON_DIM), jnp.float32) * s
    params["w2"] = jax.random.normal(ks2[2], (COMMON_DIM, COMMON_DIM), jnp.float32) * s
    params["b2"] = jax.random.normal(ks2[3], (1, COMMON_DIM), jnp.float32) * s
    return params


def reference(audio, text, p):
    """Full-precision, unfused JAX reference matching the PyTorch forward."""
    with jax.default_matmul_precision("highest"):   # scoped true-f32 matmuls
        a_proj = audio @ p["wa"] + p["ba"]
        t_proj = text @ p["wt"] + p["bt"]
        v = t_proj @ p["wv"] + p["bv"]          # softmax over one key == 1 -> attn == v
        attended = v @ p["wo"] + p["bo"]
        h = a_proj @ p["w1a"] + attended @ p["w1b"] + p["b1"]
        h = jnp.maximum(h, 0.0)
        return h @ p["w2"] + p["b2"]


if __name__ == "__main__":
    key = jax.random.PRNGKey(0)
    k_a, k_t, k_p = jax.random.split(key, 3)

    # B=256 with auto block_b=128 -> grid of 2 "parallel" steps (exercises v7x
    # megacore sharding) and no padding / no wrapper-side copies.
    B = 256
    audio = jax.random.normal(k_a, (B, AUDIO_DIM), jnp.float32)
    text = jax.random.normal(k_t, (B, TEXT_DIM), jnp.float32)
    params = init_params(k_p)

    # One-time weight fold (hoisted out of the per-call path).
    fused = prepare_fused_params(params)
    fused = jax.tree_util.tree_map(jax.block_until_ready, fused)

    fusion = jax.jit(lambda a, t: cross_modal_fusion(a, t, fused))
    out = jax.block_until_ready(fusion(audio, text))

    ref = reference(audio, text, params)
    assert out.shape == (B, COMMON_DIM)
    # bf16 folded weights / bf16 MXU operands with f32 accumulation: ~1e-3 abs err.
    assert jnp.allclose(out, ref, rtol=2e-2, atol=1e-2), (
        f"mismatch vs reference, max abs err {jnp.max(jnp.abs(out - ref))}")

    print("KERNEL_OK")
</pallas_src>

<mosaic_0001>
module attributes {stable_mosaic.version = 11 : i64} {
  func.func @fusion_kernel(%arg0: i32, %arg1: memref<128x1024xf32, #tpu.memory_space<vmem>>, %arg2: memref<128x768xf32, #tpu.memory_space<vmem>>, %arg3: memref<1024x512xbf16, #tpu.memory_space<vmem>>, %arg4: memref<768x512xbf16, #tpu.memory_space<vmem>>, %arg5: memref<1x512xf32, #tpu.memory_space<vmem>>, %arg6: memref<512x512xbf16, #tpu.memory_space<vmem>>, %arg7: memref<1x512xf32, #tpu.memory_space<vmem>>, %arg8: memref<128x512xf32, #tpu.memory_space<vmem>>) attributes {dimension_semantics = [#tpu.dimension_semantics<parallel>], iteration_bounds = array<i64: 2>, scalar_prefetch = 0 : i64, scratch_operands = 0 : i64, tpu.core_type = #tpu.core_type<tc>, window_params = [{transform_indices = @transform_0, window_bounds = array<i64: 128, 1024>}, {transform_indices = @transform_1, window_bounds = array<i64: 128, 768>}, {pipeline_mode = #tpu.pipeline_mode<synchronous>, transform_indices = @transform_2, window_bounds = array<i64: 1024, 512>}, {pipeline_mode = #tpu.pipeline_mode<synchronous>, transform_indices = @transform_3, window_bounds = array<i64: 768, 512>}, {pipeline_mode = #tpu.pipeline_mode<synchronous>, transform_indices = @transform_4, window_bounds = array<i64: 1, 512>}, {pipeline_mode = #tpu.pipeline_mode<synchronous>, transform_indices = @transform_5, window_bounds = array<i64: 512, 512>}, {pipeline_mode = #tpu.pipeline_mode<synchronous>, transform_indices = @transform_6, window_bounds = array<i64: 1, 512>}, {transform_indices = @transform_7, window_bounds = array<i64: 128, 512>}]} {
    %c0 = arith.constant 0 : index
    %c0_0 = arith.constant 0 : index
    %0 = vector.load %arg1[%c0, %c0_0] : memref<128x1024xf32, #tpu.memory_space<vmem>>, vector<128x1024xf32>
    %1 = arith.truncf %0 : vector<128x1024xf32> to vector<128x1024xbf16>
    %c0_1 = arith.constant 0 : index
    %c0_2 = arith.constant 0 : index
    %2 = vector.load %arg2[%c0_1, %c0_2] : memref<128x768xf32, #tpu.memory_space<vmem>>, vector<128x768xf32>
    %3 = arith.truncf %2 : vector<128x768xf32> to vector<128x768xbf16>
    %c0_3 = arith.constant 0 : index
    %c0_4 = arith.constant 0 : index
    %4 = vector.load %arg3[%c0_3, %c0_4] : memref<1024x512xbf16, #tpu.memory_space<vmem>>, vector<1024x512xbf16>
    %cst = arith.constant dense<0.000000e+00> : vector<128x512xf32>
    %5 = tpu.matmul %1, %4, %cst {dimension_numbers = #tpu.dot_dimension_numbers<[1], [0], [0], [1], [0, 0, 1, 1], [], []>} : vector<128x1024xbf16>, vector<1024x512xbf16>, vector<128x512xf32> -> vector<128x512xf32>
    %c0_5 = arith.constant 0 : index
    %c0_6 = arith.constant 0 : index
    %6 = vector.load %arg4[%c0_5, %c0_6] : memref<768x512xbf16, #tpu.memory_space<vmem>>, vector<768x512xbf16>
    %cst_7 = arith.constant dense<0.000000e+00> : vector<128x512xf32>
    %7 = tpu.matmul %3, %6, %cst_7 {dimension_numbers = #tpu.dot_dimension_numbers<[1], [0], [0], [1], [0, 0, 1, 1], [], []>} : vector<128x768xbf16>, vector<768x512xbf16>, vector<128x512xf32> -> vector<128x512xf32>
    %8 = arith.addf %5, %7 : vector<128x512xf32>
    %c0_8 = arith.constant 0 : index
    %c0_9 = arith.constant 0 : index
    %9 = vector.load %arg5[%c0_8, %c0_9] : memref<1x512xf32, #tpu.memory_space<vmem>>, vector<1x512xf32>
    %10 = vector.broadcast %9 : vector<1x512xf32> to vector<128x512xf32>
    %11 = arith.addf %8, %10 : vector<128x512xf32>
    %cst_10 = arith.constant 0.000000e+00 : f32
    %12 = vector.broadcast %cst_10 : f32 to vector<128x512xf32>
    %13 = arith.maximumf %11, %12 : vector<128x512xf32>
    %14 = arith.truncf %13 : vector<128x512xf32> to vector<128x512xbf16>
    %c0_11 = arith.constant 0 : index
    %c0_12 = arith.constant 0 : index
    %15 = vector.load %arg6[%c0_11, %c0_12] : memref<512x512xbf16, #tpu.memory_space<vmem>>, vector<512x512xbf16>
    %cst_13 = arith.constant dense<0.000000e+00> : vector<128x512xf32>
    %16 = tpu.matmul %14, %15, %cst_13 {dimension_numbers = #tpu.dot_dimension_numbers<[1], [0], [0], [1], [0, 0, 1, 1], [], []>} : vector<128x512xbf16>, vector<512x512xbf16>, vector<128x512xf32> -> vector<128x512xf32>
    %c0_14 = arith.constant 0 : index
    %c0_15 = arith.constant 0 : index
    %17 = vector.load %arg7[%c0_14, %c0_15] : memref<1x512xf32, #tpu.memory_space<vmem>>, vector<1x512xf32>
    %18 = vector.broadcast %17 : vector<1x512xf32> to vector<128x512xf32>
    %19 = arith.addf %16, %18 : vector<128x512xf32>
    %c0_16 = arith.constant 0 : index
    %c0_17 = arith.constant 0 : index
    %20 = vector.load %arg8[%c0_16, %c0_17] : memref<128x512xf32, #tpu.memory_space<vmem>>, vector<128x512xf32>
    tpu.vector_store %arg8[%c0_16, %c0_17], %19 {strides = array<i32>} : memref<128x512xf32, #tpu.memory_space<vmem>>, vector<128x512xf32>,
    return
  }
  func.func @transform_0(%arg0: i32) -> (i32, i32) {
    %c0_i32 = arith.constant 0 : i32
    %c0_i32_0 = arith.constant 0 : i32
    return %arg0, %c0_i32 : i32, i32
  }
  func.func @transform_1(%arg0: i32) -> (i32, i32) {
    %c0_i32 = arith.constant 0 : i32
    %c0_i32_0 = arith.constant 0 : i32
    return %arg0, %c0_i32 : i32, i32
  }
  func.func @transform_2(%arg0: i32) -> (i32, i32) {
    %c0_i32 = arith.constant 0 : i32
    %c0_i32_0 = arith.constant 0 : i32
    %c0_i32_1 = arith.constant 0 : i32
    return %c0_i32, %c0_i32_0 : i32, i32
  }
  func.func @transform_3(%arg0: i32) -> (i32, i32) {
    %c0_i32 = arith.constant 0 : i32
    %c0_i32_0 = arith.constant 0 : i32
    %c0_i32_1 = arith.constant 0 : i32
    return %c0_i32, %c0_i32_0 : i32, i32
  }
  func.func @transform_4(%arg0: i32) -> (i32, i32) {
    %c0_i32 = arith.constant 0 : i32
    %c0_i32_0 = arith.constant 0 : i32
    %c0_i32_1 = arith.constant 0 : i32
    return %c0_i32, %c0_i32_0 : i32, i32
  }
  func.func @transform_5(%arg0: i32) -> (i32, i32) {
    %c0_i32 = arith.constant 0 : i32
    %c0_i32_0 = arith.constant 0 : i32
    %c0_i32_1 = arith.constant 0 : i32
    return %c0_i32, %c0_i32_0 : i32, i32
  }
  func.func @transform_6(%arg0: i32) -> (i32, i32) {
    %c0_i32 = arith.constant 0 : i32
    %c0_i32_0 = arith.constant 0 : i32
    %c0_i32_1 = arith.constant 0 : i32
    return %c0_i32, %c0_i32_0 : i32, i32
  }
  func.func @transform_7(%arg0: i32) -> (i32, i32) {
    %c0_i32 = arith.constant 0 : i32
    %c0_i32_0 = arith.constant 0 : i32
    return %arg0, %c0_i32 : i32, i32
  }
}

</mosaic_0001>

<bundles_post_ra>
// kernel: _lambda_.1
= control target key start
LH: loop header
LB: loop body
LE: loop exit
PB: predicated region body
PF: predicated region fallthrough
CT: control target
= control target key end

     0   :  { %s13604_s0 = inlined_call_operand.hbm [shape: f32[256,1024], index: 0, kind: input, shape index: {}]   ;;  %s13605_s1 = inlined_call_operand.hbm [shape: f32[256,768], index: 1, kind: input, shape index: {}]   ;;  %s13606_s2 = inlined_call_operand.hbm [shape: bf16[1024,512], index: 2, kind: input, shape index: {}]   ;;  %s13607_s3 = inlined_call_operand.hbm [shape: bf16[768,512], index: 3, kind: input, shape index: {}]   ;;  %s13608_s4 = inlined_call_operand.hbm [shape: f32[1,512], index: 4, kind: input, shape index: {}]   ;;  %s13609_s5 = inlined_call_operand.hbm [shape: bf16[512,512], index: 5, kind: input, shape index: {}]   ;;  %s13610_s6 = inlined_call_operand.vmem [shape: f32[1,512], index: 6, kind: input, shape index: {}]   ;;  %s13611_s7 = inlined_call_operand.hbm [shape: f32[256,512], index: 7, kind: output, shape index: {}]  }
   0x1   :  { %13754 = sst [smem:[#allocation115_spill]] %s13604_s0 }
   0x2   :  { %13755 = sst [smem:[#allocation116_spill]] %s13606_s2 }
   0x3   :  { %13756 = sst [smem:[#allocation117_spill]] %s13607_s3 }
   0x4   :  { %13757 = sst [smem:[#allocation118_spill]] %s13608_s4 }
   0x5   :  { %13758 = sst [smem:[#allocation119_spill]] %s13609_s5 }
   0x6   :  { %12 = vsyncpa [#allocation3], 0 }
   0x7   :  { %14 = vsyncpa [#allocation3 + $0x1], 0 }
   0x8   :  { %15 = vsyncpa [#allocation6], 0 }
   0x9   :  { %17 = vsyncpa [#allocation6 + $0x1], 0 }
   0xa   :  { %18 = vsyncpa [#allocation9], 0 }
   0xb   :  { %19 = vsyncpa [#allocation12], 0 }
   0xc   :  { %20 = vsyncpa [#allocation4], 0 }
   0xd   :  { %22 = vsyncpa [#allocation4 + $0x1], 0  ;;  %s11459_s24 = smov 0   ;;  %s11461_s25 = smov 0  }
   0xe   :  { %s11463_s26 = smov 0   ;;  %s11465_s27 = smov 0  }
   0xf LB: > { %13759 = sst [smem:[#allocation20_spill]] %s11401_s26  ;;  %s11480_s28 = sadd.s32 4294967295, %s11405_s27   ;;  %s11405_s27 = sphi %s11465_s27, %s14140_s27   ;;  %s11401_s26 = sphi %s11463_s26, %s14137_s26   ;;  %s11397_s25 = sphi %s11461_s25, %s14139_s25   ;;  %s11393_s24 = sphi %s11459_s24, %s14138_s24  }
  0x10   : > { %s8125_s29 = sadd.s32 4294967294, %s11405_s27   ;;  %p48_p0 = scmp.ne.s32.totalorder %s11397_s25, %s11393_s24 }
  0x11   : > { %p49_p1 = scmp.eq.s32.totalorder %s11480_s28, 0  ;;  %p203_p2 = scmp.eq.s32.totalorder %s11480_s28, 1 }
  0x12   : > { %p209_p3 = scmp.eq.s32.totalorder %s8125_s29, 1  ;;  %p8126_p5 = scmp.ge.s32.totalorder %s11405_s27, 1 }
  0x13   : > { %p11489_p4 = por %p49_p1, %p48_p0  ;;  %p216_p7 = scmp.lt.s32.totalorder %s11405_s27, 3 }
  0x14   : > { %p11494_p6 = por %p209_p3, %p48_p0  ;;  %s13762_s2 = sld [smem:[#allocation116_spill]] }
  0x15   : > { %p11502_p8 = pnand %p8126_p5, %p216_p7  ;;  %s11407_s13 = smov [#allocation7]  }
  0x16   : > { %s229_s14 = sshll.u32 %s11407_s13, 4  ;;  %s13765_s3 = sld [smem:[#allocation117_spill]]  ;;  %s230_s14 = int_to_ptr.vmem [resolvable:$true] %s229_s14 }
  0x17   : > { %p11061_p9 = pneg %p11502_p8  ;;  %s11408_s19 = smov 256  }
  0x18   : > { %s11409_s20 = smov 16   ;;  %s11410_s21 = smov [#allocation8]  }
  0x19   : > { %p11510_p10 = pnand %p11061_p9, %p49_p1  ;;  %s243_s22 = sshll.u32 %s11410_s21, 4  ;;  %s244_s22 = int_to_ptr.vmem [resolvable:$true] %s243_s22 }
  0x1a   : > { %s227_s11 = sshll.u32 %s13762_s2, 4  ;;  %s13766_s4 = sld [smem:[#allocation118_spill]]  ;;  %s228_s11 = int_to_ptr.hbm [resolvable:$true] %s227_s11 }
  0x1b   : > { %11064 = dma.hbm_to_vmem [thread:$0]  (!%p11510_p10), %s228_s11, 32768, %s230_s14, [#allocation6], %s11408_s19, %s11408_s19, %s11409_s20  }
  0x1c   : > { %s241_s18 = sshll.u32 %s13765_s3, 4  ;;  %s13767_s5 = sld [smem:[#allocation119_spill]]  ;;  %s242_s18 = int_to_ptr.hbm [resolvable:$true] %s241_s18 }
  0x1d   : > { %11067 = dma.hbm_to_vmem [thread:$0]  (!%p11510_p10), %s242_s18, 24576, %s244_s22, [#allocation9], %s11408_s19, %s11408_s19, %s11409_s20  }
  0x1e   : > { %s11411_s14 = smov [#allocation10]   ;;  %s11412_s17 = smov [#allocation11]  }
  0x1f   : > { %s258_s16 = sshll.u32 %s11411_s14, 4  ;;  %s269_s21 = sshll.u32 %s11412_s17, 4  ;;  %s259_s16 = int_to_ptr.vmem [resolvable:$true] %s258_s16  ;;  %s270_s21 = int_to_ptr.vmem [resolvable:$true] %s269_s21 }
  0x20   : > { %s256_s9 = sshll.u32 %s13766_s4, 4  ;;  %s11533_s18 = sadd.s32 1, %s11405_s27   ;;  %s257_s9 = int_to_ptr.hbm [resolvable:$true] %s256_s9 }
  0x21   : > { %11070 = dma.hbm_to_vmem [thread:$0]  (!%p11510_p10), %s257_s9, 64, %s259_s16, [#allocation9]  }
  0x22   : > { %s267_s11 = sshll.u32 %s13767_s5, 4  ;;  %s35_s22 = sadd.s32 1, %s11401_s26  ;;  %s268_s11 = int_to_ptr.hbm [resolvable:$true] %s267_s11 }
  0x23   : > { %11073 = dma.hbm_to_vmem [thread:$0]  (!%p11510_p10), %s268_s11, 16384, %s270_s21, [#allocation12], %s11408_s19, %s11408_s19, %s11409_s20  }
  0x24   : > { %s32_s23 = ssub.s32 %s11405_s27, %s11533_s18  ;;  %p42_p12 = scmp.ne.s32.totalorder %s11401_s26, %s11397_s25 }
  0x25   : > { %p33_p13 = scmp.eq.s32.totalorder %s32_s23, 0  ;;  %p43_p0 = scmp.eq.s32.totalorder %s11405_s27, 0 }
  0x26   : > { %p11543_p3 = por %p203_p2, %p42_p12  ;;  %p11089_p5 = scmp.lt.s32.totalorder %s11405_s27, 2 }
  0x27   : > { %s11549_s9 = scalar_select %p33_p13, %s11401_s26, %s35_s22  }
  0x28   : > { %p44_p7 = por %p43_p0, %p42_p12  ;;  %s11552_s15 = sand.u32 1, %s11401_s26  }
  0x29   : > { %13769 = sst [smem:[#allocation21_spill]] %s11549_s9  ;;  %s8132_s19 = sshll.u32 %s11552_s15, 10 }
  0x2a   : > { %s10457_s20 = sshll.u32 %s11405_s27, 10  ;;  %s13770_s0 = sld [smem:[#allocation115_spill]] }
  0x2b   : > { %s290_s14 = scalar_lea.vmem [#allocation2], %s8132_s19  ;;  %p11559_p2 = pnand %p11089_p5, %p44_p7 }
  0x2c   : > { %s299_s16 = sshll.u32 %s290_s14, 4  ;;  %s309_s22 = sand.u32 1, %s11405_s27   ;;  %s300_s16 = int_to_ptr.vmem [resolvable:$true] %s299_s16 }
  0x2d   : > { %s287_s23 = scalar_lea.sflag [#allocation3], %s11552_s15  ;;  %p11267_p10 = pneg %p11559_p2 }
  0x30   : > { %s296_s11 = scalar_lea.hbm %s13770_s0, %s10457_s20  ;;  %s11270_s10 = scalar_lea.hbm %s13770_s0, 2048 }
  0x31   : > { %s297_s17 = sshll.u32 %s296_s11, 4  ;;  %s298_s17 = int_to_ptr.hbm [resolvable:$true] %s297_s17 }
  0x32   : > { %s11263_s2 = sshra.s32 %s298_s17, 4  ;;  %s11264_s2 = int_to_ptr.hbm [resolvable:$true] %s11263_s2 }
  0x33   : > { %s11265_s3 = scalar_lea.hbm %s11264_s2, 1024  ;;  %p11271_p0 = scmp.lt.s32.totalorder %s11264_s2, %s13770_s0 }
  0x34   : > { %p11266_p9 = scmp.ne.s32.totalorder %s11264_s2, %s11265_s3  ;;  %p11272_p5 = scmp.lt.s32.totalorder %s11270_s10, %s11265_s3 }
  0x36   : > { %p11268_p12 = pnand %p11267_p10, %p11266_p9  ;;  %p11273_p7 = por %p11272_p5, %p11271_p0 }
  0x38   : > { %p11269_p13 = pneg %p11268_p12 }
  0x3a   : > { %p11274_p11 = pnand %p11273_p7, %p11269_p13 }
  0x3c   : > { %11277 = shalt.err (!%p11274_p11)
}
  0x3d   : > { %s11413_s14 = smov 1024   ;;  %s11414_s4 = smov 64  }
  0x3e   : > { %11077 = dma.hbm_to_vmem [thread:$0]  (!%p11559_p2), %s298_s17, 16384, %s300_s16, %s287_s23, %s11413_s14, %s11413_s14, %s11414_s4  }
  0x3f   : > { %s11036_s5 = smul.u32 768, %s11552_s15  ;;  %s310_s10 = scalar_lea.sflag [#allocation6], %s309_s22 }
  0x40   : > { %s11037_s9 = smul.u32 768, %s11405_s27  ;;  %s11300_s16 = scalar_lea.hbm %s13605_s1, 1536 }
  0x41   : > { %s313_s13 = scalar_lea.vmem [#allocation5], %s11036_s5 }
  0x42   : > { %s319_s26 = scalar_lea.hbm %s13605_s1, %s11037_s9  ;;  %s322_s2 = sshll.u32 %s313_s13, 4  ;;  %s323_s2 = int_to_ptr.vmem [resolvable:$true] %s322_s2 }
  0x43   : > { %s320_s3 = sshll.u32 %s319_s26, 4  ;;  %s321_s3 = int_to_ptr.hbm [resolvable:$true] %s320_s3 }
  0x44   : > { %s11293_s11 = sshra.s32 %s321_s3, 4  ;;  %s11294_s11 = int_to_ptr.hbm [resolvable:$true] %s11293_s11 }
  0x45   : > { %s11295_s0 = scalar_lea.hbm %s11294_s11, 768  ;;  %p11301_p13 = scmp.lt.s32.totalorder %s11294_s11, %s13605_s1 }
  0x46   : > { %p11296_p11 = scmp.ne.s32.totalorder %s11294_s11, %s11295_s0  ;;  %p11302_p0 = scmp.lt.s32.totalorder %s11300_s16, %s11295_s0 }
  0x48   : > { %p11298_p9 = pnand %p11296_p11, %p11267_p10  ;;  %p11303_p5 = por %p11302_p0, %p11301_p13 }
  0x4a   : > { %p11299_p12 = pneg %p11298_p9 }
  0x4c   : > { %p11304_p7 = pnand %p11303_p5, %p11299_p12 }
  0x4e   : > { %11307 = shalt.err (!%p11304_p7)
}
  0x4f   : > { %s11415_s5 = smov 768   ;;  %s11416_s26 = smov 48  }
  0x50   : > { %11080 = dma.hbm_to_vmem [thread:$0]  (!%p11559_p2), %s321_s3, 12288, %s323_s2, %s310_s10, %s11415_s5, %s11415_s5, %s11416_s26  }
  0x51   : > { %334 = sbr.rel (%p11502_p8) target bundleno = 2592 (0xa20), region = 48 }
  0x56   : > { %s11597_s22 = sand.u32 1, %s11397_s25  }
  0x57   : > { %s8140_s23 = sshll.u32 %s11597_s22, 10  ;;  %s337_s14 = scalar_lea.sflag [#allocation3], %s11597_s22 }
  0x58   : > { %s11601_s0 = scalar_lea.vmem [#allocation2], %s8140_s23 }
  0x59   : > { %11368 = dma.done.wait (%p11489_p4), %s337_s14, 16384  }
  0x5a   : > { %11370 = vsyncadd (%p11489_p4), %s337_s14, 4294950912  ;;  %s346_s12 = sand.u32 1, %s11480_s28   ;;  %s11038_s21 = smul.u32 768, %s11597_s22 }
  0x5b   : > { %s347_s19 = scalar_lea.sflag [#allocation6], %s346_s12 }
  0x5c   : > { %s11609_s20 = scalar_lea.vmem [#allocation5], %s11038_s21 }
  0x5d   : > { %11372 = dma.done.wait (%p11489_p4), %s347_s19, 12288  }
  0x5e   : > { %11374 = vsyncadd (%p11489_p4), %s347_s19, 4294955008 }
  0x5f   : > { %11376 = dma.done.wait (%p49_p1), [#allocation6], 32768  }
  0x60   : > { %11378 = vsyncadd (%p49_p1), [#allocation6], 4294934528 }
  0x61   : > { %11380 = dma.done.wait (%p49_p1), [#allocation9], 24640  }
  0x62   : > { %11382 = vsyncadd (%p49_p1), [#allocation9], 4294942656 }
  0x63   : > { %11384 = dma.done.wait (%p49_p1), [#allocation12], 16384  }
  0x64   : > { %11386 = vsyncadd (%p49_p1), [#allocation12], 4294950912  ;;  %v8260_v0 = vld [vmem:[#allocation8 + $0xe0] sm:$0xf]  ;;  %v10744_v1 = vld [vmem:[#allocation8 + $0xec] sm:$0xf0] }
  0x65   : > { %v8388_v2 = vld [vmem:[#allocation8 + $0x1e0] sm:$0xf]  ;;  %v8261_v3 = vor.u32 %v10744_v1, %v8260_v0  ;;  %v10776_v4 = vld [vmem:[#allocation8 + $0x1ec] sm:$0xf0]  ;;  %s8145_s2 = sshll.u32 %s11597_s22, 9  ;;  %s11035_s4 = sshll.u32 %s11480_s28, 9 }
  0x66   : > { %v8516_v5 = vld [vmem:[#allocation8 + $0x2e0] sm:$0xf]  ;;  %v10808_v6 = vld [vmem:[#allocation8 + $0x2ec] sm:$0xf0]  ;;  %v8389_v7 = vor.u32 %v10776_v4, %v8388_v2  ;;  %s13299_s3 = scalar_lea.vmem [#allocation13], %s8145_s2  ;;  %s7987_s17 = scalar_lea.hbm %s13611_s7, %s11035_s4 }
  0x67   : > { %v8517_v8 = vor.u32 %v10808_v6, %v8516_v5  ;;  %v8644_v9 = vld [vmem:[#allocation8 + $0x3e0] sm:$0xf]  ;;  %v10840_v10 = vld [vmem:[#allocation8 + $0x3ec] sm:$0xf0]  ;;  %2154 = vmatpush.bf16.msra.mxu0 %v8261_v3  ;;  %s7988_s9 = sshll.u32 %s13299_s3, 4  ;;  %s7990_s5 = sshll.u32 %s7987_s17, 4  ;;  %s7989_s9 = int_to_ptr.vmem [resolvable:$true] %s7988_s9  ;;  %s7991_s5 = int_to_ptr.hbm [resolvable:$true] %s7990_s5 }
  0x68   : > { %v8244_v11 = vld [vmem:[#allocation8 + $0xc0] sm:$0xf]  ;;  %v8645_v12 = vor.u32 %v10840_v10, %v8644_v9  ;;  %v10740_v13 = vld [vmem:[#allocation8 + $0xcc] sm:$0xf0]  ;;  %2203 = vmatpush.bf16.msra.mxu1 %v8389_v7  ;;  %s7975_s28 = scalar_lea.sflag [#allocation4], %s11597_s22  ;;  %s11337_s26 = sshra.s32 %s7991_s5, 4  ;;  %s11338_s26 = int_to_ptr.hbm [resolvable:$true] %s11337_s26 }
  0x69   : > { %v8372_v14 = vld [vmem:[#allocation8 + $0x1c0] sm:$0xf]  ;;  %v10772_v15 = vld [vmem:[#allocation8 + $0x1cc] sm:$0xf0]  ;;  %2252 = vmatpush.bf16.msra.mxu2 %v8517_v8  ;;  %v8245_v16 = vor.u32 %v10740_v13, %v8244_v11  ;;  %s11339_s23 = scalar_lea.hbm %s11338_s26, 512  ;;  %s11343_s12 = scalar_lea.hbm %s13611_s7, 1024 }
  0x6a   : > { %v8373_v17 = vor.u32 %v10772_v15, %v8372_v14  ;;  %v8500_v18 = vld [vmem:[#allocation8 + $0x2c0] sm:$0xf]  ;;  %v10804_v19 = vld [vmem:[#allocation8 + $0x2cc] sm:$0xf0]  ;;  %2301 = vmatpush.bf16.msra.mxu3 %v8645_v12  ;;  %p11340_p1 = scmp.ne.s32.totalorder %s11338_s26, %s11339_s23  ;;  %p11344_p2 = scmp.lt.s32.totalorder %s11338_s26, %s13611_s7 }
  0x6b   : > { %v8628_v20 = vld [vmem:[#allocation8 + $0x3c0] sm:$0xf]  ;;  %v8501_v21 = vor.u32 %v10804_v19, %v8500_v18  ;;  %v10836_v22 = vld [vmem:[#allocation8 + $0x3cc] sm:$0xf0]  ;;  %2155 = vmatpush.bf16.msra.mxu0 %v8245_v16  ;;  %p11345_p10 = scmp.lt.s32.totalorder %s11343_s12, %s11339_s23 }
  0x6c   : > { %v8228_v23 = vld [vmem:[#allocation8 + $0xa0] sm:$0xf]  ;;  %v10736_v24 = vld [vmem:[#allocation8 + $0xac] sm:$0xf0]  ;;  %v8629_v25 = vor.u32 %v10836_v22, %v8628_v20  ;;  %2204 = vmatpush.bf16.msra.mxu1 %v8373_v17  ;;  %p11341_p4 = pnand %p11340_p1, %p11543_p3 }
  0x6d   : > { %v8356_v26 = vld [vmem:[#allocation8 + $0x1a0] sm:$0xf]  ;;  %v10768_v27 = vld [vmem:[#allocation8 + $0x1ac] sm:$0xf0]  ;;  %v8229_v29 = vor.u32 %v10736_v24, %v8228_v23  ;;  %2253 = vmatpush.bf16.msra.mxu2 %v8501_v21  ;;  %p11346_p11 = por %p11345_p10, %p11344_p2 }
  0x6e   : > { %v8484_v28 = vld [vmem:[#allocation8 + $0x2a0] sm:$0xf]  ;;  %v10800_v30 = vld [vmem:[#allocation8 + $0x2ac] sm:$0xf0]  ;;  %v8357_v33 = vor.u32 %v10768_v27, %v8356_v26  ;;  %2302 = vmatpush.bf16.msra.mxu3 %v8629_v25  ;;  %p11342_p8 = pneg %p11341_p4 }
  0x6f   : > { %v8612_v31 = vld [vmem:[#allocation8 + $0x3a0] sm:$0xf]  ;;  %v10832_v32 = vld [vmem:[#allocation8 + $0x3ac] sm:$0xf0]  ;;  %v8485_v34 = vor.u32 %v10800_v30, %v8484_v28  ;;  %2156 = vmatpush.bf16.msra.mxu0 %v8229_v29  ;;  %v603_v30 = vld [vmem:[%s11609_s20 + $0x8] sm:$0xff] }
  0x70   : > { %v8212_v35 = vld [vmem:[#allocation8 + $0x80] sm:$0xf]  ;;  %v10732_v36 = vld [vmem:[#allocation8 + $0x8c] sm:$0xf0]  ;;  %v8613_v38 = vor.u32 %v10832_v32, %v8612_v31  ;;  %2205 = vmatpush.bf16.msra.mxu1 %v8357_v33  ;;  %v609_v31 = vld [vmem:[%s11609_s20 + $0x38] sm:$0xff]  ;;  %p11347_p9 = pnand %p11346_p11, %p11342_p8 }
  0x71   : > { %v8340_v37 = vld [vmem:[#allocation8 + $0x180] sm:$0xf]  ;;  %v10764_v39 = vld [vmem:[#allocation8 + $0x18c] sm:$0xf0]  ;;  %v8213_v44 = vor.u32 %v10732_v36, %v8212_v35  ;;  %2254 = vmatpush.bf16.msra.mxu2 %v8485_v34  ;;  %v10742_v32 = vld [vmem:[#allocation8 + $0xe4] sm:$0xf] }
  0x72   : > { %v8468_v40 = vld [vmem:[#allocation8 + $0x280] sm:$0xf]  ;;  %v10796_v41 = vld [vmem:[#allocation8 + $0x28c] sm:$0xf0]  ;;  %v8341_v45 = vor.u32 %v10764_v39, %v8340_v37  ;;  %2303 = vmatpush.bf16.msra.mxu3 %v8613_v38  ;;  %v8262_v33 = vld [vmem:[#allocation8 + $0xf0] sm:$0xf0] }
  0x73   : > { %v8596_v42 = vld [vmem:[#allocation8 + $0x380] sm:$0xf]  ;;  %v10828_v43 = vld [vmem:[#allocation8 + $0x38c] sm:$0xf0]  ;;  %v8469_v46 = vor.u32 %v10796_v41, %v8468_v40  ;;  %2157 = vmatpush.bf16.msra.mxu0 %v8213_v44  ;;  %v10774_v36 = vld [vmem:[#allocation8 + $0x1e4] sm:$0xf]  ;;  %v8265_v44 = vor.u32 %v10742_v32, %v8262_v33 }
  0x74   : > { %v8196_v47 = vld [vmem:[#allocation8 + $0x60] sm:$0xf]  ;;  %v10728_v48 = vld [vmem:[#allocation8 + $0x6c] sm:$0xf0]  ;;  %v8597_v50 = vor.u32 %v10828_v43, %v8596_v42  ;;  %2206 = vmatpush.bf16.msra.mxu1 %v8341_v45  ;;  %v8390_v37 = vld [vmem:[#allocation8 + $0x1f0] sm:$0xf0] }
  0x75   : > { %v8324_v49 = vld [vmem:[#allocation8 + $0x160] sm:$0xf]  ;;  %v10760_v51 = vld [vmem:[#allocation8 + $0x16c] sm:$0xf0]  ;;  %v8197_v56 = vor.u32 %v10728_v48, %v8196_v47  ;;  %2255 = vmatpush.bf16.msra.mxu2 %v8469_v46  ;;  %v605_v41 = vld [vmem:[%s11609_s20 + $0x18] sm:$0xff] }
  0x76   : > { %v8452_v52 = vld [vmem:[#allocation8 + $0x260] sm:$0xf]  ;;  %v10792_v53 = vld [vmem:[#allocation8 + $0x26c] sm:$0xf0]  ;;  %v8325_v57 = vor.u32 %v10760_v51, %v8324_v49  ;;  %2304 = vmatpush.bf16.msra.mxu3 %v8597_v50  ;;  %v611_v42 = vld [vmem:[%s11609_s20 + $0x48] sm:$0xff]  ;;  %v8393_v49 = vor.u32 %v10774_v36, %v8390_v37 }
  0x77   : > { %v8580_v54 = vld [vmem:[#allocation8 + $0x360] sm:$0xf]  ;;  %v10824_v55 = vld [vmem:[#allocation8 + $0x36c] sm:$0xf0]  ;;  %v8453_v58 = vor.u32 %v10792_v53, %v8452_v52  ;;  %2158 = vmatpush.bf16.msra.mxu0 %v8197_v56  ;;  %v10738_v51 = vld [vmem:[#allocation8 + $0xc4] sm:$0xf]  ;;  %v11637_v53 = vpack.c.bf16 %v609_v31, %v603_v30 }
  0x78   : > { %v8180_v59 = vld [vmem:[#allocation8 + $0x40] sm:$0xf]  ;;  %v10724_v60 = vld [vmem:[#allocation8 + $0x4c] sm:$0xf0]  ;;  %v8581_v62 = vor.u32 %v10824_v55, %v8580_v54  ;;  %2207 = vmatpush.bf16.msra.mxu1 %v8325_v57  ;;  %v8246_v52 = vld [vmem:[#allocation8 + $0xd0] sm:$0xf0]  ;;  %v11641_v57 = vpack.c.bf16 %v611_v42, %v605_v41 }
  0x79   : > { %v8308_v61 = vld [vmem:[#allocation8 + $0x140] sm:$0xf]  ;;  %v10756_v63 = vld [vmem:[#allocation8 + $0x14c] sm:$0xf0]  ;;  %v8181_v4 = vor.u32 %v10724_v60, %v8180_v59  ;;  %2256 = vmatpush.bf16.msra.mxu2 %v8453_v58  ;;  %13773 = vst [vmem:[#allocation23_spill] sm:$0xff] %v11637_v53  ;;  %v8249_v60 = vor.u32 %v10738_v51, %v8246_v52  ;;  %v627_v42 = vld [vmem:[%s11609_s20 + $0xc8] sm:$0xff] }
  0x7a   : > { %v8436_v0 = vld [vmem:[#allocation8 + $0x240] sm:$0xf]  ;;  %v10788_v1 = vld [vmem:[#allocation8 + $0x24c] sm:$0xf0]  ;;  %v8309_v5 = vor.u32 %v10756_v63, %v8308_v61  ;;  %2305 = vmatpush.bf16.msra.mxu3 %v8581_v62  ;;  %v10770_v55 = vld [vmem:[#allocation8 + $0x1c4] sm:$0xf] }
  0x7b   : > { %v8564_v2 = vld [vmem:[#allocation8 + $0x340] sm:$0xf]  ;;  %v10820_v3 = vld [vmem:[#allocation8 + $0x34c] sm:$0xf0]  ;;  %v8437_v6 = vor.u32 %v10788_v1, %v8436_v0  ;;  %2159 = vmatpush.bf16.msra.mxu0 %v8181_v4  ;;  %v8374_v56 = vld [vmem:[#allocation8 + $0x1d0] sm:$0xf0] }
  0x7c   : > { %v8164_v7 = vld [vmem:[#allocation8 + $0x20] sm:$0xf]  ;;  %v10720_v8 = vld [vmem:[#allocation8 + $0x2c] sm:$0xf0]  ;;  %v8565_v10 = vor.u32 %v10820_v3, %v8564_v2  ;;  %2208 = vmatpush.bf16.msra.mxu1 %v8309_v5  ;;  %13775 = vst [vmem:[#allocation25_spill] sm:$0xff] %v11641_v57  ;;  %v8377_v63 = vor.u32 %v10770_v55, %v8374_v56 }
  0x7d   : > { %v8292_v9 = vld [vmem:[#allocation8 + $0x120] sm:$0xf]  ;;  %v10752_v11 = vld [vmem:[#allocation8 + $0x12c] sm:$0xf0]  ;;  %v8165_v17 = vor.u32 %v10720_v8, %v8164_v7  ;;  %2257 = vmatpush.bf16.msra.mxu2 %v8437_v6  ;;  %v10734_v3 = vld [vmem:[#allocation8 + $0xa4] sm:$0xf] }
  0x7e   : > { %v8420_v12 = vld [vmem:[#allocation8 + $0x220] sm:$0xf]  ;;  %v10784_v13 = vld [vmem:[#allocation8 + $0x22c] sm:$0xf0]  ;;  %v8293_v21 = vor.u32 %v10752_v11, %v8292_v9  ;;  %2306 = vmatpush.bf16.msra.mxu3 %v8565_v10  ;;  %v8230_v4 = vld [vmem:[#allocation8 + $0xb0] sm:$0xf0] }
  0x7f   : > { %v8548_v14 = vld [vmem:[#allocation8 + $0x320] sm:$0xf]  ;;  %v10816_v15 = vld [vmem:[#allocation8 + $0x32c] sm:$0xf0]  ;;  %v8421_v22 = vor.u32 %v10784_v13, %v8420_v12  ;;  %2160 = vmatpush.bf16.msra.mxu0 %v8165_v17  ;;  %v8233_v7 = vor.u32 %v10734_v3, %v8230_v4  ;;  %v10766_v9 = vld [vmem:[#allocation8 + $0x1a4] sm:$0xf] }
  0x80   : > { %v8148_v16 = vld [vmem:[#allocation8] sm:$0xf]  ;;  %v10716_v18 = vld [vmem:[#allocation8 + $0xc] sm:$0xf0]  ;;  %v8549_v26 = vor.u32 %v10816_v15, %v8548_v14  ;;  %2209 = vmatpush.bf16.msra.mxu1 %v8293_v21  ;;  %v8358_v10 = vld [vmem:[#allocation8 + $0x1b0] sm:$0xf0] }
  0x81   : > { %v8276_v19 = vld [vmem:[#allocation8 + $0x100] sm:$0xf]  ;;  %v10748_v20 = vld [vmem:[#allocation8 + $0x10c] sm:$0xf0]  ;;  %v8149_v34 = vor.u32 %v10716_v18, %v8148_v16  ;;  %2258 = vmatpush.bf16.msra.mxu2 %v8421_v22  ;;  %v8361_v11 = vor.u32 %v10766_v9, %v8358_v10  ;;  %v615_v18 = vld [vmem:[%s11609_s20 + $0x68] sm:$0xff] }
  0x82   : > { %v8404_v23 = vld [vmem:[#allocation8 + $0x200] sm:$0xf]  ;;  %v10780_v24 = vld [vmem:[#allocation8 + $0x20c] sm:$0xf0]  ;;  %v8277_v38 = vor.u32 %v10748_v20, %v8276_v19  ;;  %2307 = vmatpush.bf16.msra.mxu3 %v8549_v26  ;;  %v621_v19 = vld [vmem:[%s11609_s20 + $0x98] sm:$0xff] }
  0x83   : > { %v8532_v25 = vld [vmem:[#allocation8 + $0x300] sm:$0xf]  ;;  %v10812_v27 = vld [vmem:[#allocation8 + $0x30c] sm:$0xf0]  ;;  %v8405_v39 = vor.u32 %v10780_v24, %v8404_v23  ;;  %2161 = vmatpush.bf16.msra.mxu0 %v8149_v34  ;;  %v617_v22 = vld [vmem:[%s11609_s20 + $0x78] sm:$0xff] }
  0x84   : > { %v602_v28 = vld [vmem:[%s11609_s20] sm:$0xff]  ;;  %v608_v29 = vld [vmem:[%s11609_s20 + $0x30] sm:$0xff]  ;;  %v8533_v43 = vor.u32 %v10812_v27, %v8532_v25  ;;  %2210 = vmatpush.bf16.msra.mxu1 %v8277_v38  ;;  %v623_v23 = vld [vmem:[%s11609_s20 + $0xa8] sm:$0xff]  ;;  %v11657_v25 = vpack.c.bf16 %v621_v19, %v615_v18 }
  0x85   : > { %v604_v35 = vld [vmem:[%s11609_s20 + $0x10] sm:$0xff]  ;;  %v610_v40 = vld [vmem:[%s11609_s20 + $0x40] sm:$0xff]  ;;  %v11635_v48 = vpack.c.bf16 %v608_v29, %v602_v28  ;;  %2259 = vmatpush.bf16.msra.mxu2 %v8405_v39  ;;  %v11661_v27 = vpack.c.bf16 %v623_v23, %v617_v22  ;;  %v641_v10 = vld [vmem:[%s11609_s20 + $0x138] sm:$0xff] }
  0x86   : > { %v8772_v45 = vld [vmem:[#allocation8 + $0x4e0] sm:$0xf]  ;;  %v10872_v46 = vld [vmem:[#allocation8 + $0x4ec] sm:$0xf0]  ;;  %v11639_v54 = vpack.c.bf16 %v610_v40, %v604_v35  ;;  %2308 = vmatpush.bf16.msra.mxu3 %v8533_v43  ;;  %13777 = vst [vmem:[#allocation27_spill] sm:$0xff] %v11657_v25  ;;  %v633_v43 = vld [vmem:[%s11609_s20 + $0xf8] sm:$0xff] }
  0x87   : > { %v8900_v47 = vld [vmem:[#allocation8 + $0x5e0] sm:$0xf]  ;;  %13772 = vst [vmem:[#allocation22_spill] sm:$0xff] %v11635_v48  ;;  %v10904_v50 = vld [vmem:[#allocation8 + $0x5ec] sm:$0xf0]  ;;  %v8773_v58 = vor.u32 %v10872_v46, %v8772_v45  ;;  %2162 = vmatmul.bf16.vlgmr.msra.gmra.mxu0 %v11635_v48  ;;  %2211 = vmatmul.bf16.vlgmr.msra.gmra.mxu1 %v11637_v53  ;;  %v629_v46 = vld [vmem:[%s11609_s20 + $0xd8] sm:$0xff] }
  0x88   : > { %13774 = vst [vmem:[#allocation24_spill] sm:$0xff] %v11639_v54  ;;  %v8901_v59 = vor.u32 %v10904_v50, %v8900_v47  ;;  %v8756_v61 = vld [vmem:[#allocation8 + $0x4c0] sm:$0xf]  ;;  %v10868_v62 = vld [vmem:[#allocation8 + $0x4cc] sm:$0xf0]  ;;  %2260 = vmatmul.bf16.vlgmr.msra.gmra.mxu2 %v11639_v54  ;;  %v635_v47 = vld [vmem:[%s11609_s20 + $0x108] sm:$0xff]  ;;  %v11677_v50 = vpack.c.bf16 %v633_v43, %v627_v42 }
  0x89   : > { %2448 = vmatpush.bf16.msrb.mxu2 %v8265_v44  ;;  %v8884_v0 = vld [vmem:[#allocation8 + $0x5c0] sm:$0xf]  ;;  %v10900_v1 = vld [vmem:[#allocation8 + $0x5cc] sm:$0xf0]  ;;  %2309 = vmatmul.bf16.vlgmr.msra.gmra.mxu3 %v11641_v57  ;;  %v8757_v2 = vor.u32 %v10868_v62, %v8756_v61  ;;  %v10730_v28 = vld [vmem:[#allocation8 + $0x84] sm:$0xf]  ;;  %v11681_v52 = vpack.c.bf16 %v635_v47, %v629_v46 }
  0x8a   : > { %2497 = vmatpush.bf16.msrb.mxu3 %v8393_v49  ;;  %2350 = vmatpush.bf16.msrb.mxu0 %v8773_v58  ;;  %v8740_v5 = vld [vmem:[#allocation8 + $0x4a0] sm:$0xf]  ;;  %v8885_v6 = vor.u32 %v10900_v1, %v8884_v0  ;;  %v10864_v8 = vld [vmem:[#allocation8 + $0x4ac] sm:$0xf0]  ;;  %v8214_v29 = vld [vmem:[#allocation8 + $0x90] sm:$0xf0] }
  0x8b   : > { %2399 = vmatpush.bf16.msrb.mxu1 %v8901_v59  ;;  %v8868_v12 = vld [vmem:[#allocation8 + $0x5a0] sm:$0xf]  ;;  %v10896_v13 = vld [vmem:[#allocation8 + $0x5ac] sm:$0xf0]  ;;  %v8741_v14 = vor.u32 %v10864_v8, %v8740_v5  ;;  %v8217_v31 = vor.u32 %v10730_v28, %v8214_v29  ;;  %v10762_v33 = vld [vmem:[#allocation8 + $0x184] sm:$0xf] }
  0x8c   : > { %v8869_v15 = vor.u32 %v10896_v13, %v8868_v12  ;;  %v614_v16 = vld [vmem:[%s11609_s20 + $0x60] sm:$0xff]  ;;  %v620_v17 = vld [vmem:[%s11609_s20 + $0x90] sm:$0xff]  ;;  %13779 = vst [vmem:[#allocation29_spill] sm:$0xff] %v11677_v50 }
  0x8d   : > { %2449 = vmatpush.bf16.msrb.mxu2 %v8249_v60  ;;  %v616_v20 = vld [vmem:[%s11609_s20 + $0x70] sm:$0xff]  ;;  %v622_v21 = vld [vmem:[%s11609_s20 + $0xa0] sm:$0xff]  ;;  %v11655_v24 = vpack.c.bf16 %v620_v17, %v614_v16 }
  0x8e   : > { %2498 = vmatpush.bf16.msrb.mxu3 %v8377_v63  ;;  %2351 = vmatpush.bf16.msrb.mxu0 %v8757_v2  ;;  %v11659_v26 = vpack.c.bf16 %v622_v21, %v616_v20  ;;  %v8724_v30 = vld [vmem:[#allocation8 + $0x480] sm:$0xf]  ;;  %v10860_v32 = vld [vmem:[#allocation8 + $0x48c] sm:$0xf0]  ;;  %v8342_v34 = vld [vmem:[#allocation8 + $0x190] sm:$0xf0] }
  0x8f   : > { %2400 = vmatpush.bf16.msrb.mxu1 %v8885_v6  ;;  %13776 = vst [vmem:[#allocation26_spill] sm:$0xff] %v11655_v24  ;;  %v8725_v35 = vor.u32 %v10860_v32, %v8724_v30  ;;  %v8345_v36 = vor.u32 %v10762_v33, %v8342_v34  ;;  %v8852_v37 = vld [vmem:[#allocation8 + $0x580] sm:$0xf]  ;;  %v10892_v38 = vld [vmem:[#allocation8 + $0x58c] sm:$0xf0]  ;;  %v639_v6 = vld [vmem:[%s11609_s20 + $0x128] sm:$0xff] }
  0x90   : > { %v8853_v39 = vor.u32 %v10892_v38, %v8852_v37  ;;  %v626_v40 = vld [vmem:[%s11609_s20 + $0xc0] sm:$0xff]  ;;  %v632_v41 = vld [vmem:[%s11609_s20 + $0xf0] sm:$0xff]  ;;  %v651_v34 = vld [vmem:[%s11609_s20 + $0x188] sm:$0xff] }
  0x91   : > { %2450 = vmatpush.bf16.msrb.mxu2 %v8233_v7  ;;  %v628_v44 = vld [vmem:[%s11609_s20 + $0xd0] sm:$0xff]  ;;  %v634_v45 = vld [vmem:[%s11609_s20 + $0x100] sm:$0xff]  ;;  %v11675_v49 = vpack.c.bf16 %v632_v41, %v626_v40  ;;  %v645_v7 = vld [vmem:[%s11609_s20 + $0x158] sm:$0xff] }
  0x92   : > { %2499 = vmatpush.bf16.msrb.mxu3 %v8361_v11  ;;  %2352 = vmatpush.bf16.msrb.mxu0 %v8741_v14  ;;  %v11679_v51 = vpack.c.bf16 %v634_v45, %v628_v44  ;;  %v10726_v55 = vld [vmem:[#allocation8 + $0x64] sm:$0xf]  ;;  %v8198_v56 = vld [vmem:[#allocation8 + $0x70] sm:$0xf0]  ;;  %v8708_v58 = vld [vmem:[#allocation8 + $0x460] sm:$0xf]  ;;  %v11697_v13 = vpack.c.bf16 %v645_v7, %v639_v6 }
  0x93   : > { %2401 = vmatpush.bf16.msrb.mxu1 %v8869_v15  ;;  %13778 = vst [vmem:[#allocation28_spill] sm:$0xff] %v11675_v49  ;;  %v8201_v59 = vor.u32 %v10726_v55, %v8198_v56  ;;  %v10856_v60 = vld [vmem:[#allocation8 + $0x46c] sm:$0xf0]  ;;  %v10758_v61 = vld [vmem:[#allocation8 + $0x164] sm:$0xf]  ;;  %v647_v11 = vld [vmem:[%s11609_s20 + $0x168] sm:$0xff] }
  0x94   : > { %v8326_v62 = vld [vmem:[#allocation8 + $0x170] sm:$0xf0]  ;;  %v8709_v63 = vor.u32 %v10856_v60, %v8708_v58  ;;  %v8836_v1 = vld [vmem:[#allocation8 + $0x560] sm:$0xf]  ;;  %v10888_v2 = vld [vmem:[#allocation8 + $0x56c] sm:$0xf0]  ;;  %v11701_v15 = vpack.c.bf16 %v647_v11, %v641_v10 }
  0x95   : > { %2451 = vmatpush.bf16.msrb.mxu2 %v8217_v31  ;;  %v8329_v0 = vor.u32 %v10758_v61, %v8326_v62  ;;  %v8837_v3 = vor.u32 %v10888_v2, %v8836_v1  ;;  %v638_v4 = vld [vmem:[%s11609_s20 + $0x120] sm:$0xff]  ;;  %v644_v5 = vld [vmem:[%s11609_s20 + $0x150] sm:$0xff]  ;;  %13781 = vst [vmem:[#allocation31_spill] sm:$0xff] %v11697_v13  ;;  %v653_v38 = vld [vmem:[%s11609_s20 + $0x198] sm:$0xff] }
  0x96   : > { %2353 = vmatpush.bf16.msrb.mxu0 %v8725_v35  ;;  %2500 = vmatpush.bf16.msrb.mxu3 %v8345_v36  ;;  %v640_v8 = vld [vmem:[%s11609_s20 + $0x130] sm:$0xff]  ;;  %v646_v9 = vld [vmem:[%s11609_s20 + $0x160] sm:$0xff]  ;;  %v11695_v12 = vpack.c.bf16 %v644_v5, %v638_v4  ;;  %v657_v35 = vld [vmem:[%s11609_s20 + $0x1b8] sm:$0xff] }
  0x97   : > { %2167 = vmatmul.bf16.gmra.mxu0 %v11655_v24  ;;  %2216 = vmatmul.bf16.gmra.mxu1 %v11657_v25  ;;  %v11699_v14 = vpack.c.bf16 %v646_v9, %v640_v8  ;;  %v10722_v16 = vld [vmem:[#allocation8 + $0x44] sm:$0xf]  ;;  %v8182_v17 = vld [vmem:[#allocation8 + $0x50] sm:$0xf0]  ;;  %v8692_v18 = vld [vmem:[#allocation8 + $0x440] sm:$0xf]  ;;  %v11717_v41 = vpack.c.bf16 %v657_v35, %v651_v34 }
  0x98   : > { %2265 = vmatmul.bf16.gmra.mxu2 %v11659_v26  ;;  %2402 = vmatpush.bf16.msrb.mxu1 %v8853_v39  ;;  %13780 = vst [vmem:[#allocation30_spill] sm:$0xff] %v11695_v12  ;;  %v8185_v19 = vor.u32 %v10722_v16, %v8182_v17  ;;  %v10852_v20 = vld [vmem:[#allocation8 + $0x44c] sm:$0xf0]  ;;  %v10754_v21 = vld [vmem:[#allocation8 + $0x144] sm:$0xf]  ;;  %v659_v39 = vld [vmem:[%s11609_s20 + $0x1c8] sm:$0xff] }
  0x99   : > { %2314 = vmatmul.bf16.gmra.mxu3 %v11661_v27  ;;  %2452 = vmatpush.bf16.msrb.mxu2 %v8201_v59  ;;  %v8310_v22 = vld [vmem:[#allocation8 + $0x150] sm:$0xf0]  ;;  %v8693_v23 = vor.u32 %v10852_v20, %v8692_v18  ;;  %v8820_v29 = vld [vmem:[#allocation8 + $0x540] sm:$0xf]  ;;  %v10884_v30 = vld [vmem:[#allocation8 + $0x54c] sm:$0xf0]  ;;  %v11721_v43 = vpack.c.bf16 %v659_v39, %v653_v38 }
  0x9a   : > { %2354 = vmatpush.bf16.msrb.mxu0 %v8709_v63  ;;  %2501 = vmatpush.bf16.msrb.mxu3 %v8329_v0  ;;  %v8313_v28 = vor.u32 %v10754_v21, %v8310_v22  ;;  %v8821_v31 = vor.u32 %v10884_v30, %v8820_v29  ;;  %v650_v32 = vld [vmem:[%s11609_s20 + $0x180] sm:$0xff]  ;;  %v656_v33 = vld [vmem:[%s11609_s20 + $0x1b0] sm:$0xff]  ;;  %13783 = vst [vmem:[#allocation33_spill] sm:$0xff] %v11717_v41  ;;  %v663_v2 = vld [vmem:[%s11609_s20 + $0x1e8] sm:$0xff] }
  0x9b   : > { %v652_v36 = vld [vmem:[%s11609_s20 + $0x190] sm:$0xff]  ;;  %v658_v37 = vld [vmem:[%s11609_s20 + $0x1c0] sm:$0xff]  ;;  %v11715_v40 = vpack.c.bf16 %v656_v33, %v650_v32  ;;  %v665_v6 = vld [vmem:[%s11609_s20 + $0x1f8] sm:$0xff] }
  0x9c   : > { %2403 = vmatpush.bf16.msrb.mxu1 %v8837_v3  ;;  %v11719_v42 = vpack.c.bf16 %v658_v37, %v652_v36  ;;  %v10718_v44 = vld [vmem:[#allocation8 + $0x24] sm:$0xf]  ;;  %v8166_v45 = vld [vmem:[#allocation8 + $0x30] sm:$0xf0]  ;;  %v8676_v46 = vld [vmem:[#allocation8 + $0x420] sm:$0xf] }
  0x9d   : > { %2453 = vmatpush.bf16.msrb.mxu2 %v8185_v19  ;;  %13782 = vst [vmem:[#allocation32_spill] sm:$0xff] %v11715_v40  ;;  %v8169_v47 = vor.u32 %v10718_v44, %v8166_v45  ;;  %v10848_v55 = vld [vmem:[#allocation8 + $0x42c] sm:$0xf0]  ;;  %v10750_v56 = vld [vmem:[#allocation8 + $0x124] sm:$0xf]  ;;  %v669_v3 = vld [vmem:[%s11609_s20 + $0x218] sm:$0xff] }
  0x9e   : > { %2355 = vmatpush.bf16.msrb.mxu0 %v8693_v23  ;;  %2502 = vmatpush.bf16.msrb.mxu3 %v8313_v28  ;;  %v8294_v58 = vld [vmem:[#allocation8 + $0x130] sm:$0xf0]  ;;  %v8677_v59 = vor.u32 %v10848_v55, %v8676_v46  ;;  %v8804_v61 = vld [vmem:[#allocation8 + $0x520] sm:$0xf]  ;;  %v10880_v62 = vld [vmem:[#allocation8 + $0x52c] sm:$0xf0]  ;;  %v11737_v9 = vpack.c.bf16 %v669_v3, %v663_v2 }
  0x9f   : > { %v8297_v60 = vor.u32 %v10750_v56, %v8294_v58  ;;  %v8805_v63 = vor.u32 %v10880_v62, %v8804_v61  ;;  %v662_v0 = vld [vmem:[%s11609_s20 + $0x1e0] sm:$0xff]  ;;  %v668_v1 = vld [vmem:[%s11609_s20 + $0x210] sm:$0xff]  ;;  %v671_v7 = vld [vmem:[%s11609_s20 + $0x228] sm:$0xff] }
  0xa0   : > { %2404 = vmatpush.bf16.msrb.mxu1 %v8821_v31  ;;  %v664_v4 = vld [vmem:[%s11609_s20 + $0x1f0] sm:$0xff]  ;;  %v670_v5 = vld [vmem:[%s11609_s20 + $0x220] sm:$0xff]  ;;  %v11735_v8 = vpack.c.bf16 %v668_v1, %v662_v0  ;;  %13785 = vst [vmem:[#allocation35_spill] sm:$0xff] %v11737_v9  ;;  %v11741_v11 = vpack.c.bf16 %v671_v7, %v665_v6  ;;  %v675_v34 = vld [vmem:[%s11609_s20 + $0x248] sm:$0xff] }
  0xa1   : > { %2454 = vmatpush.bf16.msrb.mxu2 %v8169_v47  ;;  %v11739_v10 = vpack.c.bf16 %v670_v5, %v664_v4  ;;  %v10714_v16 = vld [vmem:[#allocation8 + $0x4] sm:$0xf]  ;;  %v8150_v17 = vld [vmem:[#allocation8 + $0x10] sm:$0xf0]  ;;  %v8660_v18 = vld [vmem:[#allocation8 + $0x400] sm:$0xf] }
  0xa2   : > { %2356 = vmatpush.bf16.msrb.mxu0 %v8677_v59  ;;  %2503 = vmatpush.bf16.msrb.mxu3 %v8297_v60  ;;  %13784 = vst [vmem:[#allocation34_spill] sm:$0xff] %v11735_v8  ;;  %v8153_v19 = vor.u32 %v10714_v16, %v8150_v17  ;;  %v10844_v20 = vld [vmem:[#allocation8 + $0x40c] sm:$0xf0]  ;;  %v10746_v21 = vld [vmem:[#allocation8 + $0x104] sm:$0xf]  ;;  %v681_v35 = vld [vmem:[%s11609_s20 + $0x278] sm:$0xff] }
  0xa3   : > { %v8278_v22 = vld [vmem:[#allocation8 + $0x110] sm:$0xf0]  ;;  %v8661_v23 = vor.u32 %v10844_v20, %v8660_v18  ;;  %v8788_v29 = vld [vmem:[#allocation8 + $0x500] sm:$0xf]  ;;  %v10876_v30 = vld [vmem:[#allocation8 + $0x50c] sm:$0xf0]  ;;  %v11757_v45 = vpack.c.bf16 %v681_v35, %v675_v34 }
  0xa4   : > { %2405 = vmatpush.bf16.msrb.mxu1 %v8805_v63  ;;  %v8281_v28 = vor.u32 %v10746_v21, %v8278_v22  ;;  %v8789_v31 = vor.u32 %v10876_v30, %v8788_v29  ;;  %v674_v32 = vld [vmem:[%s11609_s20 + $0x240] sm:$0xff]  ;;  %v680_v33 = vld [vmem:[%s11609_s20 + $0x270] sm:$0xff]  ;;  %v677_v38 = vld [vmem:[%s11609_s20 + $0x258] sm:$0xff] }
  0xa5   : > { %2455 = vmatpush.bf16.msrb.mxu2 %v8153_v19  ;;  %v676_v36 = vld [vmem:[%s11609_s20 + $0x250] sm:$0xff]  ;;  %v682_v37 = vld [vmem:[%s11609_s20 + $0x280] sm:$0xff]  ;;  %v683_v39 = vld [vmem:[%s11609_s20 + $0x288] sm:$0xff]  ;;  %v11755_v44 = vpack.c.bf16 %v680_v33, %v674_v32  ;;  %13787 = vst [vmem:[#allocation37_spill] sm:$0xff] %v11757_v45 }
  0xa6   : > { %2357 = vmatpush.bf16.msrb.mxu0 %v8661_v23  ;;  %2504 = vmatpush.bf16.msrb.mxu3 %v8281_v28  ;;  %v11759_v46 = vpack.c.bf16 %v682_v37, %v676_v36  ;;  %v11761_v47 = vpack.c.bf16 %v683_v39, %v677_v38  ;;  %v10870_v55 = vld [vmem:[#allocation8 + $0x4e4] sm:$0xf]  ;;  %v8774_v56 = vld [vmem:[#allocation8 + $0x4f0] sm:$0xf0]  ;;  %v687_v6 = vld [vmem:[%s11609_s20 + $0x2a8] sm:$0xff] }
  0xa7   : > { %2172 = vmatmul.bf16.gmra.mxu0 %v11675_v49  ;;  %2221 = vmatmul.bf16.gmra.mxu1 %v11677_v50  ;;  %13786 = vst [vmem:[#allocation36_spill] sm:$0xff] %v11755_v44  ;;  %v10806_v58 = vld [vmem:[#allocation8 + $0x2e4] sm:$0xf]  ;;  %v8777_v59 = vor.u32 %v10870_v55, %v8774_v56  ;;  %v8518_v60 = vld [vmem:[#allocation8 + $0x2f0] sm:$0xf0]  ;;  %v693_v7 = vld [vmem:[%s11609_s20 + $0x2d8] sm:$0xff] }
  0xa8   : > { %2270 = vmatmul.bf16.gmra.mxu2 %v11679_v51  ;;  %2406 = vmatpush.bf16.msrb.mxu1 %v8789_v31  ;;  %v10902_v61 = vld [vmem:[#allocation8 + $0x5e4] sm:$0xf]  ;;  %v8902_v62 = vld [vmem:[#allocation8 + $0x5f0] sm:$0xf0]  ;;  %v8521_v63 = vor.u32 %v10806_v58, %v8518_v60  ;;  %v689_v18 = vld [vmem:[%s11609_s20 + $0x2b8] sm:$0xff]  ;;  %v11777_v21 = vpack.c.bf16 %v693_v7, %v687_v6 }
  0xa9   : > { %2319 = vmatmul.bf16.gmra.mxu3 %v11681_v52  ;;  %v8905_v0 = vor.u32 %v10902_v61, %v8902_v62  ;;  %2644 = vmatpush.bf16.msra.mxu2 %v8777_v59  ;;  %v10838_v1 = vld [vmem:[#allocation8 + $0x3e4] sm:$0xf]  ;;  %v8646_v2 = vld [vmem:[#allocation8 + $0x3f0] sm:$0xf0]  ;;  %v695_v19 = vld [vmem:[%s11609_s20 + $0x2e8] sm:$0xff] }
  0xaa   : > { %2546 = vmatpush.bf16.msra.mxu0 %v8521_v63  ;;  %v8649_v3 = vor.u32 %v10838_v1, %v8646_v2  ;;  %v686_v4 = vld [vmem:[%s11609_s20 + $0x2a0] sm:$0xff]  ;;  %v692_v5 = vld [vmem:[%s11609_s20 + $0x2d0] sm:$0xff]  ;;  %13789 = vst [vmem:[#allocation39_spill] sm:$0xff] %v11777_v21  ;;  %v11781_v23 = vpack.c.bf16 %v695_v19, %v689_v18  ;;  %v607_v58 = vld [vmem:[%s11609_s20 + $0x28] sm:$0xff] }
  0xab   : > { %2693 = vmatpush.bf16.msra.mxu3 %v8905_v0  ;;  %v688_v16 = vld [vmem:[%s11609_s20 + $0x2b0] sm:$0xff]  ;;  %v694_v17 = vld [vmem:[%s11609_s20 + $0x2e0] sm:$0xff]  ;;  %v11775_v20 = vpack.c.bf16 %v692_v5, %v686_v4  ;;  %v613_v59 = vld [vmem:[%s11609_s20 + $0x58] sm:$0xff] }
  0xac   : > { %2595 = vmatpush.bf16.msra.mxu1 %v8649_v3  ;;  %v11779_v22 = vpack.c.bf16 %v694_v17, %v688_v16  ;;  %13791 = vst [vmem:[#allocation41_spill] sm:$0xff] %v11781_v23  ;;  %v10866_v28 = vld [vmem:[#allocation8 + $0x4c4] sm:$0xf]  ;;  %v8758_v29 = vld [vmem:[#allocation8 + $0x4d0] sm:$0xf0]  ;;  %v11793_v62 = vpack.c.bf16 %v613_v59, %v607_v58 }
  0xad   : > { %13788 = vst [vmem:[#allocation38_spill] sm:$0xff] %v11775_v20  ;;  %v10802_v30 = vld [vmem:[#allocation8 + $0x2c4] sm:$0xf]  ;;  %v8761_v31 = vor.u32 %v10866_v28, %v8758_v29  ;;  %v8502_v32 = vld [vmem:[#allocation8 + $0x2d0] sm:$0xf0] }
  0xae   : > { %13790 = vst [vmem:[#allocation40_spill] sm:$0xff] %v11779_v22  ;;  %v10898_v33 = vld [vmem:[#allocation8 + $0x5c4] sm:$0xf]  ;;  %v8886_v34 = vld [vmem:[#allocation8 + $0x5d0] sm:$0xf0]  ;;  %v8505_v35 = vor.u32 %v10802_v30, %v8502_v32 }
  0xaf   : > { %v8889_v36 = vor.u32 %v10898_v33, %v8886_v34  ;;  %2645 = vmatpush.bf16.msra.mxu2 %v8761_v31  ;;  %v10834_v37 = vld [vmem:[#allocation8 + $0x3c4] sm:$0xf]  ;;  %v8630_v38 = vld [vmem:[#allocation8 + $0x3d0] sm:$0xf0] }
  0xb0   : > { %2547 = vmatpush.bf16.msra.mxu0 %v8505_v35  ;;  %v8633_v39 = vor.u32 %v10834_v37, %v8630_v38  ;;  %v606_v55 = vld [vmem:[%s11609_s20 + $0x20] sm:$0xff]  ;;  %v612_v56 = vld [vmem:[%s11609_s20 + $0x50] sm:$0xff]  ;;  %v619_v38 = vld [vmem:[%s11609_s20 + $0x88] sm:$0xff] }
  0xb1   : > { %2694 = vmatpush.bf16.msra.mxu3 %v8889_v36  ;;  %v11791_v60 = vpack.c.bf16 %v612_v56, %v606_v55  ;;  %v10862_v1 = vld [vmem:[#allocation8 + $0x4a4] sm:$0xf]  ;;  %v8742_v2 = vld [vmem:[#allocation8 + $0x4b0] sm:$0xf0] }
  0xb2   : > { %2596 = vmatpush.bf16.msra.mxu1 %v8633_v39  ;;  %v10798_v3 = vld [vmem:[#allocation8 + $0x2a4] sm:$0xf]  ;;  %v8745_v4 = vor.u32 %v10862_v1, %v8742_v2  ;;  %v8486_v5 = vld [vmem:[#allocation8 + $0x2b0] sm:$0xf0]  ;;  %v625_v39 = vld [vmem:[%s11609_s20 + $0xb8] sm:$0xff] }
  0xb3   : > { %v10894_v6 = vld [vmem:[#allocation8 + $0x5a4] sm:$0xf]  ;;  %v8870_v7 = vld [vmem:[#allocation8 + $0x5b0] sm:$0xf0]  ;;  %v8489_v17 = vor.u32 %v10798_v3, %v8486_v5 }
  0xb4   : > { %v8873_v18 = vor.u32 %v10894_v6, %v8870_v7  ;;  %2646 = vmatpush.bf16.msra.mxu2 %v8745_v4  ;;  %v10830_v33 = vld [vmem:[#allocation8 + $0x3a4] sm:$0xf]  ;;  %v8614_v34 = vld [vmem:[#allocation8 + $0x3b0] sm:$0xf0] }
  0xb5   : > { %2548 = vmatpush.bf16.msra.mxu0 %v8489_v17  ;;  %v8617_v35 = vor.u32 %v10830_v33, %v8614_v34  ;;  %v618_v36 = vld [vmem:[%s11609_s20 + $0x80] sm:$0xff]  ;;  %v624_v37 = vld [vmem:[%s11609_s20 + $0xb0] sm:$0xff] }
  0xb6   : > { %2695 = vmatpush.bf16.msra.mxu3 %v8873_v18  ;;  %v11805_v56 = vpack.c.bf16 %v624_v37, %v618_v36  ;;  %v10858_v3 = vld [vmem:[#allocation8 + $0x484] sm:$0xf]  ;;  %v8726_v4 = vld [vmem:[#allocation8 + $0x490] sm:$0xf0] }
  0xb7   : > { %2177 = vmatmul.bf16.gmra.mxu0 %v11695_v12  ;;  %2226 = vmatmul.bf16.gmra.mxu1 %v11697_v13  ;;  %v10794_v5 = vld [vmem:[#allocation8 + $0x284] sm:$0xf]  ;;  %v8729_v6 = vor.u32 %v10858_v3, %v8726_v4  ;;  %v8470_v7 = vld [vmem:[#allocation8 + $0x290] sm:$0xf0] }
  0xb8   : > { %2275 = vmatmul.bf16.gmra.mxu2 %v11699_v14  ;;  %2597 = vmatpush.bf16.msra.mxu1 %v8617_v35  ;;  %v8854_v17 = vld [vmem:[#allocation8 + $0x590] sm:$0xf0]  ;;  %v10826_v36 = vld [vmem:[#allocation8 + $0x384] sm:$0xf] }
  0xb9   : > { %2324 = vmatmul.bf16.gmra.mxu3 %v11701_v15  ;;  %2647 = vmatpush.bf16.msra.mxu2 %v8729_v6  ;;  %v8598_v37 = vld [vmem:[#allocation8 + $0x390] sm:$0xf0] }
  0xc7   : > { %2182 = vmatmul.bf16.gmra.mxu0 %v11715_v40  ;;  %2231 = vmatmul.bf16.gmra.mxu1 %v11717_v41 }
  0xc8   : > { %2280 = vmatmul.bf16.gmra.mxu2 %v11719_v42 }
  0xc9   : > { %2329 = vmatmul.bf16.gmra.mxu3 %v11721_v43 }
  0xd7   : > { %2187 = vmatmul.bf16.gmra.mxu0 %v11735_v8  ;;  %2236 = vmatmul.bf16.gmra.mxu1 %v11737_v9 }
  0xd8   : > { %2285 = vmatmul.bf16.gmra.mxu2 %v11739_v10 }
  0xd9   : > { %2334 = vmatmul.bf16.gmra.mxu3 %v11741_v11 }
  0xe7   : > { %2192 = vmatmul.bf16.gmra.mxu0 %v11755_v44  ;;  %2241 = vmatmul.bf16.gmra.mxu1 %v11757_v45 }
  0xe8   : > { %2290 = vmatmul.bf16.gmra.mxu2 %v11759_v46 }
  0xe9   : > { %2339 = vmatmul.bf16.gmra.mxu3 %v11761_v47 }
  0xf7   : > { %2197 = vmatmul.bf16.gmra.mxu0 %v11775_v20  ;;  %2246 = vmatmul.bf16.gmra.mxu1 %v11777_v21 }
  0xf8   : > { %2295 = vmatmul.bf16.gmra.mxu2 %v11779_v22 }
  0xf9   : > { %2344 = vmatmul.bf16.gmra.mxu3 %v11781_v23 }
 0x104   : > { %v2163_v61 = vpop.f32.mrf.mxu0  ;;  %v2212_v63 = vpop.f32.mrf.mxu1 }
 0x105   : > { %v2213_v0 = vadd.f32 %v2212_v63, %v2163_v61  ;;  %v11807_v63 = vpack.c.bf16 %v625_v39, %v619_v38  ;;  %v8601_v38 = vor.u32 %v10826_v36, %v8598_v37  ;;  %v630_v39 = vld [vmem:[%s11609_s20 + $0xe0] sm:$0xff] }
 0x107   : > { %2358 = vmatmul.bf16.vlgmr.msrb.gmra.mxu0 %v11791_v60  ;;  %2407 = vmatmul.bf16.vlgmr.msrb.gmra.mxu1 %v11793_v62 }
 0x108   : > { %2456 = vmatmul.bf16.vlgmr.msrb.gmra.mxu2 %v11635_v48  ;;  %2598 = vmatpush.bf16.msra.mxu1 %v8601_v38  ;;  %v696_v48 = vld [vmem:[%s11609_s20 + $0x2f0] sm:$0xff] }
 0x109   : > { %2505 = vmatmul.bf16.vlgmr.msrb.gmra.mxu3 %v11637_v53  ;;  %v679_v53 = vld [vmem:[%s11609_s20 + $0x268] sm:$0xff] }
 0x10b   : > { %v2261_v16 = vpop.f32.mrf.mxu2 }
 0x10c   : > { %v2262_v19 = vadd.f32 %v2261_v16, %v2213_v0  ;;  %v2310_v28 = vpop.f32.mrf.mxu3  ;;  %v2165_v29 = vpop.f32.mrf.mxu0  ;;  %v10890_v16 = vld [vmem:[#allocation8 + $0x584] sm:$0xf] }
 0x10d   : > { %v2214_v30 = vpop.f32.mrf.mxu1 }
 0x10e   : > { %v11799_v31 = vadd.f32 %v2310_v28, %v2262_v19  ;;  %v2215_v32 = vadd.f32 %v2214_v30, %v2165_v29  ;;  %v8473_v19 = vor.u32 %v10794_v5, %v8470_v7  ;;  %v8857_v28 = vor.u32 %v10890_v16, %v8854_v17  ;;  %v10854_v17 = vld [vmem:[#allocation8 + $0x464] sm:$0xf] }
 0x110   : > { %2549 = vmatpush.bf16.msra.mxu0 %v8473_v19  ;;  %2696 = vmatpush.bf16.msra.mxu3 %v8857_v28  ;;  %v10790_v19 = vld [vmem:[#allocation8 + $0x264] sm:$0xf] }
 0x113   : > { %v2263_v55 = vpop.f32.mrf.mxu2 }
 0x114   : > { %v2264_v58 = vadd.f32 %v2263_v55, %v2215_v32  ;;  %v2312_v59 = vpop.f32.mrf.mxu3  ;;  %v2168_v61 = vpop.f32.mrf.mxu0  ;;  %v636_v55 = vld [vmem:[%s11609_s20 + $0x110] sm:$0xff] }
 0x115   : > { %v2217_v0 = vpop.f32.mrf.mxu1 }
 0x116   : > { %v11809_v1 = vadd.f32 %v2312_v59, %v2264_v58  ;;  %v2218_v2 = vadd.f32 %v2217_v0, %v2168_v61  ;;  %v631_v58 = vld [vmem:[%s11609_s20 + $0xe8] sm:$0xff]  ;;  %v637_v59 = vld [vmem:[%s11609_s20 + $0x118] sm:$0xff]  ;;  %v11821_v0 = vpack.c.bf16 %v636_v55, %v630_v39 }
 0x117   : > { %2363 = vmatmul.bf16.gmra.mxu0 %v11805_v56  ;;  %2412 = vmatmul.bf16.gmra.mxu1 %v11807_v63  ;;  %v11823_v5 = vpack.c.bf16 %v637_v59, %v631_v58 }
 0x118   : > { %2461 = vmatmul.bf16.gmra.mxu2 %v11655_v24  ;;  %v684_v24 = vld [vmem:[%s11609_s20 + $0x290] sm:$0xff] }
 0x119   : > { %2510 = vmatmul.bf16.gmra.mxu3 %v11657_v25  ;;  %v667_v25 = vld [vmem:[%s11609_s20 + $0x208] sm:$0xff] }
 0x11b   : > { %v2266_v18 = vpop.f32.mrf.mxu2 }
 0x11c   : > { %v2267_v29 = vadd.f32 %v2266_v18, %v2218_v2  ;;  %v2315_v30 = vpop.f32.mrf.mxu3  ;;  %v2170_v32 = vpop.f32.mrf.mxu0  ;;  %v8710_v18 = vld [vmem:[#allocation8 + $0x470] sm:$0xf0] }
 0x11d   : > { %v2219_v33 = vpop.f32.mrf.mxu1  ;;  %v8713_v28 = vor.u32 %v10854_v17, %v8710_v18  ;;  %v643_v17 = vld [vmem:[%s11609_s20 + $0x148] sm:$0xff]  ;;  %v649_v18 = vld [vmem:[%s11609_s20 + $0x178] sm:$0xff] }
 0x11e   : > { %v11815_v34 = vadd.f32 %v2315_v30, %v2267_v29  ;;  %v2220_v35 = vadd.f32 %v2219_v33, %v2170_v32  ;;  %v8454_v29 = vld [vmem:[#allocation8 + $0x270] sm:$0xf0]  ;;  %v10886_v30 = vld [vmem:[#allocation8 + $0x564] sm:$0xf] }
 0x11f   : > { %v8838_v32 = vld [vmem:[#allocation8 + $0x570] sm:$0xf0]  ;;  %2648 = vmatpush.bf16.msra.mxu2 %v8713_v28 }
 0x120   : > { %v8841_v36 = vor.u32 %v10886_v30, %v8838_v32  ;;  %v11839_v32 = vpack.c.bf16 %v649_v18, %v643_v17 }
 0x122   : > { %2697 = vmatpush.bf16.msra.mxu3 %v8841_v36 }
 0x123   : > { %v2268_v61 = vpop.f32.mrf.mxu2 }
 0x124   : > { %v2269_v2 = vadd.f32 %v2268_v61, %v2220_v35  ;;  %v2317_v3 = vpop.f32.mrf.mxu3  ;;  %v2173_v4 = vpop.f32.mrf.mxu0  ;;  %v8457_v35 = vor.u32 %v10790_v19, %v8454_v29  ;;  %v10822_v61 = vld [vmem:[#allocation8 + $0x364] sm:$0xf] }
 0x125   : > { %v2222_v6 = vpop.f32.mrf.mxu1 }
 0x126   : > { %v11825_v7 = vadd.f32 %v2317_v3, %v2269_v2  ;;  %v2223_v16 = vadd.f32 %v2222_v6, %v2173_v4  ;;  %2550 = vmatpush.bf16.msra.mxu0 %v8457_v35  ;;  %v8582_v2 = vld [vmem:[#allocation8 + $0x370] sm:$0xf0]  ;;  %v642_v4 = vld [vmem:[%s11609_s20 + $0x140] sm:$0xff] }
 0x127   : > { %2368 = vmatmul.bf16.gmra.mxu0 %v11821_v0  ;;  %2417 = vmatmul.bf16.gmra.mxu1 %v11823_v5  ;;  %v8585_v3 = vor.u32 %v10822_v61, %v8582_v2  ;;  %v648_v6 = vld [vmem:[%s11609_s20 + $0x170] sm:$0xff]  ;;  %v10882_v61 = vld [vmem:[#allocation8 + $0x544] sm:$0xf] }
 0x128   : > { %2466 = vmatmul.bf16.gmra.mxu2 %v11675_v49  ;;  %v11837_v29 = vpack.c.bf16 %v648_v6, %v642_v4  ;;  %v8822_v2 = vld [vmem:[#allocation8 + $0x550] sm:$0xf0] }
 0x129   : > { %2515 = vmatmul.bf16.gmra.mxu3 %v11677_v50  ;;  %2599 = vmatpush.bf16.msra.mxu1 %v8585_v3  ;;  %v8825_v6 = vor.u32 %v10882_v61, %v8822_v2  ;;  %v655_v50 = vld [vmem:[%s11609_s20 + $0x1a8] sm:$0xff]  ;;  %v672_v49 = vld [vmem:[%s11609_s20 + $0x230] sm:$0xff] }
 0x12b   : > { %v2271_v33 = vpop.f32.mrf.mxu2  ;;  %2698 = vmatpush.bf16.msra.mxu3 %v8825_v6 }
 0x12c   : > { %v2272_v37 = vadd.f32 %v2271_v33, %v2223_v16  ;;  %v2320_v38 = vpop.f32.mrf.mxu3  ;;  %v2175_v39 = vpop.f32.mrf.mxu0 }
 0x12d   : > { %v2224_v55 = vpop.f32.mrf.mxu1 }
 0x12e   : > { %v11831_v58 = vadd.f32 %v2320_v38, %v2272_v37  ;;  %v2225_v59 = vadd.f32 %v2224_v55, %v2175_v39  ;;  %v10850_v37 = vld [vmem:[#allocation8 + $0x444] sm:$0xf]  ;;  %v8694_v38 = vld [vmem:[#allocation8 + $0x450] sm:$0xf0] }
 0x12f   : > { %v10786_v39 = vld [vmem:[#allocation8 + $0x244] sm:$0xf]  ;;  %v8697_v55 = vor.u32 %v10850_v37, %v8694_v38  ;;  %v8566_v37 = vld [vmem:[#allocation8 + $0x350] sm:$0xf0] }
 0x131   : > { %2649 = vmatpush.bf16.msra.mxu2 %v8697_v55 }
 0x133   : > { %v2273_v19 = vpop.f32.mrf.mxu2 }
 0x134   : > { %v2274_v16 = vadd.f32 %v2273_v19, %v2225_v59  ;;  %v2322_v30 = vpop.f32.mrf.mxu3  ;;  %v2178_v28 = vpop.f32.mrf.mxu0  ;;  %v8438_v59 = vld [vmem:[#allocation8 + $0x250] sm:$0xf0] }
 0x135   : > { %v2227_v33 = vpop.f32.mrf.mxu1  ;;  %v8441_v4 = vor.u32 %v10786_v39, %v8438_v59  ;;  %v661_v39 = vld [vmem:[%s11609_s20 + $0x1d8] sm:$0xff] }
 0x136   : > { %v11841_v35 = vadd.f32 %v2322_v30, %v2274_v16  ;;  %v2228_v36 = vadd.f32 %v2227_v33, %v2178_v28  ;;  %v10818_v33 = vld [vmem:[#allocation8 + $0x344] sm:$0xf] }
 0x137   : > { %2373 = vmatmul.bf16.gmra.mxu0 %v11837_v29  ;;  %2422 = vmatmul.bf16.gmra.mxu1 %v11839_v32  ;;  %v8569_v38 = vor.u32 %v10818_v33, %v8566_v37 }
 0x138   : > { %2471 = vmatmul.bf16.gmra.mxu2 %v11695_v12  ;;  %2551 = vmatpush.bf16.msra.mxu0 %v8441_v4  ;;  %v660_v12 = vld [vmem:[%s11609_s20 + $0x1d0] sm:$0xff] }
 0x139   : > { %2520 = vmatmul.bf16.gmra.mxu3 %v11697_v13  ;;  %v654_v13 = vld [vmem:[%s11609_s20 + $0x1a0] sm:$0xff]  ;;  %2600 = vmatpush.bf16.msra.mxu1 %v8569_v38 }
 0x13a   : > { %v11853_v61 = vpack.c.bf16 %v660_v12, %v654_v13  ;;  %v8678_v12 = vld [vmem:[#allocation8 + $0x430] sm:$0xf0]  ;;  %v10782_v13 = vld [vmem:[#allocation8 + $0x224] sm:$0xf] }
 0x13b   : > { %v2276_v3 = vpop.f32.mrf.mxu2 }
 0x13c   : > { %v2277_v17 = vadd.f32 %v2276_v3, %v2228_v36  ;;  %v2325_v18 = vpop.f32.mrf.mxu3  ;;  %v2180_v19 = vpop.f32.mrf.mxu0  ;;  %v11855_v3 = vpack.c.bf16 %v661_v39, %v655_v50  ;;  %v8806_v50 = vld [vmem:[#allocation8 + $0x530] sm:$0xf0] }
 0x13d   : > { %v2229_v16 = vpop.f32.mrf.mxu1 }
 0x13e   : > { %v11847_v30 = vadd.f32 %v2325_v18, %v2277_v17  ;;  %v2230_v28 = vadd.f32 %v2229_v16, %v2180_v19  ;;  %v10846_v18 = vld [vmem:[#allocation8 + $0x424] sm:$0xf]  ;;  %v8422_v16 = vld [vmem:[#allocation8 + $0x230] sm:$0xf0] }
 0x13f   : > { %v8681_v19 = vor.u32 %v10846_v18, %v8678_v12  ;;  %v8425_v37 = vor.u32 %v10782_v13, %v8422_v16  ;;  %v10814_v18 = vld [vmem:[#allocation8 + $0x324] sm:$0xf]  ;;  %v8550_v12 = vld [vmem:[#allocation8 + $0x330] sm:$0xf0]  ;;  %v673_v13 = vld [vmem:[%s11609_s20 + $0x238] sm:$0xff] }
 0x141   : > { %2650 = vmatpush.bf16.msra.mxu2 %v8681_v19  ;;  %2552 = vmatpush.bf16.msra.mxu0 %v8425_v37 }
 0x143   : > { %v2278_v59 = vpop.f32.mrf.mxu2 }
 0x144   : > { %v2279_v36 = vadd.f32 %v2278_v59, %v2230_v28  ;;  %v2327_v2 = vpop.f32.mrf.mxu3  ;;  %v2183_v55 = vpop.f32.mrf.mxu0  ;;  %v10878_v28 = vld [vmem:[#allocation8 + $0x524] sm:$0xf] }
 0x145   : > { %v2232_v4 = vpop.f32.mrf.mxu1  ;;  %v8809_v38 = vor.u32 %v10878_v28, %v8806_v50 }
 0x146   : > { %v11857_v6 = vadd.f32 %v2327_v2, %v2279_v36  ;;  %v2233_v17 = vadd.f32 %v2232_v4, %v2183_v55 }
 0x147   : > { %2378 = vmatmul.bf16.gmra.mxu0 %v11853_v61  ;;  %2427 = vmatmul.bf16.gmra.mxu1 %v11855_v3 }
 0x148   : > { %2476 = vmatmul.bf16.gmra.mxu2 %v11715_v40  ;;  %2699 = vmatpush.bf16.msra.mxu3 %v8809_v38  ;;  %v666_v40 = vld [vmem:[%s11609_s20 + $0x200] sm:$0xff] }
 0x149   : > { %2525 = vmatmul.bf16.gmra.mxu3 %v11717_v41  ;;  %v8553_v41 = vor.u32 %v10814_v18, %v8550_v12  ;;  %v11869_v28 = vpack.c.bf16 %v672_v49, %v666_v40  ;;  %v8662_v49 = vld [vmem:[#allocation8 + $0x410] sm:$0xf0]  ;;  %v10778_v40 = vld [vmem:[#allocation8 + $0x204] sm:$0xf] }
 0x14b   : > { %v2281_v33 = vpop.f32.mrf.mxu2  ;;  %2601 = vmatpush.bf16.msra.mxu1 %v8553_v41  ;;  %v10842_v41 = vld [vmem:[#allocation8 + $0x404] sm:$0xf] }
 0x14c   : > { %v2282_v39 = vadd.f32 %v2281_v33, %v2233_v17  ;;  %v2330_v59 = vpop.f32.mrf.mxu3  ;;  %v2185_v36 = vpop.f32.mrf.mxu0  ;;  %v11871_v33 = vpack.c.bf16 %v673_v13, %v667_v25  ;;  %v8790_v25 = vld [vmem:[#allocation8 + $0x510] sm:$0xf0] }
 0x14d   : > { %v2234_v2 = vpop.f32.mrf.mxu1 }
 0x14e   : > { %v11863_v55 = vadd.f32 %v2330_v59, %v2282_v39  ;;  %v2235_v4 = vadd.f32 %v2234_v2, %v2185_v36  ;;  %v8665_v59 = vor.u32 %v10842_v41, %v8662_v49  ;;  %v8406_v36 = vld [vmem:[#allocation8 + $0x210] sm:$0xf0]  ;;  %v10874_v2 = vld [vmem:[#allocation8 + $0x504] sm:$0xf] }
 0x14f   : > { %v8409_v18 = vor.u32 %v10778_v40, %v8406_v36  ;;  %v8793_v12 = vor.u32 %v10874_v2, %v8790_v25  ;;  %v10810_v41 = vld [vmem:[#allocation8 + $0x304] sm:$0xf]  ;;  %v8534_v49 = vld [vmem:[#allocation8 + $0x310] sm:$0xf0]  ;;  %v685_v40 = vld [vmem:[%s11609_s20 + $0x298] sm:$0xff] }
 0x150   : > { %2651 = vmatpush.bf16.msra.mxu2 %v8665_v59 }
 0x151   : > { %2553 = vmatpush.bf16.msra.mxu0 %v8409_v18  ;;  %2700 = vmatpush.bf16.msra.mxu3 %v8793_v12 }
 0x153   : > { %v2283_v16 = vpop.f32.mrf.mxu2 }
 0x154   : > { %v2284_v17 = vadd.f32 %v2283_v16, %v2235_v4  ;;  %v2332_v50 = vpop.f32.mrf.mxu3  ;;  %v2188_v19 = vpop.f32.mrf.mxu0 }
 0x155   : > { %v2237_v37 = vpop.f32.mrf.mxu1 }
 0x156   : > { %v11873_v38 = vadd.f32 %v2332_v50, %v2284_v17  ;;  %v2238_v39 = vadd.f32 %v2237_v37, %v2188_v19 }
 0x157   : > { %2383 = vmatmul.bf16.gmra.mxu0 %v11869_v28  ;;  %2432 = vmatmul.bf16.gmra.mxu1 %v11871_v33 }
 0x158   : > { %2481 = vmatmul.bf16.gmra.mxu2 %v11735_v8  ;;  %v678_v8 = vld [vmem:[%s11609_s20 + $0x260] sm:$0xff] }
 0x159   : > { %2530 = vmatmul.bf16.gmra.mxu3 %v11737_v9  ;;  %v8537_v9 = vor.u32 %v10810_v41, %v8534_v49  ;;  %v11885_v2 = vpack.c.bf16 %v684_v24, %v678_v8  ;;  %v10809_v24 = vld [vmem:[#allocation8 + $0x2f4] sm:$0xf0]  ;;  %v8268_v8 = vld [vmem:[#allocation8 + $0xe8] sm:$0xf] }
 0x15b   : > { %v2286_v4 = vpop.f32.mrf.mxu2  ;;  %2602 = vmatpush.bf16.msra.mxu1 %v8537_v9  ;;  %13792 = vst [vmem:[#allocation42_spill] sm:$0xff] %v11885_v2  ;;  %v8524_v9 = vld [vmem:[#allocation8 + $0x2e8] sm:$0xf] }
 0x15c   : > { %v2287_v13 = vadd.f32 %v2286_v4, %v2238_v39  ;;  %v2335_v16 = vpop.f32.mrf.mxu3  ;;  %v2190_v17 = vpop.f32.mrf.mxu0  ;;  %v11887_v4 = vpack.c.bf16 %v685_v40, %v679_v53  ;;  %v10841_v53 = vld [vmem:[#allocation8 + $0x3f4] sm:$0xf0] }
 0x15d   : > { %v2239_v50 = vpop.f32.mrf.mxu1 }
 0x15e   : > { %v11879_v19 = vadd.f32 %v2335_v16, %v2287_v13  ;;  %v2240_v37 = vadd.f32 %v2239_v50, %v2190_v17  ;;  %13793 = vst [vmem:[#allocation43_spill] sm:$0xff] %v11887_v4  ;;  %v8525_v16 = vor.u32 %v10809_v24, %v8524_v9  ;;  %v10745_v17 = vld [vmem:[#allocation8 + $0xf4] sm:$0xf0]  ;;  %v8652_v50 = vld [vmem:[#allocation8 + $0x3e8] sm:$0xf] }
 0x15f   : > { %v8269_v41 = vor.u32 %v10745_v17, %v8268_v8  ;;  %v8653_v49 = vor.u32 %v10841_v53, %v8652_v50  ;;  %v691_v8 = vld [vmem:[%s11609_s20 + $0x2c8] sm:$0xff]  ;;  %v697_v17 = vld [vmem:[%s11609_s20 + $0x2f8] sm:$0xff] }
 0x160   : > { %2840 = vmatpush.bf16.msrb.mxu2 %v8525_v16  ;;  %v11903_v23 = vpack.c.bf16 %v697_v17, %v691_v8 }
 0x161   : > { %2742 = vmatpush.bf16.msrb.mxu0 %v8269_v41  ;;  %2889 = vmatpush.bf16.msrb.mxu3 %v8653_v49 }
 0x162   : > { %13795 = vst [vmem:[#allocation45_spill] sm:$0xff] %v11903_v23 }
 0x163   : > { %v2288_v36 = vpop.f32.mrf.mxu2 }
 0x164   : > { %v2289_v39 = vadd.f32 %v2288_v36, %v2240_v37  ;;  %v2337_v25 = vpop.f32.mrf.mxu3  ;;  %v2193_v59 = vpop.f32.mrf.mxu0 }
 0x165   : > { %v2242_v18 = vpop.f32.mrf.mxu1 }
 0x166   : > { %v11889_v12 = vadd.f32 %v2337_v25, %v2289_v39  ;;  %v2243_v13 = vadd.f32 %v2242_v18, %v2193_v59  ;;  %v8396_v59 = vld [vmem:[#allocation8 + $0x1e8] sm:$0xf]  ;;  %v10777_v18 = vld [vmem:[#allocation8 + $0x1f4] sm:$0xf0] }
 0x167   : > { %2388 = vmatmul.bf16.gmra.mxu0 %v11885_v2  ;;  %2437 = vmatmul.bf16.gmra.mxu1 %v11887_v4 }
 0x168   : > { %2486 = vmatmul.bf16.gmra.mxu2 %v11755_v44  ;;  %v690_v44 = vld [vmem:[%s11609_s20 + $0x2c0] sm:$0xff] }
 0x169   : > { %2535 = vmatmul.bf16.gmra.mxu3 %v11757_v45  ;;  %v8397_v45 = vor.u32 %v10777_v18, %v8396_v59  ;;  %v10837_v59 = vld [vmem:[#allocation8 + $0x3d4] sm:$0xf0] }
 0x16b   : > { %v2291_v37 = vpop.f32.mrf.mxu2  ;;  %2791 = vmatpush.bf16.msrb.mxu1 %v8397_v45  ;;  %v8508_v45 = vld [vmem:[#allocation8 + $0x2c8] sm:$0xf] }
 0x16c   : > { %v2292_v40 = vadd.f32 %v2291_v37, %v2243_v13  ;;  %v2340_v36 = vpop.f32.mrf.mxu3  ;;  %v2195_v39 = vpop.f32.mrf.mxu0  ;;  %v11901_v13 = vpack.c.bf16 %v696_v48, %v690_v44  ;;  %v10805_v48 = vld [vmem:[#allocation8 + $0x2d4] sm:$0xf0]  ;;  %v8252_v44 = vld [vmem:[#allocation8 + $0xc8] sm:$0xf] }
 0x16d   : > { %v2244_v25 = vpop.f32.mrf.mxu1 }
 0x16e   : > { %v11895_v9 = vadd.f32 %v2340_v36, %v2292_v40  ;;  %v2245_v24 = vadd.f32 %v2244_v25, %v2195_v39  ;;  %13794 = vst [vmem:[#allocation44_spill] sm:$0xff] %v11901_v13  ;;  %v8509_v36 = vor.u32 %v10805_v48, %v8508_v45  ;;  %v10741_v39 = vld [vmem:[#allocation8 + $0xd4] sm:$0xf0]  ;;  %v8636_v25 = vld [vmem:[#allocation8 + $0x3c8] sm:$0xf] }
 0x16f   : > { %v8637_v8 = vor.u32 %v10837_v59, %v8636_v25  ;;  %v10801_v25 = vld [vmem:[#allocation8 + $0x2b4] sm:$0xf0] }
 0x170   : > { %2841 = vmatpush.bf16.msrb.mxu2 %v8509_v36 }
 0x171   : > { %2890 = vmatpush.bf16.msrb.mxu3 %v8637_v8 }
 0x173   : > { %v2293_v50 = vpop.f32.mrf.mxu2 }
 0x174   : > { %v2294_v53 = vadd.f32 %v2293_v50, %v2245_v24  ;;  %v2342_v37 = vpop.f32.mrf.mxu3  ;;  %v2198_v16 = vpop.f32.mrf.mxu0  ;;  %v8253_v24 = vor.u32 %v10741_v39, %v8252_v44 }
 0x175   : > { %v2247_v41 = vpop.f32.mrf.mxu1 }
 0x176   : > { %v11905_v49 = vadd.f32 %v2342_v37, %v2294_v53  ;;  %v2248_v40 = vadd.f32 %v2247_v41, %v2198_v16  ;;  %2743 = vmatpush.bf16.msrb.mxu0 %v8253_v24  ;;  %v8380_v16 = vld [vmem:[#allocation8 + $0x1c8] sm:$0xf]  ;;  %v10773_v41 = vld [vmem:[#allocation8 + $0x1d4] sm:$0xf0] }
 0x177   : > { %2393 = vmatmul.bf16.gmra.mxu0 %v11901_v13  ;;  %2442 = vmatmul.bf16.gmra.mxu1 %v11903_v23  ;;  %v8381_v23 = vor.u32 %v10773_v41, %v8380_v16  ;;  %v8620_v24 = vld [vmem:[#allocation8 + $0x3a8] sm:$0xf] }
 0x178   : > { %2491 = vmatmul.bf16.gmra.mxu2 %v11775_v20  ;;  %v8364_v41 = vld [vmem:[#allocation8 + $0x1a8] sm:$0xf] }
 0x179   : > { %2540 = vmatmul.bf16.gmra.mxu3 %v11777_v21  ;;  %2792 = vmatpush.bf16.msrb.mxu1 %v8381_v23  ;;  %v8492_v23 = vld [vmem:[#allocation8 + $0x2a8] sm:$0xf] }
 0x17a   : > { %v8493_v59 = vor.u32 %v10801_v25, %v8492_v23 }
 0x17b   : > { %v2296_v18 = vpop.f32.mrf.mxu2 }
 0x17c   : > { %v2297_v17 = vadd.f32 %v2296_v18, %v2248_v40  ;;  %v2345_v50 = vpop.f32.mrf.mxu3  ;;  %v2200_v53 = vpop.f32.mrf.mxu0  ;;  %v10737_v18 = vld [vmem:[#allocation8 + $0xb4] sm:$0xf0]  ;;  %2842 = vmatpush.bf16.msrb.mxu2 %v8493_v59 }
 0x17d   : > { %v2249_v37 = vpop.f32.mrf.mxu1 }
 0x17e   : > { %v11911_v21 = vadd.f32 %v2345_v50, %v2297_v17  ;;  %v2250_v20 = vadd.f32 %v2249_v37, %v2200_v53 }
 0x183   : > { %v2298_v45 = vpop.f32.mrf.mxu2 }
 0x184   : > { %v2299_v48 = vadd.f32 %v2298_v45, %v2250_v20  ;;  %v2347_v13 = vpop.f32.mrf.mxu3  ;;  %v2359_v22 = vpop.f32.mrf.mxu0  ;;  %v8236_v20 = vld [vmem:[#allocation8 + $0xa8] sm:$0xf]  ;;  %v10769_v45 = vld [vmem:[#allocation8 + $0x1b4] sm:$0xf0] }
 0x185   : > { %v2360_v44 = vadd.f32 %v2359_v22, %v11799_v31  ;;  %v2408_v40 = vpop.f32.mrf.mxu1  ;;  %v10833_v22 = vld [vmem:[#allocation8 + $0x3b4] sm:$0xf0] }
 0x186   : > { %v11914_v39 = vadd.f32 %v2347_v13, %v2299_v48  ;;  %v8237_v13 = vor.u32 %v10737_v18, %v8236_v20  ;;  %v8621_v8 = vor.u32 %v10833_v22, %v8620_v24  ;;  %v8365_v48 = vor.u32 %v10769_v45, %v8364_v41  ;;  %v10797_v22 = vld [vmem:[#allocation8 + $0x294] sm:$0xf0] }
 0x187   : > { %v11916_v36 = vadd.f32 %v2408_v40, %v2360_v44  ;;  %2554 = vmatmul.bf16.vlgmr.msra.gmra.mxu0 %v11639_v54  ;;  %2603 = vmatmul.bf16.vlgmr.msra.gmra.mxu1 %v11641_v57 }
 0x188   : > { %2652 = vmatmul.bf16.vlgmr.msra.gmra.mxu2 %v11791_v60  ;;  %2744 = vmatpush.bf16.msrb.mxu0 %v8237_v13 }
 0x189   : > { %13796 = vst [vmem:[#allocation46_spill] sm:$0xff] %v11916_v36  ;;  %2701 = vmatmul.bf16.vlgmr.msra.gmra.mxu3 %v11793_v62  ;;  %2793 = vmatpush.bf16.msrb.mxu1 %v8365_v48  ;;  %v10901_v36 = vld [vmem:[#allocation8 + $0x5d4] sm:$0xf0] }
 0x18a   : > { %2891 = vmatpush.bf16.msrb.mxu3 %v8621_v8  ;;  %v10733_v8 = vld [vmem:[#allocation8 + $0x94] sm:$0xf0] }
 0x18b   : > { %v2457_v31 = vpop.f32.mrf.mxu2 }
 0x18c   : > { %v2506_v17 = vpop.f32.mrf.mxu3  ;;  %v2361_v50 = vpop.f32.mrf.mxu0 }
 0x18d   : > { %v11922_v53 = vadd.f32 %v2506_v17, %v2457_v31  ;;  %v2362_v37 = vadd.f32 %v2361_v50, %v11809_v1  ;;  %v2410_v16 = vpop.f32.mrf.mxu1  ;;  %v8476_v1 = vld [vmem:[#allocation8 + $0x288] sm:$0xf]  ;;  %v10829_v50 = vld [vmem:[#allocation8 + $0x394] sm:$0xf0] }
 0x18e   : > { %v8220_v31 = vld [vmem:[#allocation8 + $0x88] sm:$0xf]  ;;  %v8477_v13 = vor.u32 %v10797_v22, %v8476_v1 }
 0x18f   : > { %v11925_v44 = vadd.f32 %v2410_v16, %v2362_v37  ;;  %v8604_v17 = vld [vmem:[#allocation8 + $0x388] sm:$0xf] }
 0x190   : > { %v8605_v16 = vor.u32 %v10829_v50, %v8604_v17  ;;  %2843 = vmatpush.bf16.msrb.mxu2 %v8477_v13 }
 0x191   : > { %13797 = vst [vmem:[#allocation47_spill] sm:$0xff] %v11925_v44  ;;  %v8892_v44 = vld [vmem:[#allocation8 + $0x5c8] sm:$0xf] }
 0x192   : > { %2892 = vmatpush.bf16.msrb.mxu3 %v8605_v16 }
 0x193   : > { %v2459_v40 = vpop.f32.mrf.mxu2 }
 0x194   : > { %v2508_v23 = vpop.f32.mrf.mxu3  ;;  %v2364_v25 = vpop.f32.mrf.mxu0 }
 0x195   : > { %v11927_v20 = vadd.f32 %v2508_v23, %v2459_v40  ;;  %v2365_v59 = vadd.f32 %v2364_v25, %v11815_v34  ;;  %v2413_v18 = vpop.f32.mrf.mxu1  ;;  %v8221_v34 = vor.u32 %v10733_v8, %v8220_v31  ;;  %v8348_v25 = vld [vmem:[#allocation8 + $0x188] sm:$0xf] }
 0x197   : > { %v11930_v24 = vadd.f32 %v2413_v18, %v2365_v59  ;;  %2559 = vmatmul.bf16.gmra.mxu0 %v11659_v26  ;;  %2608 = vmatmul.bf16.gmra.mxu1 %v11661_v27  ;;  %v10765_v59 = vld [vmem:[#allocation8 + $0x194] sm:$0xf0] }
 0x198   : > { %2657 = vmatmul.bf16.gmra.mxu2 %v11805_v56  ;;  %2745 = vmatpush.bf16.msrb.mxu0 %v8221_v34  ;;  %v8349_v18 = vor.u32 %v10765_v59, %v8348_v25  ;;  %v8204_v34 = vld [vmem:[#allocation8 + $0x68] sm:$0xf] }
 0x199   : > { %13798 = vst [vmem:[#allocation48_spill] sm:$0xff] %v11930_v24  ;;  %2706 = vmatmul.bf16.gmra.mxu3 %v11807_v63 }
 0x19a   : > { %2794 = vmatpush.bf16.msrb.mxu1 %v8349_v18 }
 0x19b   : > { %v2462_v37 = vpop.f32.mrf.mxu2 }
 0x19c   : > { %v2511_v41 = vpop.f32.mrf.mxu3  ;;  %v2366_v45 = vpop.f32.mrf.mxu0 }
 0x19d   : > { %v11936_v48 = vadd.f32 %v2511_v41, %v2462_v37  ;;  %v2367_v40 = vadd.f32 %v2366_v45, %v11825_v7  ;;  %v2415_v23 = vpop.f32.mrf.mxu1  ;;  %v8460_v7 = vld [vmem:[#allocation8 + $0x268] sm:$0xf]  ;;  %v10793_v37 = vld [vmem:[#allocation8 + $0x274] sm:$0xf0] }
 0x19e   : > { %v8461_v16 = vor.u32 %v10793_v37, %v8460_v7  ;;  %v10729_v41 = vld [vmem:[#allocation8 + $0x74] sm:$0xf0] }
 0x19f   : > { %v11939_v1 = vadd.f32 %v2415_v23, %v2367_v40  ;;  %v10825_v45 = vld [vmem:[#allocation8 + $0x374] sm:$0xf0] }
 0x1a0   : > { %2844 = vmatpush.bf16.msrb.mxu2 %v8461_v16 }
 0x1a1   : > { %13799 = vst [vmem:[#allocation49_spill] sm:$0xff] %v11939_v1 }
 0x1a3   : > { %v2464_v22 = vpop.f32.mrf.mxu2 }
 0x1a4   : > { %v2513_v24 = vpop.f32.mrf.mxu3  ;;  %v2369_v31 = vpop.f32.mrf.mxu0 }
 0x1a5   : > { %v11941_v8 = vadd.f32 %v2513_v24, %v2464_v22  ;;  %v2370_v13 = vadd.f32 %v2369_v31, %v11831_v58  ;;  %v2418_v17 = vpop.f32.mrf.mxu1  ;;  %v8588_v24 = vld [vmem:[#allocation8 + $0x368] sm:$0xf]  ;;  %v8205_v58 = vor.u32 %v10729_v41, %v8204_v34 }
 0x1a6   : > { %v8589_v23 = vor.u32 %v10825_v45, %v8588_v24 }
 0x1a7   : > { %v11944_v50 = vadd.f32 %v2418_v17, %v2370_v13  ;;  %2564 = vmatmul.bf16.gmra.mxu0 %v11679_v51  ;;  %2613 = vmatmul.bf16.gmra.mxu1 %v11681_v52  ;;  %v8332_v13 = vld [vmem:[#allocation8 + $0x168] sm:$0xf]  ;;  %v10761_v17 = vld [vmem:[#allocation8 + $0x174] sm:$0xf0] }
 0x1a8   : > { %2662 = vmatmul.bf16.gmra.mxu2 %v11821_v0  ;;  %2746 = vmatpush.bf16.msrb.mxu0 %v8205_v58 }
 0x1a9   : > { %13800 = vst [vmem:[#allocation50_spill] sm:$0xff] %v11944_v50  ;;  %2711 = vmatmul.bf16.gmra.mxu3 %v11823_v5  ;;  %v8333_v50 = vor.u32 %v10761_v17, %v8332_v13 }
 0x1aa   : > { %2893 = vmatpush.bf16.msrb.mxu3 %v8589_v23  ;;  %v10725_v23 = vld [vmem:[#allocation8 + $0x54] sm:$0xf0] }
 0x1ab   : > { %v2467_v40 = vpop.f32.mrf.mxu2  ;;  %2795 = vmatpush.bf16.msrb.mxu1 %v8333_v50  ;;  %v10789_v50 = vld [vmem:[#allocation8 + $0x254] sm:$0xf0] }
 0x1ac   : > { %v2516_v25 = vpop.f32.mrf.mxu3  ;;  %v2371_v59 = vpop.f32.mrf.mxu0 }
 0x1ad   : > { %v11950_v18 = vadd.f32 %v2516_v25, %v2467_v40  ;;  %v2372_v22 = vadd.f32 %v2371_v59, %v11841_v35  ;;  %v2420_v31 = vpop.f32.mrf.mxu1  ;;  %v8444_v35 = vld [vmem:[#allocation8 + $0x248] sm:$0xf]  ;;  %v10821_v25 = vld [vmem:[#allocation8 + $0x354] sm:$0xf0] }
 0x1ae   : > { %v8188_v40 = vld [vmem:[#allocation8 + $0x48] sm:$0xf]  ;;  %v8445_v58 = vor.u32 %v10789_v50, %v8444_v35 }
 0x1af   : > { %v11953_v7 = vadd.f32 %v2420_v31, %v2372_v22 }
 0x1b0   : > { %2845 = vmatpush.bf16.msrb.mxu2 %v8445_v58 }
 0x1b1   : > { %13801 = vst [vmem:[#allocation51_spill] sm:$0xff] %v11953_v7 }
 0x1b3   : > { %v2469_v37 = vpop.f32.mrf.mxu2 }
 0x1b4   : > { %v2518_v1 = vpop.f32.mrf.mxu3  ;;  %v2374_v34 = vpop.f32.mrf.mxu0 }
 0x1b5   : > { %v11955_v41 = vadd.f32 %v2518_v1, %v2469_v37  ;;  %v2375_v16 = vadd.f32 %v2374_v34, %v11847_v30  ;;  %v2423_v24 = vpop.f32.mrf.mxu1  ;;  %v8572_v1 = vld [vmem:[#allocation8 + $0x348] sm:$0xf]  ;;  %v8189_v30 = vor.u32 %v10725_v23, %v8188_v40 }
 0x1b6   : > { %v8573_v22 = vor.u32 %v10821_v25, %v8572_v1 }
 0x1b7   : > { %v11958_v45 = vadd.f32 %v2423_v24, %v2375_v16  ;;  %2569 = vmatmul.bf16.gmra.mxu0 %v11699_v14  ;;  %2618 = vmatmul.bf16.gmra.mxu1 %v11701_v15  ;;  %v8316_v16 = vld [vmem:[#allocation8 + $0x148] sm:$0xf]  ;;  %v10757_v24 = vld [vmem:[#allocation8 + $0x154] sm:$0xf0] }
 0x1b8   : > { %2667 = vmatmul.bf16.gmra.mxu2 %v11837_v29  ;;  %2747 = vmatpush.bf16.msrb.mxu0 %v8189_v30 }
 0x1b9   : > { %13802 = vst [vmem:[#allocation52_spill] sm:$0xff] %v11958_v45  ;;  %2716 = vmatmul.bf16.gmra.mxu3 %v11839_v32  ;;  %v8317_v45 = vor.u32 %v10757_v24, %v8316_v16 }
 0x1ba   : > { %2894 = vmatpush.bf16.msrb.mxu3 %v8573_v22  ;;  %v10721_v22 = vld [vmem:[#allocation8 + $0x34] sm:$0xf0] }
 0x1bb   : > { %v2472_v59 = vpop.f32.mrf.mxu2  ;;  %2796 = vmatpush.bf16.msrb.mxu1 %v8317_v45  ;;  %v10785_v45 = vld [vmem:[#allocation8 + $0x234] sm:$0xf0] }
 0x1bc   : > { %v2521_v31 = vpop.f32.mrf.mxu3  ;;  %v2376_v13 = vpop.f32.mrf.mxu0 }
 0x1bd   : > { %v11964_v17 = vadd.f32 %v2521_v31, %v2472_v59  ;;  %v2377_v37 = vadd.f32 %v2376_v13, %v11857_v6  ;;  %v2425_v34 = vpop.f32.mrf.mxu1  ;;  %v8428_v6 = vld [vmem:[#allocation8 + $0x228] sm:$0xf]  ;;  %v10817_v31 = vld [vmem:[#allocation8 + $0x334] sm:$0xf0] }
 0x1be   : > { %v8172_v59 = vld [vmem:[#allocation8 + $0x28] sm:$0xf]  ;;  %v8429_v30 = vor.u32 %v10785_v45, %v8428_v6 }
 0x1bf   : > { %v11967_v35 = vadd.f32 %v2425_v34, %v2377_v37 }
 0x1c0   : > { %2846 = vmatpush.bf16.msrb.mxu2 %v8429_v30 }
 0x1c1   : > { %13803 = vst [vmem:[#allocation53_spill] sm:$0xff] %v11967_v35 }
 0x1c3   : > { %v2474_v50 = vpop.f32.mrf.mxu2 }
 0x1c4   : > { %v2523_v7 = vpop.f32.mrf.mxu3  ;;  %v2379_v40 = vpop.f32.mrf.mxu0 }
 0x1c5   : > { %v11969_v23 = vadd.f32 %v2523_v7, %v2474_v50  ;;  %v2380_v58 = vadd.f32 %v2379_v40, %v11863_v55  ;;  %v2428_v1 = vpop.f32.mrf.mxu1  ;;  %v8556_v7 = vld [vmem:[#allocation8 + $0x328] sm:$0xf]  ;;  %v8173_v55 = vor.u32 %v10721_v22, %v8172_v59 }
 0x1c6   : > { %v8557_v37 = vor.u32 %v10817_v31, %v8556_v7 }
 0x1c7   : > { %v11972_v25 = vadd.f32 %v2428_v1, %v2380_v58  ;;  %2574 = vmatmul.bf16.gmra.mxu0 %v11719_v42  ;;  %2623 = vmatmul.bf16.gmra.mxu1 %v11721_v43  ;;  %v8300_v58 = vld [vmem:[#allocation8 + $0x128] sm:$0xf]  ;;  %v10753_v1 = vld [vmem:[#allocation8 + $0x134] sm:$0xf0] }
 0x1c8   : > { %2672 = vmatmul.bf16.gmra.mxu2 %v11853_v61  ;;  %2748 = vmatpush.bf16.msrb.mxu0 %v8173_v55 }
 0x1c9   : > { %13804 = vst [vmem:[#allocation54_spill] sm:$0xff] %v11972_v25  ;;  %2721 = vmatmul.bf16.gmra.mxu3 %v11855_v3  ;;  %v8301_v25 = vor.u32 %v10753_v1, %v8300_v58 }
 0x1ca   : > { %2895 = vmatpush.bf16.msrb.mxu3 %v8557_v37  ;;  %v10717_v37 = vld [vmem:[#allocation8 + $0x14] sm:$0xf0] }
 0x1cb   : > { %v2477_v13 = vpop.f32.mrf.mxu2  ;;  %2797 = vmatpush.bf16.msrb.mxu1 %v8301_v25  ;;  %v10781_v25 = vld [vmem:[#allocation8 + $0x214] sm:$0xf0] }
 0x1cc   : > { %v2526_v34 = vpop.f32.mrf.mxu3  ;;  %v2381_v16 = vpop.f32.mrf.mxu0 }
 0x1cd   : > { %v11978_v24 = vadd.f32 %v2526_v34, %v2477_v13  ;;  %v2382_v50 = vadd.f32 %v2381_v16, %v11873_v38  ;;  %v2430_v40 = vpop.f32.mrf.mxu1  ;;  %v8412_v38 = vld [vmem:[#allocation8 + $0x208] sm:$0xf]  ;;  %v10813_v34 = vld [vmem:[#allocation8 + $0x314] sm:$0xf0] }
 0x1ce   : > { %v8156_v13 = vld [vmem:[#allocation8 + $0x8] sm:$0xf]  ;;  %v8413_v55 = vor.u32 %v10781_v25, %v8412_v38 }
 0x1cf   : > { %v11981_v6 = vadd.f32 %v2430_v40, %v2382_v50 }
 0x1d0   : > { %2847 = vmatpush.bf16.msrb.mxu2 %v8413_v55 }
 0x1d1   : > { %13805 = vst [vmem:[#allocation55_spill] sm:$0xff] %v11981_v6 }
 0x1d3   : > { %v2479_v45 = vpop.f32.mrf.mxu2 }
 0x1d4   : > { %v2528_v35 = vpop.f32.mrf.mxu3  ;;  %v2384_v59 = vpop.f32.mrf.mxu0 }
 0x1d5   : > { %v11983_v22 = vadd.f32 %v2528_v35, %v2479_v45  ;;  %v2385_v30 = vadd.f32 %v2384_v59, %v11879_v19  ;;  %v2433_v7 = vpop.f32.mrf.mxu1  ;;  %v8540_v35 = vld [vmem:[#allocation8 + $0x308] sm:$0xf]  ;;  %v8157_v19 = vor.u32 %v10717_v37, %v8156_v13 }
 0x1d6   : > { %v8541_v50 = vor.u32 %v10813_v34, %v8540_v35 }
 0x1d7   : > { %v11986_v31 = vadd.f32 %v2433_v7, %v2385_v30  ;;  %2579 = vmatmul.bf16.gmra.mxu0 %v11739_v10  ;;  %2628 = vmatmul.bf16.gmra.mxu1 %v11741_v11  ;;  %v8284_v30 = vld [vmem:[#allocation8 + $0x108] sm:$0xf]  ;;  %v10749_v7 = vld [vmem:[#allocation8 + $0x114] sm:$0xf0] }
 0x1d8   : > { %2677 = vmatmul.bf16.gmra.mxu2 %v11869_v28  ;;  %2749 = vmatpush.bf16.msrb.mxu0 %v8157_v19 }
 0x1d9   : > { %13806 = vst [vmem:[#allocation56_spill] sm:$0xff] %v11986_v31  ;;  %2726 = vmatmul.bf16.gmra.mxu3 %v11871_v33  ;;  %v8285_v31 = vor.u32 %v10749_v7, %v8284_v30 }
 0x1da   : > { %2896 = vmatpush.bf16.msrb.mxu3 %v8541_v50  ;;  %v10873_v50 = vld [vmem:[#allocation8 + $0x4f4] sm:$0xf0] }
 0x1db   : > { %v2482_v16 = vpop.f32.mrf.mxu2  ;;  %2798 = vmatpush.bf16.msrb.mxu1 %v8285_v31  ;;  %v8270_v31 = vld [vmem:[#allocation8 + $0xf8] sm:$0xf0] }
 0x1dc   : > { %v2531_v40 = vpop.f32.mrf.mxu3  ;;  %v2386_v58 = vpop.f32.mrf.mxu0 }
 0x1dd   : > { %v11992_v1 = vadd.f32 %v2531_v40, %v2482_v16  ;;  %v2387_v45 = vadd.f32 %v2386_v58, %v11889_v12  ;;  %v2435_v59 = vpop.f32.mrf.mxu1  ;;  %v10743_v12 = vld [vmem:[#allocation8 + $0xec] sm:$0xf]  ;;  %v8780_v16 = vld [vmem:[#allocation8 + $0x4e8] sm:$0xf]  ;;  %v8398_v40 = vld [vmem:[#allocation8 + $0x1f8] sm:$0xf0] }
 0x1de   : > { %v8273_v19 = vor.u32 %v10743_v12, %v8270_v31 }
 0x1df   : > { %v11995_v38 = vadd.f32 %v2435_v59, %v2387_v45 }
 0x1e0   : > { %3036 = vmatpush.bf16.msra.mxu2 %v8273_v19 }
 0x1e1   : > { %13807 = vst [vmem:[#allocation57_spill] sm:$0xff] %v11995_v38 }
 0x1e3   : > { %v2484_v25 = vpop.f32.mrf.mxu2 }
 0x1e4   : > { %v2533_v6 = vpop.f32.mrf.mxu3  ;;  %v2389_v13 = vpop.f32.mrf.mxu0 }
 0x1e5   : > { %v11997_v37 = vadd.f32 %v2533_v6, %v2484_v25  ;;  %v2390_v55 = vadd.f32 %v2389_v13, %v11895_v9  ;;  %v2438_v35 = vpop.f32.mrf.mxu1  ;;  %v10775_v6 = vld [vmem:[#allocation8 + $0x1ec] sm:$0xf]  ;;  %v8781_v9 = vor.u32 %v10873_v50, %v8780_v16 }
 0x1e6   : > { %v8401_v45 = vor.u32 %v10775_v6, %v8398_v40 }
 0x1e7   : > { %v12000_v34 = vadd.f32 %v2438_v35, %v2390_v55  ;;  %2584 = vmatmul.bf16.gmra.mxu0 %v11759_v46  ;;  %2633 = vmatmul.bf16.gmra.mxu1 %v11761_v47  ;;  %v8908_v55 = vld [vmem:[#allocation8 + $0x5e8] sm:$0xf]  ;;  %v10905_v35 = vld [vmem:[#allocation8 + $0x5f4] sm:$0xf0] }
 0x1e8   : > { %2682 = vmatmul.bf16.gmra.mxu2 %v11885_v2  ;;  %2938 = vmatpush.bf16.msra.mxu0 %v8781_v9  ;;  %v8909_v12 = vor.u32 %v10905_v35, %v8908_v55  ;;  %v13813_v9 = vld [vmem:[#allocation44_spill] sm:$0xff]  ;;  %v8382_v35 = vld [vmem:[#allocation8 + $0x1d8] sm:$0xf0] }
 0x1e9   : > { %13808 = vst [vmem:[#allocation58_spill] sm:$0xff] %v12000_v34  ;;  %2731 = vmatmul.bf16.gmra.mxu3 %v11887_v4  ;;  %v10869_v55 = vld [vmem:[#allocation8 + $0x4d4] sm:$0xf0] }
 0x1ea   : > { %3085 = vmatpush.bf16.msra.mxu3 %v8401_v45  ;;  %2987 = vmatpush.bf16.msra.mxu1 %v8909_v12  ;;  %v13814_v45 = vld [vmem:[#allocation45_spill] sm:$0xff] }
 0x1eb   : > { %v2487_v58 = vpop.f32.mrf.mxu2 }
 0x1ec   : > { %v2536_v59 = vpop.f32.mrf.mxu3  ;;  %v2391_v30 = vpop.f32.mrf.mxu0 }
 0x1ed   : > { %v12006_v7 = vadd.f32 %v2536_v59, %v2487_v58  ;;  %v2392_v25 = vadd.f32 %v2391_v30, %v11905_v49  ;;  %v2440_v13 = vpop.f32.mrf.mxu1  ;;  %v13811_v49 = vld [vmem:[#allocation40_spill] sm:$0xff]  ;;  %v13812_v58 = vld [vmem:[#allocation41_spill] sm:$0xff]  ;;  %v10739_v59 = vld [vmem:[#allocation8 + $0xcc] sm:$0xf] }
 0x1ee   : > { %v8254_v30 = vld [vmem:[#allocation8 + $0xd8] sm:$0xf0] }
 0x1ef   : > { %v12009_v34 = vadd.f32 %v2440_v13, %v2392_v25  ;;  %v8764_v25 = vld [vmem:[#allocation8 + $0x4c8] sm:$0xf]  ;;  %v8257_v13 = vor.u32 %v10739_v59, %v8254_v30  ;;  %v8893_v59 = vor.u32 %v10901_v36, %v8892_v44  ;;  %v8238_v36 = vld [vmem:[#allocation8 + $0xb8] sm:$0xf0] }
 0x1f0   : > { %v8748_v44 = vld [vmem:[#allocation8 + $0x4a8] sm:$0xf] }
 0x1f1   : > { %13809 = vst [vmem:[#allocation59_spill] sm:$0xff] %v12009_v34  ;;  %3037 = vmatpush.bf16.msra.mxu2 %v8257_v13  ;;  %2988 = vmatpush.bf16.msra.mxu1 %v8893_v59 }
 0x1f3   : > { %v2489_v31 = vpop.f32.mrf.mxu2 }
 0x1f4   : > { %v2538_v38 = vpop.f32.mrf.mxu3  ;;  %v2394_v16 = vpop.f32.mrf.mxu0 }
 0x1f5   : > { %v12011_v50 = vadd.f32 %v2538_v38, %v2489_v31  ;;  %v2395_v19 = vadd.f32 %v2394_v16, %v11911_v21  ;;  %v2443_v6 = vpop.f32.mrf.mxu1  ;;  %v10771_v38 = vld [vmem:[#allocation8 + $0x1cc] sm:$0xf]  ;;  %v8765_v21 = vor.u32 %v10869_v55, %v8764_v25 }
 0x1f6   : > { %v8385_v31 = vor.u32 %v10771_v38, %v8382_v35 }
 0x1f7   : > { %v12014_v40 = vadd.f32 %v2443_v6, %v2395_v19  ;;  %2589 = vmatmul.bf16.gmra.mxu0 %v13811_v49  ;;  %2638 = vmatmul.bf16.gmra.mxu1 %v13812_v58 }
 0x1f8   : > { %2687 = vmatmul.bf16.gmra.mxu2 %v13813_v9  ;;  %2939 = vmatpush.bf16.msra.mxu0 %v8765_v21  ;;  %v10865_v21 = vld [vmem:[#allocation8 + $0x4b4] sm:$0xf0] }
 0x1f9   : > { %13810 = vst [vmem:[#allocation60_spill] sm:$0xff] %v12014_v40  ;;  %2736 = vmatmul.bf16.gmra.mxu3 %v13814_v45 }
 0x1fa   : > { %3086 = vmatpush.bf16.msra.mxu3 %v8385_v31  ;;  %v10767_v31 = vld [vmem:[#allocation8 + $0x1ac] sm:$0xf] }
 0x1fb   : > { %v2492_v12 = vpop.f32.mrf.mxu2 }
 0x1fc   : > { %v2541_v16 = vpop.f32.mrf.mxu3  ;;  %v2396_v19 = vpop.f32.mrf.mxu0 }
 0x1fd   : > { %v12020_v6 = vadd.f32 %v2541_v16, %v2492_v12  ;;  %v2397_v40 = vadd.f32 %v2396_v19, %v11914_v39  ;;  %v2445_v34 = vpop.f32.mrf.mxu1  ;;  %v13816_v12 = vld [vmem:[#allocation22_spill] sm:$0xff]  ;;  %v13817_v39 = vld [vmem:[#allocation23_spill] sm:$0xff]  ;;  %v8749_v19 = vor.u32 %v10865_v21, %v8748_v44 }
 0x1ff   : > { %v12023_v45 = vadd.f32 %v2445_v34, %v2397_v40  ;;  %v10735_v34 = vld [vmem:[#allocation8 + $0xac] sm:$0xf]  ;;  %2940 = vmatpush.bf16.msra.mxu0 %v8749_v19  ;;  %v8732_v19 = vld [vmem:[#allocation8 + $0x488] sm:$0xf] }
 0x200   : > { %v8241_v40 = vor.u32 %v10735_v34, %v8238_v36 }
 0x201   : > { %13815 = vst [vmem:[#allocation40_spill] sm:$0xff] %v12023_v45 }
 0x202   : > { %3038 = vmatpush.bf16.msra.mxu2 %v8241_v40 }
 0x203   : > { %v2494_v30 = vpop.f32.mrf.mxu2 }
 0x204   : > { %v2543_v9 = vpop.f32.mrf.mxu3  ;;  %v2555_v25 = vpop.f32.mrf.mxu0 }
 0x205   : > { %v12025_v55 = vadd.f32 %v2543_v9, %v2494_v30  ;;  %v2556_v13 = vadd.f32 %v2555_v25, %v11922_v53  ;;  %v2604_v38 = vpop.f32.mrf.mxu1  ;;  %v8366_v9 = vld [vmem:[#allocation8 + $0x1b8] sm:$0xf0] }
 0x206   : > { %v8369_v53 = vor.u32 %v10767_v31, %v8366_v9  ;;  %v13820_v9 = vld [vmem:[#allocation26_spill] sm:$0xff] }
 0x207   : > { %v2605_v35 = vadd.f32 %v2604_v38, %v2556_v13  ;;  %2750 = vmatmul.bf16.vlgmr.msrb.gmra.mxu0 %v13816_v12  ;;  %2799 = vmatmul.bf16.vlgmr.msrb.gmra.mxu1 %v13817_v39 }
 0x208   : > { %2848 = vmatmul.bf16.vlgmr.msrb.gmra.mxu2 %v11639_v54  ;;  %3087 = vmatpush.bf16.msra.mxu3 %v8369_v53  ;;  %v10897_v54 = vld [vmem:[#allocation8 + $0x5b4] sm:$0xf0] }
 0x209   : > { %2897 = vmatmul.bf16.vlgmr.msrb.gmra.mxu3 %v11641_v57  ;;  %v8876_v57 = vld [vmem:[#allocation8 + $0x5a8] sm:$0xf]  ;;  %v10861_v53 = vld [vmem:[#allocation8 + $0x494] sm:$0xf0] }
 0x20a   : > { %v8877_v36 = vor.u32 %v10897_v54, %v8876_v57  ;;  %v10731_v54 = vld [vmem:[#allocation8 + $0x8c] sm:$0xf]  ;;  %v8222_v57 = vld [vmem:[#allocation8 + $0x98] sm:$0xf0] }
 0x20b   : > { %v2653_v16 = vpop.f32.mrf.mxu2 }
 0x20c   : > { %v2654_v59 = vadd.f32 %v2653_v16, %v2605_v35  ;;  %v2702_v30 = vpop.f32.mrf.mxu3  ;;  %v2557_v25 = vpop.f32.mrf.mxu0  ;;  %2989 = vmatpush.bf16.msra.mxu1 %v8877_v36  ;;  %v13821_v16 = vld [vmem:[#allocation27_spill] sm:$0xff] }
 0x20d   : > { %v2558_v13 = vadd.f32 %v2557_v25, %v11927_v20  ;;  %v2606_v38 = vpop.f32.mrf.mxu1  ;;  %v8733_v25 = vor.u32 %v10861_v53, %v8732_v19 }
 0x20e   : > { %v12033_v45 = vadd.f32 %v2702_v30, %v2654_v59  ;;  %v10763_v59 = vld [vmem:[#allocation8 + $0x18c] sm:$0xf]  ;;  %v8350_v30 = vld [vmem:[#allocation8 + $0x198] sm:$0xf0] }
 0x20f   : > { %v2607_v34 = vadd.f32 %v2606_v38, %v2558_v13  ;;  %2941 = vmatpush.bf16.msra.mxu0 %v8733_v25  ;;  %v10727_v25 = vld [vmem:[#allocation8 + $0x6c] sm:$0xf] }
 0x210   : > { %13818 = vst [vmem:[#allocation41_spill] sm:$0xff] %v12033_v45 }
 0x213   : > { %v2655_v4 = vpop.f32.mrf.mxu2 }
 0x214   : > { %v2656_v2 = vadd.f32 %v2655_v4, %v2607_v34  ;;  %v2704_v44 = vpop.f32.mrf.mxu3  ;;  %v2560_v21 = vpop.f32.mrf.mxu0  ;;  %v8225_v4 = vor.u32 %v10731_v54, %v8222_v57 }
 0x215   : > { %v2561_v35 = vadd.f32 %v2560_v21, %v11936_v48  ;;  %v2609_v31 = vpop.f32.mrf.mxu1 }
 0x216   : > { %v12036_v40 = vadd.f32 %v2704_v44, %v2656_v2  ;;  %v8353_v2 = vor.u32 %v10763_v59, %v8350_v30  ;;  %3039 = vmatpush.bf16.msra.mxu2 %v8225_v4  ;;  %v13824_v30 = vld [vmem:[#allocation28_spill] sm:$0xff] }
 0x217   : > { %v2610_v20 = vadd.f32 %v2609_v31, %v2561_v35  ;;  %2755 = vmatmul.bf16.gmra.mxu0 %v13820_v9  ;;  %2804 = vmatmul.bf16.gmra.mxu1 %v13821_v16  ;;  %v8860_v35 = vld [vmem:[#allocation8 + $0x588] sm:$0xf]  ;;  %v10893_v31 = vld [vmem:[#allocation8 + $0x594] sm:$0xf0] }
 0x218   : > { %13819 = vst [vmem:[#allocation22_spill] sm:$0xff] %v12036_v40  ;;  %2853 = vmatmul.bf16.gmra.mxu2 %v11659_v26  ;;  %3088 = vmatpush.bf16.msra.mxu3 %v8353_v2  ;;  %v8861_v57 = vor.u32 %v10893_v31, %v8860_v35  ;;  %v8206_v2 = vld [vmem:[#allocation8 + $0x78] sm:$0xf0] }
 0x219   : > { %2902 = vmatmul.bf16.gmra.mxu3 %v11661_v27 }
 0x21a   : > { %2990 = vmatpush.bf16.msra.mxu1 %v8861_v57 }
 0x21b   : > { %v2658_v48 = vpop.f32.mrf.mxu2 }
 0x21c   : > { %v2659_v13 = vadd.f32 %v2658_v48, %v2610_v20  ;;  %v2707_v38 = vpop.f32.mrf.mxu3  ;;  %v2562_v34 = vpop.f32.mrf.mxu0  ;;  %v13825_v48 = vld [vmem:[#allocation29_spill] sm:$0xff] }
 0x21d   : > { %v2563_v36 = vadd.f32 %v2562_v34, %v11941_v8  ;;  %v2611_v44 = vpop.f32.mrf.mxu1  ;;  %v10759_v34 = vld [vmem:[#allocation8 + $0x16c] sm:$0xf] }
 0x21e   : > { %v12043_v21 = vadd.f32 %v2707_v38, %v2659_v13  ;;  %v8716_v13 = vld [vmem:[#allocation8 + $0x468] sm:$0xf]  ;;  %v10857_v38 = vld [vmem:[#allocation8 + $0x474] sm:$0xf0] }
 0x21f   : > { %v2612_v54 = vadd.f32 %v2611_v44, %v2563_v36  ;;  %v8334_v36 = vld [vmem:[#allocation8 + $0x178] sm:$0xf0]  ;;  %v8717_v44 = vor.u32 %v10857_v38, %v8716_v13 }
 0x220   : > { %13822 = vst [vmem:[#allocation23_spill] sm:$0xff] %v12043_v21 }
 0x221   : > { %2942 = vmatpush.bf16.msra.mxu0 %v8717_v44  ;;  %v10723_v44 = vld [vmem:[#allocation8 + $0x4c] sm:$0xf] }
 0x223   : > { %v2660_v40 = vpop.f32.mrf.mxu2 }
 0x224   : > { %v2661_v45 = vadd.f32 %v2660_v40, %v2612_v54  ;;  %v2709_v19 = vpop.f32.mrf.mxu3  ;;  %v2565_v53 = vpop.f32.mrf.mxu0  ;;  %v8209_v40 = vor.u32 %v10727_v25, %v8206_v2 }
 0x225   : > { %v2566_v20 = vadd.f32 %v2565_v53, %v11950_v18  ;;  %v2614_v59 = vpop.f32.mrf.mxu1 }
 0x226   : > { %v12046_v4 = vadd.f32 %v2709_v19, %v2661_v45  ;;  %v8337_v45 = vor.u32 %v10759_v34, %v8334_v36  ;;  %3040 = vmatpush.bf16.msra.mxu2 %v8209_v40  ;;  %v13828_v36 = vld [vmem:[#allocation30_spill] sm:$0xff] }
 0x227   : > { %v2615_v8 = vadd.f32 %v2614_v59, %v2566_v20  ;;  %2760 = vmatmul.bf16.gmra.mxu0 %v13824_v30  ;;  %2809 = vmatmul.bf16.gmra.mxu1 %v13825_v48  ;;  %v8844_v20 = vld [vmem:[#allocation8 + $0x568] sm:$0xf]  ;;  %v10889_v59 = vld [vmem:[#allocation8 + $0x574] sm:$0xf0] }
 0x228   : > { %13823 = vst [vmem:[#allocation26_spill] sm:$0xff] %v12046_v4  ;;  %2858 = vmatmul.bf16.gmra.mxu2 %v11679_v51  ;;  %3089 = vmatpush.bf16.msra.mxu3 %v8337_v45  ;;  %v8845_v2 = vor.u32 %v10889_v59, %v8844_v20  ;;  %v8190_v45 = vld [vmem:[#allocation8 + $0x58] sm:$0xf0] }
 0x229   : > { %2907 = vmatmul.bf16.gmra.mxu3 %v11681_v52 }
 0x22a   : > { %2991 = vmatpush.bf16.msra.mxu1 %v8845_v2 }
 0x22b   : > { %v2663_v18 = vpop.f32.mrf.mxu2 }
 0x22c   : > { %v2664_v35 = vadd.f32 %v2663_v18, %v2615_v8  ;;  %v2712_v31 = vpop.f32.mrf.mxu3  ;;  %v2567_v54 = vpop.f32.mrf.mxu0  ;;  %v13829_v18 = vld [vmem:[#allocation31_spill] sm:$0xff] }
 0x22d   : > { %v2568_v57 = vadd.f32 %v2567_v54, %v11955_v41  ;;  %v2616_v19 = vpop.f32.mrf.mxu1  ;;  %v10755_v54 = vld [vmem:[#allocation8 + $0x14c] sm:$0xf] }
 0x22e   : > { %v12053_v53 = vadd.f32 %v2712_v31, %v2664_v35  ;;  %v8700_v35 = vld [vmem:[#allocation8 + $0x448] sm:$0xf]  ;;  %v10853_v31 = vld [vmem:[#allocation8 + $0x454] sm:$0xf0] }
 0x22f   : > { %v2617_v25 = vadd.f32 %v2616_v19, %v2568_v57  ;;  %v8318_v57 = vld [vmem:[#allocation8 + $0x158] sm:$0xf0]  ;;  %v8701_v19 = vor.u32 %v10853_v31, %v8700_v35 }
 0x230   : > { %13826 = vst [vmem:[#allocation27_spill] sm:$0xff] %v12053_v53 }
 0x231   : > { %2943 = vmatpush.bf16.msra.mxu0 %v8701_v19  ;;  %v10719_v19 = vld [vmem:[#allocation8 + $0x2c] sm:$0xf] }
 0x233   : > { %v2665_v4 = vpop.f32.mrf.mxu2 }
 0x234   : > { %v2666_v21 = vadd.f32 %v2665_v4, %v2617_v25  ;;  %v2714_v13 = vpop.f32.mrf.mxu3  ;;  %v2570_v38 = vpop.f32.mrf.mxu0  ;;  %v8193_v4 = vor.u32 %v10723_v44, %v8190_v45 }
 0x235   : > { %v2571_v8 = vadd.f32 %v2570_v38, %v11964_v17  ;;  %v2619_v34 = vpop.f32.mrf.mxu1 }
 0x236   : > { %v12056_v40 = vadd.f32 %v2714_v13, %v2666_v21  ;;  %v8321_v21 = vor.u32 %v10755_v54, %v8318_v57  ;;  %3041 = vmatpush.bf16.msra.mxu2 %v8193_v4  ;;  %v13832_v57 = vld [vmem:[#allocation32_spill] sm:$0xff] }
 0x237   : > { %v2620_v41 = vadd.f32 %v2619_v34, %v2571_v8  ;;  %2765 = vmatmul.bf16.gmra.mxu0 %v13828_v36  ;;  %2814 = vmatmul.bf16.gmra.mxu1 %v13829_v18  ;;  %v8828_v8 = vld [vmem:[#allocation8 + $0x548] sm:$0xf]  ;;  %v10885_v34 = vld [vmem:[#allocation8 + $0x554] sm:$0xf0] }
 0x238   : > { %13827 = vst [vmem:[#allocation28_spill] sm:$0xff] %v12056_v40  ;;  %2863 = vmatmul.bf16.gmra.mxu2 %v11699_v14  ;;  %3090 = vmatpush.bf16.msra.mxu3 %v8321_v21  ;;  %v8829_v45 = vor.u32 %v10885_v34, %v8828_v8  ;;  %v8174_v21 = vld [vmem:[#allocation8 + $0x38] sm:$0xf0] }
 0x239   : > { %2912 = vmatmul.bf16.gmra.mxu3 %v11701_v15 }
 0x23a   : > { %2992 = vmatpush.bf16.msra.mxu1 %v8829_v45 }
 0x23b   : > { %v2668_v17 = vpop.f32.mrf.mxu2 }
 0x23c   : > { %v2669_v20 = vadd.f32 %v2668_v17, %v2620_v41  ;;  %v2717_v59 = vpop.f32.mrf.mxu3  ;;  %v2572_v25 = vpop.f32.mrf.mxu0  ;;  %v13833_v17 = vld [vmem:[#allocation33_spill] sm:$0xff] }
 0x23d   : > { %v2573_v2 = vadd.f32 %v2572_v25, %v11969_v23  ;;  %v2621_v13 = vpop.f32.mrf.mxu1  ;;  %v10751_v25 = vld [vmem:[#allocation8 + $0x12c] sm:$0xf] }
 0x23e   : > { %v12063_v38 = vadd.f32 %v2717_v59, %v2669_v20  ;;  %v8684_v20 = vld [vmem:[#allocation8 + $0x428] sm:$0xf]  ;;  %v10849_v59 = vld [vmem:[#allocation8 + $0x434] sm:$0xf0] }
 0x23f   : > { %v2622_v44 = vadd.f32 %v2621_v13, %v2573_v2  ;;  %v8302_v2 = vld [vmem:[#allocation8 + $0x138] sm:$0xf0]  ;;  %v8685_v13 = vor.u32 %v10849_v59, %v8684_v20 }
 0x240   : > { %13830 = vst [vmem:[#allocation29_spill] sm:$0xff] %v12063_v38 }
 0x241   : > { %2944 = vmatpush.bf16.msra.mxu0 %v8685_v13  ;;  %v10715_v13 = vld [vmem:[#allocation8 + $0xc] sm:$0xf] }
 0x243   : > { %v2670_v40 = vpop.f32.mrf.mxu2 }
 0x244   : > { %v2671_v53 = vadd.f32 %v2670_v40, %v2622_v44  ;;  %v2719_v35 = vpop.f32.mrf.mxu3  ;;  %v2575_v31 = vpop.f32.mrf.mxu0  ;;  %v8177_v40 = vor.u32 %v10719_v19, %v8174_v21 }
 0x245   : > { %v2576_v41 = vadd.f32 %v2575_v31, %v11978_v24  ;;  %v2624_v54 = vpop.f32.mrf.mxu1 }
 0x246   : > { %v12066_v4 = vadd.f32 %v2719_v35, %v2671_v53  ;;  %v8305_v53 = vor.u32 %v10751_v25, %v8302_v2  ;;  %3042 = vmatpush.bf16.msra.mxu2 %v8177_v40  ;;  %v13836_v2 = vld [vmem:[#allocation34_spill] sm:$0xff] }
 0x247   : > { %v2625_v23 = vadd.f32 %v2624_v54, %v2576_v41  ;;  %2770 = vmatmul.bf16.gmra.mxu0 %v13832_v57  ;;  %2819 = vmatmul.bf16.gmra.mxu1 %v13833_v17  ;;  %v8812_v41 = vld [vmem:[#allocation8 + $0x528] sm:$0xf]  ;;  %v10881_v54 = vld [vmem:[#allocation8 + $0x534] sm:$0xf0] }
 0x248   : > { %13831 = vst [vmem:[#allocation30_spill] sm:$0xff] %v12066_v4  ;;  %2868 = vmatmul.bf16.gmra.mxu2 %v11719_v42  ;;  %3091 = vmatpush.bf16.msra.mxu3 %v8305_v53  ;;  %v8813_v21 = vor.u32 %v10881_v54, %v8812_v41  ;;  %v8158_v53 = vld [vmem:[#allocation8 + $0x18] sm:$0xf0] }
 0x249   : > { %2917 = vmatmul.bf16.gmra.mxu3 %v11721_v43 }
 0x24a   : > { %2993 = vmatpush.bf16.msra.mxu1 %v8813_v21 }
 0x24b   : > { %v2673_v24 = vpop.f32.mrf.mxu2 }
 0x24c   : > { %v2674_v8 = vadd.f32 %v2673_v24, %v2625_v23  ;;  %v2722_v34 = vpop.f32.mrf.mxu3  ;;  %v2577_v44 = vpop.f32.mrf.mxu0  ;;  %v13837_v24 = vld [vmem:[#allocation35_spill] sm:$0xff] }
 0x24d   : > { %v2578_v45 = vadd.f32 %v2577_v44, %v11983_v22  ;;  %v2626_v35 = vpop.f32.mrf.mxu1  ;;  %v10747_v44 = vld [vmem:[#allocation8 + $0x10c] sm:$0xf] }
 0x24e   : > { %v12073_v31 = vadd.f32 %v2722_v34, %v2674_v8  ;;  %v8668_v8 = vld [vmem:[#allocation8 + $0x408] sm:$0xf]  ;;  %v10845_v34 = vld [vmem:[#allocation8 + $0x414] sm:$0xf0] }
 0x24f   : > { %v2627_v19 = vadd.f32 %v2626_v35, %v2578_v45  ;;  %v8286_v45 = vld [vmem:[#allocation8 + $0x118] sm:$0xf0]  ;;  %v8669_v35 = vor.u32 %v10845_v34, %v8668_v8 }
 0x250   : > { %13834 = vst [vmem:[#allocation31_spill] sm:$0xff] %v12073_v31 }
 0x251   : > { %2945 = vmatpush.bf16.msra.mxu0 %v8669_v35  ;;  %v10871_v35 = vld [vmem:[#allocation8 + $0x4ec] sm:$0xf] }
 0x253   : > { %v2675_v4 = vpop.f32.mrf.mxu2 }
 0x254   : > { %v2676_v38 = vadd.f32 %v2675_v4, %v2627_v19  ;;  %v2724_v20 = vpop.f32.mrf.mxu3  ;;  %v2580_v59 = vpop.f32.mrf.mxu0  ;;  %v8161_v4 = vor.u32 %v10715_v13, %v8158_v53 }
 0x255   : > { %v2581_v23 = vadd.f32 %v2580_v59, %v11992_v1  ;;  %v2629_v25 = vpop.f32.mrf.mxu1 }
 0x256   : > { %v12076_v40 = vadd.f32 %v2724_v20, %v2676_v38  ;;  %v8289_v38 = vor.u32 %v10747_v44, %v8286_v45  ;;  %3043 = vmatpush.bf16.msra.mxu2 %v8161_v4  ;;  %v13840_v45 = vld [vmem:[#allocation36_spill] sm:$0xff] }
 0x257   : > { %v2630_v22 = vadd.f32 %v2629_v25, %v2581_v23  ;;  %2775 = vmatmul.bf16.gmra.mxu0 %v13836_v2  ;;  %2824 = vmatmul.bf16.gmra.mxu1 %v13837_v24  ;;  %v8796_v23 = vld [vmem:[#allocation8 + $0x508] sm:$0xf]  ;;  %v10877_v25 = vld [vmem:[#allocation8 + $0x514] sm:$0xf0] }
 0x258   : > { %13835 = vst [vmem:[#allocation32_spill] sm:$0xff] %v12076_v40  ;;  %2873 = vmatmul.bf16.gmra.mxu2 %v11739_v10  ;;  %3092 = vmatpush.bf16.msra.mxu3 %v8289_v38  ;;  %v8797_v53 = vor.u32 %v10877_v25, %v8796_v23  ;;  %v8782_v38 = vld [vmem:[#allocation8 + $0x4f8] sm:$0xf0] }
 0x259   : > { %2922 = vmatmul.bf16.gmra.mxu3 %v11741_v11 }
 0x25a   : > { %2994 = vmatpush.bf16.msra.mxu1 %v8797_v53 }
 0x25b   : > { %v2678_v1 = vpop.f32.mrf.mxu2 }
 0x25c   : > { %v2679_v41 = vadd.f32 %v2678_v1, %v2630_v22  ;;  %v2727_v54 = vpop.f32.mrf.mxu3  ;;  %v2582_v19 = vpop.f32.mrf.mxu0  ;;  %v13841_v1 = vld [vmem:[#allocation37_spill] sm:$0xff] }
 0x25d   : > { %v2583_v21 = vadd.f32 %v2582_v19, %v11997_v37  ;;  %v2631_v20 = vpop.f32.mrf.mxu1  ;;  %v10903_v19 = vld [vmem:[#allocation8 + $0x5ec] sm:$0xf] }
 0x25e   : > { %v12083_v59 = vadd.f32 %v2727_v54, %v2679_v41  ;;  %v10807_v41 = vld [vmem:[#allocation8 + $0x2ec] sm:$0xf]  ;;  %v8526_v54 = vld [vmem:[#allocation8 + $0x2f8] sm:$0xf0] }
 0x25f   : > { %v2632_v13 = vadd.f32 %v2631_v20, %v2583_v21  ;;  %v8910_v21 = vld [vmem:[#allocation8 + $0x5f8] sm:$0xf0]  ;;  %v8529_v20 = vor.u32 %v10807_v41, %v8526_v54 }
 0x260   : > { %13838 = vst [vmem:[#allocation33_spill] sm:$0xff] %v12083_v59 }
 0x261   : > { %3134 = vmatpush.bf16.msrb.mxu0 %v8529_v20  ;;  %v10867_v20 = vld [vmem:[#allocation8 + $0x4cc] sm:$0xf] }
 0x263   : > { %v2680_v40 = vpop.f32.mrf.mxu2 }
 0x264   : > { %v2681_v31 = vadd.f32 %v2680_v40, %v2632_v13  ;;  %v2729_v8 = vpop.f32.mrf.mxu3  ;;  %v2585_v34 = vpop.f32.mrf.mxu0  ;;  %v8785_v40 = vor.u32 %v10871_v35, %v8782_v38 }
 0x265   : > { %v2586_v22 = vadd.f32 %v2585_v34, %v12006_v7  ;;  %v2634_v44 = vpop.f32.mrf.mxu1 }
 0x266   : > { %v12086_v4 = vadd.f32 %v2729_v8, %v2681_v31  ;;  %v8913_v31 = vor.u32 %v10903_v19, %v8910_v21  ;;  %3232 = vmatpush.bf16.msrb.mxu2 %v8785_v40  ;;  %v13844_v21 = vld [vmem:[#allocation38_spill] sm:$0xff] }
 0x267   : > { %v2635_v37 = vadd.f32 %v2634_v44, %v2586_v22  ;;  %2780 = vmatmul.bf16.gmra.mxu0 %v13840_v45  ;;  %2829 = vmatmul.bf16.gmra.mxu1 %v13841_v1  ;;  %v10839_v22 = vld [vmem:[#allocation8 + $0x3ec] sm:$0xf]  ;;  %v8654_v44 = vld [vmem:[#allocation8 + $0x3f8] sm:$0xf0] }
 0x268   : > { %13839 = vst [vmem:[#allocation34_spill] sm:$0xff] %v12086_v4  ;;  %2878 = vmatmul.bf16.gmra.mxu2 %v11759_v46  ;;  %3281 = vmatpush.bf16.msrb.mxu3 %v8913_v31  ;;  %v8657_v38 = vor.u32 %v10839_v22, %v8654_v44  ;;  %v8766_v31 = vld [vmem:[#allocation8 + $0x4d8] sm:$0xf0] }
 0x269   : > { %2927 = vmatmul.bf16.gmra.mxu3 %v11761_v47 }
 0x26a   : > { %3183 = vmatpush.bf16.msrb.mxu1 %v8657_v38 }
 0x26b   : > { %v2683_v7 = vpop.f32.mrf.mxu2 }
 0x26c   : > { %v2684_v23 = vadd.f32 %v2683_v7, %v2635_v37  ;;  %v2732_v25 = vpop.f32.mrf.mxu3  ;;  %v2587_v13 = vpop.f32.mrf.mxu0  ;;  %v13845_v7 = vld [vmem:[#allocation39_spill] sm:$0xff] }
 0x26d   : > { %v2588_v53 = vadd.f32 %v2587_v13, %v12011_v50  ;;  %v2636_v8 = vpop.f32.mrf.mxu1  ;;  %v10899_v13 = vld [vmem:[#allocation8 + $0x5cc] sm:$0xf] }
 0x26e   : > { %v12093_v34 = vadd.f32 %v2732_v25, %v2684_v23  ;;  %v10803_v23 = vld [vmem:[#allocation8 + $0x2cc] sm:$0xf]  ;;  %v8510_v25 = vld [vmem:[#allocation8 + $0x2d8] sm:$0xf0] }
 0x26f   : > { %v2637_v35 = vadd.f32 %v2636_v8, %v2588_v53  ;;  %v8894_v53 = vld [vmem:[#allocation8 + $0x5d8] sm:$0xf0]  ;;  %v8513_v8 = vor.u32 %v10803_v23, %v8510_v25 }
 0x270   : > { %13842 = vst [vmem:[#allocation35_spill] sm:$0xff] %v12093_v34 }
 0x271   : > { %3135 = vmatpush.bf16.msrb.mxu0 %v8513_v8 }
 0x273   : > { %v2685_v4 = vpop.f32.mrf.mxu2 }
 0x274   : > { %v2686_v59 = vadd.f32 %v2685_v4, %v2637_v35  ;;  %v2734_v41 = vpop.f32.mrf.mxu3  ;;  %v2590_v54 = vpop.f32.mrf.mxu0  ;;  %v8769_v4 = vor.u32 %v10867_v20, %v8766_v31 }
 0x275   : > { %v2591_v37 = vadd.f32 %v2590_v54, %v12020_v6  ;;  %v2639_v19 = vpop.f32.mrf.mxu1 }
 0x276   : > { %v12096_v40 = vadd.f32 %v2734_v41, %v2686_v59  ;;  %v8897_v59 = vor.u32 %v10899_v13, %v8894_v53  ;;  %3233 = vmatpush.bf16.msrb.mxu2 %v8769_v4  ;;  %v8750_v53 = vld [vmem:[#allocation8 + $0x4b8] sm:$0xf0] }
 0x277   : > { %v2640_v50 = vadd.f32 %v2639_v19, %v2591_v37  ;;  %2785 = vmatmul.bf16.gmra.mxu0 %v13844_v21  ;;  %2834 = vmatmul.bf16.gmra.mxu1 %v13845_v7  ;;  %v10835_v37 = vld [vmem:[#allocation8 + $0x3cc] sm:$0xf]  ;;  %v8638_v19 = vld [vmem:[#allocation8 + $0x3d8] sm:$0xf0] }
 0x278   : > { %13843 = vst [vmem:[#allocation36_spill] sm:$0xff] %v12096_v40  ;;  %2883 = vmatmul.bf16.gmra.mxu2 %v13811_v49  ;;  %3282 = vmatpush.bf16.msrb.mxu3 %v8897_v59  ;;  %v8641_v31 = vor.u32 %v10835_v37, %v8638_v19  ;;  %v8494_v59 = vld [vmem:[#allocation8 + $0x2b8] sm:$0xf0] }
 0x279   : > { %2932 = vmatmul.bf16.gmra.mxu3 %v13812_v58 }
 0x27a   : > { %3184 = vmatpush.bf16.msrb.mxu1 %v8641_v31  ;;  %v8622_v31 = vld [vmem:[#allocation8 + $0x3b8] sm:$0xf0] }
 0x27b   : > { %v2688_v6 = vpop.f32.mrf.mxu2 }
 0x27c   : > { %v2689_v22 = vadd.f32 %v2688_v6, %v2640_v50  ;;  %v2737_v44 = vpop.f32.mrf.mxu3  ;;  %v2592_v35 = vpop.f32.mrf.mxu0  ;;  %v10799_v6 = vld [vmem:[#allocation8 + $0x2ac] sm:$0xf] }
 0x27d   : > { %v2593_v38 = vadd.f32 %v2592_v35, %v12025_v55  ;;  %v2641_v41 = vpop.f32.mrf.mxu1  ;;  %v10863_v55 = vld [vmem:[#allocation8 + $0x4ac] sm:$0xf]  ;;  %v8497_v35 = vor.u32 %v10799_v6, %v8494_v59 }
 0x27e   : > { %v12103_v54 = vadd.f32 %v2737_v44, %v2689_v22  ;;  %v8753_v8 = vor.u32 %v10863_v55, %v8750_v53  ;;  %v8878_v22 = vld [vmem:[#allocation8 + $0x5b8] sm:$0xf0] }
 0x27f   : > { %v2642_v20 = vadd.f32 %v2641_v41, %v2593_v38  ;;  %3136 = vmatpush.bf16.msrb.mxu0 %v8497_v35  ;;  %v8478_v35 = vld [vmem:[#allocation8 + $0x298] sm:$0xf0] }
 0x280   : > { %13846 = vst [vmem:[#allocation37_spill] sm:$0xff] %v12103_v54  ;;  %3234 = vmatpush.bf16.msrb.mxu2 %v8753_v8  ;;  %v10859_v8 = vld [vmem:[#allocation8 + $0x48c] sm:$0xf] }
 0x283   : > { %v2690_v40 = vpop.f32.mrf.mxu2 }
 0x284   : > { %v2691_v34 = vadd.f32 %v2690_v40, %v2642_v20  ;;  %v2739_v23 = vpop.f32.mrf.mxu3  ;;  %v2751_v25 = vpop.f32.mrf.mxu0  ;;  %v10895_v40 = vld [vmem:[#allocation8 + $0x5ac] sm:$0xf] }
 0x285   : > { %v2800_v50 = vpop.f32.mrf.mxu1  ;;  %v10831_v20 = vld [vmem:[#allocation8 + $0x3ac] sm:$0xf] }
 0x286   : > { %v12105_v13 = vadd.f32 %v2739_v23, %v2691_v34  ;;  %v2801_v4 = vadd.f32 %v2800_v50, %v2751_v25  ;;  %v8881_v34 = vor.u32 %v10895_v40, %v8878_v22  ;;  %v8625_v23 = vor.u32 %v10831_v20, %v8622_v31  ;;  %v8734_v40 = vld [vmem:[#allocation8 + $0x498] sm:$0xf0]  ;;  %v10795_v22 = vld [vmem:[#allocation8 + $0x28c] sm:$0xf] }
 0x287   : > { %2946 = vmatmul.bf16.vlgmr.msra.gmra.mxu0 %v11791_v60  ;;  %2995 = vmatmul.bf16.vlgmr.msra.gmra.mxu1 %v11793_v62 }
 0x288   : > { %13847 = vst [vmem:[#allocation38_spill] sm:$0xff] %v12105_v13  ;;  %3044 = vmatmul.bf16.vlgmr.msra.gmra.mxu2 %v13816_v12  ;;  %3283 = vmatpush.bf16.msrb.mxu3 %v8881_v34  ;;  %v10891_v34 = vld [vmem:[#allocation8 + $0x58c] sm:$0xf] }
 0x289   : > { %3093 = vmatmul.bf16.vlgmr.msra.gmra.mxu3 %v13817_v39  ;;  %3185 = vmatpush.bf16.msrb.mxu1 %v8625_v23 }
 0x28b   : > { %v2849_v44 = vpop.f32.mrf.mxu2 }
 0x28c   : > { %v2850_v38 = vadd.f32 %v2849_v44, %v2801_v4  ;;  %v2898_v41 = vpop.f32.mrf.mxu3  ;;  %v2753_v37 = vpop.f32.mrf.mxu0  ;;  %v8737_v44 = vor.u32 %v10859_v8, %v8734_v40 }
 0x28d   : > { %v2802_v19 = vpop.f32.mrf.mxu1 }
 0x28e   : > { %v12111_v12 = vadd.f32 %v2898_v41, %v2850_v38  ;;  %v2803_v39 = vadd.f32 %v2802_v19, %v2753_v37  ;;  %v8862_v38 = vld [vmem:[#allocation8 + $0x598] sm:$0xf0]  ;;  %v8481_v37 = vor.u32 %v10795_v22, %v8478_v35  ;;  %3235 = vmatpush.bf16.msrb.mxu2 %v8737_v44  ;;  %v10855_v44 = vld [vmem:[#allocation8 + $0x46c] sm:$0xf] }
 0x28f   : > { %v8865_v19 = vor.u32 %v10891_v34, %v8862_v38  ;;  %v8718_v34 = vld [vmem:[#allocation8 + $0x478] sm:$0xf0]  ;;  %v10791_v38 = vld [vmem:[#allocation8 + $0x26c] sm:$0xf] }
 0x290   : > { %3137 = vmatpush.bf16.msrb.mxu0 %v8481_v37  ;;  %v8462_v37 = vld [vmem:[#allocation8 + $0x278] sm:$0xf0] }
 0x291   : > { %3284 = vmatpush.bf16.msrb.mxu3 %v8865_v19  ;;  %v10887_v19 = vld [vmem:[#allocation8 + $0x56c] sm:$0xf] }
 0x293   : > { %v2851_v25 = vpop.f32.mrf.mxu2 }
 0x294   : > { %v2852_v50 = vadd.f32 %v2851_v25, %v2803_v39  ;;  %v2900_v55 = vpop.f32.mrf.mxu3  ;;  %v2756_v53 = vpop.f32.mrf.mxu0  ;;  %v10827_v25 = vld [vmem:[#allocation8 + $0x38c] sm:$0xf] }
 0x295   : > { %v2805_v6 = vpop.f32.mrf.mxu1 }
 0x296   : > { %v12113_v59 = vadd.f32 %v2900_v55, %v2852_v50  ;;  %v2806_v4 = vadd.f32 %v2805_v6, %v2756_v53  ;;  %v8606_v50 = vld [vmem:[#allocation8 + $0x398] sm:$0xf0] }
 0x297   : > { %2951 = vmatmul.bf16.gmra.mxu0 %v11805_v56  ;;  %3000 = vmatmul.bf16.gmra.mxu1 %v11807_v63  ;;  %v8609_v55 = vor.u32 %v10827_v25, %v8606_v50 }
 0x298   : > { %3049 = vmatmul.bf16.gmra.mxu2 %v13820_v9 }
 0x299   : > { %3098 = vmatmul.bf16.gmra.mxu3 %v13821_v16  ;;  %3186 = vmatpush.bf16.msrb.mxu1 %v8609_v55 }
 0x29b   : > { %v2854_v41 = vpop.f32.mrf.mxu2 }
 0x29c   : > { %v2855_v39 = vadd.f32 %v2854_v41, %v2806_v4  ;;  %v2903_v20 = vpop.f32.mrf.mxu3  ;;  %v2758_v31 = vpop.f32.mrf.mxu0  ;;  %v8721_v41 = vor.u32 %v10855_v44, %v8718_v34 }
 0x29d   : > { %v2807_v23 = vpop.f32.mrf.mxu1 }
 0x29e   : > { %v12119_v9 = vadd.f32 %v2903_v20, %v2855_v39  ;;  %v2808_v16 = vadd.f32 %v2807_v23, %v2758_v31  ;;  %v8846_v39 = vld [vmem:[#allocation8 + $0x578] sm:$0xf0]  ;;  %v8465_v31 = vor.u32 %v10791_v38, %v8462_v37  ;;  %3236 = vmatpush.bf16.msrb.mxu2 %v8721_v41  ;;  %v10851_v41 = vld [vmem:[#allocation8 + $0x44c] sm:$0xf] }
 0x29f   : > { %v8849_v23 = vor.u32 %v10887_v19, %v8846_v39  ;;  %v8702_v19 = vld [vmem:[#allocation8 + $0x458] sm:$0xf0]  ;;  %v10787_v39 = vld [vmem:[#allocation8 + $0x24c] sm:$0xf] }
 0x2a0   : > { %3138 = vmatpush.bf16.msrb.mxu0 %v8465_v31  ;;  %v8446_v31 = vld [vmem:[#allocation8 + $0x258] sm:$0xf0] }
 0x2a1   : > { %3285 = vmatpush.bf16.msrb.mxu3 %v8849_v23  ;;  %v10883_v23 = vld [vmem:[#allocation8 + $0x54c] sm:$0xf] }
 0x2a3   : > { %v2856_v53 = vpop.f32.mrf.mxu2 }
 0x2a4   : > { %v2857_v6 = vadd.f32 %v2856_v53, %v2808_v16  ;;  %v2905_v8 = vpop.f32.mrf.mxu3  ;;  %v2761_v40 = vpop.f32.mrf.mxu0  ;;  %v10823_v53 = vld [vmem:[#allocation8 + $0x36c] sm:$0xf] }
 0x2a5   : > { %v2810_v22 = vpop.f32.mrf.mxu1 }
 0x2a6   : > { %v12121_v35 = vadd.f32 %v2905_v8, %v2857_v6  ;;  %v2811_v4 = vadd.f32 %v2810_v22, %v2761_v40  ;;  %v8590_v6 = vld [vmem:[#allocation8 + $0x378] sm:$0xf0] }
 0x2a7   : > { %2956 = vmatmul.bf16.gmra.mxu0 %v11821_v0  ;;  %3005 = vmatmul.bf16.gmra.mxu1 %v11823_v5  ;;  %v8593_v8 = vor.u32 %v10823_v53, %v8590_v6 }
 0x2a8   : > { %3054 = vmatmul.bf16.gmra.mxu2 %v13824_v30 }
 0x2a9   : > { %3103 = vmatmul.bf16.gmra.mxu3 %v13825_v48  ;;  %3187 = vmatpush.bf16.msrb.mxu1 %v8593_v8 }
 0x2ab   : > { %v2859_v20 = vpop.f32.mrf.mxu2 }
 0x2ac   : > { %v2860_v16 = vadd.f32 %v2859_v20, %v2811_v4  ;;  %v2908_v25 = vpop.f32.mrf.mxu3  ;;  %v2763_v50 = vpop.f32.mrf.mxu0  ;;  %v8705_v20 = vor.u32 %v10851_v41, %v8702_v19 }
 0x2ad   : > { %v2812_v55 = vpop.f32.mrf.mxu1 }
 0x2ae   : > { %v12127_v30 = vadd.f32 %v2908_v25, %v2860_v16  ;;  %v2813_v48 = vadd.f32 %v2812_v55, %v2763_v50  ;;  %v8830_v16 = vld [vmem:[#allocation8 + $0x558] sm:$0xf0]  ;;  %v8449_v50 = vor.u32 %v10787_v39, %v8446_v31  ;;  %3237 = vmatpush.bf16.msrb.mxu2 %v8705_v20  ;;  %v10847_v20 = vld [vmem:[#allocation8 + $0x42c] sm:$0xf] }
 0x2af   : > { %v8833_v55 = vor.u32 %v10883_v23, %v8830_v16  ;;  %v8686_v23 = vld [vmem:[#allocation8 + $0x438] sm:$0xf0]  ;;  %v10783_v16 = vld [vmem:[#allocation8 + $0x22c] sm:$0xf] }
 0x2b0   : > { %3139 = vmatpush.bf16.msrb.mxu0 %v8449_v50  ;;  %v8430_v50 = vld [vmem:[#allocation8 + $0x238] sm:$0xf0] }
 0x2b1   : > { %3286 = vmatpush.bf16.msrb.mxu3 %v8833_v55  ;;  %v10879_v55 = vld [vmem:[#allocation8 + $0x52c] sm:$0xf] }
 0x2b3   : > { %v2861_v40 = vpop.f32.mrf.mxu2 }
 0x2b4   : > { %v2862_v22 = vadd.f32 %v2861_v40, %v2813_v48  ;;  %v2910_v44 = vpop.f32.mrf.mxu3  ;;  %v2766_v34 = vpop.f32.mrf.mxu0  ;;  %v10819_v40 = vld [vmem:[#allocation8 + $0x34c] sm:$0xf] }
 0x2b5   : > { %v2815_v38 = vpop.f32.mrf.mxu1 }
 0x2b6   : > { %v12129_v37 = vadd.f32 %v2910_v44, %v2862_v22  ;;  %v2816_v4 = vadd.f32 %v2815_v38, %v2766_v34  ;;  %v8574_v22 = vld [vmem:[#allocation8 + $0x358] sm:$0xf0] }
 0x2b7   : > { %2961 = vmatmul.bf16.gmra.mxu0 %v11837_v29  ;;  %3010 = vmatmul.bf16.gmra.mxu1 %v11839_v32  ;;  %v8577_v44 = vor.u32 %v10819_v40, %v8574_v22 }
 0x2b8   : > { %3059 = vmatmul.bf16.gmra.mxu2 %v13828_v36 }
 0x2b9   : > { %3108 = vmatmul.bf16.gmra.mxu3 %v13829_v18  ;;  %3188 = vmatpush.bf16.msrb.mxu1 %v8577_v44 }
 0x2bb   : > { %v2864_v25 = vpop.f32.mrf.mxu2 }
 0x2bc   : > { %v2865_v48 = vadd.f32 %v2864_v25, %v2816_v4  ;;  %v2913_v53 = vpop.f32.mrf.mxu3  ;;  %v2768_v6 = vpop.f32.mrf.mxu0  ;;  %v8689_v25 = vor.u32 %v10847_v20, %v8686_v23 }
 0x2bd   : > { %v2817_v8 = vpop.f32.mrf.mxu1 }
 0x2be   : > { %v12135_v36 = vadd.f32 %v2913_v53, %v2865_v48  ;;  %v2818_v18 = vadd.f32 %v2817_v8, %v2768_v6  ;;  %v8814_v48 = vld [vmem:[#allocation8 + $0x538] sm:$0xf0]  ;;  %v8433_v6 = vor.u32 %v10783_v16, %v8430_v50  ;;  %3238 = vmatpush.bf16.msrb.mxu2 %v8689_v25  ;;  %v10843_v25 = vld [vmem:[#allocation8 + $0x40c] sm:$0xf] }
 0x2bf   : > { %v8817_v8 = vor.u32 %v10879_v55, %v8814_v48  ;;  %v8670_v55 = vld [vmem:[#allocation8 + $0x418] sm:$0xf0]  ;;  %v10779_v48 = vld [vmem:[#allocation8 + $0x20c] sm:$0xf] }
 0x2c0   : > { %3140 = vmatpush.bf16.msrb.mxu0 %v8433_v6  ;;  %v8414_v6 = vld [vmem:[#allocation8 + $0x218] sm:$0xf0] }
 0x2c1   : > { %3287 = vmatpush.bf16.msrb.mxu3 %v8817_v8  ;;  %v10875_v8 = vld [vmem:[#allocation8 + $0x50c] sm:$0xf] }
 0x2c3   : > { %v2866_v34 = vpop.f32.mrf.mxu2 }
 0x2c4   : > { %v2867_v38 = vadd.f32 %v2866_v34, %v2818_v18  ;;  %v2915_v41 = vpop.f32.mrf.mxu3  ;;  %v2771_v19 = vpop.f32.mrf.mxu0  ;;  %v10815_v34 = vld [vmem:[#allocation8 + $0x32c] sm:$0xf] }
 0x2c5   : > { %v2820_v39 = vpop.f32.mrf.mxu1 }
 0x2c6   : > { %v12137_v31 = vadd.f32 %v2915_v41, %v2867_v38  ;;  %v2821_v4 = vadd.f32 %v2820_v39, %v2771_v19  ;;  %v8558_v38 = vld [vmem:[#allocation8 + $0x338] sm:$0xf0] }
 0x2c7   : > { %2966 = vmatmul.bf16.gmra.mxu0 %v11853_v61  ;;  %3015 = vmatmul.bf16.gmra.mxu1 %v11855_v3  ;;  %v8561_v41 = vor.u32 %v10815_v34, %v8558_v38 }
 0x2c8   : > { %3064 = vmatmul.bf16.gmra.mxu2 %v13832_v57 }
 0x2c9   : > { %3113 = vmatmul.bf16.gmra.mxu3 %v13833_v17  ;;  %3189 = vmatpush.bf16.msrb.mxu1 %v8561_v41 }
 0x2cb   : > { %v2869_v53 = vpop.f32.mrf.mxu2 }
 0x2cc   : > { %v2870_v18 = vadd.f32 %v2869_v53, %v2821_v4  ;;  %v2918_v40 = vpop.f32.mrf.mxu3  ;;  %v2773_v22 = vpop.f32.mrf.mxu0  ;;  %v8673_v53 = vor.u32 %v10843_v25, %v8670_v55 }
 0x2cd   : > { %v2822_v44 = vpop.f32.mrf.mxu1 }
 0x2ce   : > { %v12143_v57 = vadd.f32 %v2918_v40, %v2870_v18  ;;  %v2823_v17 = vadd.f32 %v2822_v44, %v2773_v22  ;;  %v8798_v18 = vld [vmem:[#allocation8 + $0x518] sm:$0xf0]  ;;  %v8417_v22 = vor.u32 %v10779_v48, %v8414_v6  ;;  %3239 = vmatpush.bf16.msrb.mxu2 %v8673_v53  ;;  %v13849_v53 = vld [vmem:[#allocation43_spill] sm:$0xff] }
 0x2cf   : > { %v8801_v44 = vor.u32 %v10875_v8, %v8798_v18  ;;  %v13848_v8 = vld [vmem:[#allocation42_spill] sm:$0xff]  ;;  %v9284_v18 = vld [vmem:[#allocation7 + $0x2e0] sm:$0xf] }
 0x2d0   : > { %3141 = vmatpush.bf16.msrb.mxu0 %v8417_v22  ;;  %v9028_v22 = vld [vmem:[#allocation7 + $0xe0] sm:$0xf] }
 0x2d1   : > { %3288 = vmatpush.bf16.msrb.mxu3 %v8801_v44 }
 0x2d3   : > { %v2871_v19 = vpop.f32.mrf.mxu2 }
 0x2d4   : > { %v2872_v39 = vadd.f32 %v2871_v19, %v2823_v17  ;;  %v2920_v20 = vpop.f32.mrf.mxu3  ;;  %v2776_v23 = vpop.f32.mrf.mxu0  ;;  %v10811_v19 = vld [vmem:[#allocation8 + $0x30c] sm:$0xf] }
 0x2d5   : > { %v2825_v16 = vpop.f32.mrf.mxu1 }
 0x2d6   : > { %v12145_v50 = vadd.f32 %v2920_v20, %v2872_v39  ;;  %v2826_v4 = vadd.f32 %v2825_v16, %v2776_v23  ;;  %v8542_v39 = vld [vmem:[#allocation8 + $0x318] sm:$0xf0] }
 0x2d7   : > { %2971 = vmatmul.bf16.gmra.mxu0 %v11869_v28  ;;  %3020 = vmatmul.bf16.gmra.mxu1 %v11871_v33  ;;  %v8545_v20 = vor.u32 %v10811_v19, %v8542_v39 }
 0x2d8   : > { %3069 = vmatmul.bf16.gmra.mxu2 %v13836_v2 }
 0x2d9   : > { %3118 = vmatmul.bf16.gmra.mxu3 %v13837_v24  ;;  %3190 = vmatpush.bf16.msrb.mxu1 %v8545_v20 }
 0x2db   : > { %v2874_v40 = vpop.f32.mrf.mxu2 }
 0x2dc   : > { %v2875_v17 = vadd.f32 %v2874_v40, %v2826_v4  ;;  %v2923_v34 = vpop.f32.mrf.mxu3  ;;  %v2778_v38 = vpop.f32.mrf.mxu0  ;;  %v10552_v40 = vld [vmem:[#allocation7 + $0x2ec] sm:$0xf0] }
 0x2dd   : > { %v2827_v41 = vpop.f32.mrf.mxu1  ;;  %v9285_v44 = vor.u32 %v10552_v40, %v9284_v18 }
 0x2de   : > { %v12151_v2 = vadd.f32 %v2923_v34, %v2875_v17  ;;  %v2828_v24 = vadd.f32 %v2827_v41, %v2778_v38  ;;  %v10488_v17 = vld [vmem:[#allocation7 + $0xec] sm:$0xf0]  ;;  %v9412_v34 = vld [vmem:[#allocation7 + $0x3e0] sm:$0xf] }
 0x2df   : > { %v10584_v38 = vld [vmem:[#allocation7 + $0x3ec] sm:$0xf0]  ;;  %4708 = vmatpush.bf16.msra.mxu2 %v9285_v44  ;;  %v13851_v44 = vld [vmem:[#allocation45_spill] sm:$0xff] }
 0x2e0   : > { %v9413_v19 = vor.u32 %v10584_v38, %v9412_v34  ;;  %v13850_v34 = vld [vmem:[#allocation44_spill] sm:$0xff]  ;;  %v9268_v38 = vld [vmem:[#allocation7 + $0x2c0] sm:$0xf] }
 0x2e2   : > { %4757 = vmatpush.bf16.msra.mxu3 %v9413_v19 }
 0x2e3   : > { %v2876_v23 = vpop.f32.mrf.mxu2 }
 0x2e4   : > { %v2877_v16 = vadd.f32 %v2876_v23, %v2828_v24  ;;  %v2925_v25 = vpop.f32.mrf.mxu3  ;;  %v2781_v55 = vpop.f32.mrf.mxu0  ;;  %v9029_v24 = vor.u32 %v10488_v17, %v9028_v22 }
 0x2e5   : > { %v2830_v48 = vpop.f32.mrf.mxu1 }
 0x2e6   : > { %v12153_v6 = vadd.f32 %v2925_v25, %v2877_v16  ;;  %v2831_v4 = vadd.f32 %v2830_v48, %v2781_v55  ;;  %4610 = vmatpush.bf16.msra.mxu0 %v9029_v24  ;;  %v10520_v25 = vld [vmem:[#allocation7 + $0x1ec] sm:$0xf0]  ;;  %v9012_v24 = vld [vmem:[#allocation7 + $0xc0] sm:$0xf] }
 0x2e7   : > { %2976 = vmatmul.bf16.gmra.mxu0 %v13848_v8  ;;  %3025 = vmatmul.bf16.gmra.mxu1 %v13849_v53 }
 0x2e8   : > { %3074 = vmatmul.bf16.gmra.mxu2 %v13840_v45  ;;  %v9156_v45 = vld [vmem:[#allocation7 + $0x1e0] sm:$0xf] }
 0x2e9   : > { %3123 = vmatmul.bf16.gmra.mxu3 %v13841_v1  ;;  %v9157_v48 = vor.u32 %v10520_v25, %v9156_v45 }
 0x2eb   : > { %v2879_v41 = vpop.f32.mrf.mxu2  ;;  %4659 = vmatpush.bf16.msra.mxu1 %v9157_v48 }
 0x2ec   : > { %v2880_v39 = vadd.f32 %v2879_v41, %v2831_v4  ;;  %v2928_v20 = vpop.f32.mrf.mxu3  ;;  %v2783_v23 = vpop.f32.mrf.mxu0  ;;  %v10548_v41 = vld [vmem:[#allocation7 + $0x2cc] sm:$0xf0] }
 0x2ed   : > { %v2832_v16 = vpop.f32.mrf.mxu1  ;;  %v9269_v19 = vor.u32 %v10548_v41, %v9268_v38 }
 0x2ee   : > { %v12159_v1 = vadd.f32 %v2928_v20, %v2880_v39  ;;  %v2833_v55 = vadd.f32 %v2832_v16, %v2783_v23  ;;  %v10484_v39 = vld [vmem:[#allocation7 + $0xcc] sm:$0xf0]  ;;  %v9396_v20 = vld [vmem:[#allocation7 + $0x3c0] sm:$0xf] }
 0x2ef   : > { %v10580_v23 = vld [vmem:[#allocation7 + $0x3cc] sm:$0xf0]  ;;  %v9013_v45 = vor.u32 %v10484_v39, %v9012_v24  ;;  %4709 = vmatpush.bf16.msra.mxu2 %v9269_v19 }
 0x2f1   : > { %4611 = vmatpush.bf16.msra.mxu0 %v9013_v45  ;;  %v10544_v45 = vld [vmem:[#allocation7 + $0x2ac] sm:$0xf0] }
 0x2f3   : > { %v2881_v18 = vpop.f32.mrf.mxu2 }
 0x2f4   : > { %v2882_v40 = vadd.f32 %v2881_v18, %v2833_v55  ;;  %v2930_v13 = vpop.f32.mrf.mxu3  ;;  %v2786_v54 = vpop.f32.mrf.mxu0  ;;  %v10516_v18 = vld [vmem:[#allocation7 + $0x1cc] sm:$0xf0] }
 0x2f5   : > { %v2835_v22 = vpop.f32.mrf.mxu1 }
 0x2f6   : > { %v12161_v17 = vadd.f32 %v2930_v13, %v2882_v40  ;;  %v2836_v4 = vadd.f32 %v2835_v22, %v2786_v54  ;;  %v9397_v13 = vor.u32 %v10580_v23, %v9396_v20  ;;  %v13853_v20 = vld [vmem:[#allocation24_spill] sm:$0xff]  ;;  %v13854_v23 = vld [vmem:[#allocation25_spill] sm:$0xff] }
 0x2f7   : > { %2981 = vmatmul.bf16.gmra.mxu0 %v13850_v34  ;;  %3030 = vmatmul.bf16.gmra.mxu1 %v13851_v44 }
 0x2f8   : > { %3079 = vmatmul.bf16.gmra.mxu2 %v13844_v21  ;;  %4758 = vmatpush.bf16.msra.mxu3 %v9397_v13  ;;  %v9140_v21 = vld [vmem:[#allocation7 + $0x1c0] sm:$0xf] }
 0x2f9   : > { %3128 = vmatmul.bf16.gmra.mxu3 %v13845_v7  ;;  %v9141_v22 = vor.u32 %v10516_v18, %v9140_v21  ;;  %v8996_v13 = vld [vmem:[#allocation7 + $0xa0] sm:$0xf] }
 0x2fb   : > { %v2884_v16 = vpop.f32.mrf.mxu2  ;;  %4660 = vmatpush.bf16.msra.mxu1 %v9141_v22 }
 0x2fc   : > { %v2885_v25 = vadd.f32 %v2884_v16, %v2836_v4  ;;  %v2933_v54 = vpop.f32.mrf.mxu3  ;;  %v2788_v55 = vpop.f32.mrf.mxu0  ;;  %v9252_v16 = vld [vmem:[#allocation7 + $0x2a0] sm:$0xf] }
 0x2fd   : > { %v2837_v48 = vpop.f32.mrf.mxu1 }
 0x2fe   : > { %v12167_v7 = vadd.f32 %v2933_v54, %v2885_v25  ;;  %v2838_v40 = vadd.f32 %v2837_v48, %v2788_v55  ;;  %v9253_v25 = vor.u32 %v10544_v45, %v9252_v16  ;;  %v10480_v54 = vld [vmem:[#allocation7 + $0xac] sm:$0xf0]  ;;  %v9380_v55 = vld [vmem:[#allocation7 + $0x3a0] sm:$0xf] }
 0x300   : > { %4710 = vmatpush.bf16.msra.mxu2 %v9253_v25 }
 0x303   : > { %v2886_v38 = vpop.f32.mrf.mxu2 }
 0x304   : > { %v2887_v41 = vadd.f32 %v2886_v38, %v2838_v40  ;;  %v2935_v44 = vpop.f32.mrf.mxu3  ;;  %v2947_v34 = vpop.f32.mrf.mxu0  ;;  %v10512_v38 = vld [vmem:[#allocation7 + $0x1ac] sm:$0xf0] }
 0x305   : > { %v2948_v24 = vadd.f32 %v2947_v34, %v12111_v12  ;;  %v2996_v4 = vpop.f32.mrf.mxu1  ;;  %v10576_v12 = vld [vmem:[#allocation7 + $0x3ac] sm:$0xf0] }
 0x306   : > { %v12170_v39 = vadd.f32 %v2935_v44, %v2887_v41  ;;  %v8997_v44 = vor.u32 %v10480_v54, %v8996_v13  ;;  %v9381_v48 = vor.u32 %v10576_v12, %v9380_v55  ;;  %v10540_v54 = vld [vmem:[#allocation7 + $0x28c] sm:$0xf0]  ;;  %v8980_v55 = vld [vmem:[#allocation7 + $0x80] sm:$0xf] }
 0x307   : > { %v12172_v19 = vadd.f32 %v2996_v4, %v2948_v24  ;;  %3142 = vmatmul.bf16.vlgmr.msrb.gmra.mxu0 %v13853_v20  ;;  %3191 = vmatmul.bf16.vlgmr.msrb.gmra.mxu1 %v13854_v23 }
 0x308   : > { %3240 = vmatmul.bf16.vlgmr.msrb.gmra.mxu2 %v11791_v60  ;;  %4612 = vmatpush.bf16.msra.mxu0 %v8997_v44  ;;  %v9364_v44 = vld [vmem:[#allocation7 + $0x380] sm:$0xf] }
 0x309   : > { %13852 = vst [vmem:[#allocation39_spill] sm:$0xff] %v12172_v19  ;;  %3289 = vmatmul.bf16.vlgmr.msrb.gmra.mxu3 %v11793_v62  ;;  %v9124_v62 = vld [vmem:[#allocation7 + $0x1a0] sm:$0xf] }
 0x30a   : > { %4759 = vmatpush.bf16.msra.mxu3 %v9381_v48  ;;  %v9125_v41 = vor.u32 %v10512_v38, %v9124_v62  ;;  %v10572_v48 = vld [vmem:[#allocation7 + $0x38c] sm:$0xf0] }
 0x30b   : > { %v3045_v34 = vpop.f32.mrf.mxu2  ;;  %v10508_v62 = vld [vmem:[#allocation7 + $0x18c] sm:$0xf0] }
 0x30c   : > { %v3094_v21 = vpop.f32.mrf.mxu3  ;;  %v2949_v18 = vpop.f32.mrf.mxu0  ;;  %4661 = vmatpush.bf16.msra.mxu1 %v9125_v41 }
 0x30d   : > { %v12178_v40 = vadd.f32 %v3094_v21, %v3045_v34  ;;  %v2950_v22 = vadd.f32 %v2949_v18, %v12113_v59  ;;  %v2998_v60 = vpop.f32.mrf.mxu1  ;;  %v9236_v59 = vld [vmem:[#allocation7 + $0x280] sm:$0xf]  ;;  %v10476_v34 = vld [vmem:[#allocation7 + $0x8c] sm:$0xf0]  ;;  %v9365_v18 = vor.u32 %v10572_v48, %v9364_v44 }
 0x30e   : > { %v9237_v12 = vor.u32 %v10540_v54, %v9236_v59  ;;  %v10472_v44 = vld [vmem:[#allocation7 + $0x6c] sm:$0xf0]  ;;  %v9348_v48 = vld [vmem:[#allocation7 + $0x360] sm:$0xf] }
 0x30f   : > { %v12181_v24 = vadd.f32 %v2998_v60, %v2950_v22  ;;  %4760 = vmatpush.bf16.msra.mxu3 %v9365_v18 }
 0x310   : > { %4711 = vmatpush.bf16.msra.mxu2 %v9237_v12  ;;  %v8964_v12 = vld [vmem:[#allocation7 + $0x60] sm:$0xf] }
 0x311   : > { %13855 = vst [vmem:[#allocation42_spill] sm:$0xff] %v12181_v24 }
 0x313   : > { %v3047_v4 = vpop.f32.mrf.mxu2 }
 0x314   : > { %v3096_v20 = vpop.f32.mrf.mxu3  ;;  %v2952_v23 = vpop.f32.mrf.mxu0 }
 0x315   : > { %v12183_v16 = vadd.f32 %v3096_v20, %v3047_v4  ;;  %v2953_v45 = vadd.f32 %v2952_v23, %v12119_v9  ;;  %v3001_v13 = vpop.f32.mrf.mxu1  ;;  %v8981_v9 = vor.u32 %v10476_v34, %v8980_v55  ;;  %v10536_v55 = vld [vmem:[#allocation7 + $0x26c] sm:$0xf0] }
 0x317   : > { %v12186_v25 = vadd.f32 %v3001_v13, %v2953_v45  ;;  %3147 = vmatmul.bf16.gmra.mxu0 %v11659_v26  ;;  %3196 = vmatmul.bf16.gmra.mxu1 %v11661_v27 }
 0x318   : > { %3245 = vmatmul.bf16.gmra.mxu2 %v11805_v56  ;;  %4613 = vmatpush.bf16.msra.mxu0 %v8981_v9 }
 0x319   : > { %13856 = vst [vmem:[#allocation43_spill] sm:$0xff] %v12186_v25  ;;  %3294 = vmatmul.bf16.gmra.mxu3 %v11807_v63  ;;  %v9108_v63 = vld [vmem:[#allocation7 + $0x180] sm:$0xf]  ;;  %v456_v25 = vld [vmem:[%s11601_s0 + $0x170] sm:$0xff] }
 0x31a   : > { %v9109_v38 = vor.u32 %v10508_v62, %v9108_v63 }
 0x31b   : > { %v3050_v21 = vpop.f32.mrf.mxu2 }
 0x31c   : > { %v3099_v22 = vpop.f32.mrf.mxu3  ;;  %v2954_v60 = vpop.f32.mrf.mxu0  ;;  %4662 = vmatpush.bf16.msra.mxu1 %v9109_v38 }
 0x31d   : > { %v12192_v26 = vadd.f32 %v3099_v22, %v3050_v21  ;;  %v2955_v27 = vadd.f32 %v2954_v60, %v12121_v35  ;;  %v3003_v56 = vpop.f32.mrf.mxu1  ;;  %v9220_v35 = vld [vmem:[#allocation7 + $0x260] sm:$0xf]  ;;  %v10568_v21 = vld [vmem:[#allocation7 + $0x36c] sm:$0xf0] }
 0x31e   : > { %v9221_v34 = vor.u32 %v10536_v55, %v9220_v35  ;;  %v9349_v18 = vor.u32 %v10568_v21, %v9348_v48  ;;  %v10532_v35 = vld [vmem:[#allocation7 + $0x24c] sm:$0xf0]  ;;  %v8948_v55 = vld [vmem:[#allocation7 + $0x40] sm:$0xf] }
 0x31f   : > { %v12195_v41 = vadd.f32 %v3003_v56, %v2955_v27  ;;  %v10504_v27 = vld [vmem:[#allocation7 + $0x16c] sm:$0xf0] }
 0x320   : > { %4712 = vmatpush.bf16.msra.mxu2 %v9221_v34  ;;  %4761 = vmatpush.bf16.msra.mxu3 %v9349_v18  ;;  %v10468_v34 = vld [vmem:[#allocation7 + $0x4c] sm:$0xf0] }
 0x321   : > { %13857 = vst [vmem:[#allocation24_spill] sm:$0xff] %v12195_v41  ;;  %v10564_v48 = vld [vmem:[#allocation7 + $0x34c] sm:$0xf0] }
 0x322   : > { %v448_v41 = vld [vmem:[%s11601_s0 + $0x130] sm:$0xff] }
 0x323   : > { %v3052_v4 = vpop.f32.mrf.mxu2  ;;  %v12553_v19 = vpack.c.bf16 %v456_v25, %v448_v41  ;;  %v10470_v25 = vld [vmem:[#allocation7 + $0x64] sm:$0xf] }
 0x324   : > { %v3101_v20 = vpop.f32.mrf.mxu3  ;;  %v2957_v23 = vpop.f32.mrf.mxu0 }
 0x325   : > { %v12197_v45 = vadd.f32 %v3101_v20, %v3052_v4  ;;  %v2958_v13 = vadd.f32 %v2957_v23, %v12127_v30  ;;  %v3006_v59 = vpop.f32.mrf.mxu1  ;;  %v8965_v30 = vor.u32 %v10472_v44, %v8964_v12  ;;  %v9332_v44 = vld [vmem:[#allocation7 + $0x340] sm:$0xf]  ;;  %13910 = vst [vmem:[#allocation100_spill] sm:$0xff] %v12553_v19 }
 0x327   : > { %v12200_v54 = vadd.f32 %v3006_v59, %v2958_v13  ;;  %3152 = vmatmul.bf16.gmra.mxu0 %v11679_v51  ;;  %3201 = vmatmul.bf16.gmra.mxu1 %v11681_v52 }
 0x328   : > { %3250 = vmatmul.bf16.gmra.mxu2 %v11821_v0  ;;  %4614 = vmatpush.bf16.msra.mxu0 %v8965_v30 }
 0x329   : > { %13858 = vst [vmem:[#allocation25_spill] sm:$0xff] %v12200_v54  ;;  %3299 = vmatmul.bf16.gmra.mxu3 %v11823_v5  ;;  %v9092_v5 = vld [vmem:[#allocation7 + $0x160] sm:$0xf]  ;;  %v455_v54 = vld [vmem:[%s11601_s0 + $0x168] sm:$0xff] }
 0x32a   : > { %v9093_v56 = vor.u32 %v10504_v27, %v9092_v5 }
 0x32b   : > { %v3055_v9 = vpop.f32.mrf.mxu2 }
 0x32c   : > { %v3104_v22 = vpop.f32.mrf.mxu3  ;;  %v2959_v60 = vpop.f32.mrf.mxu0  ;;  %4663 = vmatpush.bf16.msra.mxu1 %v9093_v56 }
 0x32d   : > { %v12206_v51 = vadd.f32 %v3104_v22, %v3055_v9  ;;  %v2960_v52 = vadd.f32 %v2959_v60, %v12129_v37  ;;  %v3008_v0 = vpop.f32.mrf.mxu1  ;;  %v9204_v37 = vld [vmem:[#allocation7 + $0x240] sm:$0xf]  ;;  %v9333_v9 = vor.u32 %v10564_v48, %v9332_v44  ;;  %v10500_v22 = vld [vmem:[#allocation7 + $0x14c] sm:$0xf0] }
 0x32e   : > { %v9205_v12 = vor.u32 %v10532_v35, %v9204_v37  ;;  %v10464_v35 = vld [vmem:[#allocation7 + $0x2c] sm:$0xf0] }
 0x32f   : > { %v12209_v63 = vadd.f32 %v3008_v0, %v2960_v52  ;;  %4762 = vmatpush.bf16.msra.mxu3 %v9333_v9 }
 0x330   : > { %4713 = vmatpush.bf16.msra.mxu2 %v9205_v12  ;;  %v10560_v12 = vld [vmem:[#allocation7 + $0x32c] sm:$0xf0] }
 0x331   : > { %13859 = vst [vmem:[#allocation61_spill] sm:$0xff] %v12209_v63 }
 0x333   : > { %v3057_v62 = vpop.f32.mrf.mxu2 }
 0x334   : > { %v3106_v38 = vpop.f32.mrf.mxu3  ;;  %v2962_v4 = vpop.f32.mrf.mxu0 }
 0x335   : > { %v12211_v20 = vadd.f32 %v3106_v38, %v3057_v62  ;;  %v2963_v23 = vadd.f32 %v2962_v4, %v12135_v36  ;;  %v3011_v13 = vpop.f32.mrf.mxu1  ;;  %v8949_v36 = vor.u32 %v10468_v34, %v8948_v55  ;;  %v9316_v55 = vld [vmem:[#allocation7 + $0x320] sm:$0xf] }
 0x336   : > { %v9317_v44 = vor.u32 %v10560_v12, %v9316_v55  ;;  %v10492_v12 = vld [vmem:[#allocation7 + $0x10c] sm:$0xf0] }
 0x337   : > { %v12214_v59 = vadd.f32 %v3011_v13, %v2963_v23  ;;  %3157 = vmatmul.bf16.gmra.mxu0 %v11699_v14  ;;  %3206 = vmatmul.bf16.gmra.mxu1 %v11701_v15  ;;  %v10528_v23 = vld [vmem:[#allocation7 + $0x22c] sm:$0xf0]  ;;  %v8932_v13 = vld [vmem:[#allocation7 + $0x20] sm:$0xf] }
 0x338   : > { %3255 = vmatmul.bf16.gmra.mxu2 %v11837_v29  ;;  %4615 = vmatpush.bf16.msra.mxu0 %v8949_v36  ;;  %v10496_v36 = vld [vmem:[#allocation7 + $0x12c] sm:$0xf0] }
 0x339   : > { %13860 = vst [vmem:[#allocation62_spill] sm:$0xff] %v12214_v59  ;;  %3304 = vmatmul.bf16.gmra.mxu3 %v11839_v32  ;;  %v9076_v32 = vld [vmem:[#allocation7 + $0x140] sm:$0xf] }
 0x33a   : > { %v9077_v60 = vor.u32 %v10500_v22, %v9076_v32  ;;  %4763 = vmatpush.bf16.msra.mxu3 %v9317_v44 }
 0x33b   : > { %v3060_v21 = vpop.f32.mrf.mxu2 }
 0x33c   : > { %v3109_v30 = vpop.f32.mrf.mxu3  ;;  %v2964_v18 = vpop.f32.mrf.mxu0  ;;  %4664 = vmatpush.bf16.msra.mxu1 %v9077_v60 }
 0x33d   : > { %v12220_v14 = vadd.f32 %v3109_v30, %v3060_v21  ;;  %v2965_v15 = vadd.f32 %v2964_v18, %v12137_v31  ;;  %v3013_v29 = vpop.f32.mrf.mxu1  ;;  %v9188_v31 = vld [vmem:[#allocation7 + $0x220] sm:$0xf] }
 0x33e   : > { %v9189_v37 = vor.u32 %v10528_v23, %v9188_v31  ;;  %v9300_v31 = vld [vmem:[#allocation7 + $0x300] sm:$0xf]  ;;  %v10556_v23 = vld [vmem:[#allocation7 + $0x30c] sm:$0xf0] }
 0x33f   : > { %v12223_v52 = vadd.f32 %v3013_v29, %v2965_v15 }
 0x340   : > { %4714 = vmatpush.bf16.msra.mxu2 %v9189_v37  ;;  %v9301_v37 = vor.u32 %v10556_v23, %v9300_v31 }
 0x341   : > { %13861 = vst [vmem:[#allocation63_spill] sm:$0xff] %v12223_v52 }
 0x342   : > { %4764 = vmatpush.bf16.msra.mxu3 %v9301_v37 }
 0x343   : > { %v3062_v0 = vpop.f32.mrf.mxu2 }
 0x344   : > { %v3111_v5 = vpop.f32.mrf.mxu3  ;;  %v2967_v27 = vpop.f32.mrf.mxu0 }
 0x345   : > { %v12225_v56 = vadd.f32 %v3111_v5, %v3062_v0  ;;  %v2968_v62 = vadd.f32 %v2967_v27, %v12143_v57  ;;  %v3016_v38 = vpop.f32.mrf.mxu1  ;;  %v8933_v57 = vor.u32 %v10464_v35, %v8932_v13  ;;  %v10524_v5 = vld [vmem:[#allocation7 + $0x20c] sm:$0xf0]  ;;  %v8916_v27 = vld [vmem:[#allocation7] sm:$0xf] }
 0x347   : > { %v12228_v4 = vadd.f32 %v3016_v38, %v2968_v62  ;;  %3162 = vmatmul.bf16.gmra.mxu0 %v11719_v42  ;;  %3211 = vmatmul.bf16.gmra.mxu1 %v11721_v43  ;;  %v10460_v38 = vld [vmem:[#allocation7 + $0xc] sm:$0xf0] }
 0x348   : > { %3260 = vmatmul.bf16.gmra.mxu2 %v11853_v61  ;;  %4616 = vmatpush.bf16.msra.mxu0 %v8933_v57 }
 0x349   : > { %13862 = vst [vmem:[#allocation64_spill] sm:$0xff] %v12228_v4  ;;  %3309 = vmatmul.bf16.gmra.mxu3 %v11855_v3  ;;  %v9060_v3 = vld [vmem:[#allocation7 + $0x120] sm:$0xf]  ;;  %v440_v4 = vld [vmem:[%s11601_s0 + $0xf0] sm:$0xff] }
 0x34a   : > { %v9061_v9 = vor.u32 %v10496_v36, %v9060_v3 }
 0x34b   : > { %v3065_v34 = vpop.f32.mrf.mxu2 }
 0x34c   : > { %v3114_v48 = vpop.f32.mrf.mxu3  ;;  %v2969_v21 = vpop.f32.mrf.mxu0  ;;  %4665 = vmatpush.bf16.msra.mxu1 %v9061_v9  ;;  %v10680_v9 = vld [vmem:[#allocation7 + $0x6ec] sm:$0xf0] }
 0x34d   : > { %v12234_v42 = vadd.f32 %v3114_v48, %v3065_v34  ;;  %v2970_v43 = vadd.f32 %v2969_v21, %v12145_v50  ;;  %v3018_v61 = vpop.f32.mrf.mxu1  ;;  %v9172_v50 = vld [vmem:[#allocation7 + $0x200] sm:$0xf] }
 0x34e   : > { %v9173_v62 = vor.u32 %v10524_v5, %v9172_v50 }
 0x34f   : > { %v12237_v30 = vadd.f32 %v3018_v61, %v2970_v43 }
 0x350   : > { %4715 = vmatpush.bf16.msra.mxu2 %v9173_v62 }
 0x351   : > { %13863 = vst [vmem:[#allocation65_spill] sm:$0xff] %v12237_v30  ;;  %v432_v30 = vld [vmem:[%s11601_s0 + $0xb0] sm:$0xff] }
 0x352   : > { %v12527_v59 = vpack.c.bf16 %v440_v4, %v432_v30  ;;  %v10474_v4 = vld [vmem:[#allocation7 + $0x84] sm:$0xf] }
 0x353   : > { %v3067_v18 = vpop.f32.mrf.mxu2 }
 0x354   : > { %v3116_v15 = vpop.f32.mrf.mxu3  ;;  %v2972_v29 = vpop.f32.mrf.mxu0  ;;  %13904 = vst [vmem:[#allocation98_spill] sm:$0xff] %v12527_v59 }
 0x355   : > { %v12239_v32 = vadd.f32 %v3116_v15, %v3067_v18  ;;  %v2973_v22 = vadd.f32 %v2972_v29, %v12151_v2  ;;  %v3021_v60 = vpop.f32.mrf.mxu1  ;;  %v8917_v2 = vor.u32 %v10460_v38, %v8916_v27  ;;  %v9540_v18 = vld [vmem:[#allocation7 + $0x4e0] sm:$0xf]  ;;  %v10616_v29 = vld [vmem:[#allocation7 + $0x4ec] sm:$0xf0] }
 0x356   : > { %v10648_v38 = vld [vmem:[#allocation7 + $0x5ec] sm:$0xf0] }
 0x357   : > { %v12242_v0 = vadd.f32 %v3021_v60, %v2973_v22  ;;  %3167 = vmatmul.bf16.gmra.mxu0 %v11739_v10  ;;  %3216 = vmatmul.bf16.gmra.mxu1 %v11741_v11  ;;  %v9924_v22 = vld [vmem:[#allocation7 + $0x7e0] sm:$0xf]  ;;  %v10712_v60 = vld [vmem:[#allocation7 + $0x7ec] sm:$0xf0] }
 0x358   : > { %3265 = vmatmul.bf16.gmra.mxu2 %v11869_v28  ;;  %4617 = vmatpush.bf16.msra.mxu0 %v8917_v2  ;;  %v9925_v5 = vor.u32 %v10712_v60, %v9924_v22  ;;  %v9652_v22 = vld [vmem:[#allocation7 + $0x5c0] sm:$0xf]  ;;  %v10644_v60 = vld [vmem:[#allocation7 + $0x5cc] sm:$0xf0] }
 0x359   : > { %13864 = vst [vmem:[#allocation66_spill] sm:$0xff] %v12242_v0  ;;  %3314 = vmatmul.bf16.gmra.mxu3 %v11871_v33  ;;  %v9044_v33 = vld [vmem:[#allocation7 + $0x100] sm:$0xf] }
 0x35a   : > { %v9045_v34 = vor.u32 %v10492_v12, %v9044_v33  ;;  %4953 = vmatpush.bf16.msrb.mxu3 %v9925_v5  ;;  %v13870_v33 = vld [vmem:[#allocation45_spill] sm:$0xff] }
 0x35b   : > { %v3070_v13 = vpop.f32.mrf.mxu2  ;;  %v9780_v12 = vld [vmem:[#allocation7 + $0x6c0] sm:$0xf] }
 0x35c   : > { %v3119_v35 = vpop.f32.mrf.mxu3  ;;  %v2974_v55 = vpop.f32.mrf.mxu0  ;;  %4666 = vmatpush.bf16.msra.mxu1 %v9045_v34  ;;  %v10676_v34 = vld [vmem:[#allocation7 + $0x6cc] sm:$0xf0]  ;;  %v410_v5 = vld [vmem:[%s11601_s0] sm:$0xff] }
 0x35d   : > { %v12248_v10 = vadd.f32 %v3119_v35, %v3070_v13  ;;  %v2975_v11 = vadd.f32 %v2974_v55, %v12153_v6  ;;  %v3023_v28 = vpop.f32.mrf.mxu1  ;;  %v9796_v6 = vld [vmem:[#allocation7 + $0x6e0] sm:$0xf] }
 0x35e   : > { %v9797_v15 = vor.u32 %v10680_v9, %v9796_v6 }
 0x35f   : > { %v12251_v57 = vadd.f32 %v3023_v28, %v2975_v11 }
 0x360   : > { %4904 = vmatpush.bf16.msrb.mxu2 %v9797_v15 }
 0x361   : > { %13865 = vst [vmem:[#allocation67_spill] sm:$0xff] %v12251_v57 }
 0x363   : > { %v3072_v44 = vpop.f32.mrf.mxu2 }
 0x364   : > { %v3121_v48 = vpop.f32.mrf.mxu3  ;;  %v2977_v21 = vpop.f32.mrf.mxu0 }
 0x365   : > { %v12253_v43 = vadd.f32 %v3121_v48, %v3072_v44  ;;  %v2978_v61 = vadd.f32 %v2977_v21, %v12159_v1  ;;  %v3026_v3 = vpop.f32.mrf.mxu1  ;;  %v9541_v1 = vor.u32 %v10616_v29, %v9540_v18  ;;  %v9524_v44 = vld [vmem:[#allocation7 + $0x4c0] sm:$0xf]  ;;  %v9781_v48 = vor.u32 %v10676_v34, %v9780_v12  ;;  %v10612_v21 = vld [vmem:[#allocation7 + $0x4cc] sm:$0xf0] }
 0x366   : > { %v9525_v6 = vor.u32 %v10612_v21, %v9524_v44  ;;  %v10672_v21 = vld [vmem:[#allocation7 + $0x6ac] sm:$0xf0] }
 0x367   : > { %v12256_v36 = vadd.f32 %v3026_v3, %v2978_v61  ;;  %3172 = vmatmul.bf16.gmra.mxu0 %v11759_v46  ;;  %3221 = vmatmul.bf16.gmra.mxu1 %v11761_v47  ;;  %v9908_v61 = vld [vmem:[#allocation7 + $0x7c0] sm:$0xf]  ;;  %v10708_v3 = vld [vmem:[#allocation7 + $0x7cc] sm:$0xf0] }
 0x368   : > { %3270 = vmatmul.bf16.gmra.mxu2 %v13848_v8  ;;  %4806 = vmatpush.bf16.msrb.mxu0 %v9541_v1  ;;  %v9909_v9 = vor.u32 %v10708_v3, %v9908_v61  ;;  %v9653_v1 = vor.u32 %v10644_v60, %v9652_v22  ;;  %v9508_v61 = vld [vmem:[#allocation7 + $0x4a0] sm:$0xf] }
 0x369   : > { %13866 = vst [vmem:[#allocation68_spill] sm:$0xff] %v12256_v36  ;;  %3319 = vmatmul.bf16.gmra.mxu3 %v13849_v53  ;;  %v9668_v53 = vld [vmem:[#allocation7 + $0x5e0] sm:$0xf]  ;;  %4905 = vmatpush.bf16.msrb.mxu2 %v9781_v48  ;;  %v424_v36 = vld [vmem:[%s11601_s0 + $0x70] sm:$0xff] }
 0x36a   : > { %v9669_v23 = vor.u32 %v10648_v38, %v9668_v53  ;;  %4954 = vmatpush.bf16.msrb.mxu3 %v9909_v9  ;;  %v420_v53 = vld [vmem:[%s11601_s0 + $0x50] sm:$0xff]  ;;  %v413_v38 = vld [vmem:[%s11601_s0 + $0x18] sm:$0xff]  ;;  %v9764_v48 = vld [vmem:[#allocation7 + $0x6a0] sm:$0xf] }
 0x36b   : > { %v3075_v50 = vpop.f32.mrf.mxu2  ;;  %v9765_v3 = vor.u32 %v10672_v21, %v9764_v48  ;;  %v10704_v9 = vld [vmem:[#allocation7 + $0x7ac] sm:$0xf0] }
 0x36c   : > { %v3124_v27 = vpop.f32.mrf.mxu3  ;;  %v2979_v62 = vpop.f32.mrf.mxu0  ;;  %4855 = vmatpush.bf16.msrb.mxu1 %v9669_v23  ;;  %4807 = vmatpush.bf16.msrb.mxu0 %v9525_v6  ;;  %v421_v23 = vld [vmem:[%s11601_s0 + $0x58] sm:$0xff]  ;;  %v9892_v6 = vld [vmem:[#allocation7 + $0x7a0] sm:$0xf] }
 0x36d   : > { %v12262_v46 = vadd.f32 %v3124_v27, %v3075_v50  ;;  %v2980_v47 = vadd.f32 %v2979_v62, %v12161_v17  ;;  %v3028_v8 = vpop.f32.mrf.mxu1  ;;  %v13869_v17 = vld [vmem:[#allocation44_spill] sm:$0xff]  ;;  %v418_v27 = vld [vmem:[%s11601_s0 + $0x40] sm:$0xff]  ;;  %v411_v62 = vld [vmem:[%s11601_s0 + $0x8] sm:$0xff]  ;;  %v12298_v34 = vpack.c.bf16 %v421_v23, %v413_v38  ;;  %4906 = vmatpush.bf16.msrb.mxu2 %v9765_v3 }
 0x36e   : > { %v434_v38 = vld [vmem:[%s11601_s0 + $0xc0] sm:$0xff]  ;;  %v427_v23 = vld [vmem:[%s11601_s0 + $0x88] sm:$0xff] }
 0x36f   : > { %v12265_v31 = vadd.f32 %v3028_v8, %v2980_v47  ;;  %v419_v47 = vld [vmem:[%s11601_s0 + $0x48] sm:$0xff]  ;;  %v412_v8 = vld [vmem:[%s11601_s0 + $0x10] sm:$0xff]  ;;  %13873 = vst [vmem:[#allocation71_spill] sm:$0xff] %v12298_v34 }
 0x370   : > { %4856 = vmatpush.bf16.msrb.mxu1 %v9653_v1 }
 0x371   : > { %13867 = vst [vmem:[#allocation69_spill] sm:$0xff] %v12265_v31 }
 0x373   : > { %v3077_v13 = vpop.f32.mrf.mxu2 }
 0x374   : > { %v3126_v2 = vpop.f32.mrf.mxu3  ;;  %v2982_v37 = vpop.f32.mrf.mxu0 }
 0x375   : > { %v12267_v35 = vadd.f32 %v3126_v2, %v3077_v13  ;;  %v2983_v55 = vadd.f32 %v2982_v37, %v12167_v7  ;;  %v3031_v11 = vpop.f32.mrf.mxu1 }
 0x377   : > { %v12270_v28 = vadd.f32 %v3031_v11, %v2983_v55  ;;  %3177 = vmatmul.bf16.gmra.mxu0 %v13811_v49  ;;  %3226 = vmatmul.bf16.gmra.mxu1 %v13812_v58  ;;  %v12291_v55 = vpack.c.bf16 %v419_v47, %v411_v62  ;;  %v12293_v11 = vpack.c.bf16 %v420_v53, %v412_v8  ;;  %v10640_v62 = vld [vmem:[#allocation7 + $0x5ac] sm:$0xf0]  ;;  %v426_v53 = vld [vmem:[%s11601_s0 + $0x80] sm:$0xff] }
 0x378   : > { %3275 = vmatmul.bf16.gmra.mxu2 %v13869_v17 }
 0x379   : > { %13868 = vst [vmem:[#allocation70_spill] sm:$0xff] %v12270_v28  ;;  %3324 = vmatmul.bf16.gmra.mxu3 %v13870_v33  ;;  %v532_v28 = vld [vmem:[%s11601_s0 + $0x3d0] sm:$0xff] }
 0x37a   : > { %13872 = vst [vmem:[#allocation45_spill] sm:$0xff] %v12293_v11 }
 0x37b   : > { %v3080_v7 = vpop.f32.mrf.mxu2 }
 0x37c   : > { %v3129_v49 = vpop.f32.mrf.mxu3  ;;  %v2984_v58 = vpop.f32.mrf.mxu0 }
 0x37d   : > { %v12276_v18 = vadd.f32 %v3129_v49, %v3080_v7  ;;  %v2985_v15 = vadd.f32 %v2984_v58, %v12170_v39  ;;  %v3033_v29 = vpop.f32.mrf.mxu1  ;;  %v12289_v39 = vpack.c.bf16 %v418_v27, %v410_v5  ;;  %v10608_v7 = vld [vmem:[#allocation7 + $0x4ac] sm:$0xf0]  ;;  %v9893_v58 = vor.u32 %v10704_v9, %v9892_v6  ;;  %v9636_v27 = vld [vmem:[#allocation7 + $0x5a0] sm:$0xf] }
 0x37e   : > { %v9509_v49 = vor.u32 %v10608_v7, %v9508_v61  ;;  %v9637_v8 = vor.u32 %v10640_v62, %v9636_v27  ;;  %v10700_v27 = vld [vmem:[#allocation7 + $0x78c] sm:$0xf0] }
 0x37f   : > { %v12279_v50 = vadd.f32 %v3033_v29, %v2985_v15  ;;  %4955 = vmatpush.bf16.msrb.mxu3 %v9893_v58 }
 0x380   : > { %4808 = vmatpush.bf16.msrb.mxu0 %v9509_v49  ;;  %4857 = vmatpush.bf16.msrb.mxu1 %v9637_v8 }
 0x381   : > { %13871 = vst [vmem:[#allocation44_spill] sm:$0xff] %v12279_v50 }
 0x383   : > { %v3082_v13 = vpop.f32.mrf.mxu2 }
 0x384   : > { %v3131_v2 = vpop.f32.mrf.mxu3  ;;  %v3143_v37 = vpop.f32.mrf.mxu0 }
 0x385   : > { %v12295_v17 = vadd.f32 %v3131_v2, %v3082_v13  ;;  %v3144_v33 = vadd.f32 %v3143_v37, %v12178_v40  ;;  %v3192_v12 = vpop.f32.mrf.mxu1  ;;  %v435_v13 = vld [vmem:[%s11601_s0 + $0xc8] sm:$0xff]  ;;  %v428_v2 = vld [vmem:[%s11601_s0 + $0x90] sm:$0xff] }
 0x386   : > { %v436_v37 = vld [vmem:[%s11601_s0 + $0xd0] sm:$0xff]  ;;  %v12317_v3 = vpack.c.bf16 %v435_v13, %v427_v23 }
 0x387   : > { %v3193_v44 = vadd.f32 %v3192_v12, %v3144_v33  ;;  %4618 = vmatmul.bf16.vlgmr.msra.gmra.mxu0 %v12289_v39  ;;  %4667 = vmatmul.bf16.vlgmr.msra.gmra.mxu1 %v12291_v55  ;;  %v429_v33 = vld [vmem:[%s11601_s0 + $0x98] sm:$0xff]  ;;  %v12319_v7 = vpack.c.bf16 %v436_v37, %v428_v2 }
 0x388   : > { %4716 = vmatmul.bf16.vlgmr.msra.gmra.mxu2 %v12293_v11 }
 0x389   : > { %4765 = vmatmul.bf16.vlgmr.msra.gmra.mxu3 %v12298_v34 }
 0x38b   : > { %v3241_v40 = vpop.f32.mrf.mxu2 }
 0x38c   : > { %v3242_v15 = vadd.f32 %v3241_v40, %v3193_v44  ;;  %v3290_v29 = vpop.f32.mrf.mxu3  ;;  %v3145_v22 = vpop.f32.mrf.mxu0  ;;  %v12315_v44 = vpack.c.bf16 %v434_v38, %v426_v53 }
 0x38d   : > { %v3146_v60 = vadd.f32 %v3145_v22, %v12183_v16  ;;  %v3194_v1 = vpop.f32.mrf.mxu1  ;;  %v437_v16 = vld [vmem:[%s11601_s0 + $0xd8] sm:$0xff]  ;;  %v9492_v22 = vld [vmem:[#allocation7 + $0x480] sm:$0xf] }
 0x38e   : > { %v12305_v5 = vadd.f32 %v3290_v29, %v3242_v15  ;;  %v12322_v40 = vpack.c.bf16 %v437_v16, %v429_v33  ;;  %v9748_v15 = vld [vmem:[#allocation7 + $0x680] sm:$0xf]  ;;  %v10668_v29 = vld [vmem:[#allocation7 + $0x68c] sm:$0xf0] }
 0x38f   : > { %v3195_v47 = vadd.f32 %v3194_v1, %v3146_v60  ;;  %v9749_v60 = vor.u32 %v10668_v29, %v9748_v15  ;;  %v10604_v1 = vld [vmem:[#allocation7 + $0x48c] sm:$0xf0]  ;;  %v9620_v33 = vld [vmem:[#allocation7 + $0x580] sm:$0xf]  ;;  %v445_v29 = vld [vmem:[%s11601_s0 + $0x118] sm:$0xff] }
 0x390   : > { %13874 = vst [vmem:[#allocation72_spill] sm:$0xff] %v12305_v5  ;;  %v10636_v16 = vld [vmem:[#allocation7 + $0x58c] sm:$0xf0] }
 0x391   : > { %4907 = vmatpush.bf16.msrb.mxu2 %v9749_v60  ;;  %v452_v15 = vld [vmem:[%s11601_s0 + $0x150] sm:$0xff] }
 0x392   : > { %v516_v5 = vld [vmem:[%s11601_s0 + $0x350] sm:$0xff] }
 0x393   : > { %v3243_v12 = vpop.f32.mrf.mxu2 }
 0x394   : > { %v3244_v48 = vadd.f32 %v3243_v12, %v3195_v47  ;;  %v3292_v21 = vpop.f32.mrf.mxu3  ;;  %v3148_v61 = vpop.f32.mrf.mxu0  ;;  %v9493_v47 = vor.u32 %v10604_v1, %v9492_v22 }
 0x395   : > { %v3149_v6 = vadd.f32 %v3148_v61, %v12192_v26  ;;  %v3197_v9 = vpop.f32.mrf.mxu1  ;;  %v9876_v26 = vld [vmem:[#allocation7 + $0x780] sm:$0xf] }
 0x396   : > { %v12324_v49 = vadd.f32 %v3292_v21, %v3244_v48  ;;  %v9877_v8 = vor.u32 %v10700_v27, %v9876_v26  ;;  %4809 = vmatpush.bf16.msrb.mxu0 %v9493_v47  ;;  %v9621_v48 = vor.u32 %v10636_v16, %v9620_v33  ;;  %v442_v21 = vld [vmem:[%s11601_s0 + $0x100] sm:$0xff]  ;;  %v10664_v33 = vld [vmem:[#allocation7 + $0x66c] sm:$0xf0] }
 0x397   : > { %v3198_v58 = vadd.f32 %v3197_v9, %v3149_v6  ;;  %4623 = vmatmul.bf16.gmra.mxu0 %v12315_v44  ;;  %4672 = vmatmul.bf16.gmra.mxu1 %v12317_v3  ;;  %v450_v61 = vld [vmem:[%s11601_s0 + $0x140] sm:$0xff]  ;;  %v443_v6 = vld [vmem:[%s11601_s0 + $0x108] sm:$0xff] }
 0x398   : > { %13875 = vst [vmem:[#allocation73_spill] sm:$0xff] %v12324_v49  ;;  %4721 = vmatmul.bf16.gmra.mxu2 %v12319_v7  ;;  %4956 = vmatpush.bf16.msrb.mxu3 %v9877_v8  ;;  %v451_v9 = vld [vmem:[%s11601_s0 + $0x148] sm:$0xff]  ;;  %v12341_v60 = vpack.c.bf16 %v450_v61, %v442_v21  ;;  %v9476_v16 = vld [vmem:[#allocation7 + $0x460] sm:$0xf]  ;;  %v10696_v21 = vld [vmem:[#allocation7 + $0x76c] sm:$0xf0] }
 0x399   : > { %4770 = vmatmul.bf16.gmra.mxu3 %v12322_v40  ;;  %4858 = vmatpush.bf16.msrb.mxu1 %v9621_v48  ;;  %v10600_v48 = vld [vmem:[#allocation7 + $0x46c] sm:$0xf0] }
 0x39b   : > { %v3246_v62 = vpop.f32.mrf.mxu2 }
 0x39c   : > { %v3247_v53 = vadd.f32 %v3246_v62, %v3198_v58  ;;  %v3295_v38 = vpop.f32.mrf.mxu3  ;;  %v3150_v23 = vpop.f32.mrf.mxu0  ;;  %v444_v58 = vld [vmem:[%s11601_s0 + $0x110] sm:$0xff]  ;;  %v12343_v62 = vpack.c.bf16 %v451_v9, %v443_v6  ;;  %v9477_v6 = vor.u32 %v10600_v48, %v9476_v16  ;;  %v467_v16 = vld [vmem:[%s11601_s0 + $0x1c8] sm:$0xff] }
 0x39d   : > { %v3151_v13 = vadd.f32 %v3150_v23, %v12197_v45  ;;  %v3199_v2 = vpop.f32.mrf.mxu1  ;;  %v453_v45 = vld [vmem:[%s11601_s0 + $0x158] sm:$0xff]  ;;  %v12345_v47 = vpack.c.bf16 %v452_v15, %v444_v58  ;;  %v460_v48 = vld [vmem:[%s11601_s0 + $0x190] sm:$0xff] }
 0x39e   : > { %v12331_v37 = vadd.f32 %v3295_v38, %v3247_v53  ;;  %v12348_v38 = vpack.c.bf16 %v453_v45, %v445_v29  ;;  %4810 = vmatpush.bf16.msrb.mxu0 %v9477_v6 }
 0x39f   : > { %v3200_v12 = vadd.f32 %v3199_v2, %v3151_v13  ;;  %v9732_v2 = vld [vmem:[#allocation7 + $0x660] sm:$0xf] }
 0x3a0   : > { %13876 = vst [vmem:[#allocation74_spill] sm:$0xff] %v12331_v37  ;;  %v500_v37 = vld [vmem:[%s11601_s0 + $0x2d0] sm:$0xff] }
 0x3a3   : > { %v3248_v22 = vpop.f32.mrf.mxu2 }
 0x3a4   : > { %v3249_v1 = vadd.f32 %v3248_v22, %v3200_v12  ;;  %v3297_v26 = vpop.f32.mrf.mxu3  ;;  %v3153_v27 = vpop.f32.mrf.mxu0  ;;  %v9733_v12 = vor.u32 %v10664_v33, %v9732_v2  ;;  %v466_v2 = vld [vmem:[%s11601_s0 + $0x1c0] sm:$0xff]  ;;  %v459_v33 = vld [vmem:[%s11601_s0 + $0x188] sm:$0xff] }
 0x3a5   : > { %v3154_v8 = vadd.f32 %v3153_v27, %v12206_v51  ;;  %v3202_v53 = vpop.f32.mrf.mxu1  ;;  %v9860_v51 = vld [vmem:[#allocation7 + $0x760] sm:$0xf]  ;;  %v10632_v27 = vld [vmem:[#allocation7 + $0x56c] sm:$0xf0] }
 0x3a6   : > { %v12350_v23 = vadd.f32 %v3297_v26, %v3249_v1  ;;  %v9861_v9 = vor.u32 %v10696_v21, %v9860_v51  ;;  %4908 = vmatpush.bf16.msrb.mxu2 %v9733_v12  ;;  %v9604_v26 = vld [vmem:[#allocation7 + $0x560] sm:$0xf]  ;;  %v468_v51 = vld [vmem:[%s11601_s0 + $0x1d0] sm:$0xff]  ;;  %v461_v12 = vld [vmem:[%s11601_s0 + $0x198] sm:$0xff] }
 0x3a7   : > { %v3203_v13 = vadd.f32 %v3202_v53, %v3154_v8  ;;  %4628 = vmatmul.bf16.gmra.mxu0 %v12341_v60  ;;  %4677 = vmatmul.bf16.gmra.mxu1 %v12343_v62  ;;  %v9605_v53 = vor.u32 %v10632_v27, %v9604_v26 }
 0x3a8   : > { %13877 = vst [vmem:[#allocation75_spill] sm:$0xff] %v12350_v23  ;;  %4726 = vmatmul.bf16.gmra.mxu2 %v12345_v47  ;;  %4957 = vmatpush.bf16.msrb.mxu3 %v9861_v9 }
 0x3a9   : > { %4775 = vmatmul.bf16.gmra.mxu3 %v12348_v38  ;;  %4859 = vmatpush.bf16.msrb.mxu1 %v9605_v53 }
 0x3ab   : > { %v3251_v61 = vpop.f32.mrf.mxu2 }
 0x3ac   : > { %v3252_v58 = vadd.f32 %v3251_v61, %v3203_v13  ;;  %v3300_v15 = vpop.f32.mrf.mxu3  ;;  %v3155_v29 = vpop.f32.mrf.mxu0  ;;  %v458_v13 = vld [vmem:[%s11601_s0 + $0x180] sm:$0xff] }
 0x3ad   : > { %v3156_v45 = vadd.f32 %v3155_v29, %v12211_v20  ;;  %v3204_v22 = vpop.f32.mrf.mxu1  ;;  %v469_v20 = vld [vmem:[%s11601_s0 + $0x1d8] sm:$0xff]  ;;  %v12367_v61 = vpack.c.bf16 %v466_v2, %v458_v13  ;;  %v12371_v29 = vpack.c.bf16 %v468_v51, %v460_v48  ;;  %v10660_v13 = vld [vmem:[#allocation7 + $0x64c] sm:$0xf0]  ;;  %v9460_v2 = vld [vmem:[#allocation7 + $0x440] sm:$0xf] }
 0x3ae   : > { %v12357_v1 = vadd.f32 %v3300_v15, %v3252_v58  ;;  %v12369_v15 = vpack.c.bf16 %v467_v16, %v459_v33  ;;  %v12374_v26 = vpack.c.bf16 %v469_v20, %v461_v12  ;;  %v10596_v16 = vld [vmem:[#allocation7 + $0x44c] sm:$0xf0] }
 0x3af   : > { %v3205_v8 = vadd.f32 %v3204_v22, %v3156_v45  ;;  %v10692_v48 = vld [vmem:[#allocation7 + $0x74c] sm:$0xf0]  ;;  %v9461_v12 = vor.u32 %v10596_v16, %v9460_v2 }
 0x3b0   : > { %13878 = vst [vmem:[#allocation76_spill] sm:$0xff] %v12357_v1  ;;  %v484_v1 = vld [vmem:[%s11601_s0 + $0x250] sm:$0xff] }
 0x3b1   : > { %4811 = vmatpush.bf16.msrb.mxu0 %v9461_v12 }
 0x3b3   : > { %v3253_v21 = vpop.f32.mrf.mxu2 }
 0x3b4   : > { %v3254_v6 = vadd.f32 %v3253_v21, %v3205_v8  ;;  %v3302_v9 = vpop.f32.mrf.mxu3  ;;  %v3158_v58 = vpop.f32.mrf.mxu0  ;;  %v9716_v8 = vld [vmem:[#allocation7 + $0x640] sm:$0xf] }
 0x3b5   : > { %v3159_v45 = vadd.f32 %v3158_v58, %v12220_v14  ;;  %v3207_v22 = vpop.f32.mrf.mxu1  ;;  %v9717_v33 = vor.u32 %v10660_v13, %v9716_v8  ;;  %v9844_v14 = vld [vmem:[#allocation7 + $0x740] sm:$0xf]  ;;  %v10628_v13 = vld [vmem:[#allocation7 + $0x54c] sm:$0xf0] }
 0x3b6   : > { %v12376_v27 = vadd.f32 %v3302_v9, %v3254_v6  ;;  %v9845_v20 = vor.u32 %v10692_v48, %v9844_v14  ;;  %v9588_v8 = vld [vmem:[#allocation7 + $0x540] sm:$0xf]  ;;  %v475_v48 = vld [vmem:[%s11601_s0 + $0x208] sm:$0xff] }
 0x3b7   : > { %v3208_v53 = vadd.f32 %v3207_v22, %v3159_v45  ;;  %4633 = vmatmul.bf16.gmra.mxu0 %v12367_v61  ;;  %4682 = vmatmul.bf16.gmra.mxu1 %v12369_v15  ;;  %v9589_v16 = vor.u32 %v10628_v13, %v9588_v8  ;;  %v482_v14 = vld [vmem:[%s11601_s0 + $0x240] sm:$0xff] }
 0x3b8   : > { %13879 = vst [vmem:[#allocation77_spill] sm:$0xff] %v12376_v27  ;;  %4731 = vmatmul.bf16.gmra.mxu2 %v12371_v29  ;;  %4958 = vmatpush.bf16.msrb.mxu3 %v9845_v20  ;;  %v476_v27 = vld [vmem:[%s11601_s0 + $0x210] sm:$0xff] }
 0x3b9   : > { %4780 = vmatmul.bf16.gmra.mxu3 %v12374_v26  ;;  %4909 = vmatpush.bf16.msrb.mxu2 %v9717_v33  ;;  %v477_v33 = vld [vmem:[%s11601_s0 + $0x218] sm:$0xff] }
 0x3ba   : > { %4860 = vmatpush.bf16.msrb.mxu1 %v9589_v16 }
 0x3bb   : > { %v3256_v51 = vpop.f32.mrf.mxu2 }
 0x3bc   : > { %v3257_v21 = vadd.f32 %v3256_v51, %v3208_v53  ;;  %v3305_v6 = vpop.f32.mrf.mxu3  ;;  %v3160_v9 = vpop.f32.mrf.mxu0  ;;  %v474_v53 = vld [vmem:[%s11601_s0 + $0x200] sm:$0xff]  ;;  %v483_v51 = vld [vmem:[%s11601_s0 + $0x248] sm:$0xff] }
 0x3bd   : > { %v3161_v58 = vadd.f32 %v3160_v9, %v12225_v56  ;;  %v3209_v45 = vpop.f32.mrf.mxu1  ;;  %v485_v56 = vld [vmem:[%s11601_s0 + $0x258] sm:$0xff]  ;;  %v12393_v23 = vpack.c.bf16 %v482_v14, %v474_v53  ;;  %v10656_v53 = vld [vmem:[#allocation7 + $0x62c] sm:$0xf0] }
 0x3be   : > { %v12383_v22 = vadd.f32 %v3305_v6, %v3257_v21  ;;  %v12395_v6 = vpack.c.bf16 %v483_v51, %v475_v48  ;;  %v12400_v8 = vpack.c.bf16 %v485_v56, %v477_v33  ;;  %v10592_v14 = vld [vmem:[#allocation7 + $0x42c] sm:$0xf0] }
 0x3bf   : > { %v3210_v2 = vadd.f32 %v3209_v45, %v3161_v58  ;;  %v10688_v48 = vld [vmem:[#allocation7 + $0x72c] sm:$0xf0] }
 0x3c0   : > { %13880 = vst [vmem:[#allocation78_spill] sm:$0xff] %v12383_v22  ;;  %v12397_v22 = vpack.c.bf16 %v484_v1, %v476_v27  ;;  %v9444_v1 = vld [vmem:[#allocation7 + $0x420] sm:$0xf] }
 0x3c1   : > { %v9445_v33 = vor.u32 %v10592_v14, %v9444_v1 }
 0x3c3   : > { %v3258_v9 = vpop.f32.mrf.mxu2  ;;  %4812 = vmatpush.bf16.msrb.mxu0 %v9445_v33 }
 0x3c4   : > { %v3259_v12 = vadd.f32 %v3258_v9, %v3210_v2  ;;  %v3307_v20 = vpop.f32.mrf.mxu3  ;;  %v3163_v21 = vpop.f32.mrf.mxu0  ;;  %v9700_v2 = vld [vmem:[#allocation7 + $0x620] sm:$0xf] }
 0x3c5   : > { %v3164_v58 = vadd.f32 %v3163_v21, %v12234_v42  ;;  %v3212_v45 = vpop.f32.mrf.mxu1  ;;  %v9701_v27 = vor.u32 %v10656_v53, %v9700_v2  ;;  %v9828_v42 = vld [vmem:[#allocation7 + $0x720] sm:$0xf]  ;;  %v10624_v53 = vld [vmem:[#allocation7 + $0x52c] sm:$0xf0] }
 0x3c6   : > { %v12402_v13 = vadd.f32 %v3307_v20, %v3259_v12  ;;  %v9829_v56 = vor.u32 %v10688_v48, %v9828_v42  ;;  %v9572_v2 = vld [vmem:[#allocation7 + $0x520] sm:$0xf]  ;;  %v491_v48 = vld [vmem:[%s11601_s0 + $0x288] sm:$0xff] }
 0x3c7   : > { %v3213_v16 = vadd.f32 %v3212_v45, %v3164_v58  ;;  %4638 = vmatmul.bf16.gmra.mxu0 %v12393_v23  ;;  %4687 = vmatmul.bf16.gmra.mxu1 %v12395_v6  ;;  %v9573_v14 = vor.u32 %v10624_v53, %v9572_v2  ;;  %v498_v42 = vld [vmem:[%s11601_s0 + $0x2c0] sm:$0xff] }
 0x3c8   : > { %13881 = vst [vmem:[#allocation79_spill] sm:$0xff] %v12402_v13  ;;  %4736 = vmatmul.bf16.gmra.mxu2 %v12397_v22  ;;  %4959 = vmatpush.bf16.msrb.mxu3 %v9829_v56  ;;  %v492_v13 = vld [vmem:[%s11601_s0 + $0x290] sm:$0xff] }
 0x3c9   : > { %4785 = vmatmul.bf16.gmra.mxu3 %v12400_v8  ;;  %4910 = vmatpush.bf16.msrb.mxu2 %v9701_v27  ;;  %v493_v27 = vld [vmem:[%s11601_s0 + $0x298] sm:$0xff] }
 0x3ca   : > { %4861 = vmatpush.bf16.msrb.mxu1 %v9573_v14 }
 0x3cb   : > { %v3261_v51 = vpop.f32.mrf.mxu2 }
 0x3cc   : > { %v3262_v9 = vadd.f32 %v3261_v51, %v3213_v16  ;;  %v3310_v12 = vpop.f32.mrf.mxu3  ;;  %v3165_v20 = vpop.f32.mrf.mxu0  ;;  %v490_v16 = vld [vmem:[%s11601_s0 + $0x280] sm:$0xff]  ;;  %v499_v51 = vld [vmem:[%s11601_s0 + $0x2c8] sm:$0xff] }
 0x3cd   : > { %v3166_v21 = vadd.f32 %v3165_v20, %v12239_v32  ;;  %v3214_v58 = vpop.f32.mrf.mxu1  ;;  %v501_v32 = vld [vmem:[%s11601_s0 + $0x2d8] sm:$0xff]  ;;  %v12419_v49 = vpack.c.bf16 %v498_v42, %v490_v16  ;;  %v10652_v16 = vld [vmem:[#allocation7 + $0x60c] sm:$0xf0] }
 0x3ce   : > { %v12409_v45 = vadd.f32 %v3310_v12, %v3262_v9  ;;  %v12421_v12 = vpack.c.bf16 %v499_v51, %v491_v48  ;;  %v12426_v2 = vpack.c.bf16 %v501_v32, %v493_v27  ;;  %v10588_v42 = vld [vmem:[#allocation7 + $0x40c] sm:$0xf0] }
 0x3cf   : > { %v3215_v1 = vadd.f32 %v3214_v58, %v3166_v21  ;;  %v10684_v48 = vld [vmem:[#allocation7 + $0x70c] sm:$0xf0] }
 0x3d0   : > { %13882 = vst [vmem:[#allocation80_spill] sm:$0xff] %v12409_v45  ;;  %v12423_v45 = vpack.c.bf16 %v500_v37, %v492_v13  ;;  %v9428_v37 = vld [vmem:[#allocation7 + $0x400] sm:$0xf] }
 0x3d1   : > { %v9429_v27 = vor.u32 %v10588_v42, %v9428_v37 }
 0x3d3   : > { %v3263_v20 = vpop.f32.mrf.mxu2  ;;  %4813 = vmatpush.bf16.msrb.mxu0 %v9429_v27 }
 0x3d4   : > { %v3264_v33 = vadd.f32 %v3263_v20, %v3215_v1  ;;  %v3312_v56 = vpop.f32.mrf.mxu3  ;;  %v3168_v9 = vpop.f32.mrf.mxu0  ;;  %v9684_v1 = vld [vmem:[#allocation7 + $0x600] sm:$0xf] }
 0x3d5   : > { %v3169_v21 = vadd.f32 %v3168_v9, %v12248_v10  ;;  %v3217_v58 = vpop.f32.mrf.mxu1  ;;  %v9685_v13 = vor.u32 %v10652_v16, %v9684_v1  ;;  %v9812_v10 = vld [vmem:[#allocation7 + $0x700] sm:$0xf]  ;;  %v10620_v16 = vld [vmem:[#allocation7 + $0x50c] sm:$0xf0] }
 0x3d6   : > { %v12428_v53 = vadd.f32 %v3312_v56, %v3264_v33  ;;  %v9813_v32 = vor.u32 %v10684_v48, %v9812_v10  ;;  %v9556_v1 = vld [vmem:[#allocation7 + $0x500] sm:$0xf]  ;;  %v507_v48 = vld [vmem:[%s11601_s0 + $0x308] sm:$0xff] }
 0x3d7   : > { %v3218_v14 = vadd.f32 %v3217_v58, %v3169_v21  ;;  %4643 = vmatmul.bf16.gmra.mxu0 %v12419_v49  ;;  %4692 = vmatmul.bf16.gmra.mxu1 %v12421_v12  ;;  %v9557_v42 = vor.u32 %v10620_v16, %v9556_v1  ;;  %v514_v10 = vld [vmem:[%s11601_s0 + $0x340] sm:$0xff] }
 0x3d8   : > { %13883 = vst [vmem:[#allocation81_spill] sm:$0xff] %v12428_v53  ;;  %4741 = vmatmul.bf16.gmra.mxu2 %v12423_v45  ;;  %4960 = vmatpush.bf16.msrb.mxu3 %v9813_v32  ;;  %v508_v53 = vld [vmem:[%s11601_s0 + $0x310] sm:$0xff] }
 0x3d9   : > { %4790 = vmatmul.bf16.gmra.mxu3 %v12426_v2  ;;  %4911 = vmatpush.bf16.msrb.mxu2 %v9685_v13  ;;  %v509_v13 = vld [vmem:[%s11601_s0 + $0x318] sm:$0xff] }
 0x3da   : > { %4862 = vmatpush.bf16.msrb.mxu1 %v9557_v42 }
 0x3db   : > { %v3266_v51 = vpop.f32.mrf.mxu2 }
 0x3dc   : > { %v3267_v20 = vadd.f32 %v3266_v51, %v3218_v14  ;;  %v3315_v33 = vpop.f32.mrf.mxu3  ;;  %v3170_v56 = vpop.f32.mrf.mxu0  ;;  %v506_v14 = vld [vmem:[%s11601_s0 + $0x300] sm:$0xff]  ;;  %v515_v51 = vld [vmem:[%s11601_s0 + $0x348] sm:$0xff] }
 0x3dd   : > { %v3171_v9 = vadd.f32 %v3170_v56, %v12253_v43  ;;  %v3219_v21 = vpop.f32.mrf.mxu1  ;;  %v517_v43 = vld [vmem:[%s11601_s0 + $0x358] sm:$0xff]  ;;  %v12445_v50 = vpack.c.bf16 %v514_v10, %v506_v14  ;;  %v9286_v14 = vld [vmem:[#allocation7 + $0x2f0] sm:$0xf0] }
 0x3de   : > { %v12435_v58 = vadd.f32 %v3315_v33, %v3267_v20  ;;  %v12447_v33 = vpack.c.bf16 %v515_v51, %v507_v48  ;;  %v12452_v1 = vpack.c.bf16 %v517_v43, %v509_v13  ;;  %v9030_v10 = vld [vmem:[#allocation7 + $0xf0] sm:$0xf0] }
 0x3df   : > { %v3220_v37 = vadd.f32 %v3219_v21, %v3171_v9  ;;  %v9414_v48 = vld [vmem:[#allocation7 + $0x3f0] sm:$0xf0] }
 0x3e0   : > { %13884 = vst [vmem:[#allocation82_spill] sm:$0xff] %v12435_v58  ;;  %v12449_v58 = vpack.c.bf16 %v516_v5, %v508_v53  ;;  %v10486_v5 = vld [vmem:[#allocation7 + $0xe4] sm:$0xf] }
 0x3e1   : > { %13886 = vst [vmem:[#allocation84_spill] sm:$0xff] %v12452_v1  ;;  %v9033_v13 = vor.u32 %v10486_v5, %v9030_v10 }
 0x3e2   : > { %13885 = vst [vmem:[#allocation83_spill] sm:$0xff] %v12449_v58 }
 0x3e3   : > { %v3268_v56 = vpop.f32.mrf.mxu2  ;;  %5002 = vmatpush.bf16.msra.mxu0 %v9033_v13 }
 0x3e4   : > { %v3269_v27 = vadd.f32 %v3268_v56, %v3220_v37  ;;  %v3317_v32 = vpop.f32.mrf.mxu3  ;;  %v3173_v20 = vpop.f32.mrf.mxu0  ;;  %v10550_v37 = vld [vmem:[#allocation7 + $0x2e4] sm:$0xf] }
 0x3e5   : > { %v3174_v9 = vadd.f32 %v3173_v20, %v12262_v46  ;;  %v3222_v21 = vpop.f32.mrf.mxu1  ;;  %v9289_v53 = vor.u32 %v10550_v37, %v9286_v14  ;;  %v10582_v46 = vld [vmem:[#allocation7 + $0x3e4] sm:$0xf]  ;;  %v9158_v14 = vld [vmem:[#allocation7 + $0x1f0] sm:$0xf0] }
 0x3e6   : > { %v12454_v16 = vadd.f32 %v3317_v32, %v3269_v27  ;;  %v9417_v43 = vor.u32 %v10582_v46, %v9414_v48  ;;  %v10518_v37 = vld [vmem:[#allocation7 + $0x1e4] sm:$0xf]  ;;  %v523_v48 = vld [vmem:[%s11601_s0 + $0x388] sm:$0xff] }
 0x3e7   : > { %v3223_v42 = vadd.f32 %v3222_v21, %v3174_v9  ;;  %4648 = vmatmul.bf16.gmra.mxu0 %v12445_v50  ;;  %4697 = vmatmul.bf16.gmra.mxu1 %v12447_v33  ;;  %v9161_v10 = vor.u32 %v10518_v37, %v9158_v14  ;;  %v530_v46 = vld [vmem:[%s11601_s0 + $0x3c0] sm:$0xff] }
 0x3e8   : > { %13887 = vst [vmem:[#allocation85_spill] sm:$0xff] %v12454_v16  ;;  %4746 = vmatmul.bf16.gmra.mxu2 %v12449_v58  ;;  %5149 = vmatpush.bf16.msra.mxu3 %v9417_v43  ;;  %v524_v16 = vld [vmem:[%s11601_s0 + $0x390] sm:$0xff] }
 0x3e9   : > { %4795 = vmatmul.bf16.gmra.mxu3 %v12452_v1  ;;  %5100 = vmatpush.bf16.msra.mxu2 %v9289_v53  ;;  %v525_v53 = vld [vmem:[%s11601_s0 + $0x398] sm:$0xff] }
 0x3ea   : > { %5051 = vmatpush.bf16.msra.mxu1 %v9161_v10 }
 0x3eb   : > { %v3271_v51 = vpop.f32.mrf.mxu2 }
 0x3ec   : > { %v3272_v56 = vadd.f32 %v3271_v51, %v3223_v42  ;;  %v3320_v27 = vpop.f32.mrf.mxu3  ;;  %v3175_v32 = vpop.f32.mrf.mxu0  ;;  %v522_v42 = vld [vmem:[%s11601_s0 + $0x380] sm:$0xff]  ;;  %v531_v51 = vld [vmem:[%s11601_s0 + $0x3c8] sm:$0xff] }
 0x3ed   : > { %v3176_v20 = vadd.f32 %v3175_v32, %v12267_v35  ;;  %v3224_v9 = vpop.f32.mrf.mxu1  ;;  %v533_v35 = vld [vmem:[%s11601_s0 + $0x3d8] sm:$0xff]  ;;  %v12471_v31 = vpack.c.bf16 %v530_v46, %v522_v42  ;;  %v9270_v42 = vld [vmem:[#allocation7 + $0x2d0] sm:$0xf0] }
 0x3ee   : > { %v12461_v21 = vadd.f32 %v3320_v27, %v3272_v56  ;;  %v12473_v27 = vpack.c.bf16 %v531_v51, %v523_v48  ;;  %v12478_v37 = vpack.c.bf16 %v533_v35, %v525_v53  ;;  %v9014_v46 = vld [vmem:[#allocation7 + $0xd0] sm:$0xf0] }
 0x3ef   : > { %v3225_v5 = vadd.f32 %v3224_v9, %v3176_v20  ;;  %13889 = vst [vmem:[#allocation87_spill] sm:$0xff] %v12471_v31  ;;  %v9398_v48 = vld [vmem:[#allocation7 + $0x3d0] sm:$0xf0] }
 0x3f0   : > { %13888 = vst [vmem:[#allocation86_spill] sm:$0xff] %v12461_v21  ;;  %v12475_v21 = vpack.c.bf16 %v532_v28, %v524_v16  ;;  %v10482_v28 = vld [vmem:[#allocation7 + $0xc4] sm:$0xf] }
 0x3f1   : > { %13890 = vst [vmem:[#allocation88_spill] sm:$0xff] %v12473_v27  ;;  %v9017_v53 = vor.u32 %v10482_v28, %v9014_v46 }
 0x3f2   : > { %13891 = vst [vmem:[#allocation89_spill] sm:$0xff] %v12475_v21 }
 0x3f3   : > { %v3273_v32 = vpop.f32.mrf.mxu2  ;;  %13892 = vst [vmem:[#allocation90_spill] sm:$0xff] %v12478_v37  ;;  %5003 = vmatpush.bf16.msra.mxu0 %v9017_v53 }
 0x3f4   : > { %v3274_v13 = vadd.f32 %v3273_v32, %v3225_v5  ;;  %v3322_v43 = vpop.f32.mrf.mxu3  ;;  %v3178_v56 = vpop.f32.mrf.mxu0  ;;  %v10546_v5 = vld [vmem:[#allocation7 + $0x2c4] sm:$0xf] }
 0x3f5   : > { %v3179_v20 = vadd.f32 %v3178_v56, %v12276_v18  ;;  %v3227_v9 = vpop.f32.mrf.mxu1  ;;  %v9273_v16 = vor.u32 %v10546_v5, %v9270_v42  ;;  %v10578_v18 = vld [vmem:[#allocation7 + $0x3c4] sm:$0xf]  ;;  %v9142_v42 = vld [vmem:[#allocation7 + $0x1d0] sm:$0xf0] }
 0x3f6   : > { %v12480_v14 = vadd.f32 %v3322_v43, %v3274_v13  ;;  %v9401_v35 = vor.u32 %v10578_v18, %v9398_v48  ;;  %v10514_v5 = vld [vmem:[#allocation7 + $0x1c4] sm:$0xf]  ;;  %v415_v48 = vld [vmem:[%s11601_s0 + $0x28] sm:$0xff] }
 0x3f7   : > { %v3228_v10 = vadd.f32 %v3227_v9, %v3179_v20  ;;  %4653 = vmatmul.bf16.gmra.mxu0 %v12471_v31  ;;  %4702 = vmatmul.bf16.gmra.mxu1 %v12473_v27  ;;  %v9145_v46 = vor.u32 %v10514_v5, %v9142_v42  ;;  %v422_v18 = vld [vmem:[%s11601_s0 + $0x60] sm:$0xff] }
 0x3f8   : > { %13893 = vst [vmem:[#allocation91_spill] sm:$0xff] %v12480_v14  ;;  %4751 = vmatmul.bf16.gmra.mxu2 %v12475_v21  ;;  %5150 = vmatpush.bf16.msra.mxu3 %v9401_v35  ;;  %v416_v14 = vld [vmem:[%s11601_s0 + $0x30] sm:$0xff] }
 0x3f9   : > { %4800 = vmatmul.bf16.gmra.mxu3 %v12478_v37  ;;  %5101 = vmatpush.bf16.msra.mxu2 %v9273_v16  ;;  %v417_v16 = vld [vmem:[%s11601_s0 + $0x38] sm:$0xff] }
 0x3fa   : > { %5052 = vmatpush.bf16.msra.mxu1 %v9145_v46 }
 0x3fb   : > { %v3276_v51 = vpop.f32.mrf.mxu2 }
 0x3fc   : > { %v3277_v32 = vadd.f32 %v3276_v51, %v3228_v10  ;;  %v3325_v13 = vpop.f32.mrf.mxu3  ;;  %v3180_v43 = vpop.f32.mrf.mxu0  ;;  %v414_v10 = vld [vmem:[%s11601_s0 + $0x20] sm:$0xff]  ;;  %v423_v51 = vld [vmem:[%s11601_s0 + $0x68] sm:$0xff] }
 0x3fd   : > { %v3181_v56 = vadd.f32 %v3180_v43, %v12295_v17  ;;  %v3229_v20 = vpop.f32.mrf.mxu1  ;;  %v425_v17 = vld [vmem:[%s11601_s0 + $0x78] sm:$0xff]  ;;  %v12497_v57 = vpack.c.bf16 %v422_v18, %v414_v10  ;;  %v9254_v10 = vld [vmem:[#allocation7 + $0x2b0] sm:$0xf0] }
 0x3fe   : > { %v12487_v9 = vadd.f32 %v3325_v13, %v3277_v32  ;;  %v12499_v13 = vpack.c.bf16 %v423_v51, %v415_v48  ;;  %v12504_v42 = vpack.c.bf16 %v425_v17, %v417_v16  ;;  %v8998_v18 = vld [vmem:[#allocation7 + $0xb0] sm:$0xf0]  ;;  %v10574_v48 = vld [vmem:[#allocation7 + $0x3a4] sm:$0xf] }
 0x3ff   : > { %v3230_v28 = vadd.f32 %v3229_v20, %v3181_v56  ;;  %13895 = vst [vmem:[#allocation93_spill] sm:$0xff] %v12497_v57  ;;  %v13898_v56 = vld [vmem:[#allocation46_spill] sm:$0xff]  ;;  %v9382_v51 = vld [vmem:[#allocation7 + $0x3b0] sm:$0xf0] }
 0x400   : > { %13894 = vst [vmem:[#allocation92_spill] sm:$0xff] %v12487_v9  ;;  %v12501_v9 = vpack.c.bf16 %v424_v36, %v416_v14  ;;  %v10478_v36 = vld [vmem:[#allocation7 + $0xa4] sm:$0xf] }
 0x401   : > { %13896 = vst [vmem:[#allocation94_spill] sm:$0xff] %v12499_v13  ;;  %v9001_v17 = vor.u32 %v10478_v36, %v8998_v18  ;;  %v9126_v36 = vld [vmem:[#allocation7 + $0x1b0] sm:$0xf0] }
 0x402   : > { %13897 = vst [vmem:[#allocation95_spill] sm:$0xff] %v12501_v9 }
 0x403   : > { %v3278_v43 = vpop.f32.mrf.mxu2  ;;  %13899 = vst [vmem:[#allocation46_spill] sm:$0xff] %v12504_v42  ;;  %5004 = vmatpush.bf16.msra.mxu0 %v9001_v17 }
 0x404   : > { %v3279_v53 = vadd.f32 %v3278_v43, %v3230_v28  ;;  %v3327_v35 = vpop.f32.mrf.mxu3  ;;  %v4619_v32 = vpop.f32.mrf.mxu0  ;;  %v10542_v28 = vld [vmem:[#allocation7 + $0x2a4] sm:$0xf]  ;;  %v9385_v43 = vor.u32 %v10574_v48, %v9382_v51 }
 0x405   : > { %v4620_v20 = vadd.f32 %v4619_v32, %v13898_v56  ;;  %v4668_v5 = vpop.f32.mrf.mxu1  ;;  %v9257_v14 = vor.u32 %v10542_v28, %v9254_v10  ;;  %v13901_v56 = vld [vmem:[#allocation47_spill] sm:$0xff]  ;;  %v10510_v10 = vld [vmem:[#allocation7 + $0x1a4] sm:$0xf] }
 0x406   : > { %v12506_v0 = vadd.f32 %v3327_v35, %v3279_v53  ;;  %5151 = vmatpush.bf16.msra.mxu3 %v9385_v43  ;;  %v9129_v48 = vor.u32 %v10510_v10, %v9126_v36  ;;  %v438_v51 = vld [vmem:[%s11601_s0 + $0xe0] sm:$0xff] }
 0x407   : > { %v4669_v46 = vadd.f32 %v4668_v5, %v4620_v20  ;;  %4814 = vmatmul.bf16.vlgmr.msrb.gmra.mxu0 %v12497_v57  ;;  %4863 = vmatmul.bf16.vlgmr.msrb.gmra.mxu1 %v12499_v13 }
 0x408   : > { %13900 = vst [vmem:[#allocation96_spill] sm:$0xff] %v12506_v0  ;;  %4912 = vmatmul.bf16.vlgmr.msrb.gmra.mxu2 %v12501_v9  ;;  %v439_v0 = vld [vmem:[%s11601_s0 + $0xe8] sm:$0xff]  ;;  %5053 = vmatpush.bf16.msra.mxu1 %v9129_v48 }
 0x409   : > { %4961 = vmatmul.bf16.vlgmr.msrb.gmra.mxu3 %v12504_v42  ;;  %5102 = vmatpush.bf16.msra.mxu2 %v9257_v14  ;;  %v433_v14 = vld [vmem:[%s11601_s0 + $0xb8] sm:$0xff] }
 0x40b   : > { %v4717_v16 = vpop.f32.mrf.mxu2 }
 0x40c   : > { %v4718_v53 = vadd.f32 %v4717_v16, %v4669_v46  ;;  %v4766_v35 = vpop.f32.mrf.mxu3  ;;  %v4621_v32 = vpop.f32.mrf.mxu0  ;;  %v430_v46 = vld [vmem:[%s11601_s0 + $0xa0] sm:$0xff]  ;;  %v431_v16 = vld [vmem:[%s11601_s0 + $0xa8] sm:$0xff] }
 0x40d   : > { %v4622_v20 = vadd.f32 %v4621_v32, %v13901_v56  ;;  %v4670_v5 = vpop.f32.mrf.mxu1  ;;  %v441_v32 = vld [vmem:[%s11601_s0 + $0xf8] sm:$0xff]  ;;  %v12523_v52 = vpack.c.bf16 %v438_v51, %v430_v46  ;;  %v8982_v46 = vld [vmem:[#allocation7 + $0x90] sm:$0xf0]  ;;  %v10570_v51 = vld [vmem:[#allocation7 + $0x384] sm:$0xf] }
 0x40e   : > { %v12513_v28 = vadd.f32 %v4766_v35, %v4718_v53  ;;  %v12525_v35 = vpack.c.bf16 %v439_v0, %v431_v16  ;;  %v12530_v36 = vpack.c.bf16 %v441_v32, %v433_v14  ;;  %v10538_v0 = vld [vmem:[#allocation7 + $0x284] sm:$0xf]  ;;  %v9366_v16 = vld [vmem:[#allocation7 + $0x390] sm:$0xf0]  ;;  %v8985_v32 = vor.u32 %v10474_v4, %v8982_v46 }
 0x40f   : > { %v4671_v18 = vadd.f32 %v4670_v5, %v4622_v20  ;;  %13902 = vst [vmem:[#allocation47_spill] sm:$0xff] %v12523_v52  ;;  %v13905_v20 = vld [vmem:[#allocation48_spill] sm:$0xff] }
 0x410   : > { %13903 = vst [vmem:[#allocation97_spill] sm:$0xff] %v12525_v35  ;;  %5005 = vmatpush.bf16.msra.mxu0 %v8985_v32  ;;  %v9110_v4 = vld [vmem:[#allocation7 + $0x190] sm:$0xf0] }
 0x411   : > { %13906 = vst [vmem:[#allocation48_spill] sm:$0xff] %v12530_v36 }
 0x413   : > { %v4719_v56 = vpop.f32.mrf.mxu2 }
 0x414   : > { %v4720_v17 = vadd.f32 %v4719_v56, %v4671_v18  ;;  %v4768_v43 = vpop.f32.mrf.mxu3  ;;  %v4624_v53 = vpop.f32.mrf.mxu0  ;;  %v9238_v18 = vld [vmem:[#allocation7 + $0x290] sm:$0xf0]  ;;  %v9369_v56 = vor.u32 %v10570_v51, %v9366_v16  ;;  %v454_v16 = vld [vmem:[%s11601_s0 + $0x160] sm:$0xff] }
 0x415   : > { %v4625_v5 = vadd.f32 %v4624_v53, %v13905_v20  ;;  %v4673_v10 = vpop.f32.mrf.mxu1  ;;  %v9241_v30 = vor.u32 %v10538_v0, %v9238_v18  ;;  %v13907_v20 = vld [vmem:[#allocation49_spill] sm:$0xff]  ;;  %v10506_v18 = vld [vmem:[#allocation7 + $0x184] sm:$0xf] }
 0x416   : > { %v12532_v63 = vadd.f32 %v4768_v43, %v4720_v17  ;;  %5152 = vmatpush.bf16.msra.mxu3 %v9369_v56  ;;  %v9113_v51 = vor.u32 %v10506_v18, %v9110_v4 }
 0x417   : > { %v4674_v48 = vadd.f32 %v4673_v10, %v4625_v5  ;;  %4819 = vmatmul.bf16.gmra.mxu0 %v12523_v52  ;;  %4868 = vmatmul.bf16.gmra.mxu1 %v12525_v35 }
 0x418   : > { %4917 = vmatmul.bf16.gmra.mxu2 %v12527_v59  ;;  %5054 = vmatpush.bf16.msra.mxu1 %v9113_v51 }
 0x419   : > { %4966 = vmatmul.bf16.gmra.mxu3 %v12530_v36  ;;  %5103 = vmatpush.bf16.msra.mxu2 %v9241_v30  ;;  %v449_v30 = vld [vmem:[%s11601_s0 + $0x138] sm:$0xff] }
 0x41b   : > { %v4722_v14 = vpop.f32.mrf.mxu2 }
 0x41c   : > { %v4723_v17 = vadd.f32 %v4722_v14, %v4674_v48  ;;  %v4771_v43 = vpop.f32.mrf.mxu3  ;;  %v4626_v53 = vpop.f32.mrf.mxu0  ;;  %v446_v48 = vld [vmem:[%s11601_s0 + $0x120] sm:$0xff]  ;;  %v447_v14 = vld [vmem:[%s11601_s0 + $0x128] sm:$0xff] }
 0x41d   : > { %v4627_v5 = vadd.f32 %v4626_v53, %v13907_v20  ;;  %v4675_v10 = vpop.f32.mrf.mxu1  ;;  %v457_v53 = vld [vmem:[%s11601_s0 + $0x178] sm:$0xff]  ;;  %v12549_v24 = vpack.c.bf16 %v454_v16, %v446_v48  ;;  %v8966_v48 = vld [vmem:[#allocation7 + $0x70] sm:$0xf0]  ;;  %v10566_v16 = vld [vmem:[#allocation7 + $0x364] sm:$0xf] }
 0x41e   : > { %v12539_v0 = vadd.f32 %v4771_v43, %v4723_v17  ;;  %v12551_v43 = vpack.c.bf16 %v455_v54, %v447_v14  ;;  %v12556_v4 = vpack.c.bf16 %v457_v53, %v449_v30  ;;  %v10534_v54 = vld [vmem:[#allocation7 + $0x264] sm:$0xf]  ;;  %v9350_v14 = vld [vmem:[#allocation7 + $0x370] sm:$0xf0]  ;;  %v8969_v53 = vor.u32 %v10470_v25, %v8966_v48 }
 0x41f   : > { %v4676_v46 = vadd.f32 %v4675_v10, %v4627_v5  ;;  %13908 = vst [vmem:[#allocation49_spill] sm:$0xff] %v12549_v24  ;;  %v13911_v5 = vld [vmem:[#allocation50_spill] sm:$0xff]  ;;  %v9094_v25 = vld [vmem:[#allocation7 + $0x170] sm:$0xf0] }
 0x420   : > { %13909 = vst [vmem:[#allocation99_spill] sm:$0xff] %v12551_v43  ;;  %5006 = vmatpush.bf16.msra.mxu0 %v8969_v53 }
 0x421   : > { %13912 = vst [vmem:[#allocation50_spill] sm:$0xff] %v12556_v4 }
 0x423   : > { %v4724_v20 = vpop.f32.mrf.mxu2 }
 0x424   : > { %v4725_v32 = vadd.f32 %v4724_v20, %v4676_v46  ;;  %v4773_v56 = vpop.f32.mrf.mxu3  ;;  %v4629_v17 = vpop.f32.mrf.mxu0  ;;  %v9222_v46 = vld [vmem:[#allocation7 + $0x270] sm:$0xf0]  ;;  %v9353_v20 = vor.u32 %v10566_v16, %v9350_v14  ;;  %v470_v14 = vld [vmem:[%s11601_s0 + $0x1e0] sm:$0xff] }
 0x425   : > { %v4630_v10 = vadd.f32 %v4629_v17, %v13911_v5  ;;  %v4678_v18 = vpop.f32.mrf.mxu1  ;;  %v9225_v41 = vor.u32 %v10534_v54, %v9222_v46  ;;  %v13913_v5 = vld [vmem:[#allocation51_spill] sm:$0xff]  ;;  %v10502_v46 = vld [vmem:[#allocation7 + $0x164] sm:$0xf] }
 0x426   : > { %v12558_v36 = vadd.f32 %v4773_v56, %v4725_v32  ;;  %5153 = vmatpush.bf16.msra.mxu3 %v9353_v20  ;;  %v9097_v16 = vor.u32 %v10502_v46, %v9094_v25 }
 0x427   : > { %v4679_v51 = vadd.f32 %v4678_v18, %v4630_v10  ;;  %4824 = vmatmul.bf16.gmra.mxu0 %v12549_v24  ;;  %4873 = vmatmul.bf16.gmra.mxu1 %v12551_v43  ;;  %v472_v43 = vld [vmem:[%s11601_s0 + $0x1f0] sm:$0xff] }
 0x428   : > { %4922 = vmatmul.bf16.gmra.mxu2 %v12553_v19  ;;  %v464_v19 = vld [vmem:[%s11601_s0 + $0x1b0] sm:$0xff]  ;;  %5055 = vmatpush.bf16.msra.mxu1 %v9097_v16 }
 0x429   : > { %4971 = vmatmul.bf16.gmra.mxu3 %v12556_v4  ;;  %5104 = vmatpush.bf16.msra.mxu2 %v9225_v41  ;;  %v471_v4 = vld [vmem:[%s11601_s0 + $0x1e8] sm:$0xff]  ;;  %v465_v41 = vld [vmem:[%s11601_s0 + $0x1b8] sm:$0xff]  ;;  %v12579_v59 = vpack.c.bf16 %v472_v43, %v464_v19  ;;  %v10466_v19 = vld [vmem:[#allocation7 + $0x44] sm:$0xf] }
 0x42b   : > { %v4727_v30 = vpop.f32.mrf.mxu2  ;;  %13916 = vst [vmem:[#allocation102_spill] sm:$0xff] %v12579_v59 }
 0x42c   : > { %v4728_v32 = vadd.f32 %v4727_v30, %v4679_v51  ;;  %v4776_v56 = vpop.f32.mrf.mxu3  ;;  %v4631_v17 = vpop.f32.mrf.mxu0  ;;  %v462_v51 = vld [vmem:[%s11601_s0 + $0x1a0] sm:$0xff]  ;;  %v463_v30 = vld [vmem:[%s11601_s0 + $0x1a8] sm:$0xff] }
 0x42d   : > { %v4632_v10 = vadd.f32 %v4631_v17, %v13913_v5  ;;  %v4680_v18 = vpop.f32.mrf.mxu1  ;;  %v473_v17 = vld [vmem:[%s11601_s0 + $0x1f8] sm:$0xff]  ;;  %v12575_v24 = vpack.c.bf16 %v470_v14, %v462_v51  ;;  %v8950_v51 = vld [vmem:[#allocation7 + $0x50] sm:$0xf0]  ;;  %v10562_v14 = vld [vmem:[#allocation7 + $0x344] sm:$0xf] }
 0x42e   : > { %v12565_v54 = vadd.f32 %v4776_v56, %v4728_v32  ;;  %v12577_v56 = vpack.c.bf16 %v471_v4, %v463_v30  ;;  %v12582_v25 = vpack.c.bf16 %v473_v17, %v465_v41  ;;  %v10530_v4 = vld [vmem:[#allocation7 + $0x244] sm:$0xf]  ;;  %v9334_v30 = vld [vmem:[#allocation7 + $0x350] sm:$0xf0]  ;;  %v8953_v17 = vor.u32 %v10466_v19, %v8950_v51 }
 0x42f   : > { %v4681_v48 = vadd.f32 %v4680_v18, %v4632_v10  ;;  %13914 = vst [vmem:[#allocation51_spill] sm:$0xff] %v12575_v24  ;;  %v13917_v10 = vld [vmem:[#allocation52_spill] sm:$0xff] }
 0x430   : > { %13915 = vst [vmem:[#allocation101_spill] sm:$0xff] %v12577_v56  ;;  %5007 = vmatpush.bf16.msra.mxu0 %v8953_v17  ;;  %v9078_v19 = vld [vmem:[#allocation7 + $0x150] sm:$0xf0] }
 0x431   : > { %13918 = vst [vmem:[#allocation52_spill] sm:$0xff] %v12582_v25 }
 0x433   : > { %v4729_v5 = vpop.f32.mrf.mxu2 }
 0x434   : > { %v4730_v53 = vadd.f32 %v4729_v5, %v4681_v48  ;;  %v4778_v20 = vpop.f32.mrf.mxu3  ;;  %v4634_v32 = vpop.f32.mrf.mxu0  ;;  %v9206_v48 = vld [vmem:[#allocation7 + $0x250] sm:$0xf0]  ;;  %v9337_v5 = vor.u32 %v10562_v14, %v9334_v30  ;;  %v486_v30 = vld [vmem:[%s11601_s0 + $0x260] sm:$0xff] }
 0x435   : > { %v4635_v18 = vadd.f32 %v4634_v32, %v13917_v10  ;;  %v4683_v46 = vpop.f32.mrf.mxu1  ;;  %v9209_v43 = vor.u32 %v10530_v4, %v9206_v48  ;;  %v13919_v10 = vld [vmem:[#allocation53_spill] sm:$0xff]  ;;  %v10498_v48 = vld [vmem:[#allocation7 + $0x144] sm:$0xf] }
 0x436   : > { %v12584_v35 = vadd.f32 %v4778_v20, %v4730_v53  ;;  %5154 = vmatpush.bf16.msra.mxu3 %v9337_v5  ;;  %v9081_v14 = vor.u32 %v10498_v48, %v9078_v19 }
 0x437   : > { %v4684_v16 = vadd.f32 %v4683_v46, %v4635_v18  ;;  %4829 = vmatmul.bf16.gmra.mxu0 %v12575_v24  ;;  %4878 = vmatmul.bf16.gmra.mxu1 %v12577_v56  ;;  %v488_v56 = vld [vmem:[%s11601_s0 + $0x270] sm:$0xff] }
 0x438   : > { %4927 = vmatmul.bf16.gmra.mxu2 %v12579_v59  ;;  %v480_v59 = vld [vmem:[%s11601_s0 + $0x230] sm:$0xff]  ;;  %5056 = vmatpush.bf16.msra.mxu1 %v9081_v14 }
 0x439   : > { %4976 = vmatmul.bf16.gmra.mxu3 %v12582_v25  ;;  %5105 = vmatpush.bf16.msra.mxu2 %v9209_v43  ;;  %v487_v25 = vld [vmem:[%s11601_s0 + $0x268] sm:$0xff]  ;;  %v481_v43 = vld [vmem:[%s11601_s0 + $0x238] sm:$0xff]  ;;  %v12605_v52 = vpack.c.bf16 %v488_v56, %v480_v59  ;;  %v10462_v59 = vld [vmem:[#allocation7 + $0x24] sm:$0xf] }
 0x43b   : > { %v4732_v41 = vpop.f32.mrf.mxu2  ;;  %13922 = vst [vmem:[#allocation104_spill] sm:$0xff] %v12605_v52 }
 0x43c   : > { %v4733_v53 = vadd.f32 %v4732_v41, %v4684_v16  ;;  %v4781_v20 = vpop.f32.mrf.mxu3  ;;  %v4636_v32 = vpop.f32.mrf.mxu0  ;;  %v478_v16 = vld [vmem:[%s11601_s0 + $0x220] sm:$0xff]  ;;  %v479_v41 = vld [vmem:[%s11601_s0 + $0x228] sm:$0xff] }
 0x43d   : > { %v4637_v18 = vadd.f32 %v4636_v32, %v13919_v10  ;;  %v4685_v46 = vpop.f32.mrf.mxu1  ;;  %v489_v32 = vld [vmem:[%s11601_s0 + $0x278] sm:$0xff]  ;;  %v12601_v24 = vpack.c.bf16 %v486_v30, %v478_v16  ;;  %v8934_v16 = vld [vmem:[#allocation7 + $0x30] sm:$0xf0]  ;;  %v10558_v30 = vld [vmem:[#allocation7 + $0x324] sm:$0xf] }
 0x43e   : > { %v12591_v4 = vadd.f32 %v4781_v20, %v4733_v53  ;;  %v12603_v20 = vpack.c.bf16 %v487_v25, %v479_v41  ;;  %v12608_v19 = vpack.c.bf16 %v489_v32, %v481_v43  ;;  %v10526_v25 = vld [vmem:[#allocation7 + $0x224] sm:$0xf]  ;;  %v9318_v41 = vld [vmem:[#allocation7 + $0x330] sm:$0xf0]  ;;  %v8937_v32 = vor.u32 %v10462_v59, %v8934_v16 }
 0x43f   : > { %v4686_v51 = vadd.f32 %v4685_v46, %v4637_v18  ;;  %13920 = vst [vmem:[#allocation53_spill] sm:$0xff] %v12601_v24  ;;  %v13923_v18 = vld [vmem:[#allocation54_spill] sm:$0xff]  ;;  %v9062_v59 = vld [vmem:[#allocation7 + $0x130] sm:$0xf0] }
 0x440   : > { %13921 = vst [vmem:[#allocation103_spill] sm:$0xff] %v12603_v20  ;;  %5008 = vmatpush.bf16.msra.mxu0 %v8937_v32 }
 0x441   : > { %13924 = vst [vmem:[#allocation54_spill] sm:$0xff] %v12608_v19 }
 0x443   : > { %v4734_v10 = vpop.f32.mrf.mxu2 }
 0x444   : > { %v4735_v17 = vadd.f32 %v4734_v10, %v4686_v51  ;;  %v4783_v5 = vpop.f32.mrf.mxu3  ;;  %v4639_v53 = vpop.f32.mrf.mxu0  ;;  %v9190_v51 = vld [vmem:[#allocation7 + $0x230] sm:$0xf0]  ;;  %v9321_v10 = vor.u32 %v10558_v30, %v9318_v41  ;;  %v502_v41 = vld [vmem:[%s11601_s0 + $0x2e0] sm:$0xff] }
 0x445   : > { %v4640_v46 = vadd.f32 %v4639_v53, %v13923_v18  ;;  %v4688_v48 = vpop.f32.mrf.mxu1  ;;  %v9193_v56 = vor.u32 %v10526_v25, %v9190_v51  ;;  %v13925_v18 = vld [vmem:[#allocation55_spill] sm:$0xff]  ;;  %v10494_v51 = vld [vmem:[#allocation7 + $0x124] sm:$0xf] }
 0x446   : > { %v12610_v42 = vadd.f32 %v4783_v5, %v4735_v17  ;;  %5155 = vmatpush.bf16.msra.mxu3 %v9321_v10  ;;  %v9065_v30 = vor.u32 %v10494_v51, %v9062_v59 }
 0x447   : > { %v4689_v14 = vadd.f32 %v4688_v48, %v4640_v46  ;;  %4834 = vmatmul.bf16.gmra.mxu0 %v12601_v24  ;;  %4883 = vmatmul.bf16.gmra.mxu1 %v12603_v20  ;;  %v504_v20 = vld [vmem:[%s11601_s0 + $0x2f0] sm:$0xff] }
 0x448   : > { %4932 = vmatmul.bf16.gmra.mxu2 %v12605_v52  ;;  %v496_v52 = vld [vmem:[%s11601_s0 + $0x2b0] sm:$0xff]  ;;  %5057 = vmatpush.bf16.msra.mxu1 %v9065_v30 }
 0x449   : > { %4981 = vmatmul.bf16.gmra.mxu3 %v12608_v19  ;;  %5106 = vmatpush.bf16.msra.mxu2 %v9193_v56  ;;  %v503_v19 = vld [vmem:[%s11601_s0 + $0x2e8] sm:$0xff]  ;;  %v497_v56 = vld [vmem:[%s11601_s0 + $0x2b8] sm:$0xff]  ;;  %v12631_v9 = vpack.c.bf16 %v504_v20, %v496_v52  ;;  %v10458_v52 = vld [vmem:[#allocation7 + $0x4] sm:$0xf] }
 0x44b   : > { %v4737_v43 = vpop.f32.mrf.mxu2  ;;  %13928 = vst [vmem:[#allocation106_spill] sm:$0xff] %v12631_v9 }
 0x44c   : > { %v4738_v17 = vadd.f32 %v4737_v43, %v4689_v14  ;;  %v4786_v5 = vpop.f32.mrf.mxu3  ;;  %v4641_v53 = vpop.f32.mrf.mxu0  ;;  %v494_v14 = vld [vmem:[%s11601_s0 + $0x2a0] sm:$0xff]  ;;  %v495_v43 = vld [vmem:[%s11601_s0 + $0x2a8] sm:$0xff] }
 0x44d   : > { %v4642_v46 = vadd.f32 %v4641_v53, %v13925_v18  ;;  %v4690_v48 = vpop.f32.mrf.mxu1  ;;  %v505_v53 = vld [vmem:[%s11601_s0 + $0x2f8] sm:$0xff]  ;;  %v12627_v24 = vpack.c.bf16 %v502_v41, %v494_v14  ;;  %v8918_v14 = vld [vmem:[#allocation7 + $0x10] sm:$0xf0]  ;;  %v10554_v41 = vld [vmem:[#allocation7 + $0x304] sm:$0xf] }
 0x44e   : > { %v12617_v25 = vadd.f32 %v4786_v5, %v4738_v17  ;;  %v12629_v5 = vpack.c.bf16 %v503_v19, %v495_v43  ;;  %v12634_v59 = vpack.c.bf16 %v505_v53, %v497_v56  ;;  %v10522_v19 = vld [vmem:[#allocation7 + $0x204] sm:$0xf]  ;;  %v9302_v43 = vld [vmem:[#allocation7 + $0x310] sm:$0xf0]  ;;  %v8921_v53 = vor.u32 %v10458_v52, %v8918_v14 }
 0x44f   : > { %v4691_v16 = vadd.f32 %v4690_v48, %v4642_v46  ;;  %13926 = vst [vmem:[#allocation55_spill] sm:$0xff] %v12627_v24  ;;  %v13929_v46 = vld [vmem:[#allocation56_spill] sm:$0xff] }
 0x450   : > { %13927 = vst [vmem:[#allocation105_spill] sm:$0xff] %v12629_v5  ;;  %5009 = vmatpush.bf16.msra.mxu0 %v8921_v53  ;;  %v9046_v52 = vld [vmem:[#allocation7 + $0x110] sm:$0xf0] }
 0x451   : > { %13930 = vst [vmem:[#allocation56_spill] sm:$0xff] %v12634_v59 }
 0x453   : > { %v4739_v18 = vpop.f32.mrf.mxu2 }
 0x454   : > { %v4740_v32 = vadd.f32 %v4739_v18, %v4691_v16  ;;  %v4788_v10 = vpop.f32.mrf.mxu3  ;;  %v4644_v17 = vpop.f32.mrf.mxu0  ;;  %v9174_v16 = vld [vmem:[#allocation7 + $0x210] sm:$0xf0]  ;;  %v9305_v18 = vor.u32 %v10554_v41, %v9302_v43  ;;  %v518_v43 = vld [vmem:[%s11601_s0 + $0x360] sm:$0xff] }
 0x455   : > { %v4645_v48 = vadd.f32 %v4644_v17, %v13929_v46  ;;  %v4693_v51 = vpop.f32.mrf.mxu1  ;;  %v9177_v20 = vor.u32 %v10522_v19, %v9174_v16  ;;  %v13931_v46 = vld [vmem:[#allocation57_spill] sm:$0xff]  ;;  %v10490_v16 = vld [vmem:[#allocation7 + $0x104] sm:$0xf] }
 0x456   : > { %v12636_v13 = vadd.f32 %v4788_v10, %v4740_v32  ;;  %5156 = vmatpush.bf16.msra.mxu3 %v9305_v18  ;;  %v9049_v41 = vor.u32 %v10490_v16, %v9046_v52 }
 0x457   : > { %v4694_v30 = vadd.f32 %v4693_v51, %v4645_v48  ;;  %4839 = vmatmul.bf16.gmra.mxu0 %v12627_v24  ;;  %4888 = vmatmul.bf16.gmra.mxu1 %v12629_v5  ;;  %v520_v5 = vld [vmem:[%s11601_s0 + $0x370] sm:$0xff] }
 0x458   : > { %4937 = vmatmul.bf16.gmra.mxu2 %v12631_v9  ;;  %v512_v9 = vld [vmem:[%s11601_s0 + $0x330] sm:$0xff]  ;;  %5058 = vmatpush.bf16.msra.mxu1 %v9049_v41 }
 0x459   : > { %4986 = vmatmul.bf16.gmra.mxu3 %v12634_v59  ;;  %5107 = vmatpush.bf16.msra.mxu2 %v9177_v20  ;;  %v519_v59 = vld [vmem:[%s11601_s0 + $0x368] sm:$0xff]  ;;  %v513_v20 = vld [vmem:[%s11601_s0 + $0x338] sm:$0xff]  ;;  %v12657_v57 = vpack.c.bf16 %v520_v5, %v512_v9  ;;  %v10614_v9 = vld [vmem:[#allocation7 + $0x4e4] sm:$0xf] }
 0x45b   : > { %v4742_v56 = vpop.f32.mrf.mxu2  ;;  %13934 = vst [vmem:[#allocation108_spill] sm:$0xff] %v12657_v57 }
 0x45c   : > { %v4743_v32 = vadd.f32 %v4742_v56, %v4694_v30  ;;  %v4791_v10 = vpop.f32.mrf.mxu3  ;;  %v4646_v17 = vpop.f32.mrf.mxu0  ;;  %v510_v30 = vld [vmem:[%s11601_s0 + $0x320] sm:$0xff]  ;;  %v511_v56 = vld [vmem:[%s11601_s0 + $0x328] sm:$0xff] }
 0x45d   : > { %v4647_v48 = vadd.f32 %v4646_v17, %v13931_v46  ;;  %v4695_v51 = vpop.f32.mrf.mxu1  ;;  %v521_v17 = vld [vmem:[%s11601_s0 + $0x378] sm:$0xff]  ;;  %v12653_v24 = vpack.c.bf16 %v518_v43, %v510_v30  ;;  %v9542_v30 = vld [vmem:[#allocation7 + $0x4f0] sm:$0xf0]  ;;  %v10710_v43 = vld [vmem:[#allocation7 + $0x7e4] sm:$0xf] }
 0x45e   : > { %v12643_v19 = vadd.f32 %v4791_v10, %v4743_v32  ;;  %v12655_v10 = vpack.c.bf16 %v519_v59, %v511_v56  ;;  %v12660_v52 = vpack.c.bf16 %v521_v17, %v513_v20  ;;  %v10678_v59 = vld [vmem:[#allocation7 + $0x6e4] sm:$0xf]  ;;  %v9926_v56 = vld [vmem:[#allocation7 + $0x7f0] sm:$0xf0]  ;;  %v9545_v17 = vor.u32 %v10614_v9, %v9542_v30  ;;  %v527_v9 = vld [vmem:[%s11601_s0 + $0x3a8] sm:$0xff] }
 0x45f   : > { %v4696_v14 = vadd.f32 %v4695_v51, %v4647_v48  ;;  %13932 = vst [vmem:[#allocation57_spill] sm:$0xff] %v12653_v24  ;;  %v13935_v48 = vld [vmem:[#allocation58_spill] sm:$0xff] }
 0x460   : > { %13933 = vst [vmem:[#allocation107_spill] sm:$0xff] %v12655_v10  ;;  %5198 = vmatpush.bf16.msrb.mxu0 %v9545_v17  ;;  %v535_v30 = vld [vmem:[%s11601_s0 + $0x3e8] sm:$0xff] }
 0x461   : > { %13936 = vst [vmem:[#allocation58_spill] sm:$0xff] %v12660_v52 }
 0x463   : > { %v4744_v46 = vpop.f32.mrf.mxu2 }
 0x464   : > { %v4745_v53 = vadd.f32 %v4744_v46, %v4696_v14  ;;  %v4793_v18 = vpop.f32.mrf.mxu3  ;;  %v4649_v32 = vpop.f32.mrf.mxu0  ;;  %v9798_v14 = vld [vmem:[#allocation7 + $0x6f0] sm:$0xf0]  ;;  %v9929_v46 = vor.u32 %v10710_v43, %v9926_v56 }
 0x465   : > { %v4650_v51 = vadd.f32 %v4649_v32, %v13935_v48  ;;  %v4698_v16 = vpop.f32.mrf.mxu1  ;;  %v9801_v5 = vor.u32 %v10678_v59, %v9798_v14  ;;  %v13937_v48 = vld [vmem:[#allocation59_spill] sm:$0xff] }
 0x466   : > { %v12662_v37 = vadd.f32 %v4793_v18, %v4745_v53  ;;  %5345 = vmatpush.bf16.msrb.mxu3 %v9929_v46  ;;  %v528_v43 = vld [vmem:[%s11601_s0 + $0x3b0] sm:$0xff] }
 0x467   : > { %v4699_v41 = vadd.f32 %v4698_v16, %v4650_v51  ;;  %4844 = vmatmul.bf16.gmra.mxu0 %v12653_v24  ;;  %4893 = vmatmul.bf16.gmra.mxu1 %v12655_v10  ;;  %v536_v56 = vld [vmem:[%s11601_s0 + $0x3f0] sm:$0xff]  ;;  %v10646_v10 = vld [vmem:[#allocation7 + $0x5e4] sm:$0xf] }
 0x468   : > { %4942 = vmatmul.bf16.gmra.mxu2 %v12657_v57  ;;  %v534_v57 = vld [vmem:[%s11601_s0 + $0x3e0] sm:$0xff]  ;;  %v9670_v24 = vld [vmem:[#allocation7 + $0x5f0] sm:$0xf0] }
 0x469   : > { %4991 = vmatmul.bf16.gmra.mxu3 %v12660_v52  ;;  %5296 = vmatpush.bf16.msrb.mxu2 %v9801_v5  ;;  %v526_v52 = vld [vmem:[%s11601_s0 + $0x3a0] sm:$0xff] }
 0x46a   : > { %v12679_v5 = vpack.c.bf16 %v534_v57, %v526_v52  ;;  %v10674_v52 = vld [vmem:[#allocation7 + $0x6c4] sm:$0xf] }
 0x46b   : > { %v4747_v20 = vpop.f32.mrf.mxu2 }
 0x46c   : > { %v4748_v53 = vadd.f32 %v4747_v20, %v4699_v41  ;;  %v4796_v18 = vpop.f32.mrf.mxu3  ;;  %v4651_v32 = vpop.f32.mrf.mxu0  ;;  %v529_v41 = vld [vmem:[%s11601_s0 + $0x3b8] sm:$0xff]  ;;  %13938 = vst [vmem:[#allocation59_spill] sm:$0xff] %v12679_v5 }
 0x46d   : > { %v4652_v51 = vadd.f32 %v4651_v32, %v13937_v48  ;;  %v4700_v16 = vpop.f32.mrf.mxu1  ;;  %v537_v20 = vld [vmem:[%s11601_s0 + $0x3f8] sm:$0xff]  ;;  %v9673_v32 = vor.u32 %v10646_v10, %v9670_v24 }
 0x46e   : > { %v12669_v59 = vadd.f32 %v4796_v18, %v4748_v53  ;;  %v12681_v53 = vpack.c.bf16 %v535_v30, %v527_v9  ;;  %v12683_v18 = vpack.c.bf16 %v536_v56, %v528_v43  ;;  %v12686_v31 = vpack.c.bf16 %v537_v20, %v529_v41  ;;  %v10610_v9 = vld [vmem:[#allocation7 + $0x4c4] sm:$0xf]  ;;  %v13943_v30 = vld [vmem:[#allocation40_spill] sm:$0xff] }
 0x46f   : > { %v4701_v14 = vadd.f32 %v4700_v16, %v4652_v51  ;;  %v13941_v51 = vld [vmem:[#allocation60_spill] sm:$0xff]  ;;  %5247 = vmatpush.bf16.msrb.mxu1 %v9673_v32  ;;  %v10706_v20 = vld [vmem:[#allocation7 + $0x7c4] sm:$0xf] }
 0x470   : > { %13939 = vst [vmem:[#allocation109_spill] sm:$0xff] %v12681_v53  ;;  %v9910_v32 = vld [vmem:[#allocation7 + $0x7d0] sm:$0xf0] }
 0x471   : > { %13940 = vst [vmem:[#allocation110_spill] sm:$0xff] %v12683_v18 }
 0x472   : > { %13942 = vst [vmem:[#allocation60_spill] sm:$0xff] %v12686_v31 }
 0x473   : > { %v4749_v21 = vpop.f32.mrf.mxu2 }
 0x474   : > { %v4750_v48 = vadd.f32 %v4749_v21, %v4701_v14  ;;  %v4798_v17 = vpop.f32.mrf.mxu3  ;;  %v4654_v46 = vpop.f32.mrf.mxu0  ;;  %v9782_v14 = vld [vmem:[#allocation7 + $0x6d0] sm:$0xf0] }
 0x475   : > { %v4655_v16 = vadd.f32 %v4654_v46, %v13941_v51  ;;  %v4703_v27 = vpop.f32.mrf.mxu1  ;;  %v9785_v41 = vor.u32 %v10674_v52, %v9782_v14  ;;  %v9913_v46 = vor.u32 %v10706_v20, %v9910_v32  ;;  %v9510_v20 = vld [vmem:[#allocation7 + $0x4b0] sm:$0xf0]  ;;  %v10702_v32 = vld [vmem:[#allocation7 + $0x7a4] sm:$0xf] }
 0x476   : > { %v12688_v1 = vadd.f32 %v4798_v17, %v4750_v48 }
 0x477   : > { %v4704_v58 = vadd.f32 %v4703_v27, %v4655_v16  ;;  %4849 = vmatmul.bf16.gmra.mxu0 %v12679_v5  ;;  %4898 = vmatmul.bf16.gmra.mxu1 %v12681_v53  ;;  %v9526_v27 = vld [vmem:[#allocation7 + $0x4d0] sm:$0xf0] }
 0x478   : > { %4947 = vmatmul.bf16.gmra.mxu2 %v12683_v18  ;;  %v9529_v17 = vor.u32 %v10610_v9, %v9526_v27  ;;  %5346 = vmatpush.bf16.msrb.mxu3 %v9913_v46  ;;  %v9654_v16 = vld [vmem:[#allocation7 + $0x5d0] sm:$0xf0] }
 0x479   : > { %4996 = vmatmul.bf16.gmra.mxu3 %v12686_v31  ;;  %5297 = vmatpush.bf16.msrb.mxu2 %v9785_v41  ;;  %v10670_v41 = vld [vmem:[#allocation7 + $0x6a4] sm:$0xf]  ;;  %v9766_v27 = vld [vmem:[#allocation7 + $0x6b0] sm:$0xf0] }
 0x47a   : > { %5199 = vmatpush.bf16.msrb.mxu0 %v9529_v17  ;;  %v9894_v17 = vld [vmem:[#allocation7 + $0x7b0] sm:$0xf0] }
 0x47b   : > { %v4752_v24 = vpop.f32.mrf.mxu2 }
 0x47c   : > { %v4753_v57 = vadd.f32 %v4752_v24, %v4704_v58  ;;  %v4801_v21 = vpop.f32.mrf.mxu3  ;;  %v4656_v10 = vpop.f32.mrf.mxu0  ;;  %v10642_v58 = vld [vmem:[#allocation7 + $0x5c4] sm:$0xf] }
 0x47d   : > { %v4657_v43 = vadd.f32 %v4656_v10, %v13943_v30  ;;  %v4705_v56 = vpop.f32.mrf.mxu1  ;;  %v9657_v31 = vor.u32 %v10642_v58, %v9654_v16  ;;  %v9897_v58 = vor.u32 %v10702_v32, %v9894_v17  ;;  %v6178_v16 = vld [vmem:[#allocation10] sm:$0xf] }
 0x47e   : > { %v12695_v48 = vadd.f32 %v4801_v21, %v4753_v57 }
 0x47f   : > { %v4706_v51 = vadd.f32 %v4705_v56, %v4657_v43  ;;  %5248 = vmatpush.bf16.msrb.mxu1 %v9657_v31  ;;  %5347 = vmatpush.bf16.msrb.mxu3 %v9897_v58  ;;  %v10602_v58 = vld [vmem:[#allocation7 + $0x484] sm:$0xf] }
 0x483   : > { %v4754_v24 = vpop.f32.mrf.mxu2 }
 0x484   : > { %v4755_v18 = vadd.f32 %v4754_v24, %v4706_v51  ;;  %v4803_v53 = vpop.f32.mrf.mxu3  ;;  %v4815_v10 = vpop.f32.mrf.mxu0 }
 0x485   : > { %v4816_v52 = vadd.f32 %v4815_v10, %v12513_v28  ;;  %v4864_v14 = vpop.f32.mrf.mxu1  ;;  %v10606_v28 = vld [vmem:[#allocation7 + $0x4a4] sm:$0xf]  ;;  %v12705_v10 = vperm.slane %v6178_v16, 0 }
 0x486   : > { %v12698_v30 = vadd.f32 %v4803_v53, %v4755_v18  ;;  %v9769_v18 = vor.u32 %v10670_v41, %v9766_v27  ;;  %v9513_v51 = vor.u32 %v10606_v28, %v9510_v20 }
 0x487   : > { %v4865_v57 = vadd.f32 %v4864_v14, %v4816_v52  ;;  %5010 = vmatmul.bf16.vlgmr.msra.gmra.mxu0 %v12289_v39  ;;  %5059 = vmatmul.bf16.vlgmr.msra.gmra.mxu1 %v12291_v55  ;;  %v10638_v52 = vld [vmem:[#allocation7 + $0x5a4] sm:$0xf]  ;;  %v9638_v14 = vld [vmem:[#allocation7 + $0x5b0] sm:$0xf0] }
 0x488   : > { %5108 = vmatmul.bf16.vlgmr.msra.gmra.mxu2 %v12293_v11  ;;  %5200 = vmatpush.bf16.msrb.mxu0 %v9513_v51  ;;  %v10666_v51 = vld [vmem:[#allocation7 + $0x684] sm:$0xf] }
 0x489   : > { %5157 = vmatmul.bf16.vlgmr.msra.gmra.mxu3 %v12298_v34  ;;  %5298 = vmatpush.bf16.msrb.mxu2 %v9769_v18 }
 0x48b   : > { %v4913_v21 = vpop.f32.mrf.mxu2 }
 0x48c   : > { %v4914_v9 = vadd.f32 %v4913_v21, %v4865_v57  ;;  %v4962_v43 = vpop.f32.mrf.mxu3  ;;  %v4817_v56 = vpop.f32.mrf.mxu0  ;;  %v9641_v21 = vor.u32 %v10638_v52, %v9638_v14  ;;  %v9494_v14 = vld [vmem:[#allocation7 + $0x490] sm:$0xf0] }
 0x48d   : > { %v4818_v31 = vadd.f32 %v4817_v56, %v12532_v63  ;;  %v4866_v53 = vpop.f32.mrf.mxu1 }
 0x48e   : > { %v4963_v46 = vadd.f32 %v4962_v43, %v4914_v9  ;;  %5249 = vmatpush.bf16.msrb.mxu1 %v9641_v21  ;;  %v9878_v21 = vld [vmem:[#allocation7 + $0x790] sm:$0xf0] }
 0x48f   : > { %v4867_v24 = vadd.f32 %v4866_v53, %v4818_v31 }
 0x490   : > { %v6188_v9 = vadd.f32 %v12705_v10, %v4963_v46 }
 0x492   : > { %v6252_v53 = vmax.f32 %v6188_v9, 0.0  ;;  %v10634_v9 = vld [vmem:[#allocation7 + $0x584] sm:$0xf] }
 0x493   : > { %v4915_v57 = vpop.f32.mrf.mxu2 }
 0x494   : > { %v4916_v63 = vadd.f32 %v4915_v57, %v4867_v24  ;;  %v4964_v56 = vpop.f32.mrf.mxu3  ;;  %v4820_v41 = vpop.f32.mrf.mxu0  ;;  %v10698_v57 = vld [vmem:[#allocation7 + $0x784] sm:$0xf] }
 0x495   : > { %v4821_v27 = vadd.f32 %v4820_v41, %v12539_v0  ;;  %v4869_v34 = vpop.f32.mrf.mxu1  ;;  %v9881_v41 = vor.u32 %v10698_v57, %v9878_v21  ;;  %v10662_v21 = vld [vmem:[#allocation7 + $0x664] sm:$0xf] }
 0x496   : > { %v4965_v43 = vadd.f32 %v4964_v56, %v4916_v63  ;;  %v9497_v56 = vor.u32 %v10602_v58, %v9494_v14 }
 0x497   : > { %v4870_v28 = vadd.f32 %v4869_v34, %v4821_v27  ;;  %5015 = vmatmul.bf16.gmra.mxu0 %v12315_v44  ;;  %5064 = vmatmul.bf16.gmra.mxu1 %v12317_v3  ;;  %v9750_v34 = vld [vmem:[#allocation7 + $0x690] sm:$0xf0] }
 0x498   : > { %v6192_v31 = vadd.f32 %v12705_v10, %v4965_v43  ;;  %5113 = vmatmul.bf16.gmra.mxu2 %v12319_v7  ;;  %v9753_v52 = vor.u32 %v10666_v51, %v9750_v34  ;;  %5201 = vmatpush.bf16.msrb.mxu0 %v9497_v56  ;;  %v9622_v43 = vld [vmem:[#allocation7 + $0x590] sm:$0xf0]  ;;  %v10598_v56 = vld [vmem:[#allocation7 + $0x464] sm:$0xf] }
 0x499   : > { %5162 = vmatmul.bf16.gmra.mxu3 %v12322_v40 }
 0x49a   : > { %v6256_v18 = vmax.f32 %v6192_v31, 0.0  ;;  %5299 = vmatpush.bf16.msrb.mxu2 %v9753_v52  ;;  %5348 = vmatpush.bf16.msrb.mxu3 %v9881_v41  ;;  %v9625_v31 = vor.u32 %v10634_v9, %v9622_v43  ;;  %v9478_v43 = vld [vmem:[#allocation7 + $0x470] sm:$0xf0] }
 0x49b   : > { %v4918_v20 = vpop.f32.mrf.mxu2 }
 0x49c   : > { %v12714_v0 = vpack.c.bf16 %v6256_v18, %v6252_v53  ;;  %v4919_v32 = vadd.f32 %v4918_v20, %v4870_v28  ;;  %v4967_v17 = vpop.f32.mrf.mxu3  ;;  %v4822_v46 = vpop.f32.mrf.mxu0  ;;  %5250 = vmatpush.bf16.msrb.mxu1 %v9625_v31  ;;  %v9862_v31 = vld [vmem:[#allocation7 + $0x770] sm:$0xf0] }
 0x49d   : > { %v4823_v16 = vadd.f32 %v4822_v46, %v12558_v36  ;;  %v4871_v24 = vpop.f32.mrf.mxu1 }
 0x49e   : > { %13944 = vst [vmem:[#allocation40_spill] sm:$0xff] %v12714_v0  ;;  %v4968_v63 = vadd.f32 %v4967_v17, %v4919_v32 }
 0x49f   : > { %v4872_v27 = vadd.f32 %v4871_v24, %v4823_v16 }
 0x4a0   : > { %v6196_v51 = vadd.f32 %v12705_v10, %v4968_v63  ;;  %v9734_v63 = vld [vmem:[#allocation7 + $0x670] sm:$0xf0] }
 0x4a1   : > { %v9737_v9 = vor.u32 %v10662_v21, %v9734_v63 }
 0x4a2   : > { %v6260_v58 = vmax.f32 %v6196_v51, 0.0  ;;  %v9606_v51 = vld [vmem:[#allocation7 + $0x570] sm:$0xf0] }
 0x4a3   : > { %v4920_v28 = vpop.f32.mrf.mxu2  ;;  %5300 = vmatpush.bf16.msrb.mxu2 %v9737_v9 }
 0x4a4   : > { %v4921_v53 = vadd.f32 %v4920_v28, %v4872_v27  ;;  %v4969_v18 = vpop.f32.mrf.mxu3  ;;  %v4825_v20 = vpop.f32.mrf.mxu0  ;;  %v10694_v28 = vld [vmem:[#allocation7 + $0x764] sm:$0xf] }
 0x4a5   : > { %v4826_v36 = vadd.f32 %v4825_v20, %v12565_v54  ;;  %v4874_v46 = vpop.f32.mrf.mxu1  ;;  %v9865_v20 = vor.u32 %v10694_v28, %v9862_v31  ;;  %v10658_v28 = vld [vmem:[#allocation7 + $0x644] sm:$0xf]  ;;  %v9718_v31 = vld [vmem:[#allocation7 + $0x650] sm:$0xf0] }
 0x4a6   : > { %v4970_v32 = vadd.f32 %v4969_v18, %v4921_v53  ;;  %v9481_v18 = vor.u32 %v10598_v56, %v9478_v43 }
 0x4a7   : > { %v4875_v17 = vadd.f32 %v4874_v46, %v4826_v36  ;;  %5020 = vmatmul.bf16.gmra.mxu0 %v12341_v60  ;;  %5069 = vmatmul.bf16.gmra.mxu1 %v12343_v62  ;;  %v10630_v46 = vld [vmem:[#allocation7 + $0x564] sm:$0xf] }
 0x4a8   : > { %v6200_v34 = vadd.f32 %v12705_v10, %v4970_v32  ;;  %5118 = vmatmul.bf16.gmra.mxu2 %v12345_v47  ;;  %5202 = vmatpush.bf16.msrb.mxu0 %v9481_v18 }
 0x4a9   : > { %5167 = vmatmul.bf16.gmra.mxu3 %v12348_v38 }
 0x4aa   : > { %v6264_v16 = vmax.f32 %v6200_v34, 0.0  ;;  %5349 = vmatpush.bf16.msrb.mxu3 %v9865_v20 }
 0x4ab   : > { %v4923_v24 = vpop.f32.mrf.mxu2 }
 0x4ac   : > { %v12724_v54 = vpack.c.bf16 %v6264_v16, %v6260_v58  ;;  %v4924_v52 = vadd.f32 %v4923_v24, %v4875_v17  ;;  %v4972_v14 = vpop.f32.mrf.mxu3  ;;  %v4827_v57 = vpop.f32.mrf.mxu0  ;;  %v9609_v17 = vor.u32 %v10630_v46, %v9606_v51  ;;  %v9462_v46 = vld [vmem:[#allocation7 + $0x450] sm:$0xf0]  ;;  %v10690_v51 = vld [vmem:[#allocation7 + $0x744] sm:$0xf] }
 0x4ad   : > { %v4828_v41 = vadd.f32 %v4827_v57, %v12584_v35  ;;  %v4876_v27 = vpop.f32.mrf.mxu1 }
 0x4ae   : > { %13945 = vst [vmem:[#allocation111_spill] sm:$0xff] %v12724_v54  ;;  %v4973_v53 = vadd.f32 %v4972_v14, %v4924_v52  ;;  %5251 = vmatpush.bf16.msrb.mxu1 %v9609_v17 }
 0x4af   : > { %v4877_v36 = vadd.f32 %v4876_v27, %v4828_v41 }
 0x4b0   : > { %v6204_v57 = vadd.f32 %v12705_v10, %v4973_v53  ;;  %v10594_v53 = vld [vmem:[#allocation7 + $0x444] sm:$0xf] }
 0x4b2   : > { %v6268_v63 = vmax.f32 %v6204_v57, 0.0 }
 0x4b3   : > { %v4925_v32 = vpop.f32.mrf.mxu2 }
 0x4b4   : > { %v4926_v34 = vadd.f32 %v4925_v32, %v4877_v36  ;;  %v4974_v58 = vpop.f32.mrf.mxu3  ;;  %v4830_v16 = vpop.f32.mrf.mxu0  ;;  %v9721_v36 = vor.u32 %v10658_v28, %v9718_v31  ;;  %v9846_v32 = vld [vmem:[#allocation7 + $0x750] sm:$0xf0] }
 0x4b5   : > { %v4831_v35 = vadd.f32 %v4830_v16, %v12591_v4  ;;  %v4879_v24 = vpop.f32.mrf.mxu1 }
 0x4b6   : > { %v4975_v52 = vadd.f32 %v4974_v58, %v4926_v34  ;;  %v9465_v34 = vor.u32 %v10594_v53, %v9462_v46  ;;  %v9849_v58 = vor.u32 %v10690_v51, %v9846_v32  ;;  %5301 = vmatpush.bf16.msrb.mxu2 %v9721_v36  ;;  %v10654_v46 = vld [vmem:[#allocation7 + $0x624] sm:$0xf]  ;;  %v9702_v51 = vld [vmem:[#allocation7 + $0x630] sm:$0xf0] }
 0x4b7   : > { %v4880_v14 = vadd.f32 %v4879_v24, %v4831_v35  ;;  %5025 = vmatmul.bf16.gmra.mxu0 %v12367_v61  ;;  %5074 = vmatmul.bf16.gmra.mxu1 %v12369_v15  ;;  %v10626_v35 = vld [vmem:[#allocation7 + $0x544] sm:$0xf]  ;;  %v9590_v24 = vld [vmem:[#allocation7 + $0x550] sm:$0xf0] }
 0x4b8   : > { %v6208_v21 = vadd.f32 %v12705_v10, %v4975_v52  ;;  %5123 = vmatmul.bf16.gmra.mxu2 %v12371_v29  ;;  %5203 = vmatpush.bf16.msrb.mxu0 %v9465_v34  ;;  %v9593_v52 = vor.u32 %v10626_v35, %v9590_v24  ;;  %v10590_v32 = vld [vmem:[#allocation7 + $0x424] sm:$0xf]  ;;  %v9830_v24 = vld [vmem:[#allocation7 + $0x730] sm:$0xf0] }
 0x4b9   : > { %5172 = vmatmul.bf16.gmra.mxu3 %v12374_v26  ;;  %v10686_v35 = vld [vmem:[#allocation7 + $0x724] sm:$0xf] }
 0x4ba   : > { %v6272_v56 = vmax.f32 %v6208_v21, 0.0  ;;  %5350 = vmatpush.bf16.msrb.mxu3 %v9849_v58  ;;  %5252 = vmatpush.bf16.msrb.mxu1 %v9593_v52  ;;  %v9705_v58 = vor.u32 %v10654_v46, %v9702_v51 }
 0x4bb   : > { %v4928_v41 = vpop.f32.mrf.mxu2 }
 0x4bc   : > { %v12734_v4 = vpack.c.bf16 %v6272_v56, %v6268_v63  ;;  %v4929_v27 = vadd.f32 %v4928_v41, %v4880_v14  ;;  %v4977_v9 = vpop.f32.mrf.mxu3  ;;  %v4832_v43 = vpop.f32.mrf.mxu0  ;;  %5302 = vmatpush.bf16.msrb.mxu2 %v9705_v58  ;;  %v10650_v58 = vld [vmem:[#allocation7 + $0x604] sm:$0xf] }
 0x4bd   : > { %v4833_v18 = vadd.f32 %v4832_v43, %v12610_v42  ;;  %v4881_v20 = vpop.f32.mrf.mxu1 }
 0x4be   : > { %13946 = vst [vmem:[#allocation112_spill] sm:$0xff] %v12734_v4  ;;  %v4978_v17 = vadd.f32 %v4977_v9, %v4929_v27  ;;  %v10509_v4 = vld [vmem:[#allocation7 + $0x194] sm:$0xf0] }
 0x4bf   : > { %v4882_v16 = vadd.f32 %v4881_v20, %v4833_v18 }
 0x4c0   : > { %v6212_v41 = vadd.f32 %v12705_v10, %v4978_v17 }
 0x4c2   : > { %v6276_v28 = vmax.f32 %v6212_v41, 0.0 }
 0x4c3   : > { %v4930_v57 = vpop.f32.mrf.mxu2 }
 0x4c4   : > { %v4931_v14 = vadd.f32 %v4930_v57, %v4882_v16  ;;  %v4979_v21 = vpop.f32.mrf.mxu3  ;;  %v4835_v63 = vpop.f32.mrf.mxu0  ;;  %v9446_v16 = vld [vmem:[#allocation7 + $0x430] sm:$0xf0] }
 0x4c5   : > { %v4836_v42 = vadd.f32 %v4835_v63, %v12617_v25  ;;  %v4884_v56 = vpop.f32.mrf.mxu1  ;;  %v9449_v52 = vor.u32 %v10590_v32, %v9446_v16  ;;  %v10622_v63 = vld [vmem:[#allocation7 + $0x524] sm:$0xf]  ;;  %v9686_v16 = vld [vmem:[#allocation7 + $0x610] sm:$0xf0] }
 0x4c6   : > { %v4980_v27 = vadd.f32 %v4979_v21, %v4931_v14  ;;  %v9833_v14 = vor.u32 %v10686_v35, %v9830_v24  ;;  %v10586_v35 = vld [vmem:[#allocation7 + $0x404] sm:$0xf] }
 0x4c7   : > { %v4885_v9 = vadd.f32 %v4884_v56, %v4836_v42  ;;  %5030 = vmatmul.bf16.gmra.mxu0 %v12393_v23  ;;  %5079 = vmatmul.bf16.gmra.mxu1 %v12395_v6  ;;  %v9574_v42 = vld [vmem:[#allocation7 + $0x530] sm:$0xf0] }
 0x4c8   : > { %v6216_v43 = vadd.f32 %v12705_v10, %v4980_v27  ;;  %5128 = vmatmul.bf16.gmra.mxu2 %v12397_v22  ;;  %5204 = vmatpush.bf16.msrb.mxu0 %v9449_v52  ;;  %v9577_v41 = vor.u32 %v10622_v63, %v9574_v42  ;;  %v9689_v52 = vor.u32 %v10650_v58, %v9686_v16  ;;  %v9814_v63 = vld [vmem:[#allocation7 + $0x710] sm:$0xf0] }
 0x4c9   : > { %5177 = vmatmul.bf16.gmra.mxu3 %v12400_v8 }
 0x4ca   : > { %v6280_v31 = vmax.f32 %v6216_v43, 0.0  ;;  %5351 = vmatpush.bf16.msrb.mxu3 %v9833_v14  ;;  %5253 = vmatpush.bf16.msrb.mxu1 %v9577_v41  ;;  %v9430_v14 = vld [vmem:[#allocation7 + $0x410] sm:$0xf0] }
 0x4cb   : > { %v4933_v53 = vpop.f32.mrf.mxu2  ;;  %5303 = vmatpush.bf16.msrb.mxu2 %v9689_v52 }
 0x4cc   : > { %v12744_v25 = vpack.c.bf16 %v6280_v31, %v6276_v28  ;;  %v4934_v18 = vadd.f32 %v4933_v53, %v4885_v9  ;;  %v4982_v20 = vpop.f32.mrf.mxu3  ;;  %v4837_v36 = vpop.f32.mrf.mxu0 }
 0x4cd   : > { %v4838_v17 = vadd.f32 %v4837_v36, %v12636_v13  ;;  %v4886_v34 = vpop.f32.mrf.mxu1 }
 0x4ce   : > { %13947 = vst [vmem:[#allocation113_spill] sm:$0xff] %v12744_v25  ;;  %v4983_v57 = vadd.f32 %v4982_v20, %v4934_v18  ;;  %v9116_v25 = vld [vmem:[#allocation7 + $0x188] sm:$0xf] }
 0x4cf   : > { %v4887_v21 = vadd.f32 %v4886_v34, %v4838_v17 }
 0x4d0   : > { %v6220_v31 = vadd.f32 %v12705_v10, %v4983_v57 }
 0x4d2   : > { %v6284_v36 = vmax.f32 %v6220_v31, 0.0 }
 0x4d3   : > { %v4935_v56 = vpop.f32.mrf.mxu2 }
 0x4d4   : > { %v4936_v27 = vadd.f32 %v4935_v56, %v4887_v21  ;;  %v4984_v9 = vpop.f32.mrf.mxu3  ;;  %v4840_v43 = vpop.f32.mrf.mxu0  ;;  %v10682_v21 = vld [vmem:[#allocation7 + $0x704] sm:$0xf]  ;;  %v9433_v56 = vor.u32 %v10586_v35, %v9430_v14  ;;  %v9292_v14 = vld [vmem:[#allocation7 + $0x2e8] sm:$0xf] }
 0x4d5   : > { %v4841_v13 = vadd.f32 %v4840_v43, %v12643_v19  ;;  %v4889_v28 = vpop.f32.mrf.mxu1  ;;  %v9817_v41 = vor.u32 %v10682_v21, %v9814_v63  ;;  %v9558_v43 = vld [vmem:[#allocation7 + $0x510] sm:$0xf0]  ;;  %v10553_v21 = vld [vmem:[#allocation7 + $0x2f4] sm:$0xf0]  ;;  %v9036_v63 = vld [vmem:[#allocation7 + $0xe8] sm:$0xf] }
 0x4d6   : > { %v4985_v53 = vadd.f32 %v4984_v9, %v4936_v27  ;;  %5205 = vmatpush.bf16.msrb.mxu0 %v9433_v56  ;;  %v10618_v9 = vld [vmem:[#allocation7 + $0x504] sm:$0xf] }
 0x4d7   : > { %v4890_v18 = vadd.f32 %v4889_v28, %v4841_v13  ;;  %5035 = vmatmul.bf16.gmra.mxu0 %v12419_v49  ;;  %5084 = vmatmul.bf16.gmra.mxu1 %v12421_v12  ;;  %v9561_v28 = vor.u32 %v10618_v9, %v9558_v43  ;;  %v9420_v9 = vld [vmem:[#allocation7 + $0x3e8] sm:$0xf]  ;;  %v10585_v43 = vld [vmem:[#allocation7 + $0x3f4] sm:$0xf0] }
 0x4d8   : > { %v6224_v20 = vadd.f32 %v12705_v10, %v4985_v53  ;;  %5133 = vmatmul.bf16.gmra.mxu2 %v12423_v45  ;;  %5352 = vmatpush.bf16.msrb.mxu3 %v9817_v41  ;;  %v9293_v41 = vor.u32 %v10553_v21, %v9292_v14  ;;  %v13953_v14 = vld [vmem:[#allocation88_spill] sm:$0xff]  ;;  %v13954_v21 = vld [vmem:[#allocation89_spill] sm:$0xff] }
 0x4d9   : > { %5182 = vmatmul.bf16.gmra.mxu3 %v12426_v2  ;;  %5254 = vmatpush.bf16.msrb.mxu1 %v9561_v28 }
 0x4da   : > { %v6288_v46 = vmax.f32 %v6224_v20, 0.0  ;;  %5492 = vmatpush.bf16.msra.mxu2 %v9293_v41  ;;  %v9020_v41 = vld [vmem:[#allocation7 + $0xc8] sm:$0xf] }
 0x4db   : > { %v4938_v51 = vpop.f32.mrf.mxu2 }
 0x4dc   : > { %v12754_v19 = vpack.c.bf16 %v6288_v46, %v6284_v36  ;;  %v4939_v32 = vadd.f32 %v4938_v51, %v4890_v18  ;;  %v4987_v17 = vpop.f32.mrf.mxu3  ;;  %v4842_v34 = vpop.f32.mrf.mxu0 }
 0x4dd   : > { %v4843_v24 = vadd.f32 %v4842_v34, %v12662_v37  ;;  %v4891_v57 = vpop.f32.mrf.mxu1  ;;  %v13950_v34 = vld [vmem:[#allocation84_spill] sm:$0xff] }
 0x4de   : > { %13948 = vst [vmem:[#allocation114_spill] sm:$0xff] %v12754_v19  ;;  %v4988_v42 = vadd.f32 %v4987_v17, %v4939_v32  ;;  %v13949_v17 = vld [vmem:[#allocation83_spill] sm:$0xff] }
 0x4df   : > { %v4892_v27 = vadd.f32 %v4891_v57, %v4843_v24 }
 0x4e0   : > { %v6228_v36 = vadd.f32 %v12705_v10, %v4988_v42 }
 0x4e2   : > { %v6292_v58 = vmax.f32 %v6228_v36, 0.0 }
 0x4e3   : > { %v4940_v13 = vpop.f32.mrf.mxu2 }
 0x4e4   : > { %v4941_v31 = vadd.f32 %v4940_v13, %v4892_v27  ;;  %v4989_v53 = vpop.f32.mrf.mxu3  ;;  %v4845_v18 = vpop.f32.mrf.mxu0  ;;  %v10489_v27 = vld [vmem:[#allocation7 + $0xf4] sm:$0xf0] }
 0x4e5   : > { %v4846_v37 = vadd.f32 %v4845_v18, %v12669_v59  ;;  %v4894_v20 = vpop.f32.mrf.mxu1  ;;  %v9037_v28 = vor.u32 %v10489_v27, %v9036_v63  ;;  %v10521_v18 = vld [vmem:[#allocation7 + $0x1f4] sm:$0xf0]  ;;  %v13955_v63 = vld [vmem:[#allocation90_spill] sm:$0xff] }
 0x4e6   : > { %v4990_v46 = vadd.f32 %v4989_v53, %v4941_v31  ;;  %v9421_v31 = vor.u32 %v10585_v43, %v9420_v9  ;;  %v9164_v53 = vld [vmem:[#allocation7 + $0x1e8] sm:$0xf]  ;;  %v10485_v43 = vld [vmem:[#allocation7 + $0xd4] sm:$0xf0] }
 0x4e7   : > { %v4895_v51 = vadd.f32 %v4894_v20, %v4846_v37  ;;  %5040 = vmatmul.bf16.gmra.mxu0 %v12445_v50  ;;  %5089 = vmatmul.bf16.gmra.mxu1 %v12447_v33  ;;  %v9165_v20 = vor.u32 %v10521_v18, %v9164_v53  ;;  %v10581_v53 = vld [vmem:[#allocation7 + $0x3d4] sm:$0xf0] }
 0x4e8   : > { %v6232_v32 = vadd.f32 %v12705_v10, %v4990_v46  ;;  %5138 = vmatmul.bf16.gmra.mxu2 %v13949_v17  ;;  %5394 = vmatpush.bf16.msra.mxu0 %v9037_v28 }
 0x4e9   : > { %5187 = vmatmul.bf16.gmra.mxu3 %v13950_v34  ;;  %5443 = vmatpush.bf16.msra.mxu1 %v9165_v20 }
 0x4ea   : > { %v6296_v16 = vmax.f32 %v6232_v32, 0.0  ;;  %5541 = vmatpush.bf16.msra.mxu3 %v9421_v31  ;;  %v9021_v31 = vor.u32 %v10485_v43, %v9020_v41 }
 0x4eb   : > { %v4943_v35 = vpop.f32.mrf.mxu2 }
 0x4ec   : > { %v12764_v59 = vpack.c.bf16 %v6296_v16, %v6292_v58  ;;  %v4944_v24 = vadd.f32 %v4943_v35, %v4895_v51  ;;  %v4992_v57 = vpop.f32.mrf.mxu3  ;;  %v4847_v52 = vpop.f32.mrf.mxu0  ;;  %5395 = vmatpush.bf16.msra.mxu0 %v9021_v31 }
 0x4ed   : > { %v4848_v42 = vadd.f32 %v4847_v52, %v12688_v1  ;;  %v4896_v56 = vpop.f32.mrf.mxu1 }
 0x4ee   : > { %13951 = vst [vmem:[#allocation83_spill] sm:$0xff] %v12764_v59  ;;  %v4993_v13 = vadd.f32 %v4992_v57, %v4944_v24  ;;  %v13952_v57 = vld [vmem:[#allocation87_spill] sm:$0xff] }
 0x4ef   : > { %v4897_v37 = vadd.f32 %v4896_v56, %v4848_v42  ;;  %v9276_v42 = vld [vmem:[#allocation7 + $0x2c8] sm:$0xf]  ;;  %v10549_v56 = vld [vmem:[#allocation7 + $0x2d4] sm:$0xf0] }
 0x4f0   : > { %v6236_v16 = vadd.f32 %v12705_v10, %v4993_v13  ;;  %v9277_v9 = vor.u32 %v10549_v56, %v9276_v42  ;;  %v9404_v13 = vld [vmem:[#allocation7 + $0x3c8] sm:$0xf] }
 0x4f2   : > { %v6300_v27 = vmax.f32 %v6236_v16, 0.0  ;;  %5493 = vmatpush.bf16.msra.mxu2 %v9277_v9  ;;  %v10517_v16 = vld [vmem:[#allocation7 + $0x1d4] sm:$0xf0] }
 0x4f3   : > { %v4945_v36 = vpop.f32.mrf.mxu2 }
 0x4f4   : > { %v4946_v46 = vadd.f32 %v4945_v36, %v4897_v37  ;;  %v4994_v51 = vpop.f32.mrf.mxu3  ;;  %v4850_v1 = vpop.f32.mrf.mxu0 }
 0x4f5   : > { %v4851_v32 = vadd.f32 %v4850_v1, %v12695_v48  ;;  %v4899_v58 = vpop.f32.mrf.mxu1 }
 0x4f6   : > { %v4995_v35 = vadd.f32 %v4994_v51, %v4946_v46  ;;  %v9405_v46 = vor.u32 %v10581_v53, %v9404_v13  ;;  %v13959_v53 = vld [vmem:[#allocation94_spill] sm:$0xff] }
 0x4f7   : > { %v4900_v24 = vadd.f32 %v4899_v58, %v4851_v32  ;;  %5045 = vmatmul.bf16.gmra.mxu0 %v13952_v57  ;;  %5094 = vmatmul.bf16.gmra.mxu1 %v13953_v14  ;;  %v9148_v58 = vld [vmem:[#allocation7 + $0x1c8] sm:$0xf] }
 0x4f8   : > { %v6240_v52 = vadd.f32 %v12705_v10, %v4995_v35  ;;  %5143 = vmatmul.bf16.gmra.mxu2 %v13954_v21  ;;  %5542 = vmatpush.bf16.msra.mxu3 %v9405_v46  ;;  %v10545_v46 = vld [vmem:[#allocation7 + $0x2b4] sm:$0xf0] }
 0x4f9   : > { %5192 = vmatmul.bf16.gmra.mxu3 %v13955_v63 }
 0x4fa   : > { %v6304_v48 = vmax.f32 %v6240_v52, 0.0  ;;  %v9149_v52 = vor.u32 %v10517_v16, %v9148_v58 }
 0x4fb   : > { %v4948_v28 = vpop.f32.mrf.mxu2 }
 0x4fc   : > { %v12774_v18 = vpack.c.bf16 %v6304_v48, %v6300_v27  ;;  %v4949_v37 = vadd.f32 %v4948_v28, %v4900_v24  ;;  %v4997_v20 = vpop.f32.mrf.mxu3  ;;  %v4852_v36 = vpop.f32.mrf.mxu0  ;;  %5444 = vmatpush.bf16.msra.mxu1 %v9149_v52  ;;  %v13957_v24 = vld [vmem:[#allocation41_spill] sm:$0xff] }
 0x4fd   : > { %v4853_v51 = vadd.f32 %v4852_v36, %v12698_v30  ;;  %v4901_v1 = vpop.f32.mrf.mxu1  ;;  %v13958_v28 = vld [vmem:[#allocation93_spill] sm:$0xff]  ;;  %v9260_v36 = vld [vmem:[#allocation7 + $0x2a8] sm:$0xf] }
 0x4fe   : > { %13956 = vst [vmem:[#allocation84_spill] sm:$0xff] %v12774_v18  ;;  %v4998_v32 = vadd.f32 %v4997_v20, %v4949_v37  ;;  %v13960_v37 = vld [vmem:[#allocation95_spill] sm:$0xff]  ;;  %v13961_v20 = vld [vmem:[#allocation46_spill] sm:$0xff]  ;;  %v9261_v16 = vor.u32 %v10545_v46, %v9260_v36 }
 0x4ff   : > { %v4902_v35 = vadd.f32 %v4901_v1, %v4853_v51  ;;  %v9004_v51 = vld [vmem:[#allocation7 + $0xa8] sm:$0xf] }
 0x500   : > { %v6244_v9 = vadd.f32 %v12705_v10, %v4998_v32  ;;  %v9388_v32 = vld [vmem:[#allocation7 + $0x3a8] sm:$0xf]  ;;  %5494 = vmatpush.bf16.msra.mxu2 %v9261_v16 }
 0x502   : > { %v6308_v1 = vmax.f32 %v6244_v9, 0.0  ;;  %v9132_v9 = vld [vmem:[#allocation7 + $0x1a8] sm:$0xf] }
 0x503   : > { %v4950_v42 = vpop.f32.mrf.mxu2 }
 0x504   : > { %v4951_v56 = vadd.f32 %v4950_v42, %v4902_v35  ;;  %v4999_v41 = vpop.f32.mrf.mxu3  ;;  %v5011_v27 = vpop.f32.mrf.mxu0  ;;  %v10481_v35 = vld [vmem:[#allocation7 + $0xb4] sm:$0xf0] }
 0x505   : > { %v5012_v48 = vadd.f32 %v5011_v27, %v13957_v24  ;;  %v5060_v43 = vpop.f32.mrf.mxu1  ;;  %v9005_v42 = vor.u32 %v10481_v35, %v9004_v51  ;;  %v13964_v35 = vld [vmem:[#allocation23_spill] sm:$0xff] }
 0x506   : > { %v5000_v13 = vadd.f32 %v4999_v41, %v4951_v56  ;;  %v10577_v56 = vld [vmem:[#allocation7 + $0x3b4] sm:$0xf0] }
 0x507   : > { %v5061_v30 = vadd.f32 %v5060_v43, %v5012_v48  ;;  %5206 = vmatmul.bf16.vlgmr.msrb.gmra.mxu0 %v13958_v28  ;;  %5255 = vmatmul.bf16.vlgmr.msrb.gmra.mxu1 %v13959_v53  ;;  %v9389_v48 = vor.u32 %v10577_v56, %v9388_v32  ;;  %v13963_v43 = vld [vmem:[#allocation22_spill] sm:$0xff] }
 0x508   : > { %v6248_v31 = vadd.f32 %v12705_v10, %v5000_v13  ;;  %5304 = vmatmul.bf16.vlgmr.msrb.gmra.mxu2 %v13960_v37  ;;  %5396 = vmatpush.bf16.msra.mxu0 %v9005_v42  ;;  %v13966_v42 = vld [vmem:[#allocation97_spill] sm:$0xff] }
 0x509   : > { %5353 = vmatmul.bf16.vlgmr.msrb.gmra.mxu3 %v13961_v20 }
 0x50a   : > { %v6312_v58 = vmax.f32 %v6248_v31, 0.0  ;;  %5543 = vmatpush.bf16.msra.mxu3 %v9389_v48  ;;  %v10513_v31 = vld [vmem:[#allocation7 + $0x1b4] sm:$0xf0] }
 0x50b   : > { %v5109_v52 = vpop.f32.mrf.mxu2  ;;  %v9133_v46 = vor.u32 %v10513_v31, %v9132_v9  ;;  %v10541_v48 = vld [vmem:[#allocation7 + $0x294] sm:$0xf0]  ;;  %v9372_v31 = vld [vmem:[#allocation7 + $0x388] sm:$0xf] }
 0x50c   : > { %v12784_v41 = vpack.c.bf16 %v6312_v58, %v6308_v1  ;;  %v5110_v10 = vadd.f32 %v5109_v52, %v5061_v30  ;;  %v5158_v27 = vpop.f32.mrf.mxu3  ;;  %v5013_v24 = vpop.f32.mrf.mxu0  ;;  %v10477_v9 = vld [vmem:[#allocation7 + $0x94] sm:$0xf0] }
 0x50d   : > { %v5014_v13 = vadd.f32 %v5013_v24, %v13963_v43  ;;  %v5062_v18 = vpop.f32.mrf.mxu1  ;;  %5445 = vmatpush.bf16.msra.mxu1 %v9133_v46  ;;  %v13965_v24 = vld [vmem:[#allocation47_spill] sm:$0xff]  ;;  %v8988_v43 = vld [vmem:[#allocation7 + $0x88] sm:$0xf] }
 0x50e   : > { %13962 = vst [vmem:[#allocation41_spill] sm:$0xff] %v12784_v41  ;;  %v12787_v59 = vadd.f32 %v5158_v27, %v5110_v10  ;;  %v13967_v10 = vld [vmem:[#allocation98_spill] sm:$0xff]  ;;  %v13968_v27 = vld [vmem:[#allocation48_spill] sm:$0xff] }
 0x50f   : > { %v5063_v36 = vadd.f32 %v5062_v18, %v5014_v13  ;;  %v9244_v18 = vld [vmem:[#allocation7 + $0x288] sm:$0xf] }
 0x510   : > { %v9245_v13 = vor.u32 %v10541_v48, %v9244_v18  ;;  %v9117_v48 = vor.u32 %v10509_v4, %v9116_v25  ;;  %v9228_v4 = vld [vmem:[#allocation7 + $0x268] sm:$0xf]  ;;  %v10537_v25 = vld [vmem:[#allocation7 + $0x274] sm:$0xf0] }
 0x512   : > { %5495 = vmatpush.bf16.msra.mxu2 %v9245_v13  ;;  %5446 = vmatpush.bf16.msra.mxu1 %v9117_v48 }
 0x513   : > { %v5111_v51 = vpop.f32.mrf.mxu2 }
 0x514   : > { %v5112_v1 = vadd.f32 %v5111_v51, %v5063_v36  ;;  %v5160_v58 = vpop.f32.mrf.mxu3  ;;  %v5016_v30 = vpop.f32.mrf.mxu0  ;;  %v10573_v36 = vld [vmem:[#allocation7 + $0x394] sm:$0xf0]  ;;  %v8989_v51 = vor.u32 %v10477_v9, %v8988_v43 }
 0x515   : > { %v5017_v52 = vadd.f32 %v5016_v30, %v13964_v35  ;;  %v5065_v16 = vpop.f32.mrf.mxu1 }
 0x516   : > { %v12790_v32 = vadd.f32 %v5160_v58, %v5112_v1  ;;  %v9373_v1 = vor.u32 %v10573_v36, %v9372_v31  ;;  %5397 = vmatpush.bf16.msra.mxu0 %v8989_v51  ;;  %v13972_v51 = vld [vmem:[#allocation99_spill] sm:$0xff] }
 0x517   : > { %v5066_v56 = vadd.f32 %v5065_v16, %v5017_v52  ;;  %5211 = vmatmul.bf16.gmra.mxu0 %v13965_v24  ;;  %5260 = vmatmul.bf16.gmra.mxu1 %v13966_v42  ;;  %v13969_v52 = vld [vmem:[#allocation26_spill] sm:$0xff] }
 0x518   : > { %5309 = vmatmul.bf16.gmra.mxu2 %v13967_v10  ;;  %5544 = vmatpush.bf16.msra.mxu3 %v9373_v1  ;;  %v13973_v1 = vld [vmem:[#allocation100_spill] sm:$0xff] }
 0x519   : > { %5358 = vmatmul.bf16.gmra.mxu3 %v13968_v27 }
 0x51b   : > { %v5114_v46 = vpop.f32.mrf.mxu2 }
 0x51c   : > { %v5115_v58 = vadd.f32 %v5114_v46, %v5066_v56  ;;  %v5163_v30 = vpop.f32.mrf.mxu3  ;;  %v5018_v35 = vpop.f32.mrf.mxu0  ;;  %v13970_v56 = vld [vmem:[#allocation27_spill] sm:$0xff] }
 0x51d   : > { %v5019_v16 = vadd.f32 %v5018_v35, %v13969_v52  ;;  %v5067_v41 = vpop.f32.mrf.mxu1  ;;  %v13971_v35 = vld [vmem:[#allocation49_spill] sm:$0xff]  ;;  %v9356_v52 = vld [vmem:[#allocation7 + $0x368] sm:$0xf] }
 0x51e   : > { %v12797_v19 = vadd.f32 %v5163_v30, %v5115_v58  ;;  %v13974_v58 = vld [vmem:[#allocation50_spill] sm:$0xff]  ;;  %v10473_v30 = vld [vmem:[#allocation7 + $0x74] sm:$0xf0] }
 0x51f   : > { %v5068_v18 = vadd.f32 %v5067_v41, %v5019_v16  ;;  %v8972_v41 = vld [vmem:[#allocation7 + $0x68] sm:$0xf]  ;;  %v10569_v16 = vld [vmem:[#allocation7 + $0x374] sm:$0xf0] }
 0x520   : > { %v8973_v48 = vor.u32 %v10473_v30, %v8972_v41 }
 0x522   : > { %5398 = vmatpush.bf16.msra.mxu0 %v8973_v48  ;;  %v13978_v48 = vld [vmem:[#allocation101_spill] sm:$0xff] }
 0x523   : > { %v5116_v54 = vpop.f32.mrf.mxu2 }
 0x524   : > { %v5117_v0 = vadd.f32 %v5116_v54, %v5068_v18  ;;  %v5165_v43 = vpop.f32.mrf.mxu3  ;;  %v5021_v9 = vpop.f32.mrf.mxu0  ;;  %v9229_v54 = vor.u32 %v10537_v25, %v9228_v4 }
 0x525   : > { %v5022_v31 = vadd.f32 %v5021_v9, %v13970_v56  ;;  %v5070_v36 = vpop.f32.mrf.mxu1 }
 0x526   : > { %v12800_v13 = vadd.f32 %v5165_v43, %v5117_v0  ;;  %v9357_v0 = vor.u32 %v10569_v16, %v9356_v52  ;;  %5496 = vmatpush.bf16.msra.mxu2 %v9229_v54 }
 0x527   : > { %v5071_v46 = vadd.f32 %v5070_v36, %v5022_v31  ;;  %5216 = vmatmul.bf16.gmra.mxu0 %v13971_v35  ;;  %5265 = vmatmul.bf16.gmra.mxu1 %v13972_v51  ;;  %v13975_v31 = vld [vmem:[#allocation28_spill] sm:$0xff] }
 0x528   : > { %5314 = vmatmul.bf16.gmra.mxu2 %v13973_v1  ;;  %5545 = vmatpush.bf16.msra.mxu3 %v9357_v0  ;;  %v9100_v1 = vld [vmem:[#allocation7 + $0x168] sm:$0xf]  ;;  %v10505_v35 = vld [vmem:[#allocation7 + $0x174] sm:$0xf0] }
 0x529   : > { %5363 = vmatmul.bf16.gmra.mxu3 %v13974_v58  ;;  %v9101_v25 = vor.u32 %v10505_v35, %v9100_v1  ;;  %v13979_v0 = vld [vmem:[#allocation102_spill] sm:$0xff] }
 0x52a   : > { %v9212_v35 = vld [vmem:[#allocation7 + $0x248] sm:$0xf] }
 0x52b   : > { %v5119_v18 = vpop.f32.mrf.mxu2  ;;  %5447 = vmatpush.bf16.msra.mxu1 %v9101_v25  ;;  %v8956_v1 = vld [vmem:[#allocation7 + $0x48] sm:$0xf] }
 0x52c   : > { %v5120_v43 = vadd.f32 %v5119_v18, %v5071_v46  ;;  %v5168_v9 = vpop.f32.mrf.mxu3  ;;  %v5023_v56 = vpop.f32.mrf.mxu0  ;;  %v13976_v46 = vld [vmem:[#allocation29_spill] sm:$0xff] }
 0x52d   : > { %v5024_v36 = vadd.f32 %v5023_v56, %v13975_v31  ;;  %v5072_v51 = vpop.f32.mrf.mxu1  ;;  %v13977_v56 = vld [vmem:[#allocation51_spill] sm:$0xff]  ;;  %v9340_v31 = vld [vmem:[#allocation7 + $0x348] sm:$0xf] }
 0x52e   : > { %v12807_v58 = vadd.f32 %v5168_v9, %v5120_v43  ;;  %v13980_v43 = vld [vmem:[#allocation52_spill] sm:$0xff] }
 0x52f   : > { %v5073_v4 = vadd.f32 %v5072_v51, %v5024_v36  ;;  %v10533_v51 = vld [vmem:[#allocation7 + $0x254] sm:$0xf0] }
 0x530   : > { %v10469_v9 = vld [vmem:[#allocation7 + $0x54] sm:$0xf0] }
 0x531   : > { %v10565_v36 = vld [vmem:[#allocation7 + $0x354] sm:$0xf0]  ;;  %v8957_v25 = vor.u32 %v10469_v9, %v8956_v1 }
 0x533   : > { %v5121_v27 = vpop.f32.mrf.mxu2  ;;  %5399 = vmatpush.bf16.msra.mxu0 %v8957_v25  ;;  %v13984_v25 = vld [vmem:[#allocation103_spill] sm:$0xff] }
 0x534   : > { %v5122_v10 = vadd.f32 %v5121_v27, %v5073_v4  ;;  %v5170_v41 = vpop.f32.mrf.mxu3  ;;  %v5026_v30 = vpop.f32.mrf.mxu0  ;;  %v9213_v27 = vor.u32 %v10533_v51, %v9212_v35 }
 0x535   : > { %v5027_v52 = vadd.f32 %v5026_v30, %v13976_v46  ;;  %v5075_v16 = vpop.f32.mrf.mxu1 }
 0x536   : > { %v12810_v54 = vadd.f32 %v5170_v41, %v5122_v10  ;;  %v9341_v10 = vor.u32 %v10565_v36, %v9340_v31  ;;  %5497 = vmatpush.bf16.msra.mxu2 %v9213_v27 }
 0x537   : > { %v5076_v18 = vadd.f32 %v5075_v16, %v5027_v52  ;;  %5221 = vmatmul.bf16.gmra.mxu0 %v13977_v56  ;;  %5270 = vmatmul.bf16.gmra.mxu1 %v13978_v48  ;;  %v13981_v52 = vld [vmem:[#allocation30_spill] sm:$0xff]  ;;  %v10501_v56 = vld [vmem:[#allocation7 + $0x154] sm:$0xf0] }
 0x538   : > { %5319 = vmatmul.bf16.gmra.mxu2 %v13979_v0  ;;  %5546 = vmatpush.bf16.msra.mxu3 %v9341_v10  ;;  %v9084_v0 = vld [vmem:[#allocation7 + $0x148] sm:$0xf]  ;;  %v13985_v10 = vld [vmem:[#allocation104_spill] sm:$0xff] }
 0x539   : > { %5368 = vmatmul.bf16.gmra.mxu3 %v13980_v43  ;;  %v9085_v51 = vor.u32 %v10501_v56, %v9084_v0  ;;  %v9196_v56 = vld [vmem:[#allocation7 + $0x228] sm:$0xf] }
 0x53a   : > { %v8940_v0 = vld [vmem:[#allocation7 + $0x28] sm:$0xf] }
 0x53b   : > { %v5124_v4 = vpop.f32.mrf.mxu2  ;;  %5448 = vmatpush.bf16.msra.mxu1 %v9085_v51 }
 0x53c   : > { %v5125_v41 = vadd.f32 %v5124_v4, %v5076_v18  ;;  %v5173_v30 = vpop.f32.mrf.mxu3  ;;  %v5028_v46 = vpop.f32.mrf.mxu0  ;;  %v13982_v18 = vld [vmem:[#allocation31_spill] sm:$0xff] }
 0x53d   : > { %v5029_v16 = vadd.f32 %v5028_v46, %v13981_v52  ;;  %v5077_v48 = vpop.f32.mrf.mxu1  ;;  %v13983_v46 = vld [vmem:[#allocation53_spill] sm:$0xff]  ;;  %v9324_v52 = vld [vmem:[#allocation7 + $0x328] sm:$0xf] }
 0x53e   : > { %v12817_v43 = vadd.f32 %v5173_v30, %v5125_v41  ;;  %v13986_v41 = vld [vmem:[#allocation54_spill] sm:$0xff]  ;;  %v10465_v30 = vld [vmem:[#allocation7 + $0x34] sm:$0xf0] }
 0x53f   : > { %v5078_v35 = vadd.f32 %v5077_v48, %v5029_v16  ;;  %v10529_v48 = vld [vmem:[#allocation7 + $0x234] sm:$0xf0]  ;;  %v8941_v51 = vor.u32 %v10465_v30, %v8940_v0 }
 0x540   : > { %v10561_v16 = vld [vmem:[#allocation7 + $0x334] sm:$0xf0] }
 0x541   : > { %5400 = vmatpush.bf16.msra.mxu0 %v8941_v51  ;;  %v13990_v51 = vld [vmem:[#allocation105_spill] sm:$0xff] }
 0x543   : > { %v5126_v42 = vpop.f32.mrf.mxu2 }
 0x544   : > { %v5127_v24 = vadd.f32 %v5126_v42, %v5078_v35  ;;  %v5175_v1 = vpop.f32.mrf.mxu3  ;;  %v5031_v9 = vpop.f32.mrf.mxu0  ;;  %v9197_v42 = vor.u32 %v10529_v48, %v9196_v56 }
 0x545   : > { %v5032_v31 = vadd.f32 %v5031_v9, %v13982_v18  ;;  %v5080_v36 = vpop.f32.mrf.mxu1 }
 0x546   : > { %v12820_v27 = vadd.f32 %v5175_v1, %v5127_v24  ;;  %v9325_v24 = vor.u32 %v10561_v16, %v9324_v52  ;;  %5498 = vmatpush.bf16.msra.mxu2 %v9197_v42 }
 0x547   : > { %v5081_v4 = vadd.f32 %v5080_v36, %v5032_v31  ;;  %5226 = vmatmul.bf16.gmra.mxu0 %v13983_v46  ;;  %5275 = vmatmul.bf16.gmra.mxu1 %v13984_v25  ;;  %v13987_v31 = vld [vmem:[#allocation32_spill] sm:$0xff] }
 0x548   : > { %5324 = vmatmul.bf16.gmra.mxu2 %v13985_v10  ;;  %5547 = vmatpush.bf16.msra.mxu3 %v9325_v24  ;;  %v9068_v10 = vld [vmem:[#allocation7 + $0x128] sm:$0xf]  ;;  %v10497_v46 = vld [vmem:[#allocation7 + $0x134] sm:$0xf0] }
 0x549   : > { %5373 = vmatmul.bf16.gmra.mxu3 %v13986_v41  ;;  %v9069_v48 = vor.u32 %v10497_v46, %v9068_v10  ;;  %v13991_v24 = vld [vmem:[#allocation106_spill] sm:$0xff] }
 0x54a   : > { %v9180_v46 = vld [vmem:[#allocation7 + $0x208] sm:$0xf] }
 0x54b   : > { %v5129_v35 = vpop.f32.mrf.mxu2  ;;  %5449 = vmatpush.bf16.msra.mxu1 %v9069_v48  ;;  %v8924_v10 = vld [vmem:[#allocation7 + $0x8] sm:$0xf] }
 0x54c   : > { %v5130_v1 = vadd.f32 %v5129_v35, %v5081_v4  ;;  %v5178_v9 = vpop.f32.mrf.mxu3  ;;  %v5033_v18 = vpop.f32.mrf.mxu0  ;;  %v13988_v4 = vld [vmem:[#allocation33_spill] sm:$0xff] }
 0x54d   : > { %v5034_v36 = vadd.f32 %v5033_v18, %v13987_v31  ;;  %v5082_v25 = vpop.f32.mrf.mxu1  ;;  %v13989_v18 = vld [vmem:[#allocation55_spill] sm:$0xff]  ;;  %v9308_v31 = vld [vmem:[#allocation7 + $0x308] sm:$0xf] }
 0x54e   : > { %v12827_v41 = vadd.f32 %v5178_v9, %v5130_v1  ;;  %v13992_v1 = vld [vmem:[#allocation56_spill] sm:$0xff] }
 0x54f   : > { %v5083_v56 = vadd.f32 %v5082_v25, %v5034_v36  ;;  %v10525_v25 = vld [vmem:[#allocation7 + $0x214] sm:$0xf0] }
 0x550   : > { %v10461_v9 = vld [vmem:[#allocation7 + $0x14] sm:$0xf0] }
 0x551   : > { %v10557_v36 = vld [vmem:[#allocation7 + $0x314] sm:$0xf0]  ;;  %v8925_v48 = vor.u32 %v10461_v9, %v8924_v10 }
 0x553   : > { %v5131_v20 = vpop.f32.mrf.mxu2  ;;  %5401 = vmatpush.bf16.msra.mxu0 %v8925_v48  ;;  %v13996_v48 = vld [vmem:[#allocation107_spill] sm:$0xff] }
 0x554   : > { %v5132_v37 = vadd.f32 %v5131_v20, %v5083_v56  ;;  %v5180_v0 = vpop.f32.mrf.mxu3  ;;  %v5036_v30 = vpop.f32.mrf.mxu0  ;;  %v9181_v20 = vor.u32 %v10525_v25, %v9180_v46 }
 0x555   : > { %v5037_v52 = vadd.f32 %v5036_v30, %v13988_v4  ;;  %v5085_v16 = vpop.f32.mrf.mxu1 }
 0x556   : > { %v12830_v42 = vadd.f32 %v5180_v0, %v5132_v37  ;;  %v9309_v37 = vor.u32 %v10557_v36, %v9308_v31  ;;  %5499 = vmatpush.bf16.msra.mxu2 %v9181_v20 }
 0x557   : > { %v5086_v35 = vadd.f32 %v5085_v16, %v5037_v52  ;;  %5231 = vmatmul.bf16.gmra.mxu0 %v13989_v18  ;;  %5280 = vmatmul.bf16.gmra.mxu1 %v13990_v51  ;;  %v13993_v52 = vld [vmem:[#allocation34_spill] sm:$0xff]  ;;  %v10493_v18 = vld [vmem:[#allocation7 + $0x114] sm:$0xf0] }
 0x558   : > { %5329 = vmatmul.bf16.gmra.mxu2 %v13991_v24  ;;  %5548 = vmatpush.bf16.msra.mxu3 %v9309_v37  ;;  %v9052_v24 = vld [vmem:[#allocation7 + $0x108] sm:$0xf]  ;;  %v13997_v37 = vld [vmem:[#allocation108_spill] sm:$0xff] }
 0x559   : > { %5378 = vmatmul.bf16.gmra.mxu3 %v13992_v1  ;;  %v9053_v25 = vor.u32 %v10493_v18, %v9052_v24  ;;  %v9804_v18 = vld [vmem:[#allocation7 + $0x6e8] sm:$0xf] }
 0x55a   : > { %v9548_v24 = vld [vmem:[#allocation7 + $0x4e8] sm:$0xf] }
 0x55b   : > { %v5134_v56 = vpop.f32.mrf.mxu2  ;;  %5450 = vmatpush.bf16.msra.mxu1 %v9053_v25 }
 0x55c   : > { %v5135_v0 = vadd.f32 %v5134_v56, %v5086_v35  ;;  %v5183_v30 = vpop.f32.mrf.mxu3  ;;  %v5038_v4 = vpop.f32.mrf.mxu0  ;;  %v13994_v35 = vld [vmem:[#allocation35_spill] sm:$0xff] }
 0x55d   : > { %v5039_v16 = vadd.f32 %v5038_v4, %v13993_v52  ;;  %v5087_v51 = vpop.f32.mrf.mxu1  ;;  %v13995_v4 = vld [vmem:[#allocation57_spill] sm:$0xff]  ;;  %v9932_v52 = vld [vmem:[#allocation7 + $0x7e8] sm:$0xf] }
 0x55e   : > { %v12837_v1 = vadd.f32 %v5183_v30, %v5135_v0  ;;  %v13998_v0 = vld [vmem:[#allocation58_spill] sm:$0xff]  ;;  %v10617_v30 = vld [vmem:[#allocation7 + $0x4f4] sm:$0xf0] }
 0x55f   : > { %v5088_v46 = vadd.f32 %v5087_v51, %v5039_v16  ;;  %v10681_v51 = vld [vmem:[#allocation7 + $0x6f4] sm:$0xf0]  ;;  %v9549_v25 = vor.u32 %v10617_v30, %v9548_v24  ;;  %v14000_v30 = vld [vmem:[#allocation37_spill] sm:$0xff] }
 0x560   : > { %v10713_v16 = vld [vmem:[#allocation7 + $0x7f4] sm:$0xf0] }
 0x561   : > { %5590 = vmatpush.bf16.msrb.mxu0 %v9549_v25  ;;  %v14002_v25 = vld [vmem:[#allocation110_spill] sm:$0xff] }
 0x563   : > { %v5136_v53 = vpop.f32.mrf.mxu2 }
 0x564   : > { %v5137_v28 = vadd.f32 %v5136_v53, %v5088_v46  ;;  %v5185_v10 = vpop.f32.mrf.mxu3  ;;  %v5041_v9 = vpop.f32.mrf.mxu0  ;;  %v9805_v53 = vor.u32 %v10681_v51, %v9804_v18  ;;  %v10649_v18 = vld [vmem:[#allocation7 + $0x5f4] sm:$0xf0] }
 0x565   : > { %v5042_v31 = vadd.f32 %v5041_v9, %v13994_v35  ;;  %v5090_v36 = vpop.f32.mrf.mxu1 }
 0x566   : > { %v12840_v20 = vadd.f32 %v5185_v10, %v5137_v28  ;;  %v9933_v28 = vor.u32 %v10713_v16, %v9932_v52  ;;  %5688 = vmatpush.bf16.msrb.mxu2 %v9805_v53 }
 0x567   : > { %v5091_v56 = vadd.f32 %v5090_v36, %v5042_v31  ;;  %5236 = vmatmul.bf16.gmra.mxu0 %v13995_v4  ;;  %5285 = vmatmul.bf16.gmra.mxu1 %v13996_v48  ;;  %v13999_v31 = vld [vmem:[#allocation36_spill] sm:$0xff]  ;;  %v9676_v4 = vld [vmem:[#allocation7 + $0x5e8] sm:$0xf] }
 0x568   : > { %5334 = vmatmul.bf16.gmra.mxu2 %v13997_v37  ;;  %5737 = vmatpush.bf16.msrb.mxu3 %v9933_v28  ;;  %v9677_v63 = vor.u32 %v10649_v18, %v9676_v4  ;;  %v10613_v18 = vld [vmem:[#allocation7 + $0x4d4] sm:$0xf0] }
 0x569   : > { %5383 = vmatmul.bf16.gmra.mxu3 %v13998_v0 }
 0x56a   : > { %5639 = vmatpush.bf16.msrb.mxu1 %v9677_v63 }
 0x56b   : > { %v5139_v46 = vpop.f32.mrf.mxu2 }
 0x56c   : > { %v5140_v10 = vadd.f32 %v5139_v46, %v5091_v56  ;;  %v5188_v9 = vpop.f32.mrf.mxu3  ;;  %v5043_v35 = vpop.f32.mrf.mxu0  ;;  %v14001_v46 = vld [vmem:[#allocation109_spill] sm:$0xff] }
 0x56d   : > { %v5044_v36 = vadd.f32 %v5043_v35, %v13999_v31  ;;  %v5092_v48 = vpop.f32.mrf.mxu1  ;;  %v10677_v35 = vld [vmem:[#allocation7 + $0x6d4] sm:$0xf0]  ;;  %v9532_v31 = vld [vmem:[#allocation7 + $0x4c8] sm:$0xf] }
 0x56e   : > { %v12847_v0 = vadd.f32 %v5188_v9, %v5140_v10  ;;  %v9788_v9 = vld [vmem:[#allocation7 + $0x6c8] sm:$0xf] }
 0x56f   : > { %v5093_v37 = vadd.f32 %v5092_v48, %v5044_v36  ;;  %v14003_v48 = vld [vmem:[#allocation60_spill] sm:$0xff]  ;;  %v14004_v36 = vld [vmem:[#allocation38_spill] sm:$0xff] }
 0x573   : > { %v5141_v51 = vpop.f32.mrf.mxu2 }
 0x574   : > { %v5142_v21 = vadd.f32 %v5141_v51, %v5093_v37  ;;  %v5190_v14 = vpop.f32.mrf.mxu3  ;;  %v5046_v24 = vpop.f32.mrf.mxu0  ;;  %v9916_v51 = vld [vmem:[#allocation7 + $0x7c8] sm:$0xf] }
 0x575   : > { %v5047_v56 = vadd.f32 %v5046_v24, %v14000_v30  ;;  %v5095_v52 = vpop.f32.mrf.mxu1  ;;  %v10709_v24 = vld [vmem:[#allocation7 + $0x7d4] sm:$0xf0] }
 0x576   : > { %v12850_v53 = vadd.f32 %v5190_v14, %v5142_v21  ;;  %v9789_v21 = vor.u32 %v10677_v35, %v9788_v9 }
 0x577   : > { %v5096_v16 = vadd.f32 %v5095_v52, %v5047_v56  ;;  %5241 = vmatmul.bf16.gmra.mxu0 %v12679_v5  ;;  %5290 = vmatmul.bf16.gmra.mxu1 %v14001_v46  ;;  %v9533_v56 = vor.u32 %v10613_v18, %v9532_v31  ;;  %v9917_v52 = vor.u32 %v10709_v24, %v9916_v51  ;;  %v10609_v18 = vld [vmem:[#allocation7 + $0x4b4] sm:$0xf0]  ;;  %v9900_v51 = vld [vmem:[#allocation7 + $0x7a8] sm:$0xf] }
 0x578   : > { %5339 = vmatmul.bf16.gmra.mxu2 %v14002_v25  ;;  %v10705_v24 = vld [vmem:[#allocation7 + $0x7b4] sm:$0xf0] }
 0x579   : > { %5388 = vmatmul.bf16.gmra.mxu3 %v14003_v48  ;;  %5689 = vmatpush.bf16.msrb.mxu2 %v9789_v21  ;;  %v10673_v21 = vld [vmem:[#allocation7 + $0x6b4] sm:$0xf0] }
 0x57a   : > { %5591 = vmatpush.bf16.msrb.mxu0 %v9533_v56  ;;  %5738 = vmatpush.bf16.msrb.mxu3 %v9917_v52 }
 0x57b   : > { %v5144_v28 = vpop.f32.mrf.mxu2 }
 0x57c   : > { %v5145_v4 = vadd.f32 %v5144_v28, %v5096_v16  ;;  %v5193_v37 = vpop.f32.mrf.mxu3  ;;  %v5048_v10 = vpop.f32.mrf.mxu0  ;;  %v9660_v16 = vld [vmem:[#allocation7 + $0x5c8] sm:$0xf]  ;;  %v10645_v28 = vld [vmem:[#allocation7 + $0x5d4] sm:$0xf0] }
 0x57d   : > { %v5049_v63 = vadd.f32 %v5048_v10, %v14004_v36  ;;  %v5097_v14 = vpop.f32.mrf.mxu1  ;;  %v9661_v46 = vor.u32 %v10645_v28, %v9660_v16  ;;  %v9901_v16 = vor.u32 %v10705_v24, %v9900_v51 }
 0x57e   : > { %v12857_v30 = vadd.f32 %v5193_v37, %v5145_v4  ;;  %v14005_v37 = vld [vmem:[#allocation71_spill] sm:$0xff] }
 0x57f   : > { %v5098_v25 = vadd.f32 %v5097_v14, %v5049_v63  ;;  %5640 = vmatpush.bf16.msrb.mxu1 %v9661_v46  ;;  %v9772_v14 = vld [vmem:[#allocation7 + $0x6a8] sm:$0xf]  ;;  %5739 = vmatpush.bf16.msrb.mxu3 %v9901_v16 }
 0x583   : > { %v5146_v48 = vpop.f32.mrf.mxu2 }
 0x584   : > { %v5147_v5 = vadd.f32 %v5146_v48, %v5098_v25  ;;  %v5195_v57 = vpop.f32.mrf.mxu3  ;;  %v5207_v10 = vpop.f32.mrf.mxu0 }
 0x585   : > { %v5208_v9 = vadd.f32 %v5207_v10, %v12787_v59  ;;  %v5256_v35 = vpop.f32.mrf.mxu1  ;;  %v9516_v59 = vld [vmem:[#allocation7 + $0x4a8] sm:$0xf]  ;;  %v11139_v10 = vld [vmem:[#allocation10] sm:$0xf] }
 0x586   : > { %v12860_v36 = vadd.f32 %v5195_v57, %v5147_v5  ;;  %v9773_v57 = vor.u32 %v10673_v21, %v9772_v14  ;;  %v9517_v52 = vor.u32 %v10609_v18, %v9516_v59 }
 0x587   : > { %v5257_v4 = vadd.f32 %v5256_v35, %v5208_v9  ;;  %5402 = vmatmul.bf16.vlgmr.msra.gmra.mxu0 %v12289_v39  ;;  %5451 = vmatmul.bf16.vlgmr.msra.gmra.mxu1 %v12291_v55  ;;  %v12867_v9 = vperm.slane %v11139_v10, 1  ;;  %v9644_v35 = vld [vmem:[#allocation7 + $0x5a8] sm:$0xf] }
 0x588   : > { %5500 = vmatmul.bf16.vlgmr.msra.gmra.mxu2 %v12293_v11  ;;  %5592 = vmatpush.bf16.msrb.mxu0 %v9517_v52  ;;  %v9500_v52 = vld [vmem:[#allocation7 + $0x488] sm:$0xf] }
 0x589   : > { %5549 = vmatmul.bf16.vlgmr.msra.gmra.mxu3 %v14005_v37  ;;  %5690 = vmatpush.bf16.msrb.mxu2 %v9773_v57 }
 0x58b   : > { %v5305_v31 = vpop.f32.mrf.mxu2 }
 0x58c   : > { %v5306_v63 = vadd.f32 %v5305_v31, %v5257_v4  ;;  %v5354_v25 = vpop.f32.mrf.mxu3  ;;  %v5209_v48 = vpop.f32.mrf.mxu0  ;;  %v10641_v4 = vld [vmem:[#allocation7 + $0x5b4] sm:$0xf0] }
 0x58d   : > { %v5210_v46 = vadd.f32 %v5209_v48, %v12790_v32  ;;  %v5258_v5 = vpop.f32.mrf.mxu1  ;;  %v9645_v37 = vor.u32 %v10641_v4, %v9644_v35  ;;  %v10605_v35 = vld [vmem:[#allocation7 + $0x494] sm:$0xf0]  ;;  %v9884_v4 = vld [vmem:[#allocation7 + $0x788] sm:$0xf] }
 0x58e   : > { %v5355_v56 = vadd.f32 %v5354_v25, %v5306_v63 }
 0x58f   : > { %v5259_v28 = vadd.f32 %v5258_v5, %v5210_v46  ;;  %5641 = vmatpush.bf16.msrb.mxu1 %v9645_v37 }
 0x590   : > { %v6189_v63 = vadd.f32 %v12867_v9, %v5355_v56  ;;  %v9756_v56 = vld [vmem:[#allocation7 + $0x688] sm:$0xf] }
 0x592   : > { %v6253_v5 = vmax.f32 %v6189_v63, 0.0  ;;  %v9628_v63 = vld [vmem:[#allocation7 + $0x588] sm:$0xf] }
 0x593   : > { %v5307_v31 = vpop.f32.mrf.mxu2 }
 0x594   : > { %v5308_v32 = vadd.f32 %v5307_v31, %v5259_v28  ;;  %v5356_v48 = vpop.f32.mrf.mxu3  ;;  %v5212_v14 = vpop.f32.mrf.mxu0  ;;  %v10701_v31 = vld [vmem:[#allocation7 + $0x794] sm:$0xf0] }
 0x595   : > { %v5213_v21 = vadd.f32 %v5212_v14, %v12797_v19  ;;  %v5261_v11 = vpop.f32.mrf.mxu1  ;;  %v9885_v14 = vor.u32 %v10701_v31, %v9884_v4  ;;  %v9740_v31 = vld [vmem:[#allocation7 + $0x668] sm:$0xf] }
 0x596   : > { %v5357_v25 = vadd.f32 %v5356_v48, %v5308_v32  ;;  %v9501_v48 = vor.u32 %v10605_v35, %v9500_v52 }
 0x597   : > { %v5262_v59 = vadd.f32 %v5261_v11, %v5213_v21  ;;  %5407 = vmatmul.bf16.gmra.mxu0 %v12315_v44  ;;  %5456 = vmatmul.bf16.gmra.mxu1 %v12317_v3  ;;  %v10669_v11 = vld [vmem:[#allocation7 + $0x694] sm:$0xf0] }
 0x598   : > { %v6193_v46 = vadd.f32 %v12867_v9, %v5357_v25  ;;  %5505 = vmatmul.bf16.gmra.mxu2 %v12319_v7  ;;  %v9757_v10 = vor.u32 %v10669_v11, %v9756_v56  ;;  %5593 = vmatpush.bf16.msrb.mxu0 %v9501_v48  ;;  %v10637_v25 = vld [vmem:[#allocation7 + $0x594] sm:$0xf0]  ;;  %v9484_v48 = vld [vmem:[#allocation7 + $0x468] sm:$0xf] }
 0x599   : > { %5554 = vmatmul.bf16.gmra.mxu3 %v12322_v40 }
 0x59a   : > { %v6257_v57 = vmax.f32 %v6193_v46, 0.0  ;;  %5691 = vmatpush.bf16.msrb.mxu2 %v9757_v10  ;;  %5740 = vmatpush.bf16.msrb.mxu3 %v9885_v14  ;;  %v9629_v46 = vor.u32 %v10637_v25, %v9628_v63  ;;  %v10601_v25 = vld [vmem:[#allocation7 + $0x474] sm:$0xf0] }
 0x59b   : > { %v5310_v18 = vpop.f32.mrf.mxu2 }
 0x59c   : > { %v12876_v19 = vpack.c.bf16 %v6257_v57, %v6253_v5  ;;  %v5311_v37 = vadd.f32 %v5310_v18, %v5262_v59  ;;  %v5359_v51 = vpop.f32.mrf.mxu3  ;;  %v5214_v24 = vpop.f32.mrf.mxu0  ;;  %5642 = vmatpush.bf16.msrb.mxu1 %v9629_v46  ;;  %v10697_v46 = vld [vmem:[#allocation7 + $0x774] sm:$0xf0] }
 0x59d   : > { %v5215_v16 = vadd.f32 %v5214_v24, %v12800_v13  ;;  %v5263_v28 = vpop.f32.mrf.mxu1 }
 0x59e   : > { %14006 = vst [vmem:[#allocation22_spill] sm:$0xff] %v12876_v19  ;;  %v5360_v32 = vadd.f32 %v5359_v51, %v5311_v37 }
 0x59f   : > { %v5264_v21 = vadd.f32 %v5263_v28, %v5215_v16 }
 0x5a0   : > { %v6197_v56 = vadd.f32 %v12867_v9, %v5360_v32  ;;  %v10665_v32 = vld [vmem:[#allocation7 + $0x674] sm:$0xf0] }
 0x5a1   : > { %v9741_v63 = vor.u32 %v10665_v32, %v9740_v31 }
 0x5a2   : > { %v6261_v52 = vmax.f32 %v6197_v56, 0.0  ;;  %v10633_v56 = vld [vmem:[#allocation7 + $0x574] sm:$0xf0] }
 0x5a3   : > { %v5312_v59 = vpop.f32.mrf.mxu2  ;;  %5692 = vmatpush.bf16.msrb.mxu2 %v9741_v63 }
 0x5a4   : > { %v5313_v5 = vadd.f32 %v5312_v59, %v5264_v21  ;;  %v5361_v57 = vpop.f32.mrf.mxu3  ;;  %v5217_v18 = vpop.f32.mrf.mxu0  ;;  %v9868_v59 = vld [vmem:[#allocation7 + $0x768] sm:$0xf] }
 0x5a5   : > { %v5218_v13 = vadd.f32 %v5217_v18, %v12807_v58  ;;  %v5266_v24 = vpop.f32.mrf.mxu1  ;;  %v9869_v18 = vor.u32 %v10697_v46, %v9868_v59  ;;  %v9724_v59 = vld [vmem:[#allocation7 + $0x648] sm:$0xf]  ;;  %v10661_v46 = vld [vmem:[#allocation7 + $0x654] sm:$0xf0] }
 0x5a6   : > { %v5362_v37 = vadd.f32 %v5361_v57, %v5313_v5  ;;  %v9485_v57 = vor.u32 %v10601_v25, %v9484_v48 }
 0x5a7   : > { %v5267_v51 = vadd.f32 %v5266_v24, %v5218_v13  ;;  %5412 = vmatmul.bf16.gmra.mxu0 %v12341_v60  ;;  %5461 = vmatmul.bf16.gmra.mxu1 %v12343_v62  ;;  %v9612_v24 = vld [vmem:[#allocation7 + $0x568] sm:$0xf] }
 0x5a8   : > { %v6201_v11 = vadd.f32 %v12867_v9, %v5362_v37  ;;  %5510 = vmatmul.bf16.gmra.mxu2 %v12345_v47  ;;  %5594 = vmatpush.bf16.msrb.mxu0 %v9485_v57 }
 0x5a9   : > { %5559 = vmatmul.bf16.gmra.mxu3 %v12348_v38 }
 0x5aa   : > { %v6265_v16 = vmax.f32 %v6201_v11, 0.0  ;;  %5741 = vmatpush.bf16.msrb.mxu3 %v9869_v18 }
 0x5ab   : > { %v5315_v28 = vpop.f32.mrf.mxu2 }
 0x5ac   : > { %v12886_v58 = vpack.c.bf16 %v6265_v16, %v6261_v52  ;;  %v5316_v10 = vadd.f32 %v5315_v28, %v5267_v51  ;;  %v5364_v35 = vpop.f32.mrf.mxu3  ;;  %v5219_v4 = vpop.f32.mrf.mxu0  ;;  %v9613_v51 = vor.u32 %v10633_v56, %v9612_v24  ;;  %v10597_v24 = vld [vmem:[#allocation7 + $0x454] sm:$0xf0]  ;;  %v9852_v56 = vld [vmem:[#allocation7 + $0x748] sm:$0xf] }
 0x5ad   : > { %v5220_v14 = vadd.f32 %v5219_v4, %v12810_v54  ;;  %v5268_v21 = vpop.f32.mrf.mxu1 }
 0x5ae   : > { %14007 = vst [vmem:[#allocation23_spill] sm:$0xff] %v12886_v58  ;;  %v5365_v5 = vadd.f32 %v5364_v35, %v5316_v10  ;;  %5643 = vmatpush.bf16.msrb.mxu1 %v9613_v51 }
 0x5af   : > { %v5269_v13 = vadd.f32 %v5268_v21, %v5220_v14 }
 0x5b0   : > { %v6205_v4 = vadd.f32 %v12867_v9, %v5365_v5  ;;  %v9468_v5 = vld [vmem:[#allocation7 + $0x448] sm:$0xf] }
 0x5b2   : > { %v6269_v32 = vmax.f32 %v6205_v4, 0.0 }
 0x5b3   : > { %v5317_v37 = vpop.f32.mrf.mxu2 }
 0x5b4   : > { %v5318_v11 = vadd.f32 %v5317_v37, %v5269_v13  ;;  %v5366_v52 = vpop.f32.mrf.mxu3  ;;  %v5222_v16 = vpop.f32.mrf.mxu0  ;;  %v9725_v13 = vor.u32 %v10661_v46, %v9724_v59  ;;  %v10693_v37 = vld [vmem:[#allocation7 + $0x754] sm:$0xf0] }
 0x5b5   : > { %v5223_v54 = vadd.f32 %v5222_v16, %v12817_v43  ;;  %v5271_v28 = vpop.f32.mrf.mxu1 }
 0x5b6   : > { %v5367_v10 = vadd.f32 %v5366_v52, %v5318_v11  ;;  %v9469_v11 = vor.u32 %v10597_v24, %v9468_v5  ;;  %v9853_v52 = vor.u32 %v10693_v37, %v9852_v56  ;;  %5693 = vmatpush.bf16.msrb.mxu2 %v9725_v13  ;;  %v9708_v24 = vld [vmem:[#allocation7 + $0x628] sm:$0xf]  ;;  %v10657_v56 = vld [vmem:[#allocation7 + $0x634] sm:$0xf0] }
 0x5b7   : > { %v5272_v35 = vadd.f32 %v5271_v28, %v5223_v54  ;;  %5417 = vmatmul.bf16.gmra.mxu0 %v12367_v61  ;;  %5466 = vmatmul.bf16.gmra.mxu1 %v12369_v15  ;;  %v9596_v54 = vld [vmem:[#allocation7 + $0x548] sm:$0xf]  ;;  %v10629_v28 = vld [vmem:[#allocation7 + $0x554] sm:$0xf0] }
 0x5b8   : > { %v6209_v31 = vadd.f32 %v12867_v9, %v5367_v10  ;;  %5515 = vmatmul.bf16.gmra.mxu2 %v12371_v29  ;;  %5595 = vmatpush.bf16.msrb.mxu0 %v9469_v11  ;;  %v9597_v10 = vor.u32 %v10629_v28, %v9596_v54  ;;  %v9452_v37 = vld [vmem:[#allocation7 + $0x428] sm:$0xf]  ;;  %v10689_v28 = vld [vmem:[#allocation7 + $0x734] sm:$0xf0] }
 0x5b9   : > { %5564 = vmatmul.bf16.gmra.mxu3 %v12374_v26  ;;  %v9836_v54 = vld [vmem:[#allocation7 + $0x728] sm:$0xf] }
 0x5ba   : > { %v6273_v48 = vmax.f32 %v6209_v31, 0.0  ;;  %5742 = vmatpush.bf16.msrb.mxu3 %v9853_v52  ;;  %5644 = vmatpush.bf16.msrb.mxu1 %v9597_v10  ;;  %v9709_v52 = vor.u32 %v10657_v56, %v9708_v24 }
 0x5bb   : > { %v5320_v14 = vpop.f32.mrf.mxu2 }
 0x5bc   : > { %v12896_v43 = vpack.c.bf16 %v6273_v48, %v6269_v32  ;;  %v5321_v21 = vadd.f32 %v5320_v14, %v5272_v35  ;;  %v5369_v63 = vpop.f32.mrf.mxu3  ;;  %v5224_v25 = vpop.f32.mrf.mxu0  ;;  %5694 = vmatpush.bf16.msrb.mxu2 %v9709_v52  ;;  %v9692_v52 = vld [vmem:[#allocation7 + $0x608] sm:$0xf] }
 0x5bd   : > { %v5225_v57 = vadd.f32 %v5224_v25, %v12820_v27  ;;  %v5273_v18 = vpop.f32.mrf.mxu1 }
 0x5be   : > { %14008 = vst [vmem:[#allocation26_spill] sm:$0xff] %v12896_v43  ;;  %v5370_v51 = vadd.f32 %v5369_v63, %v5321_v21 }
 0x5bf   : > { %v5274_v16 = vadd.f32 %v5273_v18, %v5225_v57 }
 0x5c0   : > { %v6213_v14 = vadd.f32 %v12867_v9, %v5370_v51 }
 0x5c2   : > { %v6277_v59 = vmax.f32 %v6213_v14, 0.0 }
 0x5c3   : > { %v5322_v4 = vpop.f32.mrf.mxu2 }
 0x5c4   : > { %v5323_v35 = vadd.f32 %v5322_v4, %v5274_v16  ;;  %v5371_v31 = vpop.f32.mrf.mxu3  ;;  %v5227_v32 = vpop.f32.mrf.mxu0  ;;  %v10593_v16 = vld [vmem:[#allocation7 + $0x434] sm:$0xf0] }
 0x5c5   : > { %v5228_v27 = vadd.f32 %v5227_v32, %v12827_v41  ;;  %v5276_v48 = vpop.f32.mrf.mxu1  ;;  %v9453_v10 = vor.u32 %v10593_v16, %v9452_v37  ;;  %v9580_v32 = vld [vmem:[#allocation7 + $0x528] sm:$0xf]  ;;  %v10653_v16 = vld [vmem:[#allocation7 + $0x614] sm:$0xf0] }
 0x5c6   : > { %v5372_v21 = vadd.f32 %v5371_v31, %v5323_v35  ;;  %v9837_v35 = vor.u32 %v10689_v28, %v9836_v54  ;;  %v9436_v54 = vld [vmem:[#allocation7 + $0x408] sm:$0xf] }
 0x5c7   : > { %v5277_v63 = vadd.f32 %v5276_v48, %v5228_v27  ;;  %5422 = vmatmul.bf16.gmra.mxu0 %v12393_v23  ;;  %5471 = vmatmul.bf16.gmra.mxu1 %v12395_v6  ;;  %v10625_v27 = vld [vmem:[#allocation7 + $0x534] sm:$0xf0] }
 0x5c8   : > { %v6217_v25 = vadd.f32 %v12867_v9, %v5372_v21  ;;  %5520 = vmatmul.bf16.gmra.mxu2 %v12397_v22  ;;  %5596 = vmatpush.bf16.msrb.mxu0 %v9453_v10  ;;  %v9581_v14 = vor.u32 %v10625_v27, %v9580_v32  ;;  %v9693_v10 = vor.u32 %v10653_v16, %v9692_v52  ;;  %v10685_v32 = vld [vmem:[#allocation7 + $0x714] sm:$0xf0] }
 0x5c9   : > { %5569 = vmatmul.bf16.gmra.mxu3 %v12400_v8 }
 0x5ca   : > { %v6281_v46 = vmax.f32 %v6217_v25, 0.0  ;;  %5743 = vmatpush.bf16.msrb.mxu3 %v9837_v35  ;;  %5645 = vmatpush.bf16.msrb.mxu1 %v9581_v14  ;;  %v10589_v35 = vld [vmem:[#allocation7 + $0x414] sm:$0xf0] }
 0x5cb   : > { %v5325_v5 = vpop.f32.mrf.mxu2  ;;  %5695 = vmatpush.bf16.msrb.mxu2 %v9693_v10  ;;  %v9294_v10 = vld [vmem:[#allocation7 + $0x2f8] sm:$0xf0] }
 0x5cc   : > { %v12906_v41 = vpack.c.bf16 %v6281_v46, %v6277_v59  ;;  %v5326_v57 = vadd.f32 %v5325_v5, %v5277_v63  ;;  %v5374_v18 = vpop.f32.mrf.mxu3  ;;  %v5229_v13 = vpop.f32.mrf.mxu0 }
 0x5cd   : > { %v5230_v51 = vadd.f32 %v5229_v13, %v12830_v42  ;;  %v5278_v11 = vpop.f32.mrf.mxu1 }
 0x5ce   : > { %14009 = vst [vmem:[#allocation27_spill] sm:$0xff] %v12906_v41  ;;  %v5375_v4 = vadd.f32 %v5374_v18, %v5326_v57 }
 0x5cf   : > { %v5279_v31 = vadd.f32 %v5278_v11, %v5230_v51 }
 0x5d0   : > { %v6221_v46 = vadd.f32 %v12867_v9, %v5375_v4 }
 0x5d2   : > { %v6285_v13 = vmax.f32 %v6221_v46, 0.0 }
 0x5d3   : > { %v5327_v48 = vpop.f32.mrf.mxu2 }
 0x5d4   : > { %v5328_v21 = vadd.f32 %v5327_v48, %v5279_v31  ;;  %v5376_v63 = vpop.f32.mrf.mxu3  ;;  %v5232_v25 = vpop.f32.mrf.mxu0  ;;  %v9820_v31 = vld [vmem:[#allocation7 + $0x708] sm:$0xf]  ;;  %v9437_v48 = vor.u32 %v10589_v35, %v9436_v54  ;;  %v10487_v35 = vld [vmem:[#allocation7 + $0xec] sm:$0xf] }
 0x5d5   : > { %v5233_v42 = vadd.f32 %v5232_v25, %v12837_v1  ;;  %v5281_v59 = vpop.f32.mrf.mxu1  ;;  %v9821_v14 = vor.u32 %v10685_v32, %v9820_v31  ;;  %v10621_v25 = vld [vmem:[#allocation7 + $0x514] sm:$0xf0] }
 0x5d6   : > { %v5377_v5 = vadd.f32 %v5376_v63, %v5328_v21  ;;  %5597 = vmatpush.bf16.msrb.mxu0 %v9437_v48  ;;  %v9564_v63 = vld [vmem:[#allocation7 + $0x508] sm:$0xf]  ;;  %v9038_v48 = vld [vmem:[#allocation7 + $0xf8] sm:$0xf0] }
 0x5d7   : > { %v5282_v57 = vadd.f32 %v5281_v59, %v5233_v42  ;;  %5427 = vmatmul.bf16.gmra.mxu0 %v12419_v49  ;;  %5476 = vmatmul.bf16.gmra.mxu1 %v12421_v12  ;;  %v9565_v59 = vor.u32 %v10621_v25, %v9564_v63  ;;  %v9041_v25 = vor.u32 %v10487_v35, %v9038_v48  ;;  %v9278_v35 = vld [vmem:[#allocation7 + $0x2d8] sm:$0xf0] }
 0x5d8   : > { %v6225_v18 = vadd.f32 %v12867_v9, %v5377_v5  ;;  %5525 = vmatmul.bf16.gmra.mxu2 %v12423_v45  ;;  %5744 = vmatpush.bf16.msrb.mxu3 %v9821_v14  ;;  %v10583_v14 = vld [vmem:[#allocation7 + $0x3ec] sm:$0xf]  ;;  %v9022_v48 = vld [vmem:[#allocation7 + $0xd8] sm:$0xf0] }
 0x5d9   : > { %5574 = vmatmul.bf16.gmra.mxu3 %v12426_v2  ;;  %5646 = vmatpush.bf16.msrb.mxu1 %v9565_v59  ;;  %v10519_v59 = vld [vmem:[#allocation7 + $0x1ec] sm:$0xf] }
 0x5da   : > { %v6289_v24 = vmax.f32 %v6225_v18, 0.0  ;;  %5786 = vmatpush.bf16.msra.mxu0 %v9041_v25  ;;  %v9406_v25 = vld [vmem:[#allocation7 + $0x3d8] sm:$0xf0] }
 0x5db   : > { %v5330_v56 = vpop.f32.mrf.mxu2 }
 0x5dc   : > { %v12916_v1 = vpack.c.bf16 %v6289_v24, %v6285_v13  ;;  %v5331_v37 = vadd.f32 %v5330_v56, %v5282_v57  ;;  %v5379_v51 = vpop.f32.mrf.mxu3  ;;  %v5234_v11 = vpop.f32.mrf.mxu0 }
 0x5dd   : > { %v5235_v28 = vadd.f32 %v5234_v11, %v12840_v20  ;;  %v5283_v4 = vpop.f32.mrf.mxu1 }
 0x5de   : > { %14010 = vst [vmem:[#allocation28_spill] sm:$0xff] %v12916_v1  ;;  %v5380_v27 = vadd.f32 %v5379_v51, %v5331_v37  ;;  %v9118_v1 = vld [vmem:[#allocation7 + $0x198] sm:$0xf0] }
 0x5df   : > { %v5284_v21 = vadd.f32 %v5283_v4, %v5235_v28  ;;  %v10551_v4 = vld [vmem:[#allocation7 + $0x2ec] sm:$0xf] }
 0x5e0   : > { %v6229_v13 = vadd.f32 %v12867_v9, %v5380_v27  ;;  %v9297_v27 = vor.u32 %v10551_v4, %v9294_v10  ;;  %v14015_v4 = vld [vmem:[#allocation90_spill] sm:$0xff]  ;;  %v10547_v10 = vld [vmem:[#allocation7 + $0x2cc] sm:$0xf] }
 0x5e2   : > { %v6293_v51 = vmax.f32 %v6229_v13, 0.0  ;;  %5884 = vmatpush.bf16.msra.mxu2 %v9297_v27  ;;  %v9281_v27 = vor.u32 %v10547_v10, %v9278_v35 }
 0x5e3   : > { %v5332_v42 = vpop.f32.mrf.mxu2 }
 0x5e4   : > { %v5333_v46 = vadd.f32 %v5332_v42, %v5284_v21  ;;  %v5381_v5 = vpop.f32.mrf.mxu3  ;;  %v5237_v57 = vpop.f32.mrf.mxu0  ;;  %v9422_v21 = vld [vmem:[#allocation7 + $0x3f8] sm:$0xf0] }
 0x5e5   : > { %v5238_v20 = vadd.f32 %v5237_v57, %v12847_v0  ;;  %v5286_v18 = vpop.f32.mrf.mxu1  ;;  %v9425_v42 = vor.u32 %v10583_v14, %v9422_v21  ;;  %v10579_v14 = vld [vmem:[#allocation7 + $0x3cc] sm:$0xf] }
 0x5e6   : > { %v5382_v24 = vadd.f32 %v5381_v5, %v5333_v46  ;;  %v9166_v46 = vld [vmem:[#allocation7 + $0x1f8] sm:$0xf0]  ;;  %5885 = vmatpush.bf16.msra.mxu2 %v9281_v27 }
 0x5e7   : > { %v5287_v56 = vadd.f32 %v5286_v18, %v5238_v20  ;;  %5432 = vmatmul.bf16.gmra.mxu0 %v12445_v50  ;;  %5481 = vmatmul.bf16.gmra.mxu1 %v12447_v33  ;;  %v9169_v57 = vor.u32 %v10519_v59, %v9166_v46 }
 0x5e8   : > { %v6233_v37 = vadd.f32 %v12867_v9, %v5382_v24  ;;  %5530 = vmatmul.bf16.gmra.mxu2 %v13949_v17  ;;  %5933 = vmatpush.bf16.msra.mxu3 %v9425_v42 }
 0x5e9   : > { %5579 = vmatmul.bf16.gmra.mxu3 %v13950_v34  ;;  %5835 = vmatpush.bf16.msra.mxu1 %v9169_v57  ;;  %v9409_v57 = vor.u32 %v10579_v14, %v9406_v25  ;;  %v14021_v25 = vld [vmem:[#allocation46_spill] sm:$0xff] }
 0x5ea   : > { %v6297_v11 = vmax.f32 %v6233_v37, 0.0 }
 0x5eb   : > { %v5335_v52 = vpop.f32.mrf.mxu2 }
 0x5ec   : > { %v12926_v0 = vpack.c.bf16 %v6297_v11, %v6293_v51  ;;  %v5336_v16 = vadd.f32 %v5335_v52, %v5287_v56  ;;  %v5384_v54 = vpop.f32.mrf.mxu3  ;;  %v5239_v28 = vpop.f32.mrf.mxu0  ;;  %v14012_v52 = vld [vmem:[#allocation87_spill] sm:$0xff]  ;;  %5934 = vmatpush.bf16.msra.mxu3 %v9409_v57 }
 0x5ed   : > { %v5240_v31 = vadd.f32 %v5239_v28, %v12850_v53  ;;  %v5288_v32 = vpop.f32.mrf.mxu1  ;;  %v14014_v28 = vld [vmem:[#allocation89_spill] sm:$0xff] }
 0x5ee   : > { %14011 = vst [vmem:[#allocation29_spill] sm:$0xff] %v12926_v0  ;;  %v5385_v63 = vadd.f32 %v5384_v54, %v5336_v16  ;;  %v14013_v54 = vld [vmem:[#allocation88_spill] sm:$0xff]  ;;  %v10507_v0 = vld [vmem:[#allocation7 + $0x18c] sm:$0xf] }
 0x5ef   : > { %v5289_v5 = vadd.f32 %v5288_v32, %v5240_v31  ;;  %v10483_v31 = vld [vmem:[#allocation7 + $0xcc] sm:$0xf] }
 0x5f0   : > { %v6237_v37 = vadd.f32 %v12867_v9, %v5385_v63  ;;  %v9025_v63 = vor.u32 %v10483_v31, %v9022_v48  ;;  %v14018_v48 = vld [vmem:[#allocation93_spill] sm:$0xff] }
 0x5f2   : > { %v6301_v32 = vmax.f32 %v6237_v37, 0.0  ;;  %5787 = vmatpush.bf16.msra.mxu0 %v9025_v63  ;;  %v14020_v63 = vld [vmem:[#allocation95_spill] sm:$0xff] }
 0x5f3   : > { %v5337_v20 = vpop.f32.mrf.mxu2 }
 0x5f4   : > { %v5338_v18 = vadd.f32 %v5337_v20, %v5289_v5  ;;  %v5386_v13 = vpop.f32.mrf.mxu3  ;;  %v5242_v53 = vpop.f32.mrf.mxu0 }
 0x5f5   : > { %v5243_v24 = vadd.f32 %v5242_v53, %v12857_v30  ;;  %v5291_v56 = vpop.f32.mrf.mxu1  ;;  %v10515_v53 = vld [vmem:[#allocation7 + $0x1cc] sm:$0xf] }
 0x5f6   : > { %v5387_v51 = vadd.f32 %v5386_v13, %v5338_v18 }
 0x5f7   : > { %v5292_v11 = vadd.f32 %v5291_v56, %v5243_v24  ;;  %5437 = vmatmul.bf16.gmra.mxu0 %v14012_v52  ;;  %5486 = vmatmul.bf16.gmra.mxu1 %v14013_v54  ;;  %v9150_v24 = vld [vmem:[#allocation7 + $0x1d8] sm:$0xf0] }
 0x5f8   : > { %v6241_v16 = vadd.f32 %v12867_v9, %v5387_v51  ;;  %5535 = vmatmul.bf16.gmra.mxu2 %v14014_v28  ;;  %v9153_v37 = vor.u32 %v10515_v53, %v9150_v24  ;;  %v9006_v53 = vld [vmem:[#allocation7 + $0xb8] sm:$0xf0] }
 0x5f9   : > { %5584 = vmatmul.bf16.gmra.mxu3 %v14015_v4 }
 0x5fa   : > { %v6305_v30 = vmax.f32 %v6241_v16, 0.0  ;;  %5836 = vmatpush.bf16.msra.mxu1 %v9153_v37  ;;  %v9390_v37 = vld [vmem:[#allocation7 + $0x3b8] sm:$0xf0] }
 0x5fb   : > { %v5340_v21 = vpop.f32.mrf.mxu2 }
 0x5fc   : > { %v12936_v42 = vpack.c.bf16 %v6305_v30, %v6301_v32  ;;  %v5341_v59 = vadd.f32 %v5340_v21, %v5292_v11  ;;  %v5389_v46 = vpop.f32.mrf.mxu3  ;;  %v5244_v5 = vpop.f32.mrf.mxu0  ;;  %v14017_v11 = vld [vmem:[#allocation39_spill] sm:$0xff]  ;;  %v14019_v21 = vld [vmem:[#allocation94_spill] sm:$0xff] }
 0x5fd   : > { %v5245_v20 = vadd.f32 %v5244_v5, %v12860_v36  ;;  %v5293_v18 = vpop.f32.mrf.mxu1  ;;  %v10479_v5 = vld [vmem:[#allocation7 + $0xac] sm:$0xf] }
 0x5fe   : > { %14016 = vst [vmem:[#allocation30_spill] sm:$0xff] %v12936_v42  ;;  %v5390_v13 = vadd.f32 %v5389_v46, %v5341_v59  ;;  %v10543_v59 = vld [vmem:[#allocation7 + $0x2ac] sm:$0xf]  ;;  %v9262_v46 = vld [vmem:[#allocation7 + $0x2b8] sm:$0xf0] }
 0x5ff   : > { %v5294_v56 = vadd.f32 %v5293_v18, %v5245_v20  ;;  %v9265_v18 = vor.u32 %v10543_v59, %v9262_v46 }
 0x600   : > { %v6245_v30 = vadd.f32 %v12867_v9, %v5390_v13  ;;  %v10575_v13 = vld [vmem:[#allocation7 + $0x3ac] sm:$0xf] }
 0x601   : > { %5886 = vmatpush.bf16.msra.mxu2 %v9265_v18 }
 0x602   : > { %v6309_v57 = vmax.f32 %v6245_v30, 0.0  ;;  %v10511_v30 = vld [vmem:[#allocation7 + $0x1ac] sm:$0xf] }
 0x603   : > { %v5342_v51 = vpop.f32.mrf.mxu2 }
 0x604   : > { %v5343_v16 = vadd.f32 %v5342_v51, %v5294_v56  ;;  %v5391_v10 = vpop.f32.mrf.mxu3  ;;  %v5403_v35 = vpop.f32.mrf.mxu0  ;;  %v9009_v56 = vor.u32 %v10479_v5, %v9006_v53  ;;  %v14024_v53 = vld [vmem:[#allocation43_spill] sm:$0xff] }
 0x605   : > { %v5404_v31 = vadd.f32 %v5403_v35, %v14017_v11  ;;  %v5452_v32 = vpop.f32.mrf.mxu1  ;;  %v9393_v35 = vor.u32 %v10575_v13, %v9390_v37  ;;  %v14023_v11 = vld [vmem:[#allocation42_spill] sm:$0xff] }
 0x606   : > { %v5392_v27 = vadd.f32 %v5391_v10, %v5343_v16  ;;  %5788 = vmatpush.bf16.msra.mxu0 %v9009_v56  ;;  %v14026_v56 = vld [vmem:[#allocation97_spill] sm:$0xff] }
 0x607   : > { %v5453_v36 = vadd.f32 %v5452_v32, %v5404_v31  ;;  %5598 = vmatmul.bf16.vlgmr.msrb.gmra.mxu0 %v14018_v48  ;;  %5647 = vmatmul.bf16.vlgmr.msrb.gmra.mxu1 %v14019_v21 }
 0x608   : > { %v6249_v14 = vadd.f32 %v12867_v9, %v5392_v27  ;;  %5696 = vmatmul.bf16.vlgmr.msrb.gmra.mxu2 %v14020_v63  ;;  %5935 = vmatpush.bf16.msra.mxu3 %v9393_v35  ;;  %v10539_v35 = vld [vmem:[#allocation7 + $0x28c] sm:$0xf] }
 0x609   : > { %5745 = vmatmul.bf16.vlgmr.msrb.gmra.mxu3 %v14021_v25 }
 0x60a   : > { %v6313_v20 = vmax.f32 %v6249_v14, 0.0  ;;  %v9134_v14 = vld [vmem:[#allocation7 + $0x1b8] sm:$0xf0] }
 0x60b   : > { %v5501_v24 = vpop.f32.mrf.mxu2  ;;  %v9137_v46 = vor.u32 %v10511_v30, %v9134_v14  ;;  %v8990_v30 = vld [vmem:[#allocation7 + $0x98] sm:$0xf0]  ;;  %v10571_v14 = vld [vmem:[#allocation7 + $0x38c] sm:$0xf] }
 0x60c   : > { %v12946_v51 = vpack.c.bf16 %v6313_v20, %v6309_v57  ;;  %v5502_v9 = vadd.f32 %v5501_v24, %v5453_v36  ;;  %v5550_v16 = vpop.f32.mrf.mxu3  ;;  %v5405_v10 = vpop.f32.mrf.mxu0 }
 0x60d   : > { %v5406_v31 = vadd.f32 %v5405_v10, %v14023_v11  ;;  %v5454_v32 = vpop.f32.mrf.mxu1  ;;  %5837 = vmatpush.bf16.msra.mxu1 %v9137_v46  ;;  %v14025_v10 = vld [vmem:[#allocation47_spill] sm:$0xff]  ;;  %v9246_v11 = vld [vmem:[#allocation7 + $0x298] sm:$0xf0] }
 0x60e   : > { %14022 = vst [vmem:[#allocation31_spill] sm:$0xff] %v12946_v51  ;;  %v12949_v27 = vadd.f32 %v5550_v16, %v5502_v9  ;;  %v14027_v9 = vld [vmem:[#allocation98_spill] sm:$0xff]  ;;  %v14028_v16 = vld [vmem:[#allocation48_spill] sm:$0xff] }
 0x60f   : > { %v5455_v59 = vadd.f32 %v5454_v32, %v5406_v31  ;;  %v10475_v31 = vld [vmem:[#allocation7 + $0x8c] sm:$0xf]  ;;  %v9249_v32 = vor.u32 %v10539_v35, %v9246_v11  ;;  %v9121_v11 = vor.u32 %v10507_v0, %v9118_v1  ;;  %v9230_v0 = vld [vmem:[#allocation7 + $0x278] sm:$0xf0] }
 0x610   : > { %v10535_v1 = vld [vmem:[#allocation7 + $0x26c] sm:$0xf] }
 0x611   : > { %5887 = vmatpush.bf16.msra.mxu2 %v9249_v32  ;;  %5838 = vmatpush.bf16.msra.mxu1 %v9121_v11 }
 0x613   : > { %v5503_v5 = vpop.f32.mrf.mxu2 }
 0x614   : > { %v5504_v57 = vadd.f32 %v5503_v5, %v5455_v59  ;;  %v5552_v20 = vpop.f32.mrf.mxu3  ;;  %v5408_v36 = vpop.f32.mrf.mxu0  ;;  %v9374_v59 = vld [vmem:[#allocation7 + $0x398] sm:$0xf0]  ;;  %v8993_v5 = vor.u32 %v10475_v31, %v8990_v30 }
 0x615   : > { %v5409_v24 = vadd.f32 %v5408_v36, %v14024_v53  ;;  %v5457_v18 = vpop.f32.mrf.mxu1 }
 0x616   : > { %v12952_v13 = vadd.f32 %v5552_v20, %v5504_v57  ;;  %v9377_v57 = vor.u32 %v10571_v14, %v9374_v59  ;;  %5789 = vmatpush.bf16.msra.mxu0 %v8993_v5  ;;  %v14032_v5 = vld [vmem:[#allocation99_spill] sm:$0xff] }
 0x617   : > { %v5458_v37 = vadd.f32 %v5457_v18, %v5409_v24  ;;  %5603 = vmatmul.bf16.gmra.mxu0 %v14025_v10  ;;  %5652 = vmatmul.bf16.gmra.mxu1 %v14026_v56  ;;  %v14029_v24 = vld [vmem:[#allocation24_spill] sm:$0xff] }
 0x618   : > { %5701 = vmatmul.bf16.gmra.mxu2 %v14027_v9  ;;  %5936 = vmatpush.bf16.msra.mxu3 %v9377_v57  ;;  %v14033_v57 = vld [vmem:[#allocation100_spill] sm:$0xff] }
 0x619   : > { %5750 = vmatmul.bf16.gmra.mxu3 %v14028_v16 }
 0x61b   : > { %v5506_v46 = vpop.f32.mrf.mxu2 }
 0x61c   : > { %v5507_v20 = vadd.f32 %v5506_v46, %v5458_v37  ;;  %v5555_v36 = vpop.f32.mrf.mxu3  ;;  %v5410_v53 = vpop.f32.mrf.mxu0  ;;  %v14030_v37 = vld [vmem:[#allocation25_spill] sm:$0xff] }
 0x61d   : > { %v5411_v18 = vadd.f32 %v5410_v53, %v14029_v24  ;;  %v5459_v51 = vpop.f32.mrf.mxu1  ;;  %v14031_v53 = vld [vmem:[#allocation49_spill] sm:$0xff]  ;;  %v10567_v24 = vld [vmem:[#allocation7 + $0x36c] sm:$0xf] }
 0x61e   : > { %v12959_v42 = vadd.f32 %v5555_v36, %v5507_v20  ;;  %v14034_v20 = vld [vmem:[#allocation50_spill] sm:$0xff]  ;;  %v8974_v36 = vld [vmem:[#allocation7 + $0x78] sm:$0xf0] }
 0x61f   : > { %v5460_v35 = vadd.f32 %v5459_v51, %v5411_v18  ;;  %v10471_v51 = vld [vmem:[#allocation7 + $0x6c] sm:$0xf]  ;;  %v9358_v18 = vld [vmem:[#allocation7 + $0x378] sm:$0xf0] }
 0x620   : > { %v8977_v11 = vor.u32 %v10471_v51, %v8974_v36 }
 0x622   : > { %5790 = vmatpush.bf16.msra.mxu0 %v8977_v11  ;;  %v14038_v11 = vld [vmem:[#allocation101_spill] sm:$0xff] }
 0x623   : > { %v5508_v41 = vpop.f32.mrf.mxu2 }
 0x624   : > { %v5509_v43 = vadd.f32 %v5508_v41, %v5460_v35  ;;  %v5557_v31 = vpop.f32.mrf.mxu3  ;;  %v5413_v30 = vpop.f32.mrf.mxu0  ;;  %v9233_v41 = vor.u32 %v10535_v1, %v9230_v0 }
 0x625   : > { %v5414_v14 = vadd.f32 %v5413_v30, %v14030_v37  ;;  %v5462_v59 = vpop.f32.mrf.mxu1 }
 0x626   : > { %v12962_v32 = vadd.f32 %v5557_v31, %v5509_v43  ;;  %v9361_v43 = vor.u32 %v10567_v24, %v9358_v18  ;;  %5888 = vmatpush.bf16.msra.mxu2 %v9233_v41 }
 0x627   : > { %v5463_v46 = vadd.f32 %v5462_v59, %v5414_v14  ;;  %5608 = vmatmul.bf16.gmra.mxu0 %v14031_v53  ;;  %5657 = vmatmul.bf16.gmra.mxu1 %v14032_v5  ;;  %v14035_v14 = vld [vmem:[#allocation61_spill] sm:$0xff] }
 0x628   : > { %5706 = vmatmul.bf16.gmra.mxu2 %v14033_v57  ;;  %5937 = vmatpush.bf16.msra.mxu3 %v9361_v43  ;;  %v9102_v57 = vld [vmem:[#allocation7 + $0x178] sm:$0xf0]  ;;  %v14039_v43 = vld [vmem:[#allocation102_spill] sm:$0xff] }
 0x629   : > { %5755 = vmatmul.bf16.gmra.mxu3 %v14034_v20  ;;  %v10503_v20 = vld [vmem:[#allocation7 + $0x16c] sm:$0xf] }
 0x62a   : > { %v9105_v0 = vor.u32 %v10503_v20, %v9102_v57  ;;  %v9214_v57 = vld [vmem:[#allocation7 + $0x258] sm:$0xf0]  ;;  %v10467_v20 = vld [vmem:[#allocation7 + $0x4c] sm:$0xf] }
 0x62b   : > { %v5511_v35 = vpop.f32.mrf.mxu2 }
 0x62c   : > { %v5512_v31 = vadd.f32 %v5511_v35, %v5463_v46  ;;  %v5560_v30 = vpop.f32.mrf.mxu3  ;;  %v5415_v37 = vpop.f32.mrf.mxu0  ;;  %5839 = vmatpush.bf16.msra.mxu1 %v9105_v0  ;;  %v14036_v46 = vld [vmem:[#allocation62_spill] sm:$0xff] }
 0x62d   : > { %v5416_v59 = vadd.f32 %v5415_v37, %v14035_v14  ;;  %v5464_v58 = vpop.f32.mrf.mxu1  ;;  %v14037_v37 = vld [vmem:[#allocation51_spill] sm:$0xff] }
 0x62e   : > { %v12969_v19 = vadd.f32 %v5560_v30, %v5512_v31  ;;  %v14040_v31 = vld [vmem:[#allocation52_spill] sm:$0xff]  ;;  %v8958_v30 = vld [vmem:[#allocation7 + $0x58] sm:$0xf0]  ;;  %v10563_v14 = vld [vmem:[#allocation7 + $0x34c] sm:$0xf] }
 0x62f   : > { %v5465_v1 = vadd.f32 %v5464_v58, %v5416_v59  ;;  %v10531_v58 = vld [vmem:[#allocation7 + $0x24c] sm:$0xf]  ;;  %v9342_v59 = vld [vmem:[#allocation7 + $0x358] sm:$0xf0]  ;;  %v8961_v0 = vor.u32 %v10467_v20, %v8958_v30 }
 0x631   : > { %5791 = vmatpush.bf16.msra.mxu0 %v8961_v0  ;;  %v14044_v0 = vld [vmem:[#allocation103_spill] sm:$0xff] }
 0x633   : > { %v5513_v5 = vpop.f32.mrf.mxu2 }
 0x634   : > { %v5514_v53 = vadd.f32 %v5513_v5, %v5465_v1  ;;  %v5562_v51 = vpop.f32.mrf.mxu3  ;;  %v5418_v36 = vpop.f32.mrf.mxu0  ;;  %v9217_v5 = vor.u32 %v10531_v58, %v9214_v57 }
 0x635   : > { %v5419_v24 = vadd.f32 %v5418_v36, %v14036_v46  ;;  %v5467_v18 = vpop.f32.mrf.mxu1 }
 0x636   : > { %v12972_v41 = vadd.f32 %v5562_v51, %v5514_v53  ;;  %v9345_v53 = vor.u32 %v10563_v14, %v9342_v59  ;;  %5889 = vmatpush.bf16.msra.mxu2 %v9217_v5 }
 0x637   : > { %v5468_v35 = vadd.f32 %v5467_v18, %v5419_v24  ;;  %5613 = vmatmul.bf16.gmra.mxu0 %v14037_v37  ;;  %5662 = vmatmul.bf16.gmra.mxu1 %v14038_v11  ;;  %v14041_v24 = vld [vmem:[#allocation63_spill] sm:$0xff]  ;;  %v9086_v37 = vld [vmem:[#allocation7 + $0x158] sm:$0xf0] }
 0x638   : > { %5711 = vmatmul.bf16.gmra.mxu2 %v14039_v43  ;;  %5938 = vmatpush.bf16.msra.mxu3 %v9345_v53  ;;  %v10499_v43 = vld [vmem:[#allocation7 + $0x14c] sm:$0xf]  ;;  %v14045_v53 = vld [vmem:[#allocation104_spill] sm:$0xff] }
 0x639   : > { %5760 = vmatmul.bf16.gmra.mxu3 %v14040_v31  ;;  %v9089_v57 = vor.u32 %v10499_v43, %v9086_v37  ;;  %v10527_v37 = vld [vmem:[#allocation7 + $0x22c] sm:$0xf] }
 0x63a   : > { %v10463_v43 = vld [vmem:[#allocation7 + $0x2c] sm:$0xf] }
 0x63b   : > { %v5516_v1 = vpop.f32.mrf.mxu2  ;;  %5840 = vmatpush.bf16.msra.mxu1 %v9089_v57 }
 0x63c   : > { %v5517_v51 = vadd.f32 %v5516_v1, %v5468_v35  ;;  %v5565_v36 = vpop.f32.mrf.mxu3  ;;  %v5420_v46 = vpop.f32.mrf.mxu0  ;;  %v14042_v35 = vld [vmem:[#allocation64_spill] sm:$0xff] }
 0x63d   : > { %v5421_v18 = vadd.f32 %v5420_v46, %v14041_v24  ;;  %v5469_v11 = vpop.f32.mrf.mxu1  ;;  %v14043_v46 = vld [vmem:[#allocation53_spill] sm:$0xff]  ;;  %v10559_v24 = vld [vmem:[#allocation7 + $0x32c] sm:$0xf] }
 0x63e   : > { %v12979_v31 = vadd.f32 %v5565_v36, %v5517_v51  ;;  %v14046_v51 = vld [vmem:[#allocation54_spill] sm:$0xff]  ;;  %v8942_v36 = vld [vmem:[#allocation7 + $0x38] sm:$0xf0] }
 0x63f   : > { %v5470_v58 = vadd.f32 %v5469_v11, %v5421_v18  ;;  %v9198_v11 = vld [vmem:[#allocation7 + $0x238] sm:$0xf0]  ;;  %v8945_v57 = vor.u32 %v10463_v43, %v8942_v36 }
 0x640   : > { %v9326_v18 = vld [vmem:[#allocation7 + $0x338] sm:$0xf0] }
 0x641   : > { %5792 = vmatpush.bf16.msra.mxu0 %v8945_v57  ;;  %v14050_v57 = vld [vmem:[#allocation105_spill] sm:$0xff] }
 0x643   : > { %v5518_v16 = vpop.f32.mrf.mxu2 }
 0x644   : > { %v5519_v9 = vadd.f32 %v5518_v16, %v5470_v58  ;;  %v5567_v20 = vpop.f32.mrf.mxu3  ;;  %v5423_v30 = vpop.f32.mrf.mxu0  ;;  %v9201_v16 = vor.u32 %v10527_v37, %v9198_v11 }
 0x645   : > { %v5424_v14 = vadd.f32 %v5423_v30, %v14042_v35  ;;  %v5472_v59 = vpop.f32.mrf.mxu1 }
 0x646   : > { %v12982_v5 = vadd.f32 %v5567_v20, %v5519_v9  ;;  %v9329_v9 = vor.u32 %v10559_v24, %v9326_v18  ;;  %5890 = vmatpush.bf16.msra.mxu2 %v9201_v16 }
 0x647   : > { %v5473_v1 = vadd.f32 %v5472_v59, %v5424_v14  ;;  %5618 = vmatmul.bf16.gmra.mxu0 %v14043_v46  ;;  %5667 = vmatmul.bf16.gmra.mxu1 %v14044_v0  ;;  %v14047_v14 = vld [vmem:[#allocation65_spill] sm:$0xff] }
 0x648   : > { %5716 = vmatmul.bf16.gmra.mxu2 %v14045_v53  ;;  %5939 = vmatpush.bf16.msra.mxu3 %v9329_v9  ;;  %v10495_v53 = vld [vmem:[#allocation7 + $0x12c] sm:$0xf]  ;;  %v9070_v46 = vld [vmem:[#allocation7 + $0x138] sm:$0xf0]  ;;  %v14051_v9 = vld [vmem:[#allocation106_spill] sm:$0xff] }
 0x649   : > { %5765 = vmatmul.bf16.gmra.mxu3 %v14046_v51  ;;  %v9073_v11 = vor.u32 %v10495_v53, %v9070_v46  ;;  %v10523_v46 = vld [vmem:[#allocation7 + $0x20c] sm:$0xf] }
 0x64a   : > { %v10459_v53 = vld [vmem:[#allocation7 + $0xc] sm:$0xf] }
 0x64b   : > { %v5521_v58 = vpop.f32.mrf.mxu2  ;;  %5841 = vmatpush.bf16.msra.mxu1 %v9073_v11 }
 0x64c   : > { %v5522_v20 = vadd.f32 %v5521_v58, %v5473_v1  ;;  %v5570_v30 = vpop.f32.mrf.mxu3  ;;  %v5425_v35 = vpop.f32.mrf.mxu0  ;;  %v14048_v1 = vld [vmem:[#allocation66_spill] sm:$0xff] }
 0x64d   : > { %v5426_v59 = vadd.f32 %v5425_v35, %v14047_v14  ;;  %v5474_v0 = vpop.f32.mrf.mxu1  ;;  %v14049_v35 = vld [vmem:[#allocation55_spill] sm:$0xff] }
 0x64e   : > { %v12989_v51 = vadd.f32 %v5570_v30, %v5522_v20  ;;  %v14052_v20 = vld [vmem:[#allocation56_spill] sm:$0xff]  ;;  %v8926_v30 = vld [vmem:[#allocation7 + $0x18] sm:$0xf0]  ;;  %v10555_v14 = vld [vmem:[#allocation7 + $0x30c] sm:$0xf] }
 0x64f   : > { %v5475_v37 = vadd.f32 %v5474_v0, %v5426_v59  ;;  %v9182_v0 = vld [vmem:[#allocation7 + $0x218] sm:$0xf0]  ;;  %v8929_v11 = vor.u32 %v10459_v53, %v8926_v30 }
 0x650   : > { %v9310_v59 = vld [vmem:[#allocation7 + $0x318] sm:$0xf0] }
 0x651   : > { %5793 = vmatpush.bf16.msra.mxu0 %v8929_v11  ;;  %v14056_v11 = vld [vmem:[#allocation107_spill] sm:$0xff] }
 0x653   : > { %v5523_v56 = vpop.f32.mrf.mxu2 }
 0x654   : > { %v5524_v10 = vadd.f32 %v5523_v56, %v5475_v37  ;;  %v5572_v43 = vpop.f32.mrf.mxu3  ;;  %v5428_v36 = vpop.f32.mrf.mxu0  ;;  %v9185_v56 = vor.u32 %v10523_v46, %v9182_v0 }
 0x655   : > { %v5429_v24 = vadd.f32 %v5428_v36, %v14048_v1  ;;  %v5477_v18 = vpop.f32.mrf.mxu1 }
 0x656   : > { %v12992_v16 = vadd.f32 %v5572_v43, %v5524_v10  ;;  %v9313_v10 = vor.u32 %v10555_v14, %v9310_v59  ;;  %5891 = vmatpush.bf16.msra.mxu2 %v9185_v56 }
 0x657   : > { %v5478_v58 = vadd.f32 %v5477_v18, %v5429_v24  ;;  %5623 = vmatmul.bf16.gmra.mxu0 %v14049_v35  ;;  %5672 = vmatmul.bf16.gmra.mxu1 %v14050_v57  ;;  %v14053_v24 = vld [vmem:[#allocation67_spill] sm:$0xff]  ;;  %v9054_v35 = vld [vmem:[#allocation7 + $0x118] sm:$0xf0] }
 0x658   : > { %5721 = vmatmul.bf16.gmra.mxu2 %v14051_v9  ;;  %5940 = vmatpush.bf16.msra.mxu3 %v9313_v10  ;;  %v10491_v9 = vld [vmem:[#allocation7 + $0x10c] sm:$0xf]  ;;  %v14057_v10 = vld [vmem:[#allocation108_spill] sm:$0xff] }
 0x659   : > { %5770 = vmatmul.bf16.gmra.mxu3 %v14052_v20  ;;  %v9057_v0 = vor.u32 %v10491_v9, %v9054_v35  ;;  %v10679_v35 = vld [vmem:[#allocation7 + $0x6ec] sm:$0xf] }
 0x65a   : > { %v10615_v9 = vld [vmem:[#allocation7 + $0x4ec] sm:$0xf] }
 0x65b   : > { %v5526_v37 = vpop.f32.mrf.mxu2  ;;  %5842 = vmatpush.bf16.msra.mxu1 %v9057_v0 }
 0x65c   : > { %v5527_v43 = vadd.f32 %v5526_v37, %v5478_v58  ;;  %v5575_v36 = vpop.f32.mrf.mxu3  ;;  %v5430_v1 = vpop.f32.mrf.mxu0  ;;  %v14054_v58 = vld [vmem:[#allocation68_spill] sm:$0xff] }
 0x65d   : > { %v5431_v18 = vadd.f32 %v5430_v1, %v14053_v24  ;;  %v5479_v57 = vpop.f32.mrf.mxu1  ;;  %v14055_v1 = vld [vmem:[#allocation57_spill] sm:$0xff]  ;;  %v10711_v24 = vld [vmem:[#allocation7 + $0x7ec] sm:$0xf] }
 0x65e   : > { %v12999_v20 = vadd.f32 %v5575_v36, %v5527_v43  ;;  %v14058_v43 = vld [vmem:[#allocation58_spill] sm:$0xff]  ;;  %v9550_v36 = vld [vmem:[#allocation7 + $0x4f8] sm:$0xf0] }
 0x65f   : > { %v5480_v46 = vadd.f32 %v5479_v57, %v5431_v18  ;;  %v9806_v57 = vld [vmem:[#allocation7 + $0x6f8] sm:$0xf0]  ;;  %v9553_v0 = vor.u32 %v10615_v9, %v9550_v36  ;;  %v14060_v36 = vld [vmem:[#allocation70_spill] sm:$0xff] }
 0x660   : > { %v9934_v18 = vld [vmem:[#allocation7 + $0x7f8] sm:$0xf0] }
 0x661   : > { %5982 = vmatpush.bf16.msrb.mxu0 %v9553_v0  ;;  %v14062_v0 = vld [vmem:[#allocation109_spill] sm:$0xff] }
 0x663   : > { %v5528_v25 = vpop.f32.mrf.mxu2 }
 0x664   : > { %v5529_v63 = vadd.f32 %v5528_v25, %v5480_v46  ;;  %v5577_v53 = vpop.f32.mrf.mxu3  ;;  %v5433_v30 = vpop.f32.mrf.mxu0  ;;  %v9809_v25 = vor.u32 %v10679_v35, %v9806_v57  ;;  %v9678_v35 = vld [vmem:[#allocation7 + $0x5f8] sm:$0xf0] }
 0x665   : > { %v5434_v14 = vadd.f32 %v5433_v30, %v14054_v58  ;;  %v5482_v59 = vpop.f32.mrf.mxu1 }
 0x666   : > { %v13002_v56 = vadd.f32 %v5577_v53, %v5529_v63  ;;  %v9937_v63 = vor.u32 %v10711_v24, %v9934_v18  ;;  %6080 = vmatpush.bf16.msrb.mxu2 %v9809_v25 }
 0x667   : > { %v5483_v37 = vadd.f32 %v5482_v59, %v5434_v14  ;;  %5628 = vmatmul.bf16.gmra.mxu0 %v14055_v1  ;;  %5677 = vmatmul.bf16.gmra.mxu1 %v14056_v11  ;;  %v14059_v14 = vld [vmem:[#allocation69_spill] sm:$0xff]  ;;  %v10647_v1 = vld [vmem:[#allocation7 + $0x5ec] sm:$0xf] }
 0x668   : > { %5726 = vmatmul.bf16.gmra.mxu2 %v14057_v10  ;;  %6129 = vmatpush.bf16.msrb.mxu3 %v9937_v63  ;;  %v9681_v21 = vor.u32 %v10647_v1, %v9678_v35  ;;  %v14063_v63 = vld [vmem:[#allocation110_spill] sm:$0xff]  ;;  %v14065_v35 = vld [vmem:[#allocation44_spill] sm:$0xff] }
 0x669   : > { %5775 = vmatmul.bf16.gmra.mxu3 %v14058_v43 }
 0x66a   : > { %6031 = vmatpush.bf16.msrb.mxu1 %v9681_v21 }
 0x66b   : > { %v5531_v46 = vpop.f32.mrf.mxu2 }
 0x66c   : > { %v5532_v53 = vadd.f32 %v5531_v46, %v5483_v37  ;;  %v5580_v30 = vpop.f32.mrf.mxu3  ;;  %v5435_v58 = vpop.f32.mrf.mxu0  ;;  %v14061_v46 = vld [vmem:[#allocation59_spill] sm:$0xff] }
 0x66d   : > { %v5436_v59 = vadd.f32 %v5435_v58, %v14059_v14  ;;  %v5484_v11 = vpop.f32.mrf.mxu1  ;;  %v10675_v58 = vld [vmem:[#allocation7 + $0x6cc] sm:$0xf]  ;;  %v9790_v14 = vld [vmem:[#allocation7 + $0x6d8] sm:$0xf0] }
 0x66e   : > { %v13009_v43 = vadd.f32 %v5580_v30, %v5532_v53 }
 0x66f   : > { %v5485_v10 = vadd.f32 %v5484_v11, %v5436_v59  ;;  %v14064_v11 = vld [vmem:[#allocation60_spill] sm:$0xff]  ;;  %v10611_v59 = vld [vmem:[#allocation7 + $0x4cc] sm:$0xf] }
 0x673   : > { %v5533_v57 = vpop.f32.mrf.mxu2 }
 0x674   : > { %v5534_v48 = vadd.f32 %v5533_v57, %v5485_v10  ;;  %v5582_v4 = vpop.f32.mrf.mxu3  ;;  %v5438_v9 = vpop.f32.mrf.mxu0  ;;  %v9534_v57 = vld [vmem:[#allocation7 + $0x4d8] sm:$0xf0] }
 0x675   : > { %v5439_v37 = vadd.f32 %v5438_v9, %v14060_v36  ;;  %v5487_v24 = vpop.f32.mrf.mxu1  ;;  %v10707_v9 = vld [vmem:[#allocation7 + $0x7cc] sm:$0xf]  ;;  %v9918_v36 = vld [vmem:[#allocation7 + $0x7d8] sm:$0xf0] }
 0x676   : > { %v13012_v25 = vadd.f32 %v5582_v4, %v5534_v48  ;;  %v9793_v48 = vor.u32 %v10675_v58, %v9790_v14 }
 0x677   : > { %v5488_v18 = vadd.f32 %v5487_v24, %v5439_v37  ;;  %5633 = vmatmul.bf16.gmra.mxu0 %v14061_v46  ;;  %5682 = vmatmul.bf16.gmra.mxu1 %v14062_v0  ;;  %v9537_v24 = vor.u32 %v10611_v59, %v9534_v57  ;;  %v9518_v57 = vld [vmem:[#allocation7 + $0x4b8] sm:$0xf0] }
 0x678   : > { %5731 = vmatmul.bf16.gmra.mxu2 %v14063_v63  ;;  %v9921_v63 = vor.u32 %v10707_v9, %v9918_v36  ;;  %v10703_v9 = vld [vmem:[#allocation7 + $0x7ac] sm:$0xf] }
 0x679   : > { %5780 = vmatmul.bf16.gmra.mxu3 %v14064_v11  ;;  %6081 = vmatpush.bf16.msrb.mxu2 %v9793_v48  ;;  %v9774_v48 = vld [vmem:[#allocation7 + $0x6b8] sm:$0xf0] }
 0x67a   : > { %5983 = vmatpush.bf16.msrb.mxu0 %v9537_v24  ;;  %6130 = vmatpush.bf16.msrb.mxu3 %v9921_v63  ;;  %v14067_v63 = vld [vmem:[#allocation71_spill] sm:$0xff] }
 0x67b   : > { %v5536_v53 = vpop.f32.mrf.mxu2 }
 0x67c   : > { %v5537_v1 = vadd.f32 %v5536_v53, %v5488_v18  ;;  %v5585_v10 = vpop.f32.mrf.mxu3  ;;  %v5440_v30 = vpop.f32.mrf.mxu0  ;;  %v10643_v18 = vld [vmem:[#allocation7 + $0x5cc] sm:$0xf]  ;;  %v9662_v53 = vld [vmem:[#allocation7 + $0x5d8] sm:$0xf0] }
 0x67d   : > { %v5441_v21 = vadd.f32 %v5440_v30, %v14065_v35  ;;  %v5489_v4 = vpop.f32.mrf.mxu1  ;;  %v9665_v46 = vor.u32 %v10643_v18, %v9662_v53  ;;  %v11140_v53 = vld [vmem:[#allocation10] sm:$0xf] }
 0x67e   : > { %v13019_v37 = vadd.f32 %v5585_v10, %v5537_v1  ;;  %v14066_v10 = vld [vmem:[#allocation45_spill] sm:$0xff] }
 0x67f   : > { %v5490_v0 = vadd.f32 %v5489_v4, %v5441_v21  ;;  %6032 = vmatpush.bf16.msrb.mxu1 %v9665_v46  ;;  %v10671_v4 = vld [vmem:[#allocation7 + $0x6ac] sm:$0xf] }
 0x683   : > { %v5538_v11 = vpop.f32.mrf.mxu2 }
 0x684   : > { %v5539_v28 = vadd.f32 %v5538_v11, %v5490_v0  ;;  %v5587_v54 = vpop.f32.mrf.mxu3  ;;  %v5599_v30 = vpop.f32.mrf.mxu0 }
 0x685   : > { %v5600_v58 = vadd.f32 %v5599_v30, %v12949_v27  ;;  %v5648_v14 = vpop.f32.mrf.mxu1  ;;  %v10607_v27 = vld [vmem:[#allocation7 + $0x4ac] sm:$0xf]  ;;  %v13029_v30 = vperm.slane %v11140_v53, 2 }
 0x686   : > { %v13022_v35 = vadd.f32 %v5587_v54, %v5539_v28  ;;  %v9777_v28 = vor.u32 %v10671_v4, %v9774_v48 }
 0x687   : > { %v5649_v1 = vadd.f32 %v5648_v14, %v5600_v58  ;;  %5794 = vmatmul.bf16.vlgmr.msra.gmra.mxu0 %v12289_v39  ;;  %5843 = vmatmul.bf16.vlgmr.msra.gmra.mxu1 %v12291_v55  ;;  %v9902_v39 = vld [vmem:[#allocation7 + $0x7b8] sm:$0xf0]  ;;  %v9521_v55 = vor.u32 %v10607_v27, %v9518_v57  ;;  %v10639_v58 = vld [vmem:[#allocation7 + $0x5ac] sm:$0xf] }
 0x688   : > { %5892 = vmatmul.bf16.vlgmr.msra.gmra.mxu2 %v14066_v10  ;;  %v9905_v24 = vor.u32 %v10703_v9, %v9902_v39  ;;  %v9646_v14 = vld [vmem:[#allocation7 + $0x5b8] sm:$0xf0] }
 0x689   : > { %5941 = vmatmul.bf16.vlgmr.msra.gmra.mxu3 %v14067_v63  ;;  %6082 = vmatpush.bf16.msrb.mxu2 %v9777_v28  ;;  %v9649_v10 = vor.u32 %v10639_v58, %v9646_v14  ;;  %v10699_v58 = vld [vmem:[#allocation7 + $0x78c] sm:$0xf] }
 0x68a   : > { %5984 = vmatpush.bf16.msrb.mxu0 %v9521_v55  ;;  %6131 = vmatpush.bf16.msrb.mxu3 %v9905_v24  ;;  %v9758_v55 = vld [vmem:[#allocation7 + $0x698] sm:$0xf0]  ;;  %v10603_v24 = vld [vmem:[#allocation7 + $0x48c] sm:$0xf] }
 0x68b   : > { %v5697_v59 = vpop.f32.mrf.mxu2  ;;  %6033 = vmatpush.bf16.msrb.mxu1 %v9649_v10 }
 0x68c   : > { %v5698_v21 = vadd.f32 %v5697_v59, %v5649_v1  ;;  %v5746_v0 = vpop.f32.mrf.mxu3  ;;  %v5601_v11 = vpop.f32.mrf.mxu0 }
 0x68d   : > { %v5602_v46 = vadd.f32 %v5601_v11, %v12952_v13  ;;  %v5650_v54 = vpop.f32.mrf.mxu1 }
 0x68e   : > { %v5747_v36 = vadd.f32 %v5746_v0, %v5698_v21 }
 0x68f   : > { %v5651_v18 = vadd.f32 %v5650_v54, %v5602_v46 }
 0x690   : > { %v6190_v21 = vadd.f32 %v13029_v30, %v5747_v36  ;;  %v10667_v36 = vld [vmem:[#allocation7 + $0x68c] sm:$0xf] }
 0x691   : > { %v9761_v53 = vor.u32 %v10667_v36, %v9758_v55 }
 0x692   : > { %v6254_v46 = vmax.f32 %v6190_v21, 0.0 }
 0x693   : > { %v5699_v1 = vpop.f32.mrf.mxu2  ;;  %6083 = vmatpush.bf16.msrb.mxu2 %v9761_v53  ;;  %v10599_v53 = vld [vmem:[#allocation7 + $0x46c] sm:$0xf] }
 0x694   : > { %v5700_v13 = vadd.f32 %v5699_v1, %v5651_v18  ;;  %v5748_v63 = vpop.f32.mrf.mxu3  ;;  %v5604_v59 = vpop.f32.mrf.mxu0 }
 0x695   : > { %v5605_v11 = vadd.f32 %v5604_v59, %v12959_v42  ;;  %v5653_v4 = vpop.f32.mrf.mxu1 }
 0x696   : > { %v5749_v0 = vadd.f32 %v5748_v63, %v5700_v13  ;;  %v10635_v13 = vld [vmem:[#allocation7 + $0x58c] sm:$0xf]  ;;  %v9630_v63 = vld [vmem:[#allocation7 + $0x598] sm:$0xf0] }
 0x697   : > { %v5654_v48 = vadd.f32 %v5653_v4, %v5605_v11  ;;  %5799 = vmatmul.bf16.gmra.mxu0 %v12315_v44  ;;  %5848 = vmatmul.bf16.gmra.mxu1 %v12317_v3  ;;  %v9502_v3 = vld [vmem:[#allocation7 + $0x498] sm:$0xf0]  ;;  %v9633_v11 = vor.u32 %v10635_v13, %v9630_v63 }
 0x698   : > { %v6194_v27 = vadd.f32 %v13029_v30, %v5749_v0  ;;  %5897 = vmatmul.bf16.gmra.mxu2 %v12319_v7  ;;  %v9886_v7 = vld [vmem:[#allocation7 + $0x798] sm:$0xf0] }
 0x699   : > { %5946 = vmatmul.bf16.gmra.mxu3 %v12322_v40  ;;  %v9505_v40 = vor.u32 %v10603_v24, %v9502_v3  ;;  %v9889_v1 = vor.u32 %v10699_v58, %v9886_v7  ;;  %6034 = vmatpush.bf16.msrb.mxu1 %v9633_v11  ;;  %v10695_v7 = vld [vmem:[#allocation7 + $0x76c] sm:$0xf]  ;;  %v9614_v13 = vld [vmem:[#allocation7 + $0x578] sm:$0xf0] }
 0x69a   : > { %v6258_v54 = vmax.f32 %v6194_v27, 0.0 }
 0x69b   : > { %v5702_v28 = vpop.f32.mrf.mxu2  ;;  %5985 = vmatpush.bf16.msrb.mxu0 %v9505_v40  ;;  %6132 = vmatpush.bf16.msrb.mxu3 %v9889_v1 }
 0x69c   : > { %v13038_v42 = vpack.c.bf16 %v6258_v54, %v6254_v46  ;;  %v5703_v57 = vadd.f32 %v5702_v28, %v5654_v48  ;;  %v5751_v9 = vpop.f32.mrf.mxu3  ;;  %v5606_v39 = vpop.f32.mrf.mxu0 }
 0x69d   : > { %v5607_v44 = vadd.f32 %v5606_v39, %v12962_v32  ;;  %v5655_v18 = vpop.f32.mrf.mxu1 }
 0x69e   : > { %v5752_v14 = vadd.f32 %v5751_v9, %v5703_v57 }
 0x69f   : > { %v5656_v10 = vadd.f32 %v5655_v18, %v5607_v44  ;;  %v10663_v44 = vld [vmem:[#allocation7 + $0x66c] sm:$0xf]  ;;  %v9742_v18 = vld [vmem:[#allocation7 + $0x678] sm:$0xf0] }
 0x6a0   : > { %v6198_v27 = vadd.f32 %v13029_v30, %v5752_v14  ;;  %v9745_v58 = vor.u32 %v10663_v44, %v9742_v18  ;;  %v10595_v44 = vld [vmem:[#allocation7 + $0x44c] sm:$0xf] }
 0x6a2   : > { %v6262_v57 = vmax.f32 %v6198_v27, 0.0  ;;  %6084 = vmatpush.bf16.msrb.mxu2 %v9745_v58 }
 0x6a3   : > { %v5704_v59 = vpop.f32.mrf.mxu2 }
 0x6a4   : > { %v5705_v4 = vadd.f32 %v5704_v59, %v5656_v10  ;;  %v5753_v21 = vpop.f32.mrf.mxu3  ;;  %v5609_v0 = vpop.f32.mrf.mxu0  ;;  %v10631_v10 = vld [vmem:[#allocation7 + $0x56c] sm:$0xf] }
 0x6a5   : > { %v5610_v32 = vadd.f32 %v5609_v0, %v12969_v19  ;;  %v5658_v48 = vpop.f32.mrf.mxu1  ;;  %v9617_v59 = vor.u32 %v10631_v10, %v9614_v13 }
 0x6a6   : > { %v5754_v46 = vadd.f32 %v5753_v21, %v5705_v4 }
 0x6a7   : > { %v5659_v54 = vadd.f32 %v5658_v48, %v5610_v32  ;;  %5804 = vmatmul.bf16.gmra.mxu0 %v12341_v60  ;;  %5853 = vmatmul.bf16.gmra.mxu1 %v12343_v62  ;;  %v9486_v62 = vld [vmem:[#allocation7 + $0x478] sm:$0xf0] }
 0x6a8   : > { %v6202_v28 = vadd.f32 %v13029_v30, %v5754_v46  ;;  %5902 = vmatmul.bf16.gmra.mxu2 %v12345_v47  ;;  %v9870_v47 = vld [vmem:[#allocation7 + $0x778] sm:$0xf0]  ;;  %6035 = vmatpush.bf16.msrb.mxu1 %v9617_v59 }
 0x6a9   : > { %5951 = vmatmul.bf16.gmra.mxu3 %v12348_v38  ;;  %v9489_v38 = vor.u32 %v10599_v53, %v9486_v62  ;;  %v9873_v40 = vor.u32 %v10695_v7, %v9870_v47  ;;  %v10627_v7 = vld [vmem:[#allocation7 + $0x54c] sm:$0xf]  ;;  %v9598_v47 = vld [vmem:[#allocation7 + $0x558] sm:$0xf0] }
 0x6aa   : > { %v6266_v9 = vmax.f32 %v6202_v28, 0.0 }
 0x6ab   : > { %v5707_v39 = vpop.f32.mrf.mxu2  ;;  %5986 = vmatpush.bf16.msrb.mxu0 %v9489_v38  ;;  %6133 = vmatpush.bf16.msrb.mxu3 %v9873_v40  ;;  %v9601_v38 = vor.u32 %v10627_v7, %v9598_v47 }
 0x6ac   : > { %v13048_v19 = vpack.c.bf16 %v6266_v9, %v6262_v57  ;;  %v5708_v36 = vadd.f32 %v5707_v39, %v5659_v54  ;;  %v5756_v55 = vpop.f32.mrf.mxu3  ;;  %v5611_v24 = vpop.f32.mrf.mxu0 }
 0x6ad   : > { %v5612_v60 = vadd.f32 %v5611_v24, %v12972_v41  ;;  %v5660_v3 = vpop.f32.mrf.mxu1  ;;  %v9726_v24 = vld [vmem:[#allocation7 + $0x658] sm:$0xf0]  ;;  %6036 = vmatpush.bf16.msrb.mxu1 %v9601_v38 }
 0x6ae   : > { %v5757_v14 = vadd.f32 %v5756_v55, %v5708_v36  ;;  %v10659_v55 = vld [vmem:[#allocation7 + $0x64c] sm:$0xf] }
 0x6af   : > { %v5661_v1 = vadd.f32 %v5660_v3, %v5612_v60  ;;  %v9729_v53 = vor.u32 %v10659_v55, %v9726_v24  ;;  %v10691_v60 = vld [vmem:[#allocation7 + $0x74c] sm:$0xf] }
 0x6b0   : > { %v6206_v32 = vadd.f32 %v13029_v30, %v5757_v14 }
 0x6b1   : > { %6085 = vmatpush.bf16.msrb.mxu2 %v9729_v53 }
 0x6b2   : > { %v6270_v54 = vmax.f32 %v6206_v32, 0.0 }
 0x6b3   : > { %v5709_v63 = vpop.f32.mrf.mxu2 }
 0x6b4   : > { %v5710_v11 = vadd.f32 %v5709_v63, %v5661_v1  ;;  %v5758_v4 = vpop.f32.mrf.mxu3  ;;  %v5614_v21 = vpop.f32.mrf.mxu0 }
 0x6b5   : > { %v5615_v41 = vadd.f32 %v5614_v21, %v12979_v31  ;;  %v5663_v0 = vpop.f32.mrf.mxu1 }
 0x6b6   : > { %v5759_v48 = vadd.f32 %v5758_v4, %v5710_v11 }
 0x6b7   : > { %v5664_v27 = vadd.f32 %v5663_v0, %v5615_v41  ;;  %5809 = vmatmul.bf16.gmra.mxu0 %v12367_v61  ;;  %5858 = vmatmul.bf16.gmra.mxu1 %v12369_v15  ;;  %v9470_v15 = vld [vmem:[#allocation7 + $0x458] sm:$0xf0] }
 0x6b8   : > { %v6210_v46 = vadd.f32 %v13029_v30, %v5759_v48  ;;  %5907 = vmatmul.bf16.gmra.mxu2 %v12371_v29  ;;  %v9854_v29 = vld [vmem:[#allocation7 + $0x758] sm:$0xf0] }
 0x6b9   : > { %5956 = vmatmul.bf16.gmra.mxu3 %v12374_v26  ;;  %v9473_v26 = vor.u32 %v10595_v44, %v9470_v15  ;;  %v9857_v58 = vor.u32 %v10691_v60, %v9854_v29  ;;  %v10623_v44 = vld [vmem:[#allocation7 + $0x52c] sm:$0xf] }
 0x6ba   : > { %v6274_v28 = vmax.f32 %v6210_v46, 0.0  ;;  %v10655_v46 = vld [vmem:[#allocation7 + $0x62c] sm:$0xf] }
 0x6bb   : > { %v5712_v57 = vpop.f32.mrf.mxu2  ;;  %5987 = vmatpush.bf16.msrb.mxu0 %v9473_v26  ;;  %6134 = vmatpush.bf16.msrb.mxu3 %v9857_v58 }
 0x6bc   : > { %v13058_v31 = vpack.c.bf16 %v6274_v28, %v6270_v54  ;;  %v5713_v9 = vadd.f32 %v5712_v57, %v5664_v27  ;;  %v5761_v39 = vpop.f32.mrf.mxu3  ;;  %v5616_v36 = vpop.f32.mrf.mxu0  ;;  %v9710_v54 = vld [vmem:[#allocation7 + $0x638] sm:$0xf0]  ;;  %v10591_v28 = vld [vmem:[#allocation7 + $0x42c] sm:$0xf] }
 0x6bd   : > { %v5617_v61 = vadd.f32 %v5616_v36, %v12982_v5  ;;  %v5665_v18 = vpop.f32.mrf.mxu1 }
 0x6be   : > { %v5762_v3 = vadd.f32 %v5761_v39, %v5713_v9  ;;  %v9713_v9 = vor.u32 %v10655_v46, %v9710_v54  ;;  %v10687_v39 = vld [vmem:[#allocation7 + $0x72c] sm:$0xf] }
 0x6bf   : > { %v5666_v62 = vadd.f32 %v5665_v18, %v5617_v61  ;;  %v9582_v61 = vld [vmem:[#allocation7 + $0x538] sm:$0xf0] }
 0x6c0   : > { %v6214_v63 = vadd.f32 %v13029_v30, %v5762_v3  ;;  %6086 = vmatpush.bf16.msrb.mxu2 %v9713_v9  ;;  %v9585_v53 = vor.u32 %v10623_v44, %v9582_v61 }
 0x6c2   : > { %v6278_v21 = vmax.f32 %v6214_v63, 0.0  ;;  %6037 = vmatpush.bf16.msrb.mxu1 %v9585_v53  ;;  %v10587_v63 = vld [vmem:[#allocation7 + $0x40c] sm:$0xf] }
 0x6c3   : > { %v5714_v14 = vpop.f32.mrf.mxu2 }
 0x6c4   : > { %v5715_v40 = vadd.f32 %v5714_v14, %v5666_v62  ;;  %v5763_v1 = vpop.f32.mrf.mxu3  ;;  %v5619_v10 = vpop.f32.mrf.mxu0 }
 0x6c5   : > { %v5620_v5 = vadd.f32 %v5619_v10, %v12989_v51  ;;  %v5668_v13 = vpop.f32.mrf.mxu1 }
 0x6c6   : > { %v5764_v59 = vadd.f32 %v5763_v1, %v5715_v40 }
 0x6c7   : > { %v5669_v11 = vadd.f32 %v5668_v13, %v5620_v5  ;;  %5814 = vmatmul.bf16.gmra.mxu0 %v12393_v23  ;;  %5863 = vmatmul.bf16.gmra.mxu1 %v12395_v6  ;;  %v9454_v6 = vld [vmem:[#allocation7 + $0x438] sm:$0xf0]  ;;  %v10651_v5 = vld [vmem:[#allocation7 + $0x60c] sm:$0xf] }
 0x6c8   : > { %v6218_v4 = vadd.f32 %v13029_v30, %v5764_v59  ;;  %5912 = vmatmul.bf16.gmra.mxu2 %v12397_v22  ;;  %v9838_v22 = vld [vmem:[#allocation7 + $0x738] sm:$0xf0] }
 0x6c9   : > { %5961 = vmatmul.bf16.gmra.mxu3 %v12400_v8  ;;  %v9457_v8 = vor.u32 %v10591_v28, %v9454_v6  ;;  %v9841_v55 = vor.u32 %v10687_v39, %v9838_v22  ;;  %v9694_v13 = vld [vmem:[#allocation7 + $0x618] sm:$0xf0] }
 0x6ca   : > { %v6282_v41 = vmax.f32 %v6218_v4, 0.0  ;;  %v10683_v4 = vld [vmem:[#allocation7 + $0x70c] sm:$0xf] }
 0x6cb   : > { %v5717_v0 = vpop.f32.mrf.mxu2  ;;  %5988 = vmatpush.bf16.msrb.mxu0 %v9457_v8  ;;  %6135 = vmatpush.bf16.msrb.mxu3 %v9841_v55 }
 0x6cc   : > { %v13068_v51 = vpack.c.bf16 %v6282_v41, %v6278_v21  ;;  %v5718_v32 = vadd.f32 %v5717_v0, %v5669_v11  ;;  %v5766_v48 = vpop.f32.mrf.mxu3  ;;  %v5621_v27 = vpop.f32.mrf.mxu0  ;;  %v9697_v11 = vor.u32 %v10651_v5, %v9694_v13 }
 0x6cd   : > { %v5622_v23 = vadd.f32 %v5621_v27, %v12992_v16  ;;  %v5670_v57 = vpop.f32.mrf.mxu1 }
 0x6ce   : > { %v5767_v36 = vadd.f32 %v5766_v48, %v5718_v32  ;;  %6087 = vmatpush.bf16.msrb.mxu2 %v9697_v11  ;;  %v10619_v32 = vld [vmem:[#allocation7 + $0x50c] sm:$0xf]  ;;  %v9566_v48 = vld [vmem:[#allocation7 + $0x518] sm:$0xf0] }
 0x6cf   : > { %v5671_v24 = vadd.f32 %v5670_v57, %v5622_v23  ;;  %v9569_v46 = vor.u32 %v10619_v32, %v9566_v48  ;;  %v10968_v32 = vld [vmem:[#allocation11 + $0x1ec] sm:$0xf0] }
 0x6d0   : > { %v6222_v26 = vadd.f32 %v13029_v30, %v5767_v36 }
 0x6d1   : > { %6038 = vmatpush.bf16.msrb.mxu1 %v9569_v46 }
 0x6d2   : > { %v6286_v47 = vmax.f32 %v6222_v26, 0.0 }
 0x6d3   : > { %v5719_v18 = vpop.f32.mrf.mxu2 }
 0x6d4   : > { %v5720_v15 = vadd.f32 %v5719_v18, %v5671_v24  ;;  %v5768_v60 = vpop.f32.mrf.mxu3  ;;  %v5624_v29 = vpop.f32.mrf.mxu0 }
 0x6d5   : > { %v5625_v16 = vadd.f32 %v5624_v29, %v12999_v20  ;;  %v5673_v3 = vpop.f32.mrf.mxu1 }
 0x6d6   : > { %v5769_v58 = vadd.f32 %v5768_v60, %v5720_v15 }
 0x6d7   : > { %v5674_v62 = vadd.f32 %v5673_v3, %v5625_v16  ;;  %5819 = vmatmul.bf16.gmra.mxu0 %v12419_v49  ;;  %5868 = vmatmul.bf16.gmra.mxu1 %v12421_v12  ;;  %v9438_v12 = vld [vmem:[#allocation7 + $0x418] sm:$0xf0] }
 0x6d8   : > { %v6226_v7 = vadd.f32 %v13029_v30, %v5769_v58  ;;  %5917 = vmatmul.bf16.gmra.mxu2 %v12423_v45  ;;  %v9822_v45 = vld [vmem:[#allocation7 + $0x718] sm:$0xf0] }
 0x6d9   : > { %5966 = vmatmul.bf16.gmra.mxu3 %v12426_v2  ;;  %v9441_v2 = vor.u32 %v10587_v63, %v9438_v12  ;;  %v9825_v41 = vor.u32 %v10683_v4, %v9822_v45  ;;  %v10052_v4 = vld [vmem:[#allocation11 + $0xe0] sm:$0xf]  ;;  %v10936_v45 = vld [vmem:[#allocation11 + $0xec] sm:$0xf0] }
 0x6da   : > { %v6290_v14 = vmax.f32 %v6226_v7, 0.0  ;;  %v14068_v7 = vld [vmem:[#allocation88_spill] sm:$0xff] }
 0x6db   : > { %v5722_v38 = vpop.f32.mrf.mxu2  ;;  %5989 = vmatpush.bf16.msrb.mxu0 %v9441_v2  ;;  %6136 = vmatpush.bf16.msrb.mxu3 %v9825_v41  ;;  %v10053_v2 = vor.u32 %v10936_v45, %v10052_v4  ;;  %v11032_v41 = vld [vmem:[#allocation11 + $0x3ec] sm:$0xf0]  ;;  %v14078_v4 = vld [vmem:[#allocation47_spill] sm:$0xff]  ;;  %v14079_v45 = vld [vmem:[#allocation97_spill] sm:$0xff] }
 0x6dc   : > { %v13078_v20 = vpack.c.bf16 %v6290_v14, %v6286_v47  ;;  %v5723_v40 = vadd.f32 %v5722_v38, %v5674_v62  ;;  %v5771_v1 = vpop.f32.mrf.mxu3  ;;  %v5626_v10 = vpop.f32.mrf.mxu0  ;;  %v14070_v47 = vld [vmem:[#allocation90_spill] sm:$0xff] }
 0x6dd   : > { %v5627_v49 = vadd.f32 %v5626_v10, %v13002_v56  ;;  %v5675_v59 = vpop.f32.mrf.mxu1 }
 0x6de   : > { %v5772_v21 = vadd.f32 %v5771_v1, %v5723_v40 }
 0x6df   : > { %v5676_v0 = vadd.f32 %v5675_v59, %v5627_v49  ;;  %v10308_v49 = vld [vmem:[#allocation11 + $0x2e0] sm:$0xf]  ;;  %v11000_v59 = vld [vmem:[#allocation11 + $0x2ec] sm:$0xf0]  ;;  %7126 = vmatpush.bf16.msra.mxu0 %v10053_v2 }
 0x6e0   : > { %v6230_v9 = vadd.f32 %v13029_v30, %v5772_v21  ;;  %v10309_v12 = vor.u32 %v11000_v59, %v10308_v49  ;;  %v10436_v21 = vld [vmem:[#allocation11 + $0x3e0] sm:$0xf]  ;;  %v14081_v2 = vld [vmem:[#allocation48_spill] sm:$0xff] }
 0x6e1   : > { %v10437_v48 = vor.u32 %v11032_v41, %v10436_v21  ;;  %v14080_v21 = vld [vmem:[#allocation98_spill] sm:$0xff] }
 0x6e2   : > { %v6294_v36 = vmax.f32 %v6230_v9, 0.0  ;;  %7224 = vmatpush.bf16.msra.mxu2 %v10309_v12 }
 0x6e3   : > { %v5724_v27 = vpop.f32.mrf.mxu2  ;;  %7273 = vmatpush.bf16.msra.mxu3 %v10437_v48 }
 0x6e4   : > { %v5725_v54 = vadd.f32 %v5724_v27, %v5676_v0  ;;  %v5773_v28 = vpop.f32.mrf.mxu3  ;;  %v5629_v23 = vpop.f32.mrf.mxu0  ;;  %v10180_v0 = vld [vmem:[#allocation11 + $0x1e0] sm:$0xf] }
 0x6e5   : > { %v5630_v56 = vadd.f32 %v5629_v23, %v13009_v43  ;;  %v5678_v57 = vpop.f32.mrf.mxu1  ;;  %v10181_v27 = vor.u32 %v10968_v32, %v10180_v0  ;;  %v14071_v23 = vld [vmem:[#allocation72_spill] sm:$0xff] }
 0x6e6   : > { %v5774_v6 = vadd.f32 %v5773_v28, %v5725_v54 }
 0x6e7   : > { %v5679_v39 = vadd.f32 %v5678_v57, %v5630_v56  ;;  %5824 = vmatmul.bf16.gmra.mxu0 %v12445_v50  ;;  %5873 = vmatmul.bf16.gmra.mxu1 %v12447_v33 }
 0x6e8   : > { %v6234_v22 = vadd.f32 %v13029_v30, %v5774_v6  ;;  %5922 = vmatmul.bf16.gmra.mxu2 %v13949_v17  ;;  %7175 = vmatpush.bf16.msra.mxu1 %v10181_v27  ;;  %v14082_v27 = vld [vmem:[#allocation75_spill] sm:$0xff] }
 0x6e9   : > { %5971 = vmatmul.bf16.gmra.mxu3 %v13950_v34 }
 0x6ea   : > { %v6298_v8 = vmax.f32 %v6234_v22, 0.0  ;;  %v14072_v22 = vld [vmem:[#allocation93_spill] sm:$0xff] }
 0x6eb   : > { %v5727_v55 = vpop.f32.mrf.mxu2 }
 0x6ec   : > { %v13088_v43 = vpack.c.bf16 %v6298_v8, %v6294_v36  ;;  %v5728_v24 = vadd.f32 %v5727_v55, %v5679_v39  ;;  %v5776_v44 = vpop.f32.mrf.mxu3  ;;  %v5631_v61 = vpop.f32.mrf.mxu0  ;;  %v14073_v8 = vld [vmem:[#allocation94_spill] sm:$0xff]  ;;  %v14074_v55 = vld [vmem:[#allocation95_spill] sm:$0xff] }
 0x6ed   : > { %v5632_v18 = vadd.f32 %v5631_v61, %v13012_v25  ;;  %v5680_v53 = vpop.f32.mrf.mxu1  ;;  %v14069_v25 = vld [vmem:[#allocation89_spill] sm:$0xff] }
 0x6ee   : > { %v5777_v50 = vadd.f32 %v5776_v44, %v5728_v24  ;;  %v14075_v24 = vld [vmem:[#allocation46_spill] sm:$0xff] }
 0x6ef   : > { %v5681_v15 = vadd.f32 %v5680_v53, %v5632_v18 }
 0x6f0   : > { %v6238_v3 = vadd.f32 %v13029_v30, %v5777_v50 }
 0x6f2   : > { %v6302_v14 = vmax.f32 %v6238_v3, 0.0 }
 0x6f3   : > { %v5729_v60 = vpop.f32.mrf.mxu2 }
 0x6f4   : > { %v5730_v29 = vadd.f32 %v5729_v60, %v5681_v15  ;;  %v5778_v33 = vpop.f32.mrf.mxu3  ;;  %v5634_v16 = vpop.f32.mrf.mxu0 }
 0x6f5   : > { %v5635_v17 = vadd.f32 %v5634_v16, %v13019_v37  ;;  %v5683_v34 = vpop.f32.mrf.mxu1 }
 0x6f6   : > { %v5779_v26 = vadd.f32 %v5778_v33, %v5730_v29  ;;  %v14076_v29 = vld [vmem:[#allocation73_spill] sm:$0xff] }
 0x6f7   : > { %v5684_v58 = vadd.f32 %v5683_v34, %v5635_v17  ;;  %5829 = vmatmul.bf16.gmra.mxu0 %v14012_v52  ;;  %5878 = vmatmul.bf16.gmra.mxu1 %v14068_v7  ;;  %v10996_v34 = vld [vmem:[#allocation11 + $0x2cc] sm:$0xf0]  ;;  %v10420_v7 = vld [vmem:[#allocation11 + $0x3c0] sm:$0xf] }
 0x6f8   : > { %v6242_v62 = vadd.f32 %v13029_v30, %v5779_v26  ;;  %5927 = vmatmul.bf16.gmra.mxu2 %v14069_v25 }
 0x6f9   : > { %5976 = vmatmul.bf16.gmra.mxu3 %v14070_v47  ;;  %v11028_v47 = vld [vmem:[#allocation11 + $0x3cc] sm:$0xf0] }
 0x6fa   : > { %v6306_v38 = vmax.f32 %v6242_v62, 0.0  ;;  %v10932_v62 = vld [vmem:[#allocation11 + $0xcc] sm:$0xf0] }
 0x6fb   : > { %v5732_v40 = vpop.f32.mrf.mxu2 }
 0x6fc   : > { %v13098_v1 = vpack.c.bf16 %v6306_v38, %v6302_v14  ;;  %v5733_v37 = vadd.f32 %v5732_v40, %v5684_v58  ;;  %v5781_v10 = vpop.f32.mrf.mxu3  ;;  %v5636_v5 = vpop.f32.mrf.mxu0  ;;  %v10036_v58 = vld [vmem:[#allocation11 + $0xc0] sm:$0xf]  ;;  %v10964_v38 = vld [vmem:[#allocation11 + $0x1cc] sm:$0xf0]  ;;  %v10421_v40 = vor.u32 %v11028_v47, %v10420_v7 }
 0x6fd   : > { %v5637_v13 = vadd.f32 %v5636_v5, %v13022_v35  ;;  %v5685_v63 = vpop.f32.mrf.mxu1  ;;  %v10037_v25 = vor.u32 %v10932_v62, %v10036_v58  ;;  %v10164_v14 = vld [vmem:[#allocation11 + $0x1c0] sm:$0xf] }
 0x6fe   : > { %v5782_v52 = vadd.f32 %v5781_v10, %v5733_v37  ;;  %v10165_v37 = vor.u32 %v10964_v38, %v10164_v14  ;;  %7274 = vmatpush.bf16.msra.mxu3 %v10421_v40  ;;  %v14087_v58 = vld [vmem:[#allocation50_spill] sm:$0xff]  ;;  %v14088_v14 = vld [vmem:[#allocation77_spill] sm:$0xff] }
 0x6ff   : > { %v5686_v11 = vadd.f32 %v5685_v63, %v5637_v13  ;;  %7127 = vmatpush.bf16.msra.mxu0 %v10037_v25 }
 0x700   : > { %v6246_v9 = vadd.f32 %v13029_v30, %v5782_v52  ;;  %7176 = vmatpush.bf16.msra.mxu1 %v10165_v37  ;;  %v14077_v52 = vld [vmem:[#allocation74_spill] sm:$0xff] }
 0x702   : > { %v6310_v44 = vmax.f32 %v6246_v9, 0.0  ;;  %v10020_v9 = vld [vmem:[#allocation11 + $0xa0] sm:$0xf] }
 0x703   : > { %v5734_v46 = vpop.f32.mrf.mxu2 }
 0x704   : > { %v5735_v35 = vadd.f32 %v5734_v46, %v5686_v11  ;;  %v5783_v54 = vpop.f32.mrf.mxu3  ;;  %v5795_v28 = vpop.f32.mrf.mxu0 }
 0x705   : > { %v5796_v56 = vadd.f32 %v5795_v28, %v14071_v23  ;;  %v5844_v57 = vpop.f32.mrf.mxu1  ;;  %v10276_v28 = vld [vmem:[#allocation11 + $0x2a0] sm:$0xf]  ;;  %v10992_v23 = vld [vmem:[#allocation11 + $0x2ac] sm:$0xf0] }
 0x706   : > { %v5784_v6 = vadd.f32 %v5783_v54, %v5735_v35 }
 0x707   : > { %v5845_v39 = vadd.f32 %v5844_v57, %v5796_v56  ;;  %5990 = vmatmul.bf16.vlgmr.msrb.gmra.mxu0 %v14072_v22  ;;  %6039 = vmatmul.bf16.vlgmr.msrb.gmra.mxu1 %v14073_v8  ;;  %v10277_v57 = vor.u32 %v10992_v23, %v10276_v28  ;;  %v10148_v8 = vld [vmem:[#allocation11 + $0x1a0] sm:$0xf] }
 0x708   : > { %v6250_v36 = vadd.f32 %v13029_v30, %v5784_v6  ;;  %6088 = vmatmul.bf16.vlgmr.msrb.gmra.mxu2 %v14074_v55  ;;  %v10292_v30 = vld [vmem:[#allocation11 + $0x2c0] sm:$0xf]  ;;  %v10928_v6 = vld [vmem:[#allocation11 + $0xac] sm:$0xf0] }
 0x709   : > { %6137 = vmatmul.bf16.vlgmr.msrb.gmra.mxu3 %v14075_v24  ;;  %v10293_v26 = vor.u32 %v10996_v34, %v10292_v30  ;;  %v10021_v22 = vor.u32 %v10928_v6, %v10020_v9  ;;  %v10960_v55 = vld [vmem:[#allocation11 + $0x1ac] sm:$0xf0]  ;;  %v14084_v34 = vld [vmem:[#allocation49_spill] sm:$0xff]  ;;  %v14092_v6 = vld [vmem:[#allocation102_spill] sm:$0xff] }
 0x70a   : > { %v6314_v61 = vmax.f32 %v6250_v36, 0.0  ;;  %v11024_v36 = vld [vmem:[#allocation11 + $0x3ac] sm:$0xf0]  ;;  %v14091_v9 = vld [vmem:[#allocation101_spill] sm:$0xff] }
 0x70b   : > { %v5893_v18 = vpop.f32.mrf.mxu2  ;;  %7225 = vmatpush.bf16.msra.mxu2 %v10293_v26  ;;  %7128 = vmatpush.bf16.msra.mxu0 %v10021_v22  ;;  %v14086_v26 = vld [vmem:[#allocation100_spill] sm:$0xff] }
 0x70c   : > { %v13108_v53 = vpack.c.bf16 %v6314_v61, %v6310_v44  ;;  %v5894_v50 = vadd.f32 %v5893_v18, %v5845_v39  ;;  %v5942_v15 = vpop.f32.mrf.mxu3  ;;  %v5797_v60 = vpop.f32.mrf.mxu0  ;;  %v10404_v39 = vld [vmem:[#allocation11 + $0x3a0] sm:$0xf]  ;;  %v10149_v44 = vor.u32 %v10960_v55, %v10148_v8 }
 0x70d   : > { %v5798_v33 = vadd.f32 %v5797_v60, %v14076_v29  ;;  %v5846_v16 = vpop.f32.mrf.mxu1  ;;  %v10405_v24 = vor.u32 %v11024_v36, %v10404_v39  ;;  %v14083_v60 = vld [vmem:[#allocation76_spill] sm:$0xff] }
 0x70e   : > { %v13111_v17 = vadd.f32 %v5942_v15, %v5894_v50  ;;  %7177 = vmatpush.bf16.msra.mxu1 %v10149_v44  ;;  %v14093_v39 = vld [vmem:[#allocation52_spill] sm:$0xff] }
 0x70f   : > { %v5847_v3 = vadd.f32 %v5846_v16, %v5798_v33  ;;  %7226 = vmatpush.bf16.msra.mxu2 %v10277_v57  ;;  %7275 = vmatpush.bf16.msra.mxu3 %v10405_v24  ;;  %v14090_v57 = vld [vmem:[#allocation51_spill] sm:$0xff] }
 0x710   : > { %v14094_v24 = vld [vmem:[#allocation79_spill] sm:$0xff] }
 0x713   : > { %v5895_v10 = vpop.f32.mrf.mxu2 }
 0x714   : > { %v5896_v5 = vadd.f32 %v5895_v10, %v5847_v3  ;;  %v5944_v13 = vpop.f32.mrf.mxu3  ;;  %v5800_v63 = vpop.f32.mrf.mxu0  ;;  %v14085_v3 = vld [vmem:[#allocation99_spill] sm:$0xff]  ;;  %v10260_v10 = vld [vmem:[#allocation11 + $0x280] sm:$0xf] }
 0x715   : > { %v5801_v49 = vadd.f32 %v5800_v63, %v14077_v52  ;;  %v5849_v59 = vpop.f32.mrf.mxu1  ;;  %v10004_v52 = vld [vmem:[#allocation11 + $0x80] sm:$0xf] }
 0x716   : > { %v13114_v11 = vadd.f32 %v5944_v13, %v5896_v5  ;;  %v10988_v5 = vld [vmem:[#allocation11 + $0x28c] sm:$0xf0] }
 0x717   : > { %v5850_v12 = vadd.f32 %v5849_v59, %v5801_v49  ;;  %5995 = vmatmul.bf16.gmra.mxu0 %v14078_v4  ;;  %6044 = vmatmul.bf16.gmra.mxu1 %v14079_v45  ;;  %v10261_v63 = vor.u32 %v10988_v5, %v10260_v10  ;;  %v10924_v49 = vld [vmem:[#allocation11 + $0x8c] sm:$0xf0]  ;;  %v10388_v59 = vld [vmem:[#allocation11 + $0x380] sm:$0xf] }
 0x718   : > { %6093 = vmatmul.bf16.gmra.mxu2 %v14080_v21  ;;  %v11020_v4 = vld [vmem:[#allocation11 + $0x38c] sm:$0xf0]  ;;  %v10132_v45 = vld [vmem:[#allocation11 + $0x180] sm:$0xf] }
 0x719   : > { %6142 = vmatmul.bf16.gmra.mxu3 %v14081_v2  ;;  %v10956_v21 = vld [vmem:[#allocation11 + $0x18c] sm:$0xf0]  ;;  %7227 = vmatpush.bf16.msra.mxu2 %v10261_v63  ;;  %v10389_v2 = vor.u32 %v11020_v4, %v10388_v59  ;;  %v14097_v59 = vld [vmem:[#allocation103_spill] sm:$0xff]  ;;  %v14099_v4 = vld [vmem:[#allocation54_spill] sm:$0xff] }
 0x71a   : > { %v14095_v10 = vld [vmem:[#allocation80_spill] sm:$0xff] }
 0x71b   : > { %v5898_v41 = vpop.f32.mrf.mxu2  ;;  %7276 = vmatpush.bf16.msra.mxu3 %v10389_v2 }
 0x71c   : > { %v5899_v0 = vadd.f32 %v5898_v41, %v5850_v12  ;;  %v5947_v32 = vpop.f32.mrf.mxu3  ;;  %v5802_v48 = vpop.f32.mrf.mxu0  ;;  %v10005_v12 = vor.u32 %v10924_v49, %v10004_v52  ;;  %v10133_v41 = vor.u32 %v10956_v21, %v10132_v45  ;;  %v14096_v49 = vld [vmem:[#allocation53_spill] sm:$0xff] }
 0x71d   : > { %v5803_v46 = vadd.f32 %v5802_v48, %v14082_v27  ;;  %v5851_v35 = vpop.f32.mrf.mxu1 }
 0x71e   : > { %v13121_v54 = vadd.f32 %v5947_v32, %v5899_v0  ;;  %7129 = vmatpush.bf16.msra.mxu0 %v10005_v12  ;;  %7178 = vmatpush.bf16.msra.mxu1 %v10133_v41  ;;  %v14098_v12 = vld [vmem:[#allocation104_spill] sm:$0xff] }
 0x71f   : > { %v5852_v56 = vadd.f32 %v5851_v35, %v5803_v46  ;;  %v14089_v46 = vld [vmem:[#allocation78_spill] sm:$0xff] }
 0x723   : > { %v5900_v61 = vpop.f32.mrf.mxu2 }
 0x724   : > { %v5901_v18 = vadd.f32 %v5900_v61, %v5852_v56  ;;  %v5949_v50 = vpop.f32.mrf.mxu3  ;;  %v5805_v15 = vpop.f32.mrf.mxu0 }
 0x725   : > { %v5806_v29 = vadd.f32 %v5805_v15, %v14083_v60  ;;  %v5854_v33 = vpop.f32.mrf.mxu1  ;;  %v10984_v15 = vld [vmem:[#allocation11 + $0x26c] sm:$0xf0] }
 0x726   : > { %v13124_v16 = vadd.f32 %v5949_v50, %v5901_v18  ;;  %v10244_v50 = vld [vmem:[#allocation11 + $0x260] sm:$0xf] }
 0x727   : > { %v5855_v30 = vadd.f32 %v5854_v33, %v5806_v29  ;;  %6000 = vmatmul.bf16.gmra.mxu0 %v14084_v34  ;;  %6049 = vmatmul.bf16.gmra.mxu1 %v14085_v3  ;;  %v10245_v29 = vor.u32 %v10984_v15, %v10244_v50  ;;  %v9988_v33 = vld [vmem:[#allocation11 + $0x60] sm:$0xf] }
 0x728   : > { %6098 = vmatmul.bf16.gmra.mxu2 %v14086_v26  ;;  %v10372_v34 = vld [vmem:[#allocation11 + $0x360] sm:$0xf]  ;;  %v11016_v26 = vld [vmem:[#allocation11 + $0x36c] sm:$0xf0] }
 0x729   : > { %6147 = vmatmul.bf16.gmra.mxu3 %v14087_v58  ;;  %v10116_v58 = vld [vmem:[#allocation11 + $0x160] sm:$0xf]  ;;  %7228 = vmatpush.bf16.msra.mxu2 %v10245_v29 }
 0x72b   : > { %v5903_v62 = vpop.f32.mrf.mxu2 }
 0x72c   : > { %v5904_v7 = vadd.f32 %v5903_v62, %v5855_v30  ;;  %v5952_v25 = vpop.f32.mrf.mxu3  ;;  %v5807_v47 = vpop.f32.mrf.mxu0  ;;  %v10920_v30 = vld [vmem:[#allocation11 + $0x6c] sm:$0xf0] }
 0x72d   : > { %v5808_v38 = vadd.f32 %v5807_v47, %v14088_v14  ;;  %v5856_v40 = vpop.f32.mrf.mxu1  ;;  %v9989_v3 = vor.u32 %v10920_v30, %v9988_v33  ;;  %v10952_v62 = vld [vmem:[#allocation11 + $0x16c] sm:$0xf0] }
 0x72e   : > { %v13131_v37 = vadd.f32 %v5952_v25, %v5904_v7  ;;  %v10373_v7 = vor.u32 %v11016_v26, %v10372_v34  ;;  %v10117_v25 = vor.u32 %v10952_v62, %v10116_v58  ;;  %v14102_v34 = vld [vmem:[#allocation55_spill] sm:$0xff]  ;;  %v14104_v26 = vld [vmem:[#allocation106_spill] sm:$0xff]  ;;  %v14105_v58 = vld [vmem:[#allocation56_spill] sm:$0xff] }
 0x72f   : > { %v5857_v13 = vadd.f32 %v5856_v40, %v5808_v38  ;;  %7130 = vmatpush.bf16.msra.mxu0 %v9989_v3  ;;  %v14103_v3 = vld [vmem:[#allocation105_spill] sm:$0xff] }
 0x730   : > { %7277 = vmatpush.bf16.msra.mxu3 %v10373_v7  ;;  %7179 = vmatpush.bf16.msra.mxu1 %v10117_v25 }
 0x733   : > { %v5905_v0 = vpop.f32.mrf.mxu2 }
 0x734   : > { %v5906_v32 = vadd.f32 %v5905_v0, %v5857_v13  ;;  %v5954_v48 = vpop.f32.mrf.mxu3  ;;  %v5810_v27 = vpop.f32.mrf.mxu0  ;;  %v14100_v0 = vld [vmem:[#allocation81_spill] sm:$0xff] }
 0x735   : > { %v5811_v35 = vadd.f32 %v5810_v27, %v14089_v46  ;;  %v5859_v28 = vpop.f32.mrf.mxu1  ;;  %v10228_v46 = vld [vmem:[#allocation11 + $0x240] sm:$0xf] }
 0x736   : > { %v13134_v23 = vadd.f32 %v5954_v48, %v5906_v32 }
 0x737   : > { %v5860_v56 = vadd.f32 %v5859_v28, %v5811_v35  ;;  %6005 = vmatmul.bf16.gmra.mxu0 %v14090_v57  ;;  %6054 = vmatmul.bf16.gmra.mxu1 %v14091_v9  ;;  %v10980_v35 = vld [vmem:[#allocation11 + $0x24c] sm:$0xf0]  ;;  %v9972_v57 = vld [vmem:[#allocation11 + $0x40] sm:$0xf] }
 0x738   : > { %6103 = vmatmul.bf16.gmra.mxu2 %v14092_v6  ;;  %v10916_v9 = vld [vmem:[#allocation11 + $0x4c] sm:$0xf0]  ;;  %v10356_v6 = vld [vmem:[#allocation11 + $0x340] sm:$0xf] }
 0x739   : > { %6152 = vmatmul.bf16.gmra.mxu3 %v14093_v39  ;;  %v9973_v39 = vor.u32 %v10916_v9, %v9972_v57 }
 0x73b   : > { %v5908_v22 = vpop.f32.mrf.mxu2  ;;  %7131 = vmatpush.bf16.msra.mxu0 %v9973_v39  ;;  %v10940_v39 = vld [vmem:[#allocation11 + $0x10c] sm:$0xf0] }
 0x73c   : > { %v5909_v36 = vadd.f32 %v5908_v22, %v5860_v56  ;;  %v5957_v8 = vpop.f32.mrf.mxu3  ;;  %v5812_v55 = vpop.f32.mrf.mxu0  ;;  %v10229_v56 = vor.u32 %v10980_v35, %v10228_v46  ;;  %v11012_v22 = vld [vmem:[#allocation11 + $0x34c] sm:$0xf0]  ;;  %v9940_v46 = vld [vmem:[#allocation11] sm:$0xf] }
 0x73d   : > { %v5813_v44 = vadd.f32 %v5812_v55, %v14094_v24  ;;  %v5861_v61 = vpop.f32.mrf.mxu1  ;;  %v10357_v55 = vor.u32 %v11012_v22, %v10356_v6  ;;  %v10908_v35 = vld [vmem:[#allocation11 + $0xc] sm:$0xf0]  ;;  %v10196_v22 = vld [vmem:[#allocation11 + $0x200] sm:$0xf] }
 0x73e   : > { %v13141_v18 = vadd.f32 %v5957_v8, %v5909_v36  ;;  %v10100_v36 = vld [vmem:[#allocation11 + $0x140] sm:$0xf]  ;;  %v10948_v8 = vld [vmem:[#allocation11 + $0x14c] sm:$0xf0]  ;;  %7229 = vmatpush.bf16.msra.mxu2 %v10229_v56  ;;  %v9941_v6 = vor.u32 %v10908_v35, %v9940_v46 }
 0x73f   : > { %v5862_v60 = vadd.f32 %v5861_v61, %v5813_v44  ;;  %v10101_v24 = vor.u32 %v10948_v8, %v10100_v36  ;;  %7278 = vmatpush.bf16.msra.mxu3 %v10357_v55  ;;  %v10972_v36 = vld [vmem:[#allocation11 + $0x20c] sm:$0xf0]  ;;  %v14107_v8 = vld [vmem:[#allocation86_spill] sm:$0xff] }
 0x741   : > { %7180 = vmatpush.bf16.msra.mxu1 %v10101_v24 }
 0x743   : > { %v5910_v47 = vpop.f32.mrf.mxu2 }
 0x744   : > { %v5911_v14 = vadd.f32 %v5910_v47, %v5862_v60  ;;  %v5959_v38 = vpop.f32.mrf.mxu3  ;;  %v5815_v40 = vpop.f32.mrf.mxu0  ;;  %v14101_v60 = vld [vmem:[#allocation82_spill] sm:$0xff] }
 0x745   : > { %v5816_v5 = vadd.f32 %v5815_v40, %v14095_v10  ;;  %v5864_v13 = vpop.f32.mrf.mxu1 }
 0x746   : > { %v13144_v63 = vadd.f32 %v5959_v38, %v5911_v14  ;;  %v14106_v14 = vld [vmem:[#allocation85_spill] sm:$0xff] }
 0x747   : > { %v5865_v52 = vadd.f32 %v5864_v13, %v5816_v5  ;;  %6010 = vmatmul.bf16.gmra.mxu0 %v14096_v49  ;;  %6059 = vmatmul.bf16.gmra.mxu1 %v14097_v59  ;;  %v10212_v5 = vld [vmem:[#allocation11 + $0x220] sm:$0xf]  ;;  %v10976_v13 = vld [vmem:[#allocation11 + $0x22c] sm:$0xf0] }
 0x748   : > { %6108 = vmatmul.bf16.gmra.mxu2 %v14098_v12  ;;  %v10213_v49 = vor.u32 %v10976_v13, %v10212_v5  ;;  %v9956_v59 = vld [vmem:[#allocation11 + $0x20] sm:$0xf]  ;;  %v10912_v12 = vld [vmem:[#allocation11 + $0x2c] sm:$0xf0] }
 0x749   : > { %6157 = vmatmul.bf16.gmra.mxu3 %v14099_v4  ;;  %v10340_v4 = vld [vmem:[#allocation11 + $0x320] sm:$0xf]  ;;  %v11004_v5 = vld [vmem:[#allocation11 + $0x30c] sm:$0xf0] }
 0x74a   : > { %7230 = vmatpush.bf16.msra.mxu2 %v10213_v49 }
 0x74b   : > { %v5913_v45 = vpop.f32.mrf.mxu2 }
 0x74c   : > { %v5914_v21 = vadd.f32 %v5913_v45, %v5865_v52  ;;  %v5962_v2 = vpop.f32.mrf.mxu3  ;;  %v5817_v41 = vpop.f32.mrf.mxu0  ;;  %v9957_v45 = vor.u32 %v10912_v12, %v9956_v59 }
 0x74d   : > { %v5818_v32 = vadd.f32 %v5817_v41, %v14100_v0  ;;  %v5866_v48 = vpop.f32.mrf.mxu1  ;;  %v10944_v41 = vld [vmem:[#allocation11 + $0x12c] sm:$0xf0] }
 0x74e   : > { %v13151_v27 = vadd.f32 %v5962_v2, %v5914_v21  ;;  %v11008_v21 = vld [vmem:[#allocation11 + $0x32c] sm:$0xf0]  ;;  %v10084_v2 = vld [vmem:[#allocation11 + $0x120] sm:$0xf]  ;;  %7132 = vmatpush.bf16.msra.mxu0 %v9957_v45 }
 0x74f   : > { %v5867_v28 = vadd.f32 %v5866_v48, %v5818_v32  ;;  %v10341_v0 = vor.u32 %v11008_v21, %v10340_v4  ;;  %v10085_v32 = vor.u32 %v10944_v41, %v10084_v2  ;;  %v14113_v4 = vld [vmem:[#allocation92_spill] sm:$0xff]  ;;  %v14114_v41 = vld [vmem:[#allocation59_spill] sm:$0xff] }
 0x751   : > { %7279 = vmatpush.bf16.msra.mxu3 %v10341_v0  ;;  %7181 = vmatpush.bf16.msra.mxu1 %v10085_v32  ;;  %v14115_v0 = vld [vmem:[#allocation109_spill] sm:$0xff]  ;;  %v14116_v32 = vld [vmem:[#allocation110_spill] sm:$0xff] }
 0x752   : > { %7133 = vmatpush.bf16.msra.mxu0 %v9941_v6  ;;  %v14118_v6 = vld [vmem:[#allocation96_spill] sm:$0xff] }
 0x753   : > { %v5915_v44 = vpop.f32.mrf.mxu2 }
 0x754   : > { %v13153_v61 = vadd.f32 %v5915_v44, %v5867_v28  ;;  %v13155_v50 = vpop.f32.mrf.mxu3  ;;  %v5820_v15 = vpop.f32.mrf.mxu0  ;;  %v10068_v28 = vld [vmem:[#allocation11 + $0x100] sm:$0xf] }
 0x755   : > { %v5821_v29 = vadd.f32 %v5820_v15, %v14101_v60  ;;  %v5869_v33 = vpop.f32.mrf.mxu1  ;;  %v10069_v44 = vor.u32 %v10940_v39, %v10068_v28  ;;  %v10197_v15 = vor.u32 %v10972_v36, %v10196_v22 }
 0x757   : > { %v5870_v30 = vadd.f32 %v5869_v33, %v5821_v29  ;;  %6015 = vmatmul.bf16.gmra.mxu0 %v14102_v34  ;;  %6064 = vmatmul.bf16.gmra.mxu1 %v14103_v3  ;;  %v14108_v29 = vld [vmem:[#allocation57_spill] sm:$0xff]  ;;  %v14109_v33 = vld [vmem:[#allocation107_spill] sm:$0xff]  ;;  %v14111_v34 = vld [vmem:[#allocation58_spill] sm:$0xff] }
 0x758   : > { %6113 = vmatmul.bf16.gmra.mxu2 %v14104_v26  ;;  %7182 = vmatpush.bf16.msra.mxu1 %v10069_v44  ;;  %v10934_v44 = vld [vmem:[#allocation11 + $0xe4] sm:$0xf] }
 0x759   : > { %6162 = vmatmul.bf16.gmra.mxu3 %v14105_v58  ;;  %7231 = vmatpush.bf16.msra.mxu2 %v10197_v15 }
 0x75b   : > { %v5918_v62 = vpop.f32.mrf.mxu2 }
 0x75c   : > { %v5919_v7 = vadd.f32 %v5918_v62, %v5870_v30  ;;  %v5967_v25 = vpop.f32.mrf.mxu3  ;;  %v5822_v47 = vpop.f32.mrf.mxu0  ;;  %v14110_v30 = vld [vmem:[#allocation108_spill] sm:$0xff] }
 0x75d   : > { %v5823_v38 = vadd.f32 %v5822_v47, %v14106_v14  ;;  %v5871_v40 = vpop.f32.mrf.mxu1 }
 0x75e   : > { %v13163_v10 = vadd.f32 %v5967_v25, %v5919_v7  ;;  %v14112_v7 = vld [vmem:[#allocation91_spill] sm:$0xff] }
 0x75f   : > { %v5872_v52 = vadd.f32 %v5871_v40, %v5823_v38  ;;  %v10324_v40 = vld [vmem:[#allocation11 + $0x300] sm:$0xf] }
 0x763   : > { %v5920_v48 = vpop.f32.mrf.mxu2 }
 0x764   : > { %v13165_v56 = vadd.f32 %v5920_v48, %v5872_v52  ;;  %v13167_v57 = vpop.f32.mrf.mxu3  ;;  %v5825_v9 = vpop.f32.mrf.mxu0  ;;  %v10325_v52 = vor.u32 %v11004_v5, %v10324_v40  ;;  %v14117_v48 = vld [vmem:[#allocation60_spill] sm:$0xff] }
 0x765   : > { %v5826_v55 = vadd.f32 %v5825_v9, %v14107_v8  ;;  %v5874_v24 = vpop.f32.mrf.mxu1  ;;  %v14119_v40 = vld [vmem:[#allocation40_spill] sm:$0xff] }
 0x766   : > { %7280 = vmatpush.bf16.msra.mxu3 %v10325_v52 }
 0x767   : > { %v5875_v60 = vadd.f32 %v5874_v24, %v5826_v55  ;;  %6020 = vmatmul.bf16.gmra.mxu0 %v14108_v29  ;;  %6069 = vmatmul.bf16.gmra.mxu1 %v14109_v33  ;;  %v10998_v55 = vld [vmem:[#allocation11 + $0x2e4] sm:$0xf]  ;;  %v10310_v24 = vld [vmem:[#allocation11 + $0x2f0] sm:$0xf0] }
 0x768   : > { %6118 = vmatmul.bf16.gmra.mxu2 %v14110_v30  ;;  %v10054_v29 = vld [vmem:[#allocation11 + $0xf0] sm:$0xf0]  ;;  %v11030_v33 = vld [vmem:[#allocation11 + $0x3e4] sm:$0xf] }
 0x769   : > { %6167 = vmatmul.bf16.gmra.mxu3 %v14111_v34  ;;  %v10438_v30 = vld [vmem:[#allocation11 + $0x3f0] sm:$0xf0] }
 0x76b   : > { %v5923_v3 = vpop.f32.mrf.mxu2 }
 0x76c   : > { %v5924_v26 = vadd.f32 %v5923_v3, %v5875_v60  ;;  %v5972_v58 = vpop.f32.mrf.mxu3  ;;  %v5827_v62 = vpop.f32.mrf.mxu0  ;;  %v10313_v60 = vor.u32 %v10998_v55, %v10310_v24 }
 0x76d   : > { %v5828_v25 = vadd.f32 %v5827_v62, %v14112_v7  ;;  %v5876_v47 = vpop.f32.mrf.mxu1  ;;  %v10441_v62 = vor.u32 %v11030_v33, %v10438_v30  ;;  %v10966_v7 = vld [vmem:[#allocation11 + $0x1e4] sm:$0xf] }
 0x76e   : > { %v13175_v14 = vadd.f32 %v5972_v58, %v5924_v26  ;;  %v10057_v58 = vor.u32 %v10934_v44, %v10054_v29  ;;  %7420 = vmatpush.bf16.msrb.mxu2 %v10313_v60  ;;  %v10962_v60 = vld [vmem:[#allocation11 + $0x1c4] sm:$0xf]  ;;  %v10166_v29 = vld [vmem:[#allocation11 + $0x1d0] sm:$0xf0] }
 0x76f   : > { %v5877_v38 = vadd.f32 %v5876_v47, %v5828_v25  ;;  %v10182_v25 = vld [vmem:[#allocation11 + $0x1f0] sm:$0xf0]  ;;  %7469 = vmatpush.bf16.msrb.mxu3 %v10441_v62  ;;  %v10169_v30 = vor.u32 %v10962_v60, %v10166_v29  ;;  %v14121_v62 = vld [vmem:[#allocation111_spill] sm:$0xff] }
 0x770   : > { %7322 = vmatpush.bf16.msrb.mxu0 %v10057_v58  ;;  %v10150_v60 = vld [vmem:[#allocation11 + $0x1b0] sm:$0xf0] }
 0x773   : > { %v5925_v13 = vpop.f32.mrf.mxu2 }
 0x774   : > { %v13177_v49 = vadd.f32 %v5925_v13, %v5877_v38  ;;  %v13179_v59 = vpop.f32.mrf.mxu3  ;;  %v5830_v12 = vpop.f32.mrf.mxu0  ;;  %v10185_v38 = vor.u32 %v10966_v7, %v10182_v25  ;;  %v14120_v13 = vld [vmem:[#allocation22_spill] sm:$0xff] }
 0x775   : > { %v5831_v45 = vadd.f32 %v5830_v12, %v14113_v4  ;;  %v5879_v21 = vpop.f32.mrf.mxu1 }
 0x776   : > { %7371 = vmatpush.bf16.msrb.mxu1 %v10185_v38 }
 0x777   : > { %v5880_v2 = vadd.f32 %v5879_v21, %v5831_v45  ;;  %6025 = vmatmul.bf16.gmra.mxu0 %v14114_v41  ;;  %6074 = vmatmul.bf16.gmra.mxu1 %v14115_v0 }
 0x778   : > { %6123 = vmatmul.bf16.gmra.mxu2 %v14116_v32  ;;  %v11141_v32 = vld [vmem:[#allocation10] sm:$0xf] }
 0x779   : > { %6172 = vmatmul.bf16.gmra.mxu3 %v14117_v48  ;;  %v13198_v48 = vperm.slane %v11141_v32, 3 }
 0x77a   : > { %7372 = vmatpush.bf16.msrb.mxu1 %v10169_v30 }
 0x77b   : > { %v5928_v46 = vpop.f32.mrf.mxu2 }
 0x77c   : > { %v5929_v35 = vadd.f32 %v5928_v46, %v5880_v2  ;;  %v5977_v28 = vpop.f32.mrf.mxu3  ;;  %v5832_v9 = vpop.f32.mrf.mxu0 }
 0x77d   : > { %v5833_v39 = vadd.f32 %v5832_v9, %v14118_v6  ;;  %v5881_v22 = vpop.f32.mrf.mxu1  ;;  %v10930_v6 = vld [vmem:[#allocation11 + $0xc4] sm:$0xf] }
 0x77e   : > { %v13187_v36 = vadd.f32 %v5977_v28, %v5929_v35  ;;  %v10994_v35 = vld [vmem:[#allocation11 + $0x2c4] sm:$0xf]  ;;  %v10294_v28 = vld [vmem:[#allocation11 + $0x2d0] sm:$0xf0] }
 0x77f   : > { %v5882_v8 = vadd.f32 %v5881_v22, %v5833_v39  ;;  %v10297_v9 = vor.u32 %v10994_v35, %v10294_v28  ;;  %v10038_v39 = vld [vmem:[#allocation11 + $0xd0] sm:$0xf0]  ;;  %v11026_v22 = vld [vmem:[#allocation11 + $0x3c4] sm:$0xf] }
 0x780   : > { %v10041_v44 = vor.u32 %v10930_v6, %v10038_v39  ;;  %v10278_v35 = vld [vmem:[#allocation11 + $0x2b0] sm:$0xf0]  ;;  %v11022_v39 = vld [vmem:[#allocation11 + $0x3a4] sm:$0xf] }
 0x781   : > { %7421 = vmatpush.bf16.msrb.mxu2 %v10297_v9  ;;  %v10926_v9 = vld [vmem:[#allocation11 + $0xa4] sm:$0xf]  ;;  %v10022_v6 = vld [vmem:[#allocation11 + $0xb0] sm:$0xf0] }
 0x782   : > { %7323 = vmatpush.bf16.msrb.mxu0 %v10041_v44  ;;  %v10406_v44 = vld [vmem:[#allocation11 + $0x3b0] sm:$0xf0] }
 0x783   : > { %v5930_v15 = vpop.f32.mrf.mxu2 }
 0x784   : > { %v13189_v34 = vadd.f32 %v5930_v15, %v5882_v8  ;;  %v13191_v3 = vpop.f32.mrf.mxu3  ;;  %v5991_v26 = vpop.f32.mrf.mxu0  ;;  %v10422_v15 = vld [vmem:[#allocation11 + $0x3d0] sm:$0xf0] }
 0x785   : > { %v6040_v47 = vpop.f32.mrf.mxu1  ;;  %v5992_v5 = vadd.f32 %v5991_v26, %v13111_v17  ;;  %v10425_v33 = vor.u32 %v11026_v22, %v10422_v15  ;;  %v10958_v15 = vld [vmem:[#allocation11 + $0x1a4] sm:$0xf] }
 0x787   : > { %7134 = vmatmul.bf16.vlgmr.msra.gmra.mxu0 %v14119_v40  ;;  %7183 = vmatmul.bf16.vlgmr.msra.gmra.mxu1 %v14120_v13  ;;  %v6041_v12 = vadd.f32 %v6040_v47, %v5992_v5  ;;  %v14122_v47 = vld [vmem:[#allocation23_spill] sm:$0xff] }
 0x788   : > { %7232 = vmatmul.bf16.vlgmr.msra.gmra.mxu2 %v13038_v42  ;;  %7470 = vmatpush.bf16.msrb.mxu3 %v10425_v33 }
 0x78b   : > { %v6089_v52 = vpop.f32.mrf.mxu2 }
 0x78c   : > { %v6138_v4 = vpop.f32.mrf.mxu3  ;;  %v5993_v45 = vpop.f32.mrf.mxu0  ;;  %v6090_v2 = vadd.f32 %v6089_v52, %v6041_v12 }
 0x78d   : > { %v6042_v21 = vpop.f32.mrf.mxu1  ;;  %v5994_v41 = vadd.f32 %v5993_v45, %v13114_v11 }
 0x78e   : > { %v6139_v0 = vadd.f32 %v6138_v4, %v6090_v2 }
 0x78f   : > { %v6043_v46 = vadd.f32 %v6042_v21, %v5994_v41 }
 0x790   : > { %v6191_v26 = vadd.f32 %v13198_v48, %v6139_v0 }
 0x792   : > { %v6255_v38 = vmax.f32 %v6191_v26, 0.0  ;;  %v14123_v26 = vld [vmem:[#allocation112_spill] sm:$0xff] }
 0x793   : > { %v6091_v17 = vpop.f32.mrf.mxu2 }
 0x794   : > { %v6092_v8 = vadd.f32 %v6091_v17, %v6043_v46  ;;  %v6140_v55 = vpop.f32.mrf.mxu3  ;;  %v5996_v24 = vpop.f32.mrf.mxu0  ;;  %v10990_v46 = vld [vmem:[#allocation11 + $0x2a4] sm:$0xf] }
 0x795   : > { %v6045_v11 = vpop.f32.mrf.mxu1  ;;  %v5997_v25 = vadd.f32 %v5996_v24, %v13121_v54  ;;  %v10281_v17 = vor.u32 %v10990_v46, %v10278_v35  ;;  %v10025_v24 = vor.u32 %v10926_v9, %v10022_v6  ;;  %v10986_v46 = vld [vmem:[#allocation11 + $0x284] sm:$0xf]  ;;  %v10262_v35 = vld [vmem:[#allocation11 + $0x290] sm:$0xf0] }
 0x796   : > { %v6141_v58 = vadd.f32 %v6140_v55, %v6092_v8  ;;  %v10922_v9 = vld [vmem:[#allocation11 + $0x84] sm:$0xf]  ;;  %v10006_v6 = vld [vmem:[#allocation11 + $0x90] sm:$0xf0] }
 0x797   : > { %7139 = vmatmul.bf16.gmra.mxu0 %v14121_v62  ;;  %7188 = vmatmul.bf16.gmra.mxu1 %v14122_v47  ;;  %v6046_v4 = vadd.f32 %v6045_v11, %v5997_v25  ;;  %v10153_v11 = vor.u32 %v10958_v15, %v10150_v60  ;;  %v14124_v25 = vld [vmem:[#allocation26_spill] sm:$0xff]  ;;  %v10134_v60 = vld [vmem:[#allocation11 + $0x190] sm:$0xf0] }
 0x798   : > { %v6195_v7 = vadd.f32 %v13198_v48, %v6141_v58  ;;  %7237 = vmatmul.bf16.gmra.mxu2 %v13048_v19  ;;  %7324 = vmatpush.bf16.msrb.mxu0 %v10025_v24  ;;  %v10009_v24 = vor.u32 %v10922_v9, %v10006_v6  ;;  %v10954_v15 = vld [vmem:[#allocation11 + $0x184] sm:$0xf] }
 0x799   : > { %7422 = vmatpush.bf16.msrb.mxu2 %v10281_v17  ;;  %7373 = vmatpush.bf16.msrb.mxu1 %v10153_v11  ;;  %v10265_v17 = vor.u32 %v10986_v46, %v10262_v35  ;;  %v10982_v35 = vld [vmem:[#allocation11 + $0x264] sm:$0xf] }
 0x79a   : > { %v6259_v5 = vmax.f32 %v6195_v7, 0.0  ;;  %v10918_v6 = vld [vmem:[#allocation11 + $0x64] sm:$0xf] }
 0x79b   : > { %v6094_v52 = vpop.f32.mrf.mxu2 }
 0x79c   : > { %v13206_v12 = vpack.c.bf16 %v6259_v5, %v6255_v38  ;;  %v6143_v45 = vpop.f32.mrf.mxu3  ;;  %v5998_v21 = vpop.f32.mrf.mxu0  ;;  %v6095_v41 = vadd.f32 %v6094_v52, %v6046_v4  ;;  %7325 = vmatpush.bf16.msrb.mxu0 %v10009_v24 }
 0x79d   : > { %v6047_v2 = vpop.f32.mrf.mxu1  ;;  %v5999_v0 = vadd.f32 %v5998_v21, %v13124_v16  ;;  %v10409_v16 = vor.u32 %v11022_v39, %v10406_v44  ;;  %v11018_v39 = vld [vmem:[#allocation11 + $0x384] sm:$0xf]  ;;  %v10390_v44 = vld [vmem:[#allocation11 + $0x390] sm:$0xf0]  ;;  %7423 = vmatpush.bf16.msrb.mxu2 %v10265_v17 }
 0x79e   : > { %7281 = vmatmul.bf16.vlgmr.msra.gmra.mxu3 %v13206_v12  ;;  %v6144_v54 = vadd.f32 %v6143_v45, %v6095_v41 }
 0x79f   : > { %v6048_v32 = vadd.f32 %v6047_v2, %v5999_v0  ;;  %7471 = vmatpush.bf16.msrb.mxu3 %v10409_v16  ;;  %v10137_v16 = vor.u32 %v10954_v15, %v10134_v60  ;;  %v10374_v15 = vld [vmem:[#allocation11 + $0x370] sm:$0xf0]  ;;  %v10950_v60 = vld [vmem:[#allocation11 + $0x164] sm:$0xf] }
 0x7a0   : > { %v6199_v33 = vadd.f32 %v13198_v48, %v6144_v54 }
 0x7a1   : > { %7374 = vmatpush.bf16.msrb.mxu1 %v10137_v16 }
 0x7a2   : > { %v6263_v38 = vmax.f32 %v6199_v33, 0.0 }
 0x7a3   : > { %v6096_v28 = vpop.f32.mrf.mxu2 }
 0x7a4   : > { %v6097_v22 = vadd.f32 %v6096_v28, %v6048_v32  ;;  %v6145_v8 = vpop.f32.mrf.mxu3  ;;  %v6001_v55 = vpop.f32.mrf.mxu0 }
 0x7a5   : > { %v6050_v29 = vpop.f32.mrf.mxu1  ;;  %v6002_v7 = vadd.f32 %v6001_v55, %v13131_v37 }
 0x7a6   : > { %v6146_v30 = vadd.f32 %v6145_v8, %v6097_v22 }
 0x7a7   : > { %7144 = vmatmul.bf16.gmra.mxu0 %v14123_v26  ;;  %7193 = vmatmul.bf16.gmra.mxu1 %v14124_v25  ;;  %v6051_v45 = vadd.f32 %v6050_v29, %v6002_v7 }
 0x7a8   : > { %v6203_v58 = vadd.f32 %v13198_v48, %v6146_v30  ;;  %7242 = vmatmul.bf16.gmra.mxu2 %v13058_v31  ;;  %v14125_v30 = vld [vmem:[#allocation113_spill] sm:$0xff] }
 0x7aa   : > { %v6267_v5 = vmax.f32 %v6203_v58, 0.0 }
 0x7ab   : > { %v6099_v52 = vpop.f32.mrf.mxu2 }
 0x7ac   : > { %v13216_v4 = vpack.c.bf16 %v6267_v5, %v6263_v38  ;;  %v6148_v21 = vpop.f32.mrf.mxu3  ;;  %v6003_v2 = vpop.f32.mrf.mxu0  ;;  %v6100_v0 = vadd.f32 %v6099_v52, %v6051_v45  ;;  %v14126_v38 = vld [vmem:[#allocation27_spill] sm:$0xff] }
 0x7ad   : > { %v6052_v41 = vpop.f32.mrf.mxu1  ;;  %v6004_v54 = vadd.f32 %v6003_v2, %v13134_v23  ;;  %v10393_v23 = vor.u32 %v11018_v39, %v10390_v44  ;;  %v9990_v39 = vld [vmem:[#allocation11 + $0x70] sm:$0xf0] }
 0x7ae   : > { %7286 = vmatmul.bf16.gmra.mxu3 %v13216_v4  ;;  %v6149_v37 = vadd.f32 %v6148_v21, %v6100_v0  ;;  %v9993_v44 = vor.u32 %v10918_v6, %v9990_v39  ;;  %v10230_v6 = vld [vmem:[#allocation11 + $0x250] sm:$0xf0] }
 0x7af   : > { %v6053_v32 = vadd.f32 %v6052_v41, %v6004_v54  ;;  %7472 = vmatpush.bf16.msrb.mxu3 %v10393_v23 }
 0x7b0   : > { %v6207_v11 = vadd.f32 %v13198_v48, %v6149_v37  ;;  %7326 = vmatpush.bf16.msrb.mxu0 %v9993_v44 }
 0x7b2   : > { %v6271_v5 = vmax.f32 %v6207_v11, 0.0 }
 0x7b3   : > { %v6101_v28 = vpop.f32.mrf.mxu2 }
 0x7b4   : > { %v6102_v22 = vadd.f32 %v6101_v28, %v6053_v32  ;;  %v6150_v8 = vpop.f32.mrf.mxu3  ;;  %v6006_v55 = vpop.f32.mrf.mxu0  ;;  %v10246_v28 = vld [vmem:[#allocation11 + $0x270] sm:$0xf0] }
 0x7b5   : > { %v6055_v29 = vpop.f32.mrf.mxu1  ;;  %v6007_v7 = vadd.f32 %v6006_v55, %v13141_v18  ;;  %v10249_v9 = vor.u32 %v10982_v35, %v10246_v28 }
 0x7b6   : > { %v6151_v33 = vadd.f32 %v6150_v8, %v6102_v22  ;;  %v11014_v22 = vld [vmem:[#allocation11 + $0x364] sm:$0xf] }
 0x7b7   : > { %7149 = vmatmul.bf16.gmra.mxu0 %v14125_v30  ;;  %7198 = vmatmul.bf16.gmra.mxu1 %v14126_v38  ;;  %v6056_v2 = vadd.f32 %v6055_v29, %v6007_v7  ;;  %v10118_v29 = vld [vmem:[#allocation11 + $0x170] sm:$0xf0] }
 0x7b8   : > { %v6211_v58 = vadd.f32 %v13198_v48, %v6151_v33  ;;  %7247 = vmatmul.bf16.gmra.mxu2 %v13068_v51  ;;  %v10121_v16 = vor.u32 %v10950_v60, %v10118_v29  ;;  %v10358_v60 = vld [vmem:[#allocation11 + $0x350] sm:$0xf0]  ;;  %v10946_v29 = vld [vmem:[#allocation11 + $0x144] sm:$0xf] }
 0x7b9   : > { %7424 = vmatpush.bf16.msrb.mxu2 %v10249_v9  ;;  %v10978_v9 = vld [vmem:[#allocation11 + $0x244] sm:$0xf] }
 0x7ba   : > { %v6275_v52 = vmax.f32 %v6211_v58, 0.0  ;;  %v14127_v58 = vld [vmem:[#allocation114_spill] sm:$0xff]  ;;  %7375 = vmatpush.bf16.msrb.mxu1 %v10121_v16 }
 0x7bb   : > { %v6104_v45 = vpop.f32.mrf.mxu2 }
 0x7bc   : > { %v13226_v21 = vpack.c.bf16 %v6275_v52, %v6271_v5  ;;  %v6153_v41 = vpop.f32.mrf.mxu3  ;;  %v6008_v0 = vpop.f32.mrf.mxu0  ;;  %v6105_v37 = vadd.f32 %v6104_v45, %v6056_v2  ;;  %v14128_v52 = vld [vmem:[#allocation28_spill] sm:$0xff] }
 0x7bd   : > { %v6057_v54 = vpop.f32.mrf.mxu1  ;;  %v6009_v32 = vadd.f32 %v6008_v0, %v13144_v63  ;;  %v10377_v63 = vor.u32 %v11014_v22, %v10374_v15  ;;  %v5965_v0 = vadd.f32 %v13155_v50, %v13153_v61  ;;  %v10233_v22 = vor.u32 %v10978_v9, %v10230_v6 }
 0x7be   : > { %7291 = vmatmul.bf16.gmra.mxu3 %v13226_v21  ;;  %v6154_v18 = vadd.f32 %v6153_v41, %v6105_v37 }
 0x7bf   : > { %v6058_v46 = vadd.f32 %v6057_v54, %v6009_v32  ;;  %7473 = vmatpush.bf16.msrb.mxu3 %v10377_v63  ;;  %7425 = vmatpush.bf16.msrb.mxu2 %v10233_v22  ;;  %v10910_v22 = vld [vmem:[#allocation11 + $0x24] sm:$0xf] }
 0x7c0   : > { %v6215_v11 = vadd.f32 %v13198_v48, %v6154_v18 }
 0x7c2   : > { %v6279_v45 = vmax.f32 %v6215_v11, 0.0 }
 0x7c3   : > { %v6106_v17 = vpop.f32.mrf.mxu2 }
 0x7c4   : > { %v6107_v8 = vadd.f32 %v6106_v17, %v6058_v46  ;;  %v6155_v55 = vpop.f32.mrf.mxu3  ;;  %v6011_v24 = vpop.f32.mrf.mxu0 }
 0x7c5   : > { %v6060_v23 = vpop.f32.mrf.mxu1  ;;  %v6012_v5 = vadd.f32 %v6011_v24, %v13151_v27  ;;  %v11010_v24 = vld [vmem:[#allocation11 + $0x344] sm:$0xf] }
 0x7c6   : > { %v6156_v33 = vadd.f32 %v6155_v55, %v6107_v8  ;;  %v10914_v8 = vld [vmem:[#allocation11 + $0x44] sm:$0xf]  ;;  %v9974_v55 = vld [vmem:[#allocation11 + $0x50] sm:$0xf0]  ;;  %v10361_v16 = vor.u32 %v11010_v24, %v10358_v60 }
 0x7c7   : > { %7154 = vmatmul.bf16.gmra.mxu0 %v14127_v58  ;;  %7203 = vmatmul.bf16.gmra.mxu1 %v14128_v52  ;;  %v6061_v37 = vadd.f32 %v6060_v23, %v6012_v5  ;;  %v9977_v15 = vor.u32 %v10914_v8, %v9974_v55  ;;  %v10102_v23 = vld [vmem:[#allocation11 + $0x150] sm:$0xf0]  ;;  %v14129_v5 = vld [vmem:[#allocation83_spill] sm:$0xff]  ;;  %v10942_v24 = vld [vmem:[#allocation11 + $0x124] sm:$0xf] }
 0x7c8   : > { %v6219_v7 = vadd.f32 %v13198_v48, %v6156_v33  ;;  %7252 = vmatmul.bf16.gmra.mxu2 %v13078_v20  ;;  %v10105_v11 = vor.u32 %v10946_v29, %v10102_v23  ;;  %7474 = vmatpush.bf16.msrb.mxu3 %v10361_v16  ;;  %v9958_v55 = vld [vmem:[#allocation11 + $0x30] sm:$0xf0] }
 0x7c9   : > { %7327 = vmatpush.bf16.msrb.mxu0 %v9977_v15  ;;  %v11006_v15 = vld [vmem:[#allocation11 + $0x324] sm:$0xf]  ;;  %v10342_v60 = vld [vmem:[#allocation11 + $0x330] sm:$0xf0] }
 0x7ca   : > { %v6283_v2 = vmax.f32 %v6219_v7, 0.0  ;;  %7376 = vmatpush.bf16.msrb.mxu1 %v10105_v11  ;;  %v10345_v23 = vor.u32 %v11006_v15, %v10342_v60  ;;  %v9942_v16 = vld [vmem:[#allocation11 + $0x10] sm:$0xf0]  ;;  %v10938_v11 = vld [vmem:[#allocation11 + $0x104] sm:$0xf] }
 0x7cb   : > { %v6109_v41 = vpop.f32.mrf.mxu2  ;;  %v11002_v60 = vld [vmem:[#allocation11 + $0x304] sm:$0xf] }
 0x7cc   : > { %v13238_v54 = vpack.c.bf16 %v6283_v2, %v6279_v45  ;;  %v6158_v32 = vpop.f32.mrf.mxu3  ;;  %v6013_v18 = vpop.f32.mrf.mxu0  ;;  %v6110_v35 = vadd.f32 %v6109_v41, %v6061_v37  ;;  %v14130_v41 = vld [vmem:[#allocation29_spill] sm:$0xff]  ;;  %7475 = vmatpush.bf16.msrb.mxu3 %v10345_v23 }
 0x7cd   : > { %v6062_v46 = vpop.f32.mrf.mxu1  ;;  %v6014_v28 = vadd.f32 %v6013_v18, %v5965_v0  ;;  %v5970_v18 = vadd.f32 %v13167_v57, %v13165_v56 }
 0x7ce   : > { %7296 = vmatmul.bf16.gmra.mxu3 %v13238_v54  ;;  %v6159_v27 = vadd.f32 %v6158_v32, %v6110_v35 }
 0x7cf   : > { %v6063_v17 = vadd.f32 %v6062_v46, %v6014_v28 }
 0x7d0   : > { %v6223_v33 = vadd.f32 %v13198_v48, %v6159_v27 }
 0x7d2   : > { %v6287_v0 = vmax.f32 %v6223_v33, 0.0 }
 0x7d3   : > { %v6111_v39 = vpop.f32.mrf.mxu2 }
 0x7d4   : > { %v6112_v61 = vadd.f32 %v6111_v39, %v6063_v17  ;;  %v6160_v50 = vpop.f32.mrf.mxu3  ;;  %v6016_v44 = vpop.f32.mrf.mxu0  ;;  %v10214_v39 = vld [vmem:[#allocation11 + $0x230] sm:$0xf0] }
 0x7d5   : > { %v6065_v63 = vpop.f32.mrf.mxu1  ;;  %v6017_v2 = vadd.f32 %v6016_v44, %v13163_v10  ;;  %v10974_v10 = vld [vmem:[#allocation11 + $0x224] sm:$0xf] }
 0x7d6   : > { %v6161_v7 = vadd.f32 %v6160_v50, %v6112_v61  ;;  %v10217_v8 = vor.u32 %v10974_v10, %v10214_v39  ;;  %v10086_v61 = vld [vmem:[#allocation11 + $0x130] sm:$0xf0]  ;;  %v9961_v50 = vor.u32 %v10910_v22, %v9958_v55  ;;  %v14132_v39 = vld [vmem:[#allocation30_spill] sm:$0xff] }
 0x7d7   : > { %7159 = vmatmul.bf16.gmra.mxu0 %v14129_v5  ;;  %7208 = vmatmul.bf16.gmra.mxu1 %v14130_v41  ;;  %v6066_v35 = vadd.f32 %v6065_v63, %v6017_v2  ;;  %v10089_v44 = vor.u32 %v10942_v24, %v10086_v61  ;;  %v10906_v63 = vld [vmem:[#allocation11 + $0x4] sm:$0xf]  ;;  %v10070_v2 = vld [vmem:[#allocation11 + $0x110] sm:$0xf0]  ;;  %v5975_v24 = vadd.f32 %v13179_v59, %v13177_v49 }
 0x7d8   : > { %v6227_v45 = vadd.f32 %v13198_v48, %v6161_v7  ;;  %7257 = vmatmul.bf16.gmra.mxu2 %v13088_v43  ;;  %7328 = vmatpush.bf16.msrb.mxu0 %v9961_v50 }
 0x7d9   : > { %7426 = vmatpush.bf16.msrb.mxu2 %v10217_v8  ;;  %7377 = vmatpush.bf16.msrb.mxu1 %v10089_v44 }
 0x7da   : > { %v6291_v37 = vmax.f32 %v6227_v45, 0.0 }
 0x7db   : > { %v6114_v32 = vpop.f32.mrf.mxu2 }
 0x7dc   : > { %v13249_v46 = vpack.c.bf16 %v6291_v37, %v6287_v0  ;;  %v6163_v28 = vpop.f32.mrf.mxu3  ;;  %v6018_v27 = vpop.f32.mrf.mxu0  ;;  %v6115_v9 = vadd.f32 %v6114_v32, %v6066_v35  ;;  %v10970_v0 = vld [vmem:[#allocation11 + $0x204] sm:$0xf]  ;;  %v9945_v32 = vor.u32 %v10906_v63, %v9942_v16  ;;  %v10198_v35 = vld [vmem:[#allocation11 + $0x210] sm:$0xf0] }
 0x7dd   : > { %v6067_v17 = vpop.f32.mrf.mxu1  ;;  %v6019_v6 = vadd.f32 %v6018_v27, %v5970_v18  ;;  %v10073_v18 = vor.u32 %v10938_v11, %v10070_v2 }
 0x7de   : > { %7301 = vmatmul.bf16.gmra.mxu3 %v13249_v46  ;;  %v6164_v56 = vadd.f32 %v6163_v28, %v6115_v9  ;;  %v14131_v9 = vld [vmem:[#allocation84_spill] sm:$0xff]  ;;  %7329 = vmatpush.bf16.msrb.mxu0 %v9945_v32 }
 0x7df   : > { %v6068_v57 = vadd.f32 %v6067_v17, %v6019_v6  ;;  %v10201_v17 = vor.u32 %v10970_v0, %v10198_v35  ;;  %7378 = vmatpush.bf16.msrb.mxu1 %v10073_v18  ;;  %v14133_v0 = vld [vmem:[#allocation41_spill] sm:$0xff]  ;;  %v14134_v18 = vld [vmem:[#allocation31_spill] sm:$0xff] }
 0x7e0   : > { %v6231_v28 = vadd.f32 %v13198_v48, %v6164_v56 }
 0x7e1   : > { %7427 = vmatpush.bf16.msrb.mxu2 %v10201_v17  ;;  %v5980_v17 = vadd.f32 %v13191_v3, %v13189_v34  ;;  %v10188_v34 = vld [vmem:[#allocation11 + $0x1e8] sm:$0xf]  ;;  %v10969_v3 = vld [vmem:[#allocation11 + $0x1f4] sm:$0xf0] }
 0x7e2   : > { %v6295_v22 = vmax.f32 %v6231_v28, 0.0 }
 0x7e3   : > { %v6116_v29 = vpop.f32.mrf.mxu2 }
 0x7e4   : > { %v6117_v33 = vadd.f32 %v6116_v29, %v6068_v57  ;;  %v6165_v7 = vpop.f32.mrf.mxu3  ;;  %v6021_v45 = vpop.f32.mrf.mxu0  ;;  %v10326_v29 = vld [vmem:[#allocation11 + $0x310] sm:$0xf0] }
 0x7e5   : > { %v6070_v37 = vpop.f32.mrf.mxu1  ;;  %v6022_v10 = vadd.f32 %v6021_v45, %v13175_v14  ;;  %v10329_v23 = vor.u32 %v11002_v60, %v10326_v29  ;;  %v11033_v29 = vld [vmem:[#allocation11 + $0x3f4] sm:$0xf0] }
 0x7e6   : > { %v6166_v27 = vadd.f32 %v6165_v7, %v6117_v33 }
 0x7e7   : > { %7164 = vmatmul.bf16.gmra.mxu0 %v14131_v9  ;;  %7213 = vmatmul.bf16.gmra.mxu1 %v14132_v39  ;;  %v6071_v50 = vadd.f32 %v6070_v37, %v6022_v10 }
 0x7e8   : > { %v6235_v6 = vadd.f32 %v13198_v48, %v6166_v27  ;;  %7262 = vmatmul.bf16.gmra.mxu2 %v13098_v1  ;;  %7476 = vmatpush.bf16.msrb.mxu3 %v10329_v23 }
 0x7ea   : > { %v6299_v8 = vmax.f32 %v6235_v6, 0.0 }
 0x7eb   : > { %v6119_v55 = vpop.f32.mrf.mxu2 }
 0x7ec   : > { %v13260_v61 = vpack.c.bf16 %v6299_v8, %v6295_v22  ;;  %v6168_v44 = vpop.f32.mrf.mxu3  ;;  %v6023_v56 = vpop.f32.mrf.mxu0  ;;  %v6120_v15 = vadd.f32 %v6119_v55, %v6071_v50  ;;  %v10316_v55 = vld [vmem:[#allocation11 + $0x2e8] sm:$0xf] }
 0x7ed   : > { %v6072_v57 = vpop.f32.mrf.mxu1  ;;  %v6024_v14 = vadd.f32 %v6023_v56, %v5975_v24  ;;  %v11001_v24 = vld [vmem:[#allocation11 + $0x2f4] sm:$0xf0] }
 0x7ee   : > { %7306 = vmatmul.bf16.gmra.mxu3 %v13260_v61  ;;  %v6169_v63 = vadd.f32 %v6168_v44, %v6120_v15  ;;  %v10317_v44 = vor.u32 %v11001_v24, %v10316_v55  ;;  %v10937_v15 = vld [vmem:[#allocation11 + $0xf4] sm:$0xf0] }
 0x7ef   : > { %v6073_v16 = vadd.f32 %v6072_v57, %v6024_v14  ;;  %v10060_v57 = vld [vmem:[#allocation11 + $0xe8] sm:$0xf] }
 0x7f0   : > { %v6239_v45 = vadd.f32 %v13198_v48, %v6169_v63  ;;  %7616 = vmatpush.bf16.msra.mxu2 %v10317_v44  ;;  %v10444_v14 = vld [vmem:[#allocation11 + $0x3e8] sm:$0xf]  ;;  %v10061_v60 = vor.u32 %v10937_v15, %v10060_v57  ;;  %v10189_v63 = vor.u32 %v10969_v3, %v10188_v34  ;;  %v10933_v44 = vld [vmem:[#allocation11 + $0xd4] sm:$0xf0] }
 0x7f1   : > { %v10445_v23 = vor.u32 %v11033_v29, %v10444_v14  ;;  %v10172_v57 = vld [vmem:[#allocation11 + $0x1c8] sm:$0xf]  ;;  %v10965_v15 = vld [vmem:[#allocation11 + $0x1d4] sm:$0xf0]  ;;  %v13285_v29 = vld [vmem:[%s13610_s6] sm:$0xf] }
 0x7f2   : > { %v6303_v35 = vmax.f32 %v6239_v45, 0.0  ;;  %7518 = vmatpush.bf16.msra.mxu0 %v10061_v60  ;;  %7567 = vmatpush.bf16.msra.mxu1 %v10189_v63  ;;  %v10173_v60 = vor.u32 %v10965_v15, %v10172_v57  ;;  %v13288_v63 = vperm.slane %v13285_v29, 0 }
 0x7f3   : > { %v6121_v11 = vpop.f32.mrf.mxu2  ;;  %7665 = vmatpush.bf16.msra.mxu3 %v10445_v23 }
 0x7f4   : > { %v6122_v33 = vadd.f32 %v6121_v11, %v6073_v16  ;;  %v6170_v7 = vpop.f32.mrf.mxu3  ;;  %v6026_v49 = vpop.f32.mrf.mxu0 }
 0x7f5   : > { %v6075_v59 = vpop.f32.mrf.mxu1  ;;  %v6027_v32 = vadd.f32 %v6026_v49, %v13187_v36 }
 0x7f6   : > { %v6171_v2 = vadd.f32 %v6170_v7, %v6122_v33  ;;  %7568 = vmatpush.bf16.msra.mxu1 %v10173_v60 }
 0x7f7   : > { %7169 = vmatmul.bf16.gmra.mxu0 %v14133_v0  ;;  %7218 = vmatmul.bf16.gmra.mxu1 %v14134_v18  ;;  %v6076_v10 = vadd.f32 %v6075_v59, %v6027_v32 }
 0x7f8   : > { %v6243_v37 = vadd.f32 %v13198_v48, %v6171_v2  ;;  %7267 = vmatmul.bf16.gmra.mxu2 %v13108_v53 }
 0x7fa   : > { %v6307_v28 = vmax.f32 %v6243_v37, 0.0 }
 0x7fb   : > { %v6124_v27 = vpop.f32.mrf.mxu2 }
 0x7fc   : > { %v13271_v6 = vpack.c.bf16 %v6307_v28, %v6303_v35  ;;  %v6173_v22 = vpop.f32.mrf.mxu3  ;;  %v6028_v8 = vpop.f32.mrf.mxu0  ;;  %v6125_v36 = vadd.f32 %v6124_v27, %v6076_v10 }
 0x7fd   : > { %v6077_v50 = vpop.f32.mrf.mxu1  ;;  %v6029_v56 = vadd.f32 %v6028_v8, %v5980_v17  ;;  %v10997_v8 = vld [vmem:[#allocation11 + $0x2d4] sm:$0xf0] }
 0x7fe   : > { %7311 = vmatmul.bf16.gmra.mxu3 %v13271_v6  ;;  %v6174_v16 = vadd.f32 %v6173_v22, %v6125_v36  ;;  %v10300_v22 = vld [vmem:[#allocation11 + $0x2c8] sm:$0xf] }
 0x7ff   : > { %v6078_v11 = vadd.f32 %v6077_v50, %v6029_v56  ;;  %v10301_v24 = vor.u32 %v10997_v8, %v10300_v22  ;;  %v10044_v50 = vld [vmem:[#allocation11 + $0xc8] sm:$0xf]  ;;  %v11029_v56 = vld [vmem:[#allocation11 + $0x3d4] sm:$0xf0] }
 0x800   : > { %v6247_v2 = vadd.f32 %v13198_v48, %v6174_v16  ;;  %v10045_v36 = vor.u32 %v10933_v44, %v10044_v50  ;;  %v10412_v22 = vld [vmem:[#allocation11 + $0x3a8] sm:$0xf]  ;;  %v11025_v50 = vld [vmem:[#allocation11 + $0x3b4] sm:$0xf0] }
 0x801   : > { %7617 = vmatpush.bf16.msra.mxu2 %v10301_v24  ;;  %v10156_v44 = vld [vmem:[#allocation11 + $0x1a8] sm:$0xf] }
 0x802   : > { %v6311_v35 = vmax.f32 %v6247_v2, 0.0  ;;  %7519 = vmatpush.bf16.msra.mxu0 %v10045_v36  ;;  %v10413_v36 = vor.u32 %v11025_v50, %v10412_v22  ;;  %v10396_v50 = vld [vmem:[#allocation11 + $0x388] sm:$0xf] }
 0x803   : > { %v6126_v33 = vpop.f32.mrf.mxu2 }
 0x804   : > { %v6127_v7 = vadd.f32 %v6126_v33, %v6078_v11  ;;  %v7135_v49 = vpop.f32.mrf.mxu0  ;;  %v6175_v59 = vpop.f32.mrf.mxu3 }
 0x805   : > { %v7184_v45 = vpop.f32.mrf.mxu1  ;;  %v7136_v16 = vadd.f32 %v7135_v49, %v13288_v63  ;;  %v10961_v49 = vld [vmem:[#allocation11 + $0x1b4] sm:$0xf0] }
 0x806   : > { %v6176_v37 = vadd.f32 %v6175_v59, %v6127_v7  ;;  %v10284_v7 = vld [vmem:[#allocation11 + $0x2a8] sm:$0xf]  ;;  %v10993_v59 = vld [vmem:[#allocation11 + $0x2b4] sm:$0xf0] }
 0x807   : > { %7330 = vmatmul.bf16.vlgmr.msrb.gmra.mxu0 %v14119_v40  ;;  %7379 = vmatmul.bf16.vlgmr.msrb.gmra.mxu1 %v14120_v13 }
 0x808   : > { %v6251_v32 = vadd.f32 %v13198_v48, %v6176_v37  ;;  %7428 = vmatmul.bf16.vlgmr.msrb.gmra.mxu2 %v13038_v42  ;;  %v10428_v48 = vld [vmem:[#allocation11 + $0x3c8] sm:$0xf]  ;;  %v10285_v37 = vor.u32 %v10993_v59, %v10284_v7 }
 0x809   : > { %v10429_v14 = vor.u32 %v11029_v56, %v10428_v48  ;;  %v10157_v56 = vor.u32 %v10961_v49, %v10156_v44 }
 0x80a   : > { %v6315_v28 = vmax.f32 %v6251_v32, 0.0  ;;  %v7185_v32 = vadd.f32 %v7184_v45, %v7136_v16  ;;  %7618 = vmatpush.bf16.msra.mxu2 %v10285_v37 }
 0x80b   : > { %v7233_v27 = vpop.f32.mrf.mxu2  ;;  %7666 = vmatpush.bf16.msra.mxu3 %v10429_v14  ;;  %7569 = vmatpush.bf16.msra.mxu1 %v10157_v56 }
 0x80c   : > { %v13279_v17 = vpack.c.bf16 %v6315_v28, %v6311_v35  ;;  %v7137_v10 = vpop.f32.mrf.mxu0  ;;  %v10028_v35 = vld [vmem:[#allocation11 + $0xa8] sm:$0xf]  ;;  %v10929_v28 = vld [vmem:[#allocation11 + $0xb4] sm:$0xf0]  ;;  %v7234_v8 = vadd.f32 %v7233_v27, %v7185_v32 }
 0x80d   : > { %v7186_v55 = vpop.f32.mrf.mxu1  ;;  %v10029_v24 = vor.u32 %v10929_v28, %v10028_v35  ;;  %v7138_v57 = vadd.f32 %v7137_v10, %v13288_v63  ;;  %v10268_v35 = vld [vmem:[#allocation11 + $0x288] sm:$0xf]  ;;  %v10989_v28 = vld [vmem:[#allocation11 + $0x294] sm:$0xf0] }
 0x80e   : > { %7316 = vmatmul.bf16.gmra.mxu3 %v13279_v17 }
 0x80f   : > { %7520 = vmatpush.bf16.msra.mxu0 %v10029_v24  ;;  %7667 = vmatpush.bf16.msra.mxu3 %v10413_v36  ;;  %v7187_v60 = vadd.f32 %v7186_v55, %v7138_v57  ;;  %v10925_v24 = vld [vmem:[#allocation11 + $0x94] sm:$0xf0] }
 0x810   : > { %v10957_v36 = vld [vmem:[#allocation11 + $0x194] sm:$0xf0] }
 0x813   : > { %v7235_v34 = vpop.f32.mrf.mxu2 }
 0x814   : > { %v7140_v3 = vpop.f32.mrf.mxu0  ;;  %v7236_v16 = vadd.f32 %v7235_v34, %v7187_v60  ;;  %v10012_v34 = vld [vmem:[#allocation11 + $0x88] sm:$0xf] }
 0x815   : > { %v7189_v23 = vpop.f32.mrf.mxu1  ;;  %v7141_v7 = vadd.f32 %v7140_v3, %v13288_v63  ;;  %v10013_v49 = vor.u32 %v10925_v24, %v10012_v34  ;;  %v11021_v3 = vld [vmem:[#allocation11 + $0x394] sm:$0xf0]  ;;  %v10252_v34 = vld [vmem:[#allocation11 + $0x268] sm:$0xf] }
 0x816   : > { %v10397_v57 = vor.u32 %v11021_v3, %v10396_v50  ;;  %v10985_v24 = vld [vmem:[#allocation11 + $0x274] sm:$0xf0]  ;;  %v10380_v3 = vld [vmem:[#allocation11 + $0x368] sm:$0xf] }
 0x817   : > { %7335 = vmatmul.bf16.gmra.mxu0 %v14121_v62  ;;  %7384 = vmatmul.bf16.gmra.mxu1 %v14122_v47  ;;  %v7190_v55 = vadd.f32 %v7189_v23, %v7141_v7 }
 0x818   : > { %7433 = vmatmul.bf16.gmra.mxu2 %v13048_v19  ;;  %7521 = vmatpush.bf16.msra.mxu0 %v10013_v49  ;;  %v10921_v49 = vld [vmem:[#allocation11 + $0x74] sm:$0xf0] }
 0x819   : > { %7668 = vmatpush.bf16.msra.mxu3 %v10397_v57  ;;  %v10953_v57 = vld [vmem:[#allocation11 + $0x174] sm:$0xf0] }
 0x81b   : > { %v7238_v11 = vpop.f32.mrf.mxu2 }
 0x81c   : > { %v7142_v33 = vpop.f32.mrf.mxu0  ;;  %v7239_v44 = vadd.f32 %v7238_v11, %v7190_v55 }
 0x81d   : > { %v13294_v2 = vpop.f32.mrf.mxu1  ;;  %v7143_v60 = vadd.f32 %v7142_v33, %v13288_v63 }
 0x81e   : > { %7477 = vmatmul.bf16.vlgmr.msrb.gmra.mxu3 %v13206_v12 }
 0x81f   : > { %v7192_v11 = vadd.f32 %v13294_v2, %v7143_v60 }
 0x821   : > { %v7282_v48 = vpop.f32.mrf.mxu3 }
 0x822   : > { %v7283_v15 = vadd.f32 %v7282_v48, %v7234_v8  ;;  %v10269_v8 = vor.u32 %v10989_v28, %v10268_v35  ;;  %v10140_v48 = vld [vmem:[#allocation11 + $0x188] sm:$0xf] }
 0x823   : > { %v7240_v45 = vpop.f32.mrf.mxu2 }
 0x824   : > { %7910 = vst [vmem:[%s13299_s3] sm:$0xff] %v7283_v15  ;;  %v7145_v27 = vpop.f32.mrf.mxu0  ;;  %7619 = vmatpush.bf16.msra.mxu2 %v10269_v8  ;;  %v10141_v15 = vor.u32 %v10957_v36, %v10140_v48 }
 0x825   : > { %v7194_v14 = vpop.f32.mrf.mxu1  ;;  %v7146_v33 = vadd.f32 %v7145_v27, %v13288_v63  ;;  %v11017_v27 = vld [vmem:[#allocation11 + $0x374] sm:$0xf0] }
 0x826   : > { %7570 = vmatpush.bf16.msra.mxu1 %v10141_v15  ;;  %v10381_v60 = vor.u32 %v11017_v27, %v10380_v3  ;;  %v10364_v27 = vld [vmem:[#allocation11 + $0x348] sm:$0xf] }
 0x827   : > { %7340 = vmatmul.bf16.gmra.mxu0 %v14123_v26  ;;  %7389 = vmatmul.bf16.gmra.mxu1 %v14124_v25  ;;  %v7195_v2 = vadd.f32 %v7194_v14, %v7146_v33 }
 0x828   : > { %7438 = vmatmul.bf16.gmra.mxu2 %v13058_v31  ;;  %7669 = vmatpush.bf16.msra.mxu3 %v10381_v60  ;;  %v10949_v60 = vld [vmem:[#allocation11 + $0x154] sm:$0xf0] }
 0x829   : > { %v7284_v10 = vpop.f32.mrf.mxu3 }
 0x82a   : > { %v7285_v59 = vadd.f32 %v7284_v10, %v7236_v16 }
 0x82b   : > { %v7243_v37 = vpop.f32.mrf.mxu2 }
 0x82c   : > { %7914 = vst [vmem:[%s13299_s3 + $0x20] sm:$0xff] %v7285_v59  ;;  %v7147_v32 = vpop.f32.mrf.mxu0  ;;  %v7241_v59 = vadd.f32 %v7240_v45, %v7192_v11  ;;  %v9996_v45 = vld [vmem:[#allocation11 + $0x68] sm:$0xf]  ;;  %v7244_v48 = vadd.f32 %v7243_v37, %v7195_v2 }
 0x82d   : > { %v13307_v22 = vpop.f32.mrf.mxu1  ;;  %v9997_v36 = vor.u32 %v10921_v49, %v9996_v45  ;;  %v7148_v11 = vadd.f32 %v7147_v32, %v13288_v63  ;;  %v10236_v45 = vld [vmem:[#allocation11 + $0x248] sm:$0xf]  ;;  %v10981_v49 = vld [vmem:[#allocation11 + $0x254] sm:$0xf0] }
 0x82e   : > { %7482 = vmatmul.bf16.gmra.mxu3 %v13216_v4 }
 0x82f   : > { %7522 = vmatpush.bf16.msra.mxu0 %v9997_v36  ;;  %v7197_v37 = vadd.f32 %v13307_v22, %v7148_v11  ;;  %v10917_v36 = vld [vmem:[#allocation11 + $0x54] sm:$0xf0] }
 0x831   : > { %v7287_v56 = vpop.f32.mrf.mxu3 }
 0x832   : > { %v7288_v16 = vadd.f32 %v7287_v56, %v7239_v44  ;;  %v10253_v44 = vor.u32 %v10985_v24, %v10252_v34  ;;  %v10124_v56 = vld [vmem:[#allocation11 + $0x168] sm:$0xf] }
 0x833   : > { %v7245_v23 = vpop.f32.mrf.mxu2 }
 0x834   : > { %7918 = vst [vmem:[%s13299_s3 + $0x40] sm:$0xff] %v7288_v16  ;;  %v7150_v10 = vpop.f32.mrf.mxu0  ;;  %7620 = vmatpush.bf16.msra.mxu2 %v10253_v44  ;;  %v10125_v16 = vor.u32 %v10953_v57, %v10124_v56 }
 0x835   : > { %v7199_v7 = vpop.f32.mrf.mxu1  ;;  %v7151_v32 = vadd.f32 %v7150_v10, %v13288_v63  ;;  %v11013_v10 = vld [vmem:[#allocation11 + $0x354] sm:$0xf0] }
 0x836   : > { %7571 = vmatpush.bf16.msra.mxu1 %v10125_v16  ;;  %v10365_v11 = vor.u32 %v11013_v10, %v10364_v27  ;;  %v10348_v10 = vld [vmem:[#allocation11 + $0x328] sm:$0xf] }
 0x837   : > { %7345 = vmatmul.bf16.gmra.mxu0 %v14125_v30  ;;  %7394 = vmatmul.bf16.gmra.mxu1 %v14126_v38  ;;  %v7200_v22 = vadd.f32 %v7199_v7, %v7151_v32 }
 0x838   : > { %7443 = vmatmul.bf16.gmra.mxu2 %v13068_v51  ;;  %7670 = vmatpush.bf16.msra.mxu3 %v10365_v11  ;;  %v10945_v11 = vld [vmem:[#allocation11 + $0x134] sm:$0xf0] }
 0x839   : > { %v7289_v35 = vpop.f32.mrf.mxu3 }
 0x83a   : > { %v7290_v28 = vadd.f32 %v7289_v35, %v7241_v59 }
 0x83b   : > { %v7248_v8 = vpop.f32.mrf.mxu2 }
 0x83c   : > { %7922 = vst [vmem:[%s13299_s3 + $0x60] sm:$0xff] %v7290_v28  ;;  %v7152_v55 = vpop.f32.mrf.mxu0  ;;  %v7246_v28 = vadd.f32 %v7245_v23, %v7197_v37  ;;  %v9980_v23 = vld [vmem:[#allocation11 + $0x48] sm:$0xf]  ;;  %v7249_v56 = vadd.f32 %v7248_v8, %v7200_v22 }
 0x83d   : > { %v13318_v50 = vpop.f32.mrf.mxu1  ;;  %v9981_v57 = vor.u32 %v10917_v36, %v9980_v23  ;;  %v7153_v37 = vadd.f32 %v7152_v55, %v13288_v63  ;;  %v10220_v23 = vld [vmem:[#allocation11 + $0x228] sm:$0xf]  ;;  %v10977_v36 = vld [vmem:[#allocation11 + $0x234] sm:$0xf0] }
 0x83e   : > { %7487 = vmatmul.bf16.gmra.mxu3 %v13226_v21 }
 0x83f   : > { %7523 = vmatpush.bf16.msra.mxu0 %v9981_v57  ;;  %v7202_v8 = vadd.f32 %v13318_v50, %v7153_v37  ;;  %v10913_v57 = vld [vmem:[#allocation11 + $0x34] sm:$0xf0] }
 0x841   : > { %v7292_v15 = vpop.f32.mrf.mxu3 }
 0x842   : > { %v7293_v59 = vadd.f32 %v7292_v15, %v7244_v48  ;;  %v10237_v48 = vor.u32 %v10981_v49, %v10236_v45  ;;  %v10108_v15 = vld [vmem:[#allocation11 + $0x148] sm:$0xf] }
 0x843   : > { %v7250_v14 = vpop.f32.mrf.mxu2 }
 0x844   : > { %7926 = vst [vmem:[%s13299_s3 + $0x80] sm:$0xff] %v7293_v59  ;;  %v7155_v35 = vpop.f32.mrf.mxu0  ;;  %7621 = vmatpush.bf16.msra.mxu2 %v10237_v48  ;;  %v10109_v59 = vor.u32 %v10949_v60, %v10108_v15 }
 0x845   : > { %v7204_v33 = vpop.f32.mrf.mxu1  ;;  %v7156_v45 = vadd.f32 %v7155_v35, %v13288_v63  ;;  %v11009_v35 = vld [vmem:[#allocation11 + $0x334] sm:$0xf0] }
 0x846   : > { %7572 = vmatpush.bf16.msra.mxu1 %v10109_v59  ;;  %v10349_v37 = vor.u32 %v11009_v35, %v10348_v10 }
 0x847   : > { %7350 = vmatmul.bf16.gmra.mxu0 %v14127_v58  ;;  %7399 = vmatmul.bf16.gmra.mxu1 %v14128_v52  ;;  %v7205_v50 = vadd.f32 %v7204_v33, %v7156_v45  ;;  %v10909_v45 = vld [vmem:[#allocation11 + $0x14] sm:$0xf0] }
 0x848   : > { %7448 = vmatmul.bf16.gmra.mxu2 %v13078_v20  ;;  %7671 = vmatpush.bf16.msra.mxu3 %v10349_v37 }
 0x849   : > { %v7294_v34 = vpop.f32.mrf.mxu3 }
 0x84a   : > { %v7295_v24 = vadd.f32 %v7294_v34, %v7246_v28 }
 0x84b   : > { %v7253_v44 = vpop.f32.mrf.mxu2 }
 0x84c   : > { %7930 = vst [vmem:[%s13299_s3 + $0xa0] sm:$0xff] %v7295_v24  ;;  %v7157_v2 = vpop.f32.mrf.mxu0  ;;  %v7251_v24 = vadd.f32 %v7250_v14, %v7202_v8  ;;  %v9964_v14 = vld [vmem:[#allocation11 + $0x28] sm:$0xf]  ;;  %v7254_v15 = vadd.f32 %v7253_v44, %v7205_v50 }
 0x84d   : > { %v13329_v3 = vpop.f32.mrf.mxu1  ;;  %v9965_v60 = vor.u32 %v10913_v57, %v9964_v14  ;;  %v7158_v8 = vadd.f32 %v7157_v2, %v13288_v63  ;;  %v10973_v57 = vld [vmem:[#allocation11 + $0x214] sm:$0xf0] }
 0x84e   : > { %7492 = vmatmul.bf16.gmra.mxu3 %v13238_v54 }
 0x84f   : > { %7524 = vmatpush.bf16.msra.mxu0 %v9965_v60  ;;  %v7207_v10 = vadd.f32 %v13329_v3, %v7158_v8 }
 0x851   : > { %v7297_v16 = vpop.f32.mrf.mxu3 }
 0x852   : > { %v7298_v28 = vadd.f32 %v7297_v16, %v7249_v56  ;;  %v10221_v56 = vor.u32 %v10977_v36, %v10220_v23  ;;  %v10092_v16 = vld [vmem:[#allocation11 + $0x128] sm:$0xf]  ;;  %v10941_v36 = vld [vmem:[#allocation11 + $0x114] sm:$0xf0] }
 0x853   : > { %v7255_v7 = vpop.f32.mrf.mxu2 }
 0x854   : > { %7934 = vst [vmem:[%s13299_s3 + $0xc0] sm:$0xff] %v7298_v28  ;;  %v7160_v34 = vpop.f32.mrf.mxu0  ;;  %7622 = vmatpush.bf16.msra.mxu2 %v10221_v56  ;;  %v10093_v28 = vor.u32 %v10945_v11, %v10092_v16  ;;  %v10204_v56 = vld [vmem:[#allocation11 + $0x208] sm:$0xf] }
 0x855   : > { %v13334_v32 = vpop.f32.mrf.mxu1  ;;  %v10205_v2 = vor.u32 %v10973_v57, %v10204_v56  ;;  %v7161_v35 = vadd.f32 %v7160_v34, %v13288_v63 }
 0x856   : > { %7573 = vmatpush.bf16.msra.mxu1 %v10093_v28  ;;  %v10332_v28 = vld [vmem:[#allocation11 + $0x308] sm:$0xf] }
 0x857   : > { %7355 = vmatmul.bf16.gmra.mxu0 %v14129_v5  ;;  %7404 = vmatmul.bf16.gmra.mxu1 %v14130_v41  ;;  %v7210_v37 = vadd.f32 %v13334_v32, %v7161_v35 }
 0x858   : > { %7453 = vmatmul.bf16.gmra.mxu2 %v13088_v43 }
 0x859   : > { %v7299_v55 = vpop.f32.mrf.mxu3  ;;  %7623 = vmatpush.bf16.msra.mxu2 %v10205_v2  ;;  %v10999_v2 = vld [vmem:[#allocation11 + $0x2ec] sm:$0xf] }
 0x85a   : > { %v7300_v49 = vadd.f32 %v7299_v55, %v7251_v24  ;;  %v9948_v55 = vld [vmem:[#allocation11 + $0x8] sm:$0xf] }
 0x85b   : > { %v7258_v48 = vpop.f32.mrf.mxu2  ;;  %v9949_v23 = vor.u32 %v10909_v45, %v9948_v55 }
 0x85c   : > { %7938 = vst [vmem:[%s13299_s3 + $0xe0] sm:$0xff] %v7300_v49  ;;  %v7162_v22 = vpop.f32.mrf.mxu0  ;;  %v10076_v49 = vld [vmem:[#allocation11 + $0x108] sm:$0xf]  ;;  %v7259_v8 = vadd.f32 %v7258_v48, %v7210_v37  ;;  %v11031_v37 = vld [vmem:[#allocation11 + $0x3ec] sm:$0xf] }
 0x85d   : > { %v13342_v27 = vpop.f32.mrf.mxu1  ;;  %v10077_v14 = vor.u32 %v10941_v36, %v10076_v49  ;;  %7525 = vmatpush.bf16.msra.mxu0 %v9949_v23  ;;  %v7163_v45 = vadd.f32 %v7162_v22, %v13288_v63 }
 0x85e   : > { %7497 = vmatmul.bf16.gmra.mxu3 %v13249_v46 }
 0x85f   : > { %7574 = vmatpush.bf16.msra.mxu1 %v10077_v14  ;;  %v7212_v56 = vadd.f32 %v13342_v27, %v7163_v45 }
 0x861   : > { %v7302_v59 = vpop.f32.mrf.mxu3 }
 0x862   : > { %v7303_v24 = vadd.f32 %v7302_v59, %v7254_v15  ;;  %v7256_v15 = vadd.f32 %v7255_v7, %v7207_v10  ;;  %v11005_v7 = vld [vmem:[#allocation11 + $0x314] sm:$0xf0] }
 0x863   : > { %v7260_v33 = vpop.f32.mrf.mxu2 }
 0x864   : > { %7942 = vst [vmem:[%s13299_s3 + $0x100] sm:$0xff] %v7303_v24  ;;  %v7165_v44 = vpop.f32.mrf.mxu0  ;;  %v10333_v24 = vor.u32 %v11005_v7, %v10332_v28  ;;  %v7261_v32 = vadd.f32 %v7260_v33, %v7212_v56  ;;  %v10935_v33 = vld [vmem:[#allocation11 + $0xec] sm:$0xf] }
 0x865   : > { %v7214_v50 = vpop.f32.mrf.mxu1  ;;  %v7166_v14 = vadd.f32 %v7165_v44, %v13288_v63  ;;  %v10446_v44 = vld [vmem:[#allocation11 + $0x3f8] sm:$0xf0] }
 0x866   : > { %7672 = vmatpush.bf16.msra.mxu3 %v10333_v24  ;;  %v10190_v24 = vld [vmem:[#allocation11 + $0x1f8] sm:$0xf0]  ;;  %v10449_v45 = vor.u32 %v11031_v37, %v10446_v44  ;;  %v11027_v44 = vld [vmem:[#allocation11 + $0x3cc] sm:$0xf] }
 0x867   : > { %7360 = vmatmul.bf16.gmra.mxu0 %v14131_v9  ;;  %7409 = vmatmul.bf16.gmra.mxu1 %v14132_v39  ;;  %v7215_v27 = vadd.f32 %v7214_v50, %v7166_v14 }
 0x868   : > { %7458 = vmatmul.bf16.gmra.mxu2 %v13098_v1 }
 0x869   : > { %v7304_v60 = vpop.f32.mrf.mxu3 }
 0x86a   : > { %v7305_v16 = vadd.f32 %v7304_v60, %v7256_v15  ;;  %v10318_v15 = vld [vmem:[#allocation11 + $0x2f8] sm:$0xf0]  ;;  %7861 = vmatpush.bf16.msrb.mxu3 %v10449_v45 }
 0x86b   : > { %v7263_v11 = vpop.f32.mrf.mxu2  ;;  %v10321_v35 = vor.u32 %v10999_v2, %v10318_v15  ;;  %v10174_v45 = vld [vmem:[#allocation11 + $0x1d8] sm:$0xf0] }
 0x86c   : > { %7946 = vst [vmem:[%s13299_s3 + $0x120] sm:$0xff] %v7305_v16  ;;  %v7167_v59 = vpop.f32.mrf.mxu0  ;;  %v10062_v16 = vld [vmem:[#allocation11 + $0xf8] sm:$0xf0]  ;;  %v7264_v28 = vadd.f32 %v7263_v11, %v7215_v27 }
 0x86d   : > { %v7216_v3 = vpop.f32.mrf.mxu1  ;;  %7812 = vmatpush.bf16.msrb.mxu2 %v10321_v35  ;;  %v10065_v7 = vor.u32 %v10935_v33, %v10062_v16  ;;  %v7168_v56 = vadd.f32 %v7167_v59, %v13288_v63  ;;  %v10995_v33 = vld [vmem:[#allocation11 + $0x2cc] sm:$0xf]  ;;  %v10302_v16 = vld [vmem:[#allocation11 + $0x2d8] sm:$0xf0] }
 0x86e   : > { %7502 = vmatmul.bf16.gmra.mxu3 %v13260_v61 }
 0x86f   : > { %7714 = vmatpush.bf16.msrb.mxu0 %v10065_v7  ;;  %v10046_v7 = vld [vmem:[#allocation11 + $0xd8] sm:$0xf0] }
 0x871   : > { %v7307_v55 = vpop.f32.mrf.mxu3 }
 0x872   : > { %v7308_v49 = vadd.f32 %v7307_v55, %v7259_v8  ;;  %v10967_v8 = vld [vmem:[#allocation11 + $0x1ec] sm:$0xf] }
 0x873   : > { %v7265_v34 = vpop.f32.mrf.mxu2 }
 0x874   : > { %7950 = vst [vmem:[%s13299_s3 + $0x140] sm:$0xff] %v7308_v49  ;;  %v7170_v23 = vpop.f32.mrf.mxu0  ;;  %v10193_v49 = vor.u32 %v10967_v8, %v10190_v24 }
 0x875   : > { %v7219_v36 = vpop.f32.mrf.mxu1  ;;  %v7171_v59 = vadd.f32 %v7170_v23, %v13288_v63  ;;  %v10430_v23 = vld [vmem:[#allocation11 + $0x3d8] sm:$0xf0] }
 0x876   : > { %7763 = vmatpush.bf16.msrb.mxu1 %v10193_v49 }
 0x877   : > { %7365 = vmatmul.bf16.gmra.mxu0 %v14133_v0  ;;  %7414 = vmatmul.bf16.gmra.mxu1 %v14134_v18 }
 0x878   : > { %7463 = vmatmul.bf16.gmra.mxu2 %v13108_v53 }
 0x879   : > { %v7309_v48 = vpop.f32.mrf.mxu3 }
 0x87a   : > { %v7310_v22 = vadd.f32 %v7309_v48, %v7261_v32 }
 0x87b   : > { %v7268_v57 = vpop.f32.mrf.mxu2 }
 0x87c   : > { %7954 = vst [vmem:[%s13299_s3 + $0x160] sm:$0xff] %v7310_v22  ;;  %v7172_v10 = vpop.f32.mrf.mxu0  ;;  %v7217_v22 = vadd.f32 %v7216_v3, %v7168_v56  ;;  %v7220_v3 = vadd.f32 %v7219_v36, %v7171_v59  ;;  %v10433_v56 = vor.u32 %v11027_v44, %v10430_v23 }
 0x87d   : > { %v13363_v60 = vpop.f32.mrf.mxu1 }
 0x87e   : > { %7507 = vmatmul.bf16.gmra.mxu3 %v13271_v6  ;;  %v7266_v11 = vadd.f32 %v7265_v34, %v7217_v22  ;;  %v10931_v34 = vld [vmem:[#allocation11 + $0xcc] sm:$0xf]  ;;  %v7269_v8 = vadd.f32 %v7268_v57, %v7220_v3  ;;  %v7173_v22 = vadd.f32 %v7172_v10, %v13288_v63 }
 0x87f   : > { %v10049_v24 = vor.u32 %v10931_v34, %v10046_v7  ;;  %7862 = vmatpush.bf16.msrb.mxu3 %v10433_v56  ;;  %v10991_v34 = vld [vmem:[#allocation11 + $0x2ac] sm:$0xf]  ;;  %v10286_v7 = vld [vmem:[#allocation11 + $0x2b8] sm:$0xf0] }
 0x880   : > { %v7222_v57 = vadd.f32 %v13363_v60, %v7173_v22 }
 0x881   : > { %v7312_v55 = vpop.f32.mrf.mxu3  ;;  %7715 = vmatpush.bf16.msrb.mxu0 %v10049_v24  ;;  %v11023_v24 = vld [vmem:[#allocation11 + $0x3ac] sm:$0xf] }
 0x882   : > { %v7313_v32 = vadd.f32 %v7312_v55, %v7264_v28  ;;  %v10305_v28 = vor.u32 %v10995_v33, %v10302_v16  ;;  %v10963_v55 = vld [vmem:[#allocation11 + $0x1cc] sm:$0xf] }
 0x883   : > { %v7270_v50 = vpop.f32.mrf.mxu2 }
 0x884   : > { %7958 = vst [vmem:[%s13299_s3 + $0x180] sm:$0xff] %v7313_v32  ;;  %v7331_v48 = vpop.f32.mrf.mxu0  ;;  %7813 = vmatpush.bf16.msrb.mxu2 %v10305_v28  ;;  %v10177_v32 = vor.u32 %v10963_v55, %v10174_v45  ;;  %v7271_v33 = vadd.f32 %v7270_v50, %v7222_v57  ;;  %v10927_v50 = vld [vmem:[#allocation11 + $0xac] sm:$0xf] }
 0x885   : > { %v7380_v14 = vpop.f32.mrf.mxu1  ;;  %v10959_v45 = vld [vmem:[#allocation11 + $0x1ac] sm:$0xf] }
 0x886   : > { %7764 = vmatpush.bf16.msrb.mxu1 %v10177_v32 }
 0x887   : > { %7526 = vmatmul.bf16.vlgmr.msra.gmra.mxu0 %v14119_v40  ;;  %7575 = vmatmul.bf16.vlgmr.msra.gmra.mxu1 %v14120_v13 }
 0x888   : > { %7624 = vmatmul.bf16.vlgmr.msra.gmra.mxu2 %v13038_v42 }
 0x889   : > { %v7314_v2 = vpop.f32.mrf.mxu3 }
 0x88a   : > { %v7315_v15 = vadd.f32 %v7314_v2, %v7266_v11 }
 0x88b   : > { %v7429_v35 = vpop.f32.mrf.mxu2 }
 0x88c   : > { %7962 = vst [vmem:[%s13299_s3 + $0x1a0] sm:$0xff] %v7315_v15  ;;  %v7333_v27 = vpop.f32.mrf.mxu0  ;;  %v13380_v15 = vperm.slane %v13285_v29, 1  ;;  %v10289_v29 = vor.u32 %v10991_v34, %v10286_v7 }
 0x88d   : > { %v13373_v37 = vpop.f32.mrf.mxu1 }
 0x88e   : > { %7512 = vmatmul.bf16.gmra.mxu3 %v13279_v17  ;;  %v7332_v10 = vadd.f32 %v7331_v48, %v13380_v15  ;;  %7814 = vmatpush.bf16.msrb.mxu2 %v10289_v29  ;;  %v10414_v48 = vld [vmem:[#allocation11 + $0x3b8] sm:$0xf0] }
 0x88f   : > { %v10417_v32 = vor.u32 %v11023_v24, %v10414_v48 }
 0x890   : > { %v7381_v44 = vadd.f32 %v7380_v14, %v7332_v10 }
 0x891   : > { %v7317_v49 = vpop.f32.mrf.mxu3  ;;  %7863 = vmatpush.bf16.msrb.mxu3 %v10417_v32 }
 0x892   : > { %v7318_v11 = vadd.f32 %v7317_v49, %v7269_v8  ;;  %v10030_v8 = vld [vmem:[#allocation11 + $0xb8] sm:$0xf0]  ;;  %v7430_v23 = vadd.f32 %v7429_v35, %v7381_v44  ;;  %v10987_v44 = vld [vmem:[#allocation11 + $0x28c] sm:$0xf] }
 0x893   : > { %v7431_v36 = vpop.f32.mrf.mxu2  ;;  %v10033_v55 = vor.u32 %v10927_v50, %v10030_v8  ;;  %v10158_v49 = vld [vmem:[#allocation11 + $0x1b8] sm:$0xf0] }
 0x894   : > { %7966 = vst [vmem:[%s13299_s3 + $0x1c0] sm:$0xff] %v7318_v11  ;;  %v7336_v2 = vpop.f32.mrf.mxu0  ;;  %v10161_v22 = vor.u32 %v10959_v45, %v10158_v49  ;;  %v7334_v11 = vadd.f32 %v7333_v27, %v13380_v15  ;;  %v10270_v50 = vld [vmem:[#allocation11 + $0x298] sm:$0xf0]  ;;  %v10955_v49 = vld [vmem:[#allocation11 + $0x18c] sm:$0xf] }
 0x895   : > { %v7385_v59 = vpop.f32.mrf.mxu1  ;;  %7716 = vmatpush.bf16.msrb.mxu0 %v10033_v55  ;;  %v7337_v27 = vadd.f32 %v7336_v2, %v13380_v15  ;;  %v10273_v24 = vor.u32 %v10987_v44, %v10270_v50  ;;  %v11019_v55 = vld [vmem:[#allocation11 + $0x38c] sm:$0xf]  ;;  %v10398_v2 = vld [vmem:[#allocation11 + $0x398] sm:$0xf0] }
 0x896   : > { %7765 = vmatpush.bf16.msrb.mxu1 %v10161_v22  ;;  %v7383_v35 = vadd.f32 %v13373_v37, %v7334_v11  ;;  %v10401_v22 = vor.u32 %v11019_v55, %v10398_v2 }
 0x897   : > { %7531 = vmatmul.bf16.gmra.mxu0 %v14121_v62  ;;  %7580 = vmatmul.bf16.gmra.mxu1 %v14122_v47  ;;  %v7386_v37 = vadd.f32 %v7385_v59, %v7337_v27 }
 0x898   : > { %7629 = vmatmul.bf16.gmra.mxu2 %v13048_v19  ;;  %v7432_v10 = vadd.f32 %v7431_v36, %v7383_v35  ;;  %v10923_v36 = vld [vmem:[#allocation11 + $0x8c] sm:$0xf]  ;;  %7864 = vmatpush.bf16.msrb.mxu3 %v10401_v22 }
 0x899   : > { %v7319_v63 = vpop.f32.mrf.mxu3  ;;  %7815 = vmatpush.bf16.msrb.mxu2 %v10273_v24 }
 0x89a   : > { %v7320_v16 = vadd.f32 %v7319_v63, %v7271_v33 }
 0x89b   : > { %v7434_v28 = vpop.f32.mrf.mxu2 }
 0x89c   : > { %7970 = vst [vmem:[%s13299_s3 + $0x1e0] sm:$0xff] %v7320_v16  ;;  %v7338_v3 = vpop.f32.mrf.mxu0  ;;  %v7435_v48 = vadd.f32 %v7434_v28, %v7386_v37  ;;  %v10983_v37 = vld [vmem:[#allocation11 + $0x26c] sm:$0xf] }
 0x89d   : > { %v13387_v60 = vpop.f32.mrf.mxu1 }
 0x89e   : > { %7673 = vmatmul.bf16.vlgmr.msra.gmra.mxu3 %v13206_v12 }
 0x8a1   : > { %v7478_v56 = vpop.f32.mrf.mxu3 }
 0x8a2   : > { %v7479_v57 = vadd.f32 %v7478_v56, %v7430_v23  ;;  %v10014_v23 = vld [vmem:[#allocation11 + $0x98] sm:$0xf0] }
 0x8a3   : > { %v7436_v14 = vpop.f32.mrf.mxu2  ;;  %v10017_v45 = vor.u32 %v10923_v36, %v10014_v23  ;;  %v10142_v56 = vld [vmem:[#allocation11 + $0x198] sm:$0xf0] }
 0x8a4   : > { %7911 = vst [vmem:[%s13299_s3 + $0x8] sm:$0xff] %v7479_v57  ;;  %v7341_v33 = vpop.f32.mrf.mxu0  ;;  %v10145_v11 = vor.u32 %v10955_v49, %v10142_v56  ;;  %v7339_v57 = vadd.f32 %v7338_v3, %v13380_v15  ;;  %v10254_v36 = vld [vmem:[#allocation11 + $0x278] sm:$0xf0]  ;;  %v10951_v56 = vld [vmem:[#allocation11 + $0x16c] sm:$0xf] }
 0x8a5   : > { %v7390_v63 = vpop.f32.mrf.mxu1  ;;  %7717 = vmatpush.bf16.msrb.mxu0 %v10017_v45  ;;  %v7342_v3 = vadd.f32 %v7341_v33, %v13380_v15  ;;  %v10257_v55 = vor.u32 %v10983_v37, %v10254_v36  ;;  %v11015_v45 = vld [vmem:[#allocation11 + $0x36c] sm:$0xf]  ;;  %v10382_v33 = vld [vmem:[#allocation11 + $0x378] sm:$0xf0] }
 0x8a6   : > { %7766 = vmatpush.bf16.msrb.mxu1 %v10145_v11  ;;  %v7388_v28 = vadd.f32 %v13387_v60, %v7339_v57  ;;  %v10385_v11 = vor.u32 %v11015_v45, %v10382_v33 }
 0x8a7   : > { %7536 = vmatmul.bf16.gmra.mxu0 %v14123_v26  ;;  %7585 = vmatmul.bf16.gmra.mxu1 %v14124_v25  ;;  %v7391_v60 = vadd.f32 %v7390_v63, %v7342_v3 }
 0x8a8   : > { %7634 = vmatmul.bf16.gmra.mxu2 %v13058_v31  ;;  %v7437_v27 = vadd.f32 %v7436_v14, %v7388_v28  ;;  %v10919_v14 = vld [vmem:[#allocation11 + $0x6c] sm:$0xf]  ;;  %7865 = vmatpush.bf16.msrb.mxu3 %v10385_v11 }
 0x8a9   : > { %v7480_v16 = vpop.f32.mrf.mxu3  ;;  %7816 = vmatpush.bf16.msrb.mxu2 %v10257_v55 }
 0x8aa   : > { %v7481_v34 = vadd.f32 %v7480_v16, %v7432_v10 }
 0x8ab   : > { %v7439_v7 = vpop.f32.mrf.mxu2 }
 0x8ac   : > { %7915 = vst [vmem:[%s13299_s3 + $0x28] sm:$0xff] %v7481_v34  ;;  %v7343_v29 = vpop.f32.mrf.mxu0  ;;  %v7440_v2 = vadd.f32 %v7439_v7, %v7391_v60  ;;  %v10979_v60 = vld [vmem:[#allocation11 + $0x24c] sm:$0xf] }
 0x8ad   : > { %v13398_v8 = vpop.f32.mrf.mxu1 }
 0x8ae   : > { %7678 = vmatmul.bf16.gmra.mxu3 %v13216_v4 }
 0x8b1   : > { %v7483_v32 = vpop.f32.mrf.mxu3 }
 0x8b2   : > { %v7484_v35 = vadd.f32 %v7483_v32, %v7435_v48  ;;  %v9998_v48 = vld [vmem:[#allocation11 + $0x78] sm:$0xf0] }
 0x8b3   : > { %v7441_v59 = vpop.f32.mrf.mxu2  ;;  %v10001_v49 = vor.u32 %v10919_v14, %v9998_v48  ;;  %v10126_v32 = vld [vmem:[#allocation11 + $0x178] sm:$0xf0] }
 0x8b4   : > { %7919 = vst [vmem:[%s13299_s3 + $0x48] sm:$0xff] %v7484_v35  ;;  %v7346_v10 = vpop.f32.mrf.mxu0  ;;  %v10129_v57 = vor.u32 %v10951_v56, %v10126_v32  ;;  %v7344_v35 = vadd.f32 %v7343_v29, %v13380_v15  ;;  %v10238_v14 = vld [vmem:[#allocation11 + $0x258] sm:$0xf0]  ;;  %v10947_v32 = vld [vmem:[#allocation11 + $0x14c] sm:$0xf] }
 0x8b5   : > { %v7395_v16 = vpop.f32.mrf.mxu1  ;;  %7718 = vmatpush.bf16.msrb.mxu0 %v10001_v49  ;;  %v7347_v29 = vadd.f32 %v7346_v10, %v13380_v15  ;;  %v10241_v45 = vor.u32 %v10979_v60, %v10238_v14  ;;  %v11011_v49 = vld [vmem:[#allocation11 + $0x34c] sm:$0xf]  ;;  %v10366_v10 = vld [vmem:[#allocation11 + $0x358] sm:$0xf0] }
 0x8b6   : > { %7767 = vmatpush.bf16.msrb.mxu1 %v10129_v57  ;;  %v7393_v7 = vadd.f32 %v13398_v8, %v7344_v35  ;;  %v10369_v57 = vor.u32 %v11011_v49, %v10366_v10 }
 0x8b7   : > { %7541 = vmatmul.bf16.gmra.mxu0 %v14125_v30  ;;  %7590 = vmatmul.bf16.gmra.mxu1 %v14126_v38  ;;  %v7396_v8 = vadd.f32 %v7395_v16, %v7347_v29 }
 0x8b8   : > { %7639 = vmatmul.bf16.gmra.mxu2 %v13068_v51  ;;  %v7442_v3 = vadd.f32 %v7441_v59, %v7393_v7  ;;  %v10915_v59 = vld [vmem:[#allocation11 + $0x4c] sm:$0xf]  ;;  %7866 = vmatpush.bf16.msrb.mxu3 %v10369_v57 }
 0x8b9   : > { %v7485_v34 = vpop.f32.mrf.mxu3  ;;  %7817 = vmatpush.bf16.msrb.mxu2 %v10241_v45 }
 0x8ba   : > { %v7486_v44 = vadd.f32 %v7485_v34, %v7437_v27 }
 0x8bb   : > { %v7444_v50 = vpop.f32.mrf.mxu2 }
 0x8bc   : > { %7923 = vst [vmem:[%s13299_s3 + $0x68] sm:$0xff] %v7486_v44  ;;  %v7348_v24 = vpop.f32.mrf.mxu0  ;;  %v7445_v33 = vadd.f32 %v7444_v50, %v7396_v8  ;;  %v10975_v8 = vld [vmem:[#allocation11 + $0x22c] sm:$0xf] }
 0x8bd   : > { %v13409_v23 = vpop.f32.mrf.mxu1 }
 0x8be   : > { %7683 = vmatmul.bf16.gmra.mxu3 %v13226_v21 }
 0x8c1   : > { %v7488_v22 = vpop.f32.mrf.mxu3 }
 0x8c2   : > { %v7489_v28 = vadd.f32 %v7488_v22, %v7440_v2  ;;  %v9982_v2 = vld [vmem:[#allocation11 + $0x58] sm:$0xf0] }
 0x8c3   : > { %v7446_v63 = vpop.f32.mrf.mxu2  ;;  %v9985_v56 = vor.u32 %v10915_v59, %v9982_v2  ;;  %v10110_v22 = vld [vmem:[#allocation11 + $0x158] sm:$0xf0] }
 0x8c4   : > { %7927 = vst [vmem:[%s13299_s3 + $0x88] sm:$0xff] %v7489_v28  ;;  %v7351_v27 = vpop.f32.mrf.mxu0  ;;  %v10113_v35 = vor.u32 %v10947_v32, %v10110_v22  ;;  %v7349_v28 = vadd.f32 %v7348_v24, %v13380_v15  ;;  %v10222_v59 = vld [vmem:[#allocation11 + $0x238] sm:$0xf0]  ;;  %v10943_v22 = vld [vmem:[#allocation11 + $0x12c] sm:$0xf] }
 0x8c5   : > { %v7400_v34 = vpop.f32.mrf.mxu1  ;;  %7719 = vmatpush.bf16.msrb.mxu0 %v9985_v56  ;;  %v10225_v49 = vor.u32 %v10975_v8, %v10222_v59  ;;  %v11007_v56 = vld [vmem:[#allocation11 + $0x32c] sm:$0xf]  ;;  %v10078_v8 = vld [vmem:[#allocation11 + $0x118] sm:$0xf0] }
 0x8c6   : > { %7768 = vmatpush.bf16.msrb.mxu1 %v10113_v35  ;;  %v7398_v50 = vadd.f32 %v13409_v23, %v7349_v28  ;;  %v10971_v59 = vld [vmem:[#allocation11 + $0x20c] sm:$0xf] }
 0x8c7   : > { %7546 = vmatmul.bf16.gmra.mxu0 %v14127_v58  ;;  %7595 = vmatmul.bf16.gmra.mxu1 %v14128_v52 }
 0x8c8   : > { %7644 = vmatmul.bf16.gmra.mxu2 %v13078_v20  ;;  %v7447_v29 = vadd.f32 %v7446_v63, %v7398_v50  ;;  %v10911_v63 = vld [vmem:[#allocation11 + $0x2c] sm:$0xf] }
 0x8c9   : > { %v7490_v44 = vpop.f32.mrf.mxu3  ;;  %7818 = vmatpush.bf16.msrb.mxu2 %v10225_v49 }
 0x8ca   : > { %v7491_v37 = vadd.f32 %v7490_v44, %v7442_v3 }
 0x8cb   : > { %v7449_v36 = vpop.f32.mrf.mxu2 }
 0x8cc   : > { %7931 = vst [vmem:[%s13299_s3 + $0xa8] sm:$0xff] %v7491_v37  ;;  %v7353_v55 = vpop.f32.mrf.mxu0  ;;  %v7352_v37 = vadd.f32 %v7351_v27, %v13380_v15  ;;  %v10350_v27 = vld [vmem:[#allocation11 + $0x338] sm:$0xf0] }
 0x8cd   : > { %v13420_v48 = vpop.f32.mrf.mxu1  ;;  %v10353_v35 = vor.u32 %v11007_v56, %v10350_v27 }
 0x8ce   : > { %7688 = vmatmul.bf16.gmra.mxu3 %v13238_v54  ;;  %v7401_v23 = vadd.f32 %v7400_v34, %v7352_v37  ;;  %v10939_v37 = vld [vmem:[#allocation11 + $0x10c] sm:$0xf] }
 0x8cf   : > { %7867 = vmatpush.bf16.msrb.mxu3 %v10353_v35  ;;  %v11003_v35 = vld [vmem:[#allocation11 + $0x30c] sm:$0xf] }
 0x8d0   : > { %v7450_v10 = vadd.f32 %v7449_v36, %v7401_v23  ;;  %v10081_v23 = vor.u32 %v10939_v37, %v10078_v8 }
 0x8d1   : > { %v7493_v11 = vpop.f32.mrf.mxu3 }
 0x8d2   : > { %v7494_v7 = vadd.f32 %v7493_v11, %v7445_v33  ;;  %v9966_v33 = vld [vmem:[#allocation11 + $0x38] sm:$0xf0] }
 0x8d3   : > { %v7451_v16 = vpop.f32.mrf.mxu2  ;;  %v9969_v32 = vor.u32 %v10911_v63, %v9966_v33  ;;  %v10094_v11 = vld [vmem:[#allocation11 + $0x138] sm:$0xf0] }
 0x8d4   : > { %7935 = vst [vmem:[%s13299_s3 + $0xc8] sm:$0xff] %v7494_v7  ;;  %v7356_v3 = vpop.f32.mrf.mxu0  ;;  %v10097_v28 = vor.u32 %v10943_v22, %v10094_v11  ;;  %v7354_v7 = vadd.f32 %v7353_v55, %v13380_v15  ;;  %v10206_v63 = vld [vmem:[#allocation11 + $0x218] sm:$0xf0] }
 0x8d5   : > { %v13425_v44 = vpop.f32.mrf.mxu1  ;;  %7720 = vmatpush.bf16.msrb.mxu0 %v9969_v32  ;;  %v10209_v55 = vor.u32 %v10971_v59, %v10206_v63  ;;  %v7357_v32 = vadd.f32 %v7356_v3, %v13380_v15 }
 0x8d6   : > { %7769 = vmatpush.bf16.msrb.mxu1 %v10097_v28  ;;  %v7403_v33 = vadd.f32 %v13420_v48, %v7354_v7 }
 0x8d7   : > { %7551 = vmatmul.bf16.gmra.mxu0 %v14129_v5  ;;  %7600 = vmatmul.bf16.gmra.mxu1 %v14130_v41 }
 0x8d8   : > { %7649 = vmatmul.bf16.gmra.mxu2 %v13088_v43  ;;  %v7452_v56 = vadd.f32 %v7451_v16, %v7403_v33  ;;  %v10334_v16 = vld [vmem:[#allocation11 + $0x318] sm:$0xf0] }
 0x8d9   : > { %v7495_v24 = vpop.f32.mrf.mxu3  ;;  %7819 = vmatpush.bf16.msrb.mxu2 %v10209_v55  ;;  %v10337_v7 = vor.u32 %v11003_v35, %v10334_v16 }
 0x8da   : > { %v7496_v60 = vadd.f32 %v7495_v24, %v7447_v29  ;;  %v10907_v29 = vld [vmem:[#allocation11 + $0xc] sm:$0xf]  ;;  %v9950_v24 = vld [vmem:[#allocation11 + $0x18] sm:$0xf0]  ;;  %7770 = vmatpush.bf16.msrb.mxu1 %v10081_v23 }
 0x8db   : > { %v7454_v14 = vpop.f32.mrf.mxu2  ;;  %7868 = vmatpush.bf16.msrb.mxu3 %v10337_v7 }
 0x8dc   : > { %7939 = vst [vmem:[%s13299_s3 + $0xe8] sm:$0xff] %v7496_v60  ;;  %v7358_v45 = vpop.f32.mrf.mxu0  ;;  %v9953_v60 = vor.u32 %v10907_v29, %v9950_v24 }
 0x8dd   : > { %v13433_v2 = vpop.f32.mrf.mxu1  ;;  %v7359_v29 = vadd.f32 %v7358_v45, %v13380_v15 }
 0x8de   : > { %7693 = vmatmul.bf16.gmra.mxu3 %v13249_v46  ;;  %7721 = vmatpush.bf16.msrb.mxu0 %v9953_v60 }
 0x8df   : > { %v7408_v8 = vadd.f32 %v13433_v2, %v7359_v29 }
 0x8e1   : > { %v7498_v57 = vpop.f32.mrf.mxu3 }
 0x8e2   : > { %v7499_v50 = vadd.f32 %v7498_v57, %v7450_v10  ;;  %v7406_v57 = vadd.f32 %v13425_v44, %v7357_v32 }
 0x8e3   : > { %v7456_v34 = vpop.f32.mrf.mxu2 }
 0x8e4   : > { %7943 = vst [vmem:[%s13299_s3 + $0x108] sm:$0xff] %v7499_v50  ;;  %v7361_v36 = vpop.f32.mrf.mxu0  ;;  %v7455_v28 = vadd.f32 %v7454_v14, %v7406_v57  ;;  %v7457_v44 = vadd.f32 %v7456_v34, %v7408_v8 }
 0x8e5   : > { %v7410_v49 = vpop.f32.mrf.mxu1  ;;  %v7362_v45 = vadd.f32 %v7361_v36, %v13380_v15 }
 0x8e7   : > { %7556 = vmatmul.bf16.gmra.mxu0 %v14131_v9  ;;  %7605 = vmatmul.bf16.gmra.mxu1 %v14132_v39  ;;  %v7411_v55 = vadd.f32 %v7410_v49, %v7362_v45 }
 0x8e8   : > { %7654 = vmatmul.bf16.gmra.mxu2 %v13098_v1 }
 0x8e9   : > { %v7500_v10 = vpop.f32.mrf.mxu3 }
 0x8ea   : > { %v7501_v27 = vadd.f32 %v7500_v10, %v7452_v56 }
 0x8eb   : > { %v7459_v22 = vpop.f32.mrf.mxu2 }
 0x8ec   : > { %7947 = vst [vmem:[%s13299_s3 + $0x128] sm:$0xff] %v7501_v27  ;;  %v7363_v11 = vpop.f32.mrf.mxu0  ;;  %v7460_v2 = vadd.f32 %v7459_v22, %v7411_v55 }
 0x8ed   : > { %v7412_v48 = vpop.f32.mrf.mxu1  ;;  %v7364_v34 = vadd.f32 %v7363_v11, %v13380_v15 }
 0x8ee   : > { %7698 = vmatmul.bf16.gmra.mxu3 %v13260_v61 }
 0x8ef   : > { %v7413_v35 = vadd.f32 %v7412_v48, %v7364_v34 }
 0x8f1   : > { %v7503_v50 = vpop.f32.mrf.mxu3 }
 0x8f2   : > { %v7504_v24 = vadd.f32 %v7503_v50, %v7455_v28 }
 0x8f3   : > { %v7461_v3 = vpop.f32.mrf.mxu2 }
 0x8f4   : > { %7951 = vst [vmem:[%s13299_s3 + $0x148] sm:$0xff] %v7504_v24  ;;  %v7366_v37 = vpop.f32.mrf.mxu0  ;;  %v7462_v36 = vadd.f32 %v7461_v3, %v7413_v35 }
 0x8f5   : > { %v7415_v60 = vpop.f32.mrf.mxu1  ;;  %v7367_v22 = vadd.f32 %v7366_v37, %v13380_v15  ;;  %v13468_v37 = vld [vmem:[%s13610_s6] sm:$0xf] }
 0x8f7   : > { %7561 = vmatmul.bf16.gmra.mxu0 %v14133_v0  ;;  %7610 = vmatmul.bf16.gmra.mxu1 %v14134_v18  ;;  %v7416_v50 = vadd.f32 %v7415_v60, %v7367_v22  ;;  %v13471_v60 = vperm.slane %v13468_v37, 2 }
 0x8f8   : > { %7659 = vmatmul.bf16.gmra.mxu2 %v13108_v53 }
 0x8f9   : > { %v7505_v14 = vpop.f32.mrf.mxu3 }
 0x8fa   : > { %v7506_v59 = vadd.f32 %v7505_v14, %v7457_v44 }
 0x8fb   : > { %v7464_v23 = vpop.f32.mrf.mxu2 }
 0x8fc   : > { %7955 = vst [vmem:[%s13299_s3 + $0x168] sm:$0xff] %v7506_v59  ;;  %v7368_v63 = vpop.f32.mrf.mxu0  ;;  %v7465_v48 = vadd.f32 %v7464_v23, %v7416_v50 }
 0x8fd   : > { %v7417_v33 = vpop.f32.mrf.mxu1 }
 0x8fe   : > { %7703 = vmatmul.bf16.gmra.mxu3 %v13271_v6 }
 0x901   : > { %v7508_v56 = vpop.f32.mrf.mxu3 }
 0x902   : > { %v7509_v10 = vadd.f32 %v7508_v56, %v7460_v2 }
 0x903   : > { %v7466_v32 = vpop.f32.mrf.mxu2 }
 0x904   : > { %7959 = vst [vmem:[%s13299_s3 + $0x188] sm:$0xff] %v7509_v10  ;;  %v7527_v27 = vpop.f32.mrf.mxu0 }
 0x905   : > { %v7576_v57 = vpop.f32.mrf.mxu1  ;;  %v7528_v14 = vadd.f32 %v7527_v27, %v13471_v60 }
 0x907   : > { %7722 = vmatmul.bf16.vlgmr.msrb.gmra.mxu0 %v14119_v40  ;;  %7771 = vmatmul.bf16.vlgmr.msrb.gmra.mxu1 %v14120_v13  ;;  %v7369_v40 = vadd.f32 %v7368_v63, %v13380_v15 }
 0x908   : > { %7820 = vmatmul.bf16.vlgmr.msrb.gmra.mxu2 %v13038_v42 }
 0x909   : > { %v7510_v49 = vpop.f32.mrf.mxu3  ;;  %v7418_v8 = vadd.f32 %v7417_v33, %v7369_v40  ;;  %v7577_v33 = vadd.f32 %v7576_v57, %v7528_v14 }
 0x90a   : > { %v7511_v16 = vadd.f32 %v7510_v49, %v7462_v36 }
 0x90b   : > { %v7625_v28 = vpop.f32.mrf.mxu2  ;;  %v7467_v44 = vadd.f32 %v7466_v32, %v7418_v8 }
 0x90c   : > { %7963 = vst [vmem:[%s13299_s3 + $0x1a8] sm:$0xff] %v7511_v16  ;;  %v7529_v11 = vpop.f32.mrf.mxu0  ;;  %v7626_v55 = vadd.f32 %v7625_v28, %v7577_v33 }
 0x90d   : > { %v7578_v7 = vpop.f32.mrf.mxu1 }
 0x90e   : > { %7708 = vmatmul.bf16.gmra.mxu3 %v13279_v17 }
 0x911   : > { %v7513_v29 = vpop.f32.mrf.mxu3 }
 0x912   : > { %v7514_v24 = vadd.f32 %v7513_v29, %v7465_v48 }
 0x913   : > { %v7627_v13 = vpop.f32.mrf.mxu2 }
 0x914   : > { %7967 = vst [vmem:[%s13299_s3 + $0x1c8] sm:$0xff] %v7514_v24  ;;  %v7532_v42 = vpop.f32.mrf.mxu0 }
 0x915   : > { %v7581_v3 = vpop.f32.mrf.mxu1  ;;  %v7533_v27 = vadd.f32 %v7532_v42, %v13471_v60 }
 0x917   : > { %7727 = vmatmul.bf16.gmra.mxu0 %v14121_v62  ;;  %7776 = vmatmul.bf16.gmra.mxu1 %v14122_v47  ;;  %v7530_v62 = vadd.f32 %v7529_v11, %v13471_v60  ;;  %v7582_v22 = vadd.f32 %v7581_v3, %v7533_v27 }
 0x918   : > { %7825 = vmatmul.bf16.gmra.mxu2 %v13048_v19 }
 0x919   : > { %v7515_v15 = vpop.f32.mrf.mxu3  ;;  %v7579_v10 = vadd.f32 %v7578_v7, %v7530_v62 }
 0x91a   : > { %v7516_v45 = vadd.f32 %v7515_v15, %v7467_v44 }
 0x91b   : > { %v7630_v59 = vpop.f32.mrf.mxu2  ;;  %v7628_v32 = vadd.f32 %v7627_v13, %v7579_v10 }
 0x91c   : > { %7971 = vst [vmem:[%s13299_s3 + $0x1e8] sm:$0xff] %v7516_v45  ;;  %v7534_v23 = vpop.f32.mrf.mxu0  ;;  %v7631_v16 = vadd.f32 %v7630_v59, %v7582_v22 }
 0x91d   : > { %v7583_v63 = vpop.f32.mrf.mxu1 }
 0x91e   : > { %7869 = vmatmul.bf16.vlgmr.msrb.gmra.mxu3 %v13206_v12 }
 0x921   : > { %v7674_v2 = vpop.f32.mrf.mxu3 }
 0x922   : > { %v7675_v47 = vadd.f32 %v7674_v2, %v7626_v55 }
 0x923   : > { %v7632_v56 = vpop.f32.mrf.mxu2 }
 0x924   : > { %7912 = vst [vmem:[%s13299_s3 + $0x10] sm:$0xff] %v7675_v47  ;;  %v7537_v19 = vpop.f32.mrf.mxu0 }
 0x925   : > { %v7586_v34 = vpop.f32.mrf.mxu1  ;;  %v7538_v29 = vadd.f32 %v7537_v19, %v13471_v60 }
 0x927   : > { %7732 = vmatmul.bf16.gmra.mxu0 %v14123_v26  ;;  %7781 = vmatmul.bf16.gmra.mxu1 %v14124_v25  ;;  %v7535_v26 = vadd.f32 %v7534_v23, %v13471_v60  ;;  %v7587_v3 = vadd.f32 %v7586_v34, %v7538_v29 }
 0x928   : > { %7830 = vmatmul.bf16.gmra.mxu2 %v13058_v31 }
 0x929   : > { %v7676_v12 = vpop.f32.mrf.mxu3  ;;  %v7584_v50 = vadd.f32 %v7583_v63, %v7535_v26 }
 0x92a   : > { %v7677_v57 = vadd.f32 %v7676_v12, %v7628_v32 }
 0x92b   : > { %v7635_v35 = vpop.f32.mrf.mxu2  ;;  %v7633_v48 = vadd.f32 %v7632_v56, %v7584_v50 }
 0x92c   : > { %7916 = vst [vmem:[%s13299_s3 + $0x30] sm:$0xff] %v7677_v57  ;;  %v7539_v36 = vpop.f32.mrf.mxu0  ;;  %v7636_v8 = vadd.f32 %v7635_v35, %v7587_v3 }
 0x92d   : > { %v7588_v49 = vpop.f32.mrf.mxu1 }
 0x92e   : > { %7874 = vmatmul.bf16.gmra.mxu3 %v13216_v4 }
 0x931   : > { %v7679_v28 = vpop.f32.mrf.mxu3 }
 0x932   : > { %v7680_v25 = vadd.f32 %v7679_v28, %v7631_v16 }
 0x933   : > { %v7637_v11 = vpop.f32.mrf.mxu2 }
 0x934   : > { %7920 = vst [vmem:[%s13299_s3 + $0x50] sm:$0xff] %v7680_v25  ;;  %v7542_v31 = vpop.f32.mrf.mxu0 }
 0x935   : > { %v7591_v7 = vpop.f32.mrf.mxu1  ;;  %v7543_v23 = vadd.f32 %v7542_v31, %v13471_v60 }
 0x937   : > { %7737 = vmatmul.bf16.gmra.mxu0 %v14125_v30  ;;  %7786 = vmatmul.bf16.gmra.mxu1 %v14126_v38  ;;  %v7540_v30 = vadd.f32 %v7539_v36, %v13471_v60  ;;  %v7592_v62 = vadd.f32 %v7591_v7, %v7543_v23 }
 0x938   : > { %7835 = vmatmul.bf16.gmra.mxu2 %v13068_v51 }
 0x939   : > { %v7681_v4 = vpop.f32.mrf.mxu3  ;;  %v7589_v45 = vadd.f32 %v7588_v49, %v7540_v30 }
 0x93a   : > { %v7682_v40 = vadd.f32 %v7681_v4, %v7633_v48 }
 0x93b   : > { %v7640_v24 = vpop.f32.mrf.mxu2  ;;  %v7638_v59 = vadd.f32 %v7637_v11, %v7589_v45 }
 0x93c   : > { %7924 = vst [vmem:[%s13299_s3 + $0x70] sm:$0xff] %v7682_v40  ;;  %v7544_v13 = vpop.f32.mrf.mxu0  ;;  %v7641_v47 = vadd.f32 %v7640_v24, %v7592_v62 }
 0x93d   : > { %v7593_v42 = vpop.f32.mrf.mxu1 }
 0x93e   : > { %7879 = vmatmul.bf16.gmra.mxu3 %v13226_v21 }
 0x941   : > { %v7684_v44 = vpop.f32.mrf.mxu3 }
 0x942   : > { %v7685_v38 = vadd.f32 %v7684_v44, %v7636_v8 }
 0x943   : > { %v7642_v15 = vpop.f32.mrf.mxu2 }
 0x944   : > { %7928 = vst [vmem:[%s13299_s3 + $0x90] sm:$0xff] %v7685_v38  ;;  %v7547_v51 = vpop.f32.mrf.mxu0 }
 0x945   : > { %v7596_v14 = vpop.f32.mrf.mxu1  ;;  %v7548_v12 = vadd.f32 %v7547_v51, %v13471_v60 }
 0x947   : > { %7742 = vmatmul.bf16.gmra.mxu0 %v14127_v58  ;;  %7791 = vmatmul.bf16.gmra.mxu1 %v14128_v52  ;;  %v7545_v58 = vadd.f32 %v7544_v13, %v13471_v60  ;;  %v7597_v49 = vadd.f32 %v7596_v14, %v7548_v12 }
 0x948   : > { %7840 = vmatmul.bf16.gmra.mxu2 %v13078_v20 }
 0x949   : > { %v7686_v21 = vpop.f32.mrf.mxu3  ;;  %v7594_v10 = vadd.f32 %v7593_v42, %v7545_v58 }
 0x94a   : > { %v7687_v63 = vadd.f32 %v7686_v21, %v7638_v59 }
 0x94b   : > { %v7645_v33 = vpop.f32.mrf.mxu2  ;;  %v7643_v32 = vadd.f32 %v7642_v15, %v7594_v10 }
 0x94c   : > { %7932 = vst [vmem:[%s13299_s3 + $0xb0] sm:$0xff] %v7687_v63  ;;  %v7549_v55 = vpop.f32.mrf.mxu0  ;;  %v7646_v22 = vadd.f32 %v7645_v33, %v7597_v49 }
 0x94d   : > { %v7598_v2 = vpop.f32.mrf.mxu1 }
 0x94e   : > { %7884 = vmatmul.bf16.gmra.mxu3 %v13238_v54 }
 0x951   : > { %v7689_v56 = vpop.f32.mrf.mxu3 }
 0x952   : > { %v7690_v52 = vadd.f32 %v7689_v56, %v7641_v47 }
 0x953   : > { %v7647_v19 = vpop.f32.mrf.mxu2 }
 0x954   : > { %7936 = vst [vmem:[%s13299_s3 + $0xd0] sm:$0xff] %v7690_v52  ;;  %v7552_v20 = vpop.f32.mrf.mxu0 }
 0x955   : > { %v7601_v34 = vpop.f32.mrf.mxu1  ;;  %v7553_v31 = vadd.f32 %v7552_v20, %v13471_v60 }
 0x957   : > { %7747 = vmatmul.bf16.gmra.mxu0 %v14129_v5  ;;  %7796 = vmatmul.bf16.gmra.mxu1 %v14130_v41  ;;  %v7550_v5 = vadd.f32 %v7549_v55, %v13471_v60  ;;  %v7602_v29 = vadd.f32 %v7601_v34, %v7553_v31 }
 0x958   : > { %7845 = vmatmul.bf16.gmra.mxu2 %v13088_v43 }
 0x959   : > { %v7691_v54 = vpop.f32.mrf.mxu3  ;;  %v7599_v25 = vadd.f32 %v7598_v2, %v7550_v5 }
 0x95a   : > { %v7692_v27 = vadd.f32 %v7691_v54, %v7643_v32 }
 0x95b   : > { %v7650_v57 = vpop.f32.mrf.mxu2  ;;  %v7648_v11 = vadd.f32 %v7647_v19, %v7599_v25 }
 0x95c   : > { %7940 = vst [vmem:[%s13299_s3 + $0xf0] sm:$0xff] %v7692_v27  ;;  %v7554_v35 = vpop.f32.mrf.mxu0  ;;  %v7651_v40 = vadd.f32 %v7650_v57, %v7602_v29  ;;  %v13535_v27 = vperm.slane %v13468_v37, 3 }
 0x95d   : > { %v7603_v36 = vpop.f32.mrf.mxu1 }
 0x95e   : > { %7889 = vmatmul.bf16.gmra.mxu3 %v13249_v46 }
 0x961   : > { %v7694_v16 = vpop.f32.mrf.mxu3 }
 0x962   : > { %v7695_v41 = vadd.f32 %v7694_v16, %v7646_v22 }
 0x963   : > { %v7652_v28 = vpop.f32.mrf.mxu2 }
 0x964   : > { %7944 = vst [vmem:[%s13299_s3 + $0x110] sm:$0xff] %v7695_v41  ;;  %v7557_v43 = vpop.f32.mrf.mxu0 }
 0x965   : > { %v7606_v26 = vpop.f32.mrf.mxu1  ;;  %v7558_v44 = vadd.f32 %v7557_v43, %v13471_v60 }
 0x967   : > { %7752 = vmatmul.bf16.gmra.mxu0 %v14131_v9  ;;  %7801 = vmatmul.bf16.gmra.mxu1 %v14132_v39  ;;  %v7555_v9 = vadd.f32 %v7554_v35, %v13471_v60  ;;  %v7607_v14 = vadd.f32 %v7606_v26, %v7558_v44 }
 0x968   : > { %7850 = vmatmul.bf16.gmra.mxu2 %v13098_v1 }
 0x969   : > { %v7696_v46 = vpop.f32.mrf.mxu3  ;;  %v7604_v3 = vadd.f32 %v7603_v36, %v7555_v9 }
 0x96a   : > { %v7697_v7 = vadd.f32 %v7696_v46, %v7648_v11 }
 0x96b   : > { %v7655_v50 = vpop.f32.mrf.mxu2  ;;  %v7653_v8 = vadd.f32 %v7652_v28, %v7604_v3 }
 0x96c   : > { %7948 = vst [vmem:[%s13299_s3 + $0x130] sm:$0xff] %v7697_v7  ;;  %v7559_v48 = vpop.f32.mrf.mxu0  ;;  %v7656_v45 = vadd.f32 %v7655_v50, %v7607_v14 }
 0x96d   : > { %v7608_v4 = vpop.f32.mrf.mxu1  ;;  %v7560_v59 = vadd.f32 %v7559_v48, %v13471_v60 }
 0x96e   : > { %7894 = vmatmul.bf16.gmra.mxu3 %v13260_v61 }
 0x96f   : > { %v7609_v63 = vadd.f32 %v7608_v4, %v7560_v59 }
 0x971   : > { %v7699_v24 = vpop.f32.mrf.mxu3 }
 0x972   : > { %v7700_v39 = vadd.f32 %v7699_v24, %v7651_v40 }
 0x973   : > { %v7657_v13 = vpop.f32.mrf.mxu2 }
 0x974   : > { %7952 = vst [vmem:[%s13299_s3 + $0x150] sm:$0xff] %v7700_v39  ;;  %v7562_v1 = vpop.f32.mrf.mxu0  ;;  %v7658_v33 = vadd.f32 %v7657_v13, %v7609_v63 }
 0x975   : > { %v7611_v42 = vpop.f32.mrf.mxu1  ;;  %v7563_v2 = vadd.f32 %v7562_v1, %v13471_v60 }
 0x977   : > { %7757 = vmatmul.bf16.gmra.mxu0 %v14133_v0  ;;  %7806 = vmatmul.bf16.gmra.mxu1 %v14134_v18  ;;  %v7612_v58 = vadd.f32 %v7611_v42, %v7563_v2 }
 0x978   : > { %7855 = vmatmul.bf16.gmra.mxu2 %v13108_v53 }
 0x979   : > { %v7701_v61 = vpop.f32.mrf.mxu3 }
 0x97a   : > { %v7702_v30 = vadd.f32 %v7701_v61, %v7653_v8 }
 0x97b   : > { %v7660_v38 = vpop.f32.mrf.mxu2 }
 0x97c   : > { %7956 = vst [vmem:[%s13299_s3 + $0x170] sm:$0xff] %v7702_v30  ;;  %v7564_v15 = vpop.f32.mrf.mxu0  ;;  %v7661_v52 = vadd.f32 %v7660_v38, %v7612_v58 }
 0x97d   : > { %v7613_v51 = vpop.f32.mrf.mxu1  ;;  %v7565_v20 = vadd.f32 %v7564_v15, %v13471_v60 }
 0x97e   : > { %7899 = vmatmul.bf16.gmra.mxu3 %v13271_v6 }
 0x97f   : > { %v7614_v12 = vadd.f32 %v7613_v51, %v7565_v20 }
 0x981   : > { %v7704_v0 = vpop.f32.mrf.mxu3 }
 0x982   : > { %v7705_v18 = vadd.f32 %v7704_v0, %v7656_v45 }
 0x983   : > { %v7662_v21 = vpop.f32.mrf.mxu2 }
 0x984   : > { %7960 = vst [vmem:[%s13299_s3 + $0x190] sm:$0xff] %v7705_v18  ;;  %v7723_v53 = vpop.f32.mrf.mxu0  ;;  %v7663_v57 = vadd.f32 %v7662_v21, %v7614_v12 }
 0x985   : > { %v7772_v23 = vpop.f32.mrf.mxu1  ;;  %v7724_v36 = vadd.f32 %v7723_v53, %v13535_v27 }
 0x987   : > { %v7773_v60 = vadd.f32 %v7772_v23, %v7724_v36 }
 0x989   : > { %v7706_v55 = vpop.f32.mrf.mxu3 }
 0x98a   : > { %v7707_v62 = vadd.f32 %v7706_v55, %v7658_v33 }
 0x98b   : > { %v7821_v47 = vpop.f32.mrf.mxu2 }
 0x98c   : > { %7964 = vst [vmem:[%s13299_s3 + $0x1b0] sm:$0xff] %v7707_v62  ;;  %v7725_v56 = vpop.f32.mrf.mxu0  ;;  %v7822_v5 = vadd.f32 %v7821_v47, %v7773_v60 }
 0x98d   : > { %v7774_v6 = vpop.f32.mrf.mxu1  ;;  %v7726_v28 = vadd.f32 %v7725_v56, %v13535_v27 }
 0x98e   : > { %7904 = vmatmul.bf16.gmra.mxu3 %v13279_v17 }
 0x98f   : > { %v7775_v25 = vadd.f32 %v7774_v6, %v7726_v28 }
 0x991   : > { %v7709_v19 = vpop.f32.mrf.mxu3 }
 0x992   : > { %v7710_v34 = vadd.f32 %v7709_v19, %v7661_v52 }
 0x993   : > { %v7823_v10 = vpop.f32.mrf.mxu2 }
 0x994   : > { %7968 = vst [vmem:[%s13299_s3 + $0x1d0] sm:$0xff] %v7710_v34  ;;  %v7728_v32 = vpop.f32.mrf.mxu0  ;;  %v7824_v46 = vadd.f32 %v7823_v10, %v7775_v25 }
 0x995   : > { %v7777_v54 = vpop.f32.mrf.mxu1  ;;  %v7729_v7 = vadd.f32 %v7728_v32, %v13535_v27 }
 0x997   : > { %v7778_v29 = vadd.f32 %v7777_v54, %v7729_v7 }
 0x999   : > { %v7711_v35 = vpop.f32.mrf.mxu3 }
 0x99a   : > { %v7712_v17 = vadd.f32 %v7711_v35, %v7663_v57 }
 0x99b   : > { %v7826_v49 = vpop.f32.mrf.mxu2 }
 0x99c   : > { %7972 = vst [vmem:[%s13299_s3 + $0x1f0] sm:$0xff] %v7712_v17  ;;  %v7730_v22 = vpop.f32.mrf.mxu0  ;;  %v7827_v40 = vadd.f32 %v7826_v49, %v7778_v29 }
 0x99d   : > { %v7779_v16 = vpop.f32.mrf.mxu1  ;;  %v7731_v39 = vadd.f32 %v7730_v22, %v13535_v27 }
 0x99f   : > { %v7780_v3 = vadd.f32 %v7779_v16, %v7731_v39 }
 0x9a1   : > { %v7870_v41 = vpop.f32.mrf.mxu3 }
 0x9a2   : > { %v7871_v43 = vadd.f32 %v7870_v41, %v7822_v5 }
 0x9a3   : > { %v7828_v26 = vpop.f32.mrf.mxu2 }
 0x9a4   : > { %7913 = vst [vmem:[%s13299_s3 + $0x18] sm:$0xff] %v7871_v43  ;;  %v7733_v37 = vpop.f32.mrf.mxu0  ;;  %v7829_v8 = vadd.f32 %v7828_v26, %v7780_v3 }
 0x9a5   : > { %v7782_v11 = vpop.f32.mrf.mxu1  ;;  %v7734_v44 = vadd.f32 %v7733_v37, %v13535_v27 }
 0x9a7   : > { %v7783_v51 = vadd.f32 %v7782_v11, %v7734_v44 }
 0x9a9   : > { %v7872_v31 = vpop.f32.mrf.mxu3 }
 0x9aa   : > { %v7873_v50 = vadd.f32 %v7872_v31, %v7824_v46 }
 0x9ab   : > { %v7831_v48 = vpop.f32.mrf.mxu2 }
 0x9ac   : > { %7917 = vst [vmem:[%s13299_s3 + $0x38] sm:$0xff] %v7873_v50  ;;  %v7735_v4 = vpop.f32.mrf.mxu0  ;;  %v7832_v45 = vadd.f32 %v7831_v48, %v7783_v51 }
 0x9ad   : > { %v7784_v24 = vpop.f32.mrf.mxu1  ;;  %v7736_v59 = vadd.f32 %v7735_v4, %v13535_v27 }
 0x9af   : > { %v7785_v23 = vadd.f32 %v7784_v24, %v7736_v59 }
 0x9b1   : > { %v7875_v9 = vpop.f32.mrf.mxu3 }
 0x9b2   : > { %v7876_v13 = vadd.f32 %v7875_v9, %v7827_v40 }
 0x9b3   : > { %v7833_v1 = vpop.f32.mrf.mxu2 }
 0x9b4   : > { %7921 = vst [vmem:[%s13299_s3 + $0x58] sm:$0xff] %v7876_v13  ;;  %v7738_v42 = vpop.f32.mrf.mxu0  ;;  %v7834_v63 = vadd.f32 %v7833_v1, %v7785_v23 }
 0x9b5   : > { %v7787_v30 = vpop.f32.mrf.mxu1  ;;  %v7739_v2 = vadd.f32 %v7738_v42, %v13535_v27 }
 0x9b7   : > { %v7788_v47 = vadd.f32 %v7787_v30, %v7739_v2 }
 0x9b9   : > { %v7877_v61 = vpop.f32.mrf.mxu3 }
 0x9ba   : > { %v7878_v38 = vadd.f32 %v7877_v61, %v7829_v8 }
 0x9bb   : > { %v7836_v15 = vpop.f32.mrf.mxu2 }
 0x9bc   : > { %7925 = vst [vmem:[%s13299_s3 + $0x78] sm:$0xff] %v7878_v38  ;;  %v7740_v14 = vpop.f32.mrf.mxu0  ;;  %v7837_v58 = vadd.f32 %v7836_v15, %v7788_v47 }
 0x9bd   : > { %v7789_v21 = vpop.f32.mrf.mxu1  ;;  %v7741_v19 = vadd.f32 %v7740_v14, %v13535_v27 }
 0x9bf   : > { %v7790_v10 = vadd.f32 %v7789_v21, %v7741_v19 }
 0x9c1   : > { %v7880_v0 = vpop.f32.mrf.mxu3 }
 0x9c2   : > { %v7881_v18 = vadd.f32 %v7880_v0, %v7832_v45 }
 0x9c3   : > { %v7838_v53 = vpop.f32.mrf.mxu2 }
 0x9c4   : > { %7929 = vst [vmem:[%s13299_s3 + $0x98] sm:$0xff] %v7881_v18  ;;  %v7743_v33 = vpop.f32.mrf.mxu0  ;;  %v7839_v32 = vadd.f32 %v7838_v53, %v7790_v10 }
 0x9c5   : > { %v7792_v56 = vpop.f32.mrf.mxu1  ;;  %v7744_v35 = vadd.f32 %v7743_v33, %v13535_v27 }
 0x9c7   : > { %v7793_v49 = vadd.f32 %v7792_v56, %v7744_v35 }
 0x9c9   : > { %v7882_v55 = vpop.f32.mrf.mxu3 }
 0x9ca   : > { %v7883_v62 = vadd.f32 %v7882_v55, %v7834_v63 }
 0x9cb   : > { %v7841_v6 = vpop.f32.mrf.mxu2 }
 0x9cc   : > { %7933 = vst [vmem:[%s13299_s3 + $0xb8] sm:$0xff] %v7883_v62  ;;  %v7745_v34 = vpop.f32.mrf.mxu0  ;;  %v7842_v22 = vadd.f32 %v7841_v6, %v7793_v49 }
 0x9cd   : > { %v7794_v54 = vpop.f32.mrf.mxu1  ;;  %v7746_v60 = vadd.f32 %v7745_v34, %v13535_v27 }
 0x9cf   : > { %v7795_v43 = vadd.f32 %v7794_v54, %v7746_v60 }
 0x9d1   : > { %v7885_v52 = vpop.f32.mrf.mxu3 }
 0x9d2   : > { %v7886_v20 = vadd.f32 %v7885_v52, %v7837_v58 }
 0x9d3   : > { %v7843_v12 = vpop.f32.mrf.mxu2 }
 0x9d4   : > { %7937 = vst [vmem:[%s13299_s3 + $0xd8] sm:$0xff] %v7886_v20  ;;  %v7748_v17 = vpop.f32.mrf.mxu0  ;;  %v7844_v37 = vadd.f32 %v7843_v12, %v7795_v43 }
 0x9d5   : > { %v7797_v5 = vpop.f32.mrf.mxu1  ;;  %v7749_v11 = vadd.f32 %v7748_v17, %v13535_v27 }
 0x9d7   : > { %v7798_v50 = vadd.f32 %v7797_v5, %v7749_v11 }
 0x9d9   : > { %v7887_v57 = vpop.f32.mrf.mxu3 }
 0x9da   : > { %v7888_v36 = vadd.f32 %v7887_v57, %v7839_v32 }
 0x9db   : > { %v7846_v28 = vpop.f32.mrf.mxu2 }
 0x9dc   : > { %7941 = vst [vmem:[%s13299_s3 + $0xf8] sm:$0xff] %v7888_v36  ;;  %v7750_v26 = vpop.f32.mrf.mxu0  ;;  %v7847_v48 = vadd.f32 %v7846_v28, %v7798_v50 }
 0x9dd   : > { %v7799_v31 = vpop.f32.mrf.mxu1  ;;  %v7751_v40 = vadd.f32 %v7750_v26, %v13535_v27 }
 0x9df   : > { %v7800_v9 = vadd.f32 %v7799_v31, %v7751_v40 }
 0x9e1   : > { %v7890_v16 = vpop.f32.mrf.mxu3 }
 0x9e2   : > { %v7891_v41 = vadd.f32 %v7890_v16, %v7842_v22 }
 0x9e3   : > { %v7848_v7 = vpop.f32.mrf.mxu2 }
 0x9e4   : > { %7945 = vst [vmem:[%s13299_s3 + $0x118] sm:$0xff] %v7891_v41  ;;  %v7753_v4 = vpop.f32.mrf.mxu0  ;;  %v7849_v1 = vadd.f32 %v7848_v7, %v7800_v9 }
 0x9e5   : > { %v7802_v39 = vpop.f32.mrf.mxu1  ;;  %v7754_v3 = vadd.f32 %v7753_v4, %v13535_v27 }
 0x9e7   : > { %v7803_v44 = vadd.f32 %v7802_v39, %v7754_v3 }
 0x9e9   : > { %v7892_v25 = vpop.f32.mrf.mxu3 }
 0x9ea   : > { %v7893_v46 = vadd.f32 %v7892_v25, %v7844_v37 }
 0x9eb   : > { %v7851_v13 = vpop.f32.mrf.mxu2 }
 0x9ec   : > { %7949 = vst [vmem:[%s13299_s3 + $0x138] sm:$0xff] %v7893_v46  ;;  %v7755_v61 = vpop.f32.mrf.mxu0  ;;  %v7852_v30 = vadd.f32 %v7851_v13, %v7803_v44 }
 0x9ed   : > { %v7804_v38 = vpop.f32.mrf.mxu1  ;;  %v7756_v14 = vadd.f32 %v7755_v61, %v13535_v27 }
 0x9ef   : > { %v7805_v59 = vadd.f32 %v7804_v38, %v7756_v14 }
 0x9f1   : > { %v7895_v29 = vpop.f32.mrf.mxu3 }
 0x9f2   : > { %v7896_v24 = vadd.f32 %v7895_v29, %v7847_v48 }
 0x9f3   : > { %v7853_v15 = vpop.f32.mrf.mxu2 }
 0x9f4   : > { %7953 = vst [vmem:[%s13299_s3 + $0x158] sm:$0xff] %v7896_v24  ;;  %v7758_v0 = vpop.f32.mrf.mxu0  ;;  %v7854_v18 = vadd.f32 %v7853_v15, %v7805_v59 }
 0x9f5   : > { %v7759_v53 = vadd.f32 %v7758_v0, %v13535_v27  ;;  %v7807_v63 = vpop.f32.mrf.mxu1 }
 0x9f7   : > { %v7808_v55 = vadd.f32 %v7807_v63, %v7759_v53 }
 0x9f9   : > { %v7897_v42 = vpop.f32.mrf.mxu3 }
 0x9fa   : > { %v7898_v8 = vadd.f32 %v7897_v42, %v7849_v1 }
 0x9fb   : > { %v7856_v33 = vpop.f32.mrf.mxu2 }
 0x9fc   : > { %7957 = vst [vmem:[%s13299_s3 + $0x178] sm:$0xff] %v7898_v8  ;;  %v7760_v2 = vpop.f32.mrf.mxu0  ;;  %v7857_v62 = vadd.f32 %v7856_v33, %v7808_v55 }
 0x9fd   : > { %v7761_v56 = vadd.f32 %v7760_v2, %v13535_v27  ;;  %v7809_v58 = vpop.f32.mrf.mxu1 }
 0x9ff   : > { %v7810_v19 = vadd.f32 %v7809_v58, %v7761_v56 }
 0xa01   : > { %v7900_v51 = vpop.f32.mrf.mxu3 }
 0xa02   : > { %v7901_v45 = vadd.f32 %v7900_v51, %v7852_v30 }
 0xa03   : > { %v7858_v52 = vpop.f32.mrf.mxu2 }
 0xa04   : > { %7961 = vst [vmem:[%s13299_s3 + $0x198] sm:$0xff] %v7901_v45  ;;  %v7859_v20 = vadd.f32 %v7858_v52, %v7810_v19 }
 0xa09   : > { %v7902_v21 = vpop.f32.mrf.mxu3 }
 0xa0a   : > { %v7903_v23 = vadd.f32 %v7902_v21, %v7854_v18 }
 0xa0c   : > { %7965 = vst [vmem:[%s13299_s3 + $0x1b8] sm:$0xff] %v7903_v23 }
 0xa11   : > { %v7905_v47 = vpop.f32.mrf.mxu3 }
 0xa12   : > { %v7906_v6 = vadd.f32 %v7905_v47, %v7857_v62 }
 0xa14   : > { %7969 = vst [vmem:[%s13299_s3 + $0x1d8] sm:$0xff] %v7906_v6 }
 0xa19   : > { %v7907_v34 = vpop.f32.mrf.mxu3 }
 0xa1a   : > { %v7908_v10 = vadd.f32 %v7907_v34, %v7859_v20 }
 0xa1c   : > { %7973 = vst [vmem:[%s13299_s3 + $0x1f8] sm:$0xff] %v7908_v10 }
 0xa1d   : > { %11350 = shalt.err (!%p11347_p9)
}
 0xa1e   : > { %s11417_s22 = smov 512   ;;  %s11418_s20 = smov 32  }
 0xa1f   : > { %11059 = dma.vmem_to_hbm [thread:$0]  (%p11543_p3), %s7989_s9, 8192, %s7991_s5, %s7975_s28, %s11417_s22, %s11417_s22, %s11418_s20  }
 0xa20 PF: > { %s8005_s30 = sand.u32 1, %s11393_s24   ;;  %p14135_p12 = scmp.ge.s32.totalorder %s11405_s27, 2 }
 0xa21   : > { %s8006_s13 = scalar_lea.sflag [#allocation4], %s8005_s30 }
 0xa22   : > { %p11082_p13 = pnand %p14135_p12, %p11494_p6 }
 0xa24   : > { %p11083_p0 = pneg %p11082_p13 }
 0xa26   : > { %11388 = dma.done.wait (%p11083_p0), %s8006_s13, 8192  }
 0xa27   : > { %11390 = vsyncadd (%p11083_p0), %s8006_s13, 4294959104  ;;  %s14136_s2 = sld [smem:[#allocation20_spill]]  ;;  %p25_p5 = scmp.ge.s32.totalorder %s11533_s18, 4  }
 0xa28   : > { %s14137_s26 = sld [smem:[#allocation21_spill]]  ;;  %s14138_s24 = smov %s11397_s25 }
 0xa29   : > { %s14140_s27 = smov %s11533_s18  ;;  %27 = sbr.rel (!%p25_p5) target bundleno = 15 (0xf), region = 122 }
 0xa2d   : > { %s14139_s25 = smov %s14136_s2 }
 0xa2e   :  { %8012 = vsyncpa [#allocation3], 1 }
 0xa2f   :  { %8014 = vsyncpa [#allocation3 + $0x1], 1 }
 0xa30   :  { %8015 = vsyncpa [#allocation6], 1 }
 0xa31   :  { %8017 = vsyncpa [#allocation6 + $0x1], 1 }
 0xa32   :  { %8018 = vsyncpa [#allocation9], 1 }
 0xa33   :  { %8019 = vsyncpa [#allocation12], 1 }
 0xa34   :  { %8020 = vsyncpa [#allocation4], 1 }
 0xa35   :  { %8022 = vsyncpa [#allocation4 + $0x1], 1 }

</bundles_post_ra>
